<compile_context>
chip_gen: v7x
topology: tpu7x:2x2x1
jax: 0.10.0
libtpu: 0.0.40
codegen_flags: <defaults>
</compile_context>

<pallas_src>
import functools

import jax
import jax.numpy as jnp
from jax.experimental import pallas as pl
from jax.experimental.pallas import tpu as pltpu

_BN_EPS = 1e-5


def _round_up(x, m):
    return (x + m - 1) // m * m


# ----------------------------------------------------------------------------
# Pallas kernels
# ----------------------------------------------------------------------------
def _conv_bn_relu_kernel(p_ref, w_ref, g_ref, b_ref, o_ref, *, inv_m):
    # p: (9*Cin, Mpad) f32   w: (Cb, 9*Cin) f32   g/b: (Cb, 1) f32
    # o: (Cb, Mpad) f32 with Cb = Cout / cout_split.  BN statistics are
    # per-channel, so splitting Cout across the (parallel) grid is exact.
    z = jnp.dot(w_ref[...], p_ref[...], preferred_element_type=jnp.float32)
    # Training-mode BatchNorm folded to one scale+shift (single stats sweep).
    # Padded lanes of p are zero => padded z lanes are zero => they contribute
    # nothing to the sums; dividing by the true M (inv_m) keeps stats exact.
    s1 = jnp.sum(z, axis=1, keepdims=True)
    s2 = jnp.sum(z * z, axis=1, keepdims=True)
    mean = s1 * inv_m
    var = jnp.maximum(s2 * inv_m - mean * mean, 0.0)     # f32, clamp cancellation
    scale = g_ref[...] * jax.lax.rsqrt(var + _BN_EPS)
    shift = b_ref[...] - mean * scale
    o_ref[...] = jnp.maximum(z * scale + shift, 0.0)     # one FMA + max per elem


def _head_kernel(p_ref, w_ref, g_ref, b_ref, o_ref, *, inv_m, n):
    # Fused conv5 + bn5 + relu + AvgPool2d((2,2), stride=1) + log_softmax.
    # p: (9*128, Mpad) f32 with true M = n*2*2 lanes ordered (n, oh, ow)
    # w: (10, 9*128) f32    g/b: (10, 1) f32    o: (10, n) f32 (classes on rows)
    z = jnp.dot(w_ref[...], p_ref[...], preferred_element_type=jnp.float32)
    s1 = jnp.sum(z, axis=1, keepdims=True)
    s2 = jnp.sum(z * z, axis=1, keepdims=True)
    mean = s1 * inv_m
    var = jnp.maximum(s2 * inv_m - mean * mean, 0.0)
    scale = g_ref[...] * jax.lax.rsqrt(var + _BN_EPS)
    shift = b_ref[...] - mean * scale
    y = jnp.maximum(z * scale + shift, 0.0)              # (10, Mpad)
    # GAP over each sample's 2x2 conv5 output = mean of its 4 contiguous lanes;
    # then log_softmax over the 10 classes (sublane axis), one column/sample.
    for i in range(n):
        gi = 0.25 * jnp.sum(y[:, 4 * i:4 * i + 4], axis=1, keepdims=True)  # (10,1)
        mx = jnp.max(gi, axis=0, keepdims=True)
        si = gi - mx
        lse = jnp.log(jnp.sum(jnp.exp(si), axis=0, keepdims=True))
        o_ref[:, i:i + 1] = si - lse


# ----------------------------------------------------------------------------
# Wrappers
# ----------------------------------------------------------------------------
def conv_bn_relu(pT, w_mat, gamma, beta, *, true_m, cout_split):
    k, m_pad = pT.shape
    cout = w_mat.shape[0]
    cb = cout // cout_split
    return pl.pallas_call(
        functools.partial(_conv_bn_relu_kernel, inv_m=1.0 / true_m),
        out_shape=jax.ShapeDtypeStruct((cout, m_pad), jnp.float32),
        grid=(cout_split,),
        in_specs=[
            pl.BlockSpec((k, m_pad), lambda i: (0, 0)),   # patches: shared
            pl.BlockSpec((cb, k), lambda i: (i, 0)),      # weights: Cout split
            pl.BlockSpec((cb, 1), lambda i: (i, 0)),
            pl.BlockSpec((cb, 1), lambda i: (i, 0)),
        ],
        out_specs=pl.BlockSpec((cb, m_pad), lambda i: (i, 0)),
        compiler_params=pltpu.CompilerParams(
            dimension_semantics=("parallel",),
            allow_input_fusion=[True, False, False, False]),
    )(pT, w_mat, gamma, beta)


def head(p5, w_mat, gamma, beta, *, true_m, n):
    k, m_pad = p5.shape
    return pl.pallas_call(
        functools.partial(_head_kernel, inv_m=1.0 / true_m, n=n),
        out_shape=jax.ShapeDtypeStruct((10, n), jnp.float32),
        grid=(1,),
        in_specs=[
            pl.BlockSpec((k, m_pad), lambda i: (0, 0)),
            pl.BlockSpec((10, k), lambda i: (0, 0)),
            pl.BlockSpec((10, 1), lambda i: (0, 0)),
            pl.BlockSpec((10, 1), lambda i: (0, 0)),
        ],
        out_specs=pl.BlockSpec((10, n), lambda i: (0, 0)),
        compiler_params=pltpu.CompilerParams(
            dimension_semantics=("arbitrary",),
            allow_input_fusion=[True, False, False, False]),
    )(p5, w_mat, gamma, beta)


def _window_taps(a, oh, ow, stride, m_pad):
    # a: (Cin, N, H, W).  Returns (9*Cin, m_pad): the 9 shifted 3x3 windows,
    # K ordered (kh, kw, cin), M ordered (n, oh, ow), zero-padded to m_pad.
    # Pure slice/concat/pad data movement: XLA fuses it, and allow_input_fusion
    # lets it feed the pallas_call input DMA without materializing P in HBM.
    cin, n = a.shape[0], a.shape[1]
    taps = [
        a[:, :, di:di + stride * (oh - 1) + 1:stride,
               dj:dj + stride * (ow - 1) + 1:stride]
        for di in range(3) for dj in range(3)
    ]
    p = jnp.concatenate(taps, axis=0).reshape(9 * cin, n * oh * ow)
    m = n * oh * ow
    if m_pad > m:
        p = jnp.pad(p, ((0, 0), (0, m_pad - m)))
    return p


def _tensorcores_per_chip():
    """2 on chips with two TensorCores behind one device (v4/v5p megacore, v7x);
    1 on v5e/v6e; 1 when not running on TPU (e.g. interpret mode on CPU)."""
    try:
        d = jax.devices()[0]
        if d.platform != "tpu":
            return 1
        kind = d.device_kind.lower()
        if ("v5p" in kind) or ("v4" in kind) or ("7" in kind):
            return 2
        return 1
    except Exception:
        return 1


# ----------------------------------------------------------------------------
# Parameters (deterministic, synthetic) — stored directly in matmul layout.
# ----------------------------------------------------------------------------
def init_params(key):
    chans = [(1, 16), (16, 32), (32, 64), (64, 128), (128, 10)]
    params = []
    for i, (cin, cout) in enumerate(chans):
        kw = jax.random.fold_in(key, i)
        w = jax.random.normal(kw, (cout, cin, 3, 3), jnp.float32) / jnp.sqrt(cin * 9.0)
        gamma = jnp.ones((cout, 1), jnp.float32)   # BatchNorm affine defaults
        beta = jnp.zeros((cout, 1), jnp.float32)
        # (Cout, 9*Cin) with K ordered (kh, kw, cin) — matches _window_taps.
        # f32 end-to-end (the net is ~45 MFLOP; bf16 buys nothing here and the
        # sandbox dot executor rejects bf16 x bf16 = f32).
        wm = w.transpose(0, 2, 3, 1).reshape(cout, cin * 9)
        # Conv bias omitted: training-mode BN subtracts the batch mean, so a
        # per-channel conv bias cancels exactly in the forward pass.
        params.append((wm, gamma, beta))
    return params


@functools.partial(jax.jit, static_argnames=("n_tc",))
def netconv_forward(x, params, *, n_tc=1):
    n, _, hh, ww = x.shape
    # (N, 1, H, W) -> (Cin=1, N, H, W): pure reshape; stays channels-first.
    a = x.astype(jnp.float32).reshape(n, hh, ww)[None]
    h, w = hh, ww
    strides = (1, 2, 2, 2)
    for li in range(4):
        s = strides[li]
        oh, ow = (h - 3) // s + 1, (w - 3) // s + 1
        m = n * oh * ow
        m_pad = _round_up(m, 128)
        wm, g, b = params[li]
        cout = wm.shape[0]
        # Split Cout across the parallel grid only if a 2nd TensorCore exists
        # and each half still has >= 8 sublanes (true for all layers here).
        split = n_tc if (n_tc > 1 and cout % (8 * n_tc) == 0) else 1
        pT = _window_taps(a, oh, ow, s, m_pad)                   # (9*Cin, Mpad)
        aT = conv_bn_relu(pT, wm, g, b, true_m=m, cout_split=split)
        a = aT[:, :m].reshape(cout, n, oh, ow)
        h, w = oh, ow
    # Head: conv5 + bn5 + relu + GAP(2x2) + log_softmax, one fused kernel.
    wm5, g5, b5 = params[4]
    oh, ow = (h - 3) // 2 + 1, (w - 3) // 2 + 1
    assert oh == 2 and ow == 2, "head expects a 2x2 conv5 output (64x64 input)"
    m5 = n * oh * ow
    p5 = _window_taps(a, oh, ow, 2, _round_up(m5, 128))          # (1152, 128)
    out = head(p5, wm5, g5, b5, true_m=m5, n=n)                  # (10, N)
    return out.T                                                 # (N, 10)


# ----------------------------------------------------------------------------
# Pure-JAX reference (conv_general_dilated) for correctness checking.
# ----------------------------------------------------------------------------
def _reference_forward(x, params):
    a = x.astype(jnp.float32)
    strides = (1, 2, 2, 2, 2)
    for li in range(5):
        wm, g, b = params[li]
        cout, k9 = wm.shape
        cin = k9 // 9
        w = wm.reshape(cout, 3, 3, cin).transpose(0, 3, 1, 2)    # OIHW
        s = strides[li]
        z = jax.lax.conv_general_dilated(
            a, w, window_strides=(s, s), padding="VALID",
            dimension_numbers=("NCHW", "OIHW", "NCHW"))
        mean = jnp.mean(z, axis=(0, 2, 3), keepdims=True)
        var = jnp.mean(jnp.square(z - mean), axis=(0, 2, 3), keepdims=True)
        zn = (z - mean) * jax.lax.rsqrt(var + _BN_EPS)
        a = jnp.maximum(zn * g.reshape(1, -1, 1, 1) + b.reshape(1, -1, 1, 1), 0.0)
    gpool = jnp.mean(a, axis=(2, 3))                             # GAP 2x2 -> (N, 10)
    return jax.nn.log_softmax(gpool, axis=1)


if __name__ == "__main__":
    key = jax.random.PRNGKey(0)
    k_x, k_p = jax.random.split(key)
    # Input: batch=2, 1 channel, 64x64 (shrinks to 2x2 after the 5 convs, so
    # GAP -> 1x1 and view(-1, 10) matches the PyTorch forward).
    x = jax.random.normal(k_x, (2, 1, 64, 64), jnp.float32)
    params = init_params(k_p)

    n_tc = _tensorcores_per_chip()
    out = jax.block_until_ready(netconv_forward(x, params, n_tc=n_tc))

    assert out.shape == (2, 10), out.shape
    # log_softmax rows should (approximately) exp-sum to 1.
    assert bool(jnp.allclose(jnp.sum(jnp.exp(out), axis=1), 1.0, atol=1e-4))
    # Parity against a pure-JAX conv/BN/ReLU reference.
    ref = _reference_forward(x, params)
    assert bool(jnp.allclose(out, ref, atol=2e-3, rtol=2e-3)), \
        float(jnp.max(jnp.abs(out - ref)))
    print("KERNEL_OK")
</pallas_src>

<mosaic_0001>
module attributes {stable_mosaic.version = 11 : i64} {
  func.func @_conv_bn_relu_kernel(%arg0: i32, %arg1: memref<9x7808xf32, #tpu.memory_space<vmem>>, %arg2: memref<16x9xf32, #tpu.memory_space<vmem>>, %arg3: memref<16x1xf32, #tpu.memory_space<vmem>>, %arg4: memref<16x1xf32, #tpu.memory_space<vmem>>, %arg5: memref<16x7808xf32, #tpu.memory_space<vmem>>) attributes {dimension_semantics = [#tpu.dimension_semantics<parallel>], iteration_bounds = array<i64: 1>, scalar_prefetch = 0 : i64, scratch_operands = 0 : i64, tpu.core_type = #tpu.core_type<tc>, window_params = [{pipeline_mode = #tpu.pipeline_mode<synchronous>, transform_indices = @transform_0, window_bounds = array<i64: 9, 7808>}, {transform_indices = @transform_1, window_bounds = array<i64: 16, 9>}, {transform_indices = @transform_2, window_bounds = array<i64: 16, 1>}, {transform_indices = @transform_3, window_bounds = array<i64: 16, 1>}, {transform_indices = @transform_4, window_bounds = array<i64: 16, 7808>}]} {
    %c0 = arith.constant 0 : index
    %c0_0 = arith.constant 0 : index
    %0 = vector.load %arg2[%c0, %c0_0] : memref<16x9xf32, #tpu.memory_space<vmem>>, vector<16x9xf32>
    %c0_1 = arith.constant 0 : index
    %c0_2 = arith.constant 0 : index
    %1 = vector.load %arg1[%c0_1, %c0_2] : memref<9x7808xf32, #tpu.memory_space<vmem>>, vector<9x7808xf32>
    %cst = arith.constant dense<0.000000e+00> : vector<16x7808xf32>
    %2 = tpu.matmul %0, %1, %cst {dimension_numbers = #tpu.dot_dimension_numbers<[1], [0], [0], [1], [0, 0, 1, 1], [], []>} : vector<16x9xf32>, vector<9x7808xf32>, vector<16x7808xf32> -> vector<16x7808xf32>
    %cst_3 = arith.constant dense<0.000000e+00> : vector<16xf32>
    %3 = vector.multi_reduction <add>, %2, %cst_3 [1] : vector<16x7808xf32> to vector<16xf32>
    %4 = vector.shape_cast %3 : vector<16xf32> to vector<16x1xf32>
    %5 = arith.mulf %2, %2 : vector<16x7808xf32>
    %cst_4 = arith.constant dense<0.000000e+00> : vector<16xf32>
    %6 = vector.multi_reduction <add>, %5, %cst_4 [1] : vector<16x7808xf32> to vector<16xf32>
    %7 = vector.shape_cast %6 : vector<16xf32> to vector<16x1xf32>
    %cst_5 = arith.constant 1.30072847E-4 : f32
    %8 = vector.broadcast %cst_5 : f32 to vector<16x1xf32>
    %9 = arith.mulf %4, %8 : vector<16x1xf32>
    %cst_6 = arith.constant 1.30072847E-4 : f32
    %10 = vector.broadcast %cst_6 : f32 to vector<16x1xf32>
    %11 = arith.mulf %7, %10 : vector<16x1xf32>
    %12 = arith.mulf %9, %9 : vector<16x1xf32>
    %13 = arith.subf %11, %12 : vector<16x1xf32>
    %cst_7 = arith.constant 0.000000e+00 : f32
    %14 = vector.broadcast %cst_7 : f32 to vector<16x1xf32>
    %15 = arith.maximumf %13, %14 : vector<16x1xf32>
    %c0_8 = arith.constant 0 : index
    %c0_9 = arith.constant 0 : index
    %16 = vector.load %arg3[%c0_8, %c0_9] : memref<16x1xf32, #tpu.memory_space<vmem>>, vector<16x1xf32>
    %cst_10 = arith.constant 9.99999974E-6 : f32
    %17 = vector.broadcast %cst_10 : f32 to vector<16x1xf32>
    %18 = arith.addf %15, %17 : vector<16x1xf32>
    %19 = math.rsqrt %18 : vector<16x1xf32>
    %20 = arith.mulf %16, %19 : vector<16x1xf32>
    %c0_11 = arith.constant 0 : index
    %c0_12 = arith.constant 0 : index
    %21 = vector.load %arg4[%c0_11, %c0_12] : memref<16x1xf32, #tpu.memory_space<vmem>>, vector<16x1xf32>
    %22 = arith.mulf %9, %20 : vector<16x1xf32>
    %23 = arith.subf %21, %22 : vector<16x1xf32>
    %24 = vector.broadcast %20 : vector<16x1xf32> to vector<16x7808xf32>
    %25 = arith.mulf %2, %24 : vector<16x7808xf32>
    %26 = vector.broadcast %23 : vector<16x1xf32> to vector<16x7808xf32>
    %27 = arith.addf %25, %26 : vector<16x7808xf32>
    %cst_13 = arith.constant 0.000000e+00 : f32
    %28 = vector.broadcast %cst_13 : f32 to vector<16x7808xf32>
    %29 = arith.maximumf %27, %28 : vector<16x7808xf32>
    %c0_14 = arith.constant 0 : index
    %c0_15 = arith.constant 0 : index
    %30 = vector.load %arg5[%c0_14, %c0_15] : memref<16x7808xf32, #tpu.memory_space<vmem>>, vector<16x7808xf32>
    tpu.vector_store %arg5[%c0_14, %c0_15], %29 {strides = array<i32>} : memref<16x7808xf32, #tpu.memory_space<vmem>>, vector<16x7808xf32>,
    return
  }
  func.func @transform_0(%arg0: i32) -> (i32, i32) {
    %c0_i32 = arith.constant 0 : i32
    %c0_i32_0 = arith.constant 0 : i32
    %c0_i32_1 = arith.constant 0 : i32
    return %c0_i32, %c0_i32_0 : i32, i32
  }
  func.func @transform_1(%arg0: i32) -> (i32, i32) {
    %c0_i32 = arith.constant 0 : i32
    %c0_i32_0 = arith.constant 0 : i32
    return %arg0, %c0_i32 : i32, i32
  }
  func.func @transform_2(%arg0: i32) -> (i32, i32) {
    %c0_i32 = arith.constant 0 : i32
    %c0_i32_0 = arith.constant 0 : i32
    return %arg0, %c0_i32 : i32, i32
  }
  func.func @transform_3(%arg0: i32) -> (i32, i32) {
    %c0_i32 = arith.constant 0 : i32
    %c0_i32_0 = arith.constant 0 : i32
    return %arg0, %c0_i32 : i32, i32
  }
  func.func @transform_4(%arg0: i32) -> (i32, i32) {
    %c0_i32 = arith.constant 0 : i32
    %c0_i32_0 = arith.constant 0 : i32
    return %arg0, %c0_i32 : i32, i32
  }
}

module attributes {stable_mosaic.version = 11 : i64} {
  func.func @_conv_bn_relu_kernel(%arg0: i32, %arg1: memref<144x1920xf32, #tpu.memory_space<vmem>>, %arg2: memref<32x144xf32, #tpu.memory_space<vmem>>, %arg3: memref<32x1xf32, #tpu.memory_space<vmem>>, %arg4: memref<32x1xf32, #tpu.memory_space<vmem>>, %arg5: memref<32x1920xf32, #tpu.memory_space<vmem>>) attributes {dimension_semantics = [#tpu.dimension_semantics<parallel>], iteration_bounds = array<i64: 1>, scalar_prefetch = 0 : i64, scratch_operands = 0 : i64, tpu.core_type = #tpu.core_type<tc>, window_params = [{pipeline_mode = #tpu.pipeline_mode<synchronous>, transform_indices = @transform_0, window_bounds = array<i64: 144, 1920>}, {transform_indices = @transform_1, window_bounds = array<i64: 32, 144>}, {transform_indices = @transform_2, window_bounds = array<i64: 32, 1>}, {transform_indices = @transform_3, window_bounds = array<i64: 32, 1>}, {transform_indices = @transform_4, window_bounds = array<i64: 32, 1920>}]} {
    %c0 = arith.constant 0 : index
    %c0_0 = arith.constant 0 : index
    %0 = vector.load %arg2[%c0, %c0_0] : memref<32x144xf32, #tpu.memory_space<vmem>>, vector<32x144xf32>
    %c0_1 = arith.constant 0 : index
    %c0_2 = arith.constant 0 : index
    %1 = vector.load %arg1[%c0_1, %c0_2] : memref<144x1920xf32, #tpu.memory_space<vmem>>, vector<144x1920xf32>
    %cst = arith.constant dense<0.000000e+00> : vector<32x1920xf32>
    %2 = tpu.matmul %0, %1, %cst {dimension_numbers = #tpu.dot_dimension_numbers<[1], [0], [0], [1], [0, 0, 1, 1], [], []>} : vector<32x144xf32>, vector<144x1920xf32>, vector<32x1920xf32> -> vector<32x1920xf32>
    %cst_3 = arith.constant dense<0.000000e+00> : vector<32xf32>
    %3 = vector.multi_reduction <add>, %2, %cst_3 [1] : vector<32x1920xf32> to vector<32xf32>
    %4 = vector.shape_cast %3 : vector<32xf32> to vector<32x1xf32>
    %5 = arith.mulf %2, %2 : vector<32x1920xf32>
    %cst_4 = arith.constant dense<0.000000e+00> : vector<32xf32>
    %6 = vector.multi_reduction <add>, %5, %cst_4 [1] : vector<32x1920xf32> to vector<32xf32>
    %7 = vector.shape_cast %6 : vector<32xf32> to vector<32x1xf32>
    %cst_5 = arith.constant 5.55555569E-4 : f32
    %8 = vector.broadcast %cst_5 : f32 to vector<32x1xf32>
    %9 = arith.mulf %4, %8 : vector<32x1xf32>
    %cst_6 = arith.constant 5.55555569E-4 : f32
    %10 = vector.broadcast %cst_6 : f32 to vector<32x1xf32>
    %11 = arith.mulf %7, %10 : vector<32x1xf32>
    %12 = arith.mulf %9, %9 : vector<32x1xf32>
    %13 = arith.subf %11, %12 : vector<32x1xf32>
    %cst_7 = arith.constant 0.000000e+00 : f32
    %14 = vector.broadcast %cst_7 : f32 to vector<32x1xf32>
    %15 = arith.maximumf %13, %14 : vector<32x1xf32>
    %c0_8 = arith.constant 0 : index
    %c0_9 = arith.constant 0 : index
    %16 = vector.load %arg3[%c0_8, %c0_9] : memref<32x1xf32, #tpu.memory_space<vmem>>, vector<32x1xf32>
    %cst_10 = arith.constant 9.99999974E-6 : f32
    %17 = vector.broadcast %cst_10 : f32 to vector<32x1xf32>
    %18 = arith.addf %15, %17 : vector<32x1xf32>
    %19 = math.rsqrt %18 : vector<32x1xf32>
    %20 = arith.mulf %16, %19 : vector<32x1xf32>
    %c0_11 = arith.constant 0 : index
    %c0_12 = arith.constant 0 : index
    %21 = vector.load %arg4[%c0_11, %c0_12] : memref<32x1xf32, #tpu.memory_space<vmem>>, vector<32x1xf32>
    %22 = arith.mulf %9, %20 : vector<32x1xf32>
    %23 = arith.subf %21, %22 : vector<32x1xf32>
    %24 = vector.broadcast %20 : vector<32x1xf32> to vector<32x1920xf32>
    %25 = arith.mulf %2, %24 : vector<32x1920xf32>
    %26 = vector.broadcast %23 : vector<32x1xf32> to vector<32x1920xf32>
    %27 = arith.addf %25, %26 : vector<32x1920xf32>
    %cst_13 = arith.constant 0.000000e+00 : f32
    %28 = vector.broadcast %cst_13 : f32 to vector<32x1920xf32>
    %29 = arith.maximumf %27, %28 : vector<32x1920xf32>
    %c0_14 = arith.constant 0 : index
    %c0_15 = arith.constant 0 : index
    %30 = vector.load %arg5[%c0_14, %c0_15] : memref<32x1920xf32, #tpu.memory_space<vmem>>, vector<32x1920xf32>
    tpu.vector_store %arg5[%c0_14, %c0_15], %29 {strides = array<i32>} : memref<32x1920xf32, #tpu.memory_space<vmem>>, vector<32x1920xf32>,
    return
  }
  func.func @transform_0(%arg0: i32) -> (i32, i32) {
    %c0_i32 = arith.constant 0 : i32
    %c0_i32_0 = arith.constant 0 : i32
    %c0_i32_1 = arith.constant 0 : i32
    return %c0_i32, %c0_i32_0 : i32, i32
  }
  func.func @transform_1(%arg0: i32) -> (i32, i32) {
    %c0_i32 = arith.constant 0 : i32
    %c0_i32_0 = arith.constant 0 : i32
    return %arg0, %c0_i32 : i32, i32
  }
  func.func @transform_2(%arg0: i32) -> (i32, i32) {
    %c0_i32 = arith.constant 0 : i32
    %c0_i32_0 = arith.constant 0 : i32
    return %arg0, %c0_i32 : i32, i32
  }
  func.func @transform_3(%arg0: i32) -> (i32, i32) {
    %c0_i32 = arith.constant 0 : i32
    %c0_i32_0 = arith.constant 0 : i32
    return %arg0, %c0_i32 : i32, i32
  }
  func.func @transform_4(%arg0: i32) -> (i32, i32) {
    %c0_i32 = arith.constant 0 : i32
    %c0_i32_0 = arith.constant 0 : i32
    return %arg0, %c0_i32 : i32, i32
  }
}

module attributes {stable_mosaic.version = 11 : i64} {
  func.func @_conv_bn_relu_kernel(%arg0: i32, %arg1: memref<288x512xf32, #tpu.memory_space<vmem>>, %arg2: memref<64x288xf32, #tpu.memory_space<vmem>>, %arg3: memref<64x1xf32, #tpu.memory_space<vmem>>, %arg4: memref<64x1xf32, #tpu.memory_space<vmem>>, %arg5: memref<64x512xf32, #tpu.memory_space<vmem>>) attributes {dimension_semantics = [#tpu.dimension_semantics<parallel>], iteration_bounds = array<i64: 1>, scalar_prefetch = 0 : i64, scratch_operands = 0 : i64, tpu.core_type = #tpu.core_type<tc>, window_params = [{pipeline_mode = #tpu.pipeline_mode<synchronous>, transform_indices = @transform_0, window_bounds = array<i64: 288, 512>}, {transform_indices = @transform_1, window_bounds = array<i64: 64, 288>}, {transform_indices = @transform_2, window_bounds = array<i64: 64, 1>}, {transform_indices = @transform_3, window_bounds = array<i64: 64, 1>}, {transform_indices = @transform_4, window_bounds = array<i64: 64, 512>}]} {
    %c0 = arith.constant 0 : index
    %c0_0 = arith.constant 0 : index
    %0 = vector.load %arg2[%c0, %c0_0] : memref<64x288xf32, #tpu.memory_space<vmem>>, vector<64x288xf32>
    %c0_1 = arith.constant 0 : index
    %c0_2 = arith.constant 0 : index
    %1 = vector.load %arg1[%c0_1, %c0_2] : memref<288x512xf32, #tpu.memory_space<vmem>>, vector<288x512xf32>
    %cst = arith.constant dense<0.000000e+00> : vector<64x512xf32>
    %2 = tpu.matmul %0, %1, %cst {dimension_numbers = #tpu.dot_dimension_numbers<[1], [0], [0], [1], [0, 0, 1, 1], [], []>} : vector<64x288xf32>, vector<288x512xf32>, vector<64x512xf32> -> vector<64x512xf32>
    %cst_3 = arith.constant dense<0.000000e+00> : vector<64xf32>
    %3 = vector.multi_reduction <add>, %2, %cst_3 [1] : vector<64x512xf32> to vector<64xf32>
    %4 = vector.shape_cast %3 : vector<64xf32> to vector<64x1xf32>
    %5 = arith.mulf %2, %2 : vector<64x512xf32>
    %cst_4 = arith.constant dense<0.000000e+00> : vector<64xf32>
    %6 = vector.multi_reduction <add>, %5, %cst_4 [1] : vector<64x512xf32> to vector<64xf32>
    %7 = vector.shape_cast %6 : vector<64xf32> to vector<64x1xf32>
    %cst_5 = arith.constant 0.00255102036 : f32
    %8 = vector.broadcast %cst_5 : f32 to vector<64x1xf32>
    %9 = arith.mulf %4, %8 : vector<64x1xf32>
    %cst_6 = arith.constant 0.00255102036 : f32
    %10 = vector.broadcast %cst_6 : f32 to vector<64x1xf32>
    %11 = arith.mulf %7, %10 : vector<64x1xf32>
    %12 = arith.mulf %9, %9 : vector<64x1xf32>
    %13 = arith.subf %11, %12 : vector<64x1xf32>
    %cst_7 = arith.constant 0.000000e+00 : f32
    %14 = vector.broadcast %cst_7 : f32 to vector<64x1xf32>
    %15 = arith.maximumf %13, %14 : vector<64x1xf32>
    %c0_8 = arith.constant 0 : index
    %c0_9 = arith.constant 0 : index
    %16 = vector.load %arg3[%c0_8, %c0_9] : memref<64x1xf32, #tpu.memory_space<vmem>>, vector<64x1xf32>
    %cst_10 = arith.constant 9.99999974E-6 : f32
    %17 = vector.broadcast %cst_10 : f32 to vector<64x1xf32>
    %18 = arith.addf %15, %17 : vector<64x1xf32>
    %19 = math.rsqrt %18 : vector<64x1xf32>
    %20 = arith.mulf %16, %19 : vector<64x1xf32>
    %c0_11 = arith.constant 0 : index
    %c0_12 = arith.constant 0 : index
    %21 = vector.load %arg4[%c0_11, %c0_12] : memref<64x1xf32, #tpu.memory_space<vmem>>, vector<64x1xf32>
    %22 = arith.mulf %9, %20 : vector<64x1xf32>
    %23 = arith.subf %21, %22 : vector<64x1xf32>
    %24 = vector.broadcast %20 : vector<64x1xf32> to vector<64x512xf32>
    %25 = arith.mulf %2, %24 : vector<64x512xf32>
    %26 = vector.broadcast %23 : vector<64x1xf32> to vector<64x512xf32>
    %27 = arith.addf %25, %26 : vector<64x512xf32>
    %cst_13 = arith.constant 0.000000e+00 : f32
    %28 = vector.broadcast %cst_13 : f32 to vector<64x512xf32>
    %29 = arith.maximumf %27, %28 : vector<64x512xf32>
    %c0_14 = arith.constant 0 : index
    %c0_15 = arith.constant 0 : index
    %30 = vector.load %arg5[%c0_14, %c0_15] : memref<64x512xf32, #tpu.memory_space<vmem>>, vector<64x512xf32>
    tpu.vector_store %arg5[%c0_14, %c0_15], %29 {strides = array<i32>} : memref<64x512xf32, #tpu.memory_space<vmem>>, vector<64x512xf32>,
    return
  }
  func.func @transform_0(%arg0: i32) -> (i32, i32) {
    %c0_i32 = arith.constant 0 : i32
    %c0_i32_0 = arith.constant 0 : i32
    %c0_i32_1 = arith.constant 0 : i32
    return %c0_i32, %c0_i32_0 : i32, i32
  }
  func.func @transform_1(%arg0: i32) -> (i32, i32) {
    %c0_i32 = arith.constant 0 : i32
    %c0_i32_0 = arith.constant 0 : i32
    return %arg0, %c0_i32 : i32, i32
  }
  func.func @transform_2(%arg0: i32) -> (i32, i32) {
    %c0_i32 = arith.constant 0 : i32
    %c0_i32_0 = arith.constant 0 : i32
    return %arg0, %c0_i32 : i32, i32
  }
  func.func @transform_3(%arg0: i32) -> (i32, i32) {
    %c0_i32 = arith.constant 0 : i32
    %c0_i32_0 = arith.constant 0 : i32
    return %arg0, %c0_i32 : i32, i32
  }
  func.func @transform_4(%arg0: i32) -> (i32, i32) {
    %c0_i32 = arith.constant 0 : i32
    %c0_i32_0 = arith.constant 0 : i32
    return %arg0, %c0_i32 : i32, i32
  }
}

module attributes {stable_mosaic.version = 11 : i64} {
  func.func @_conv_bn_relu_kernel(%arg0: i32, %arg1: memref<576x128xf32, #tpu.memory_space<vmem>>, %arg2: memref<128x576xf32, #tpu.memory_space<vmem>>, %arg3: memref<128x1xf32, #tpu.memory_space<vmem>>, %arg4: memref<128x1xf32, #tpu.memory_space<vmem>>, %arg5: memref<128x128xf32, #tpu.memory_space<vmem>>) attributes {dimension_semantics = [#tpu.dimension_semantics<parallel>], iteration_bounds = array<i64: 1>, scalar_prefetch = 0 : i64, scratch_operands = 0 : i64, tpu.core_type = #tpu.core_type<tc>, window_params = [{pipeline_mode = #tpu.pipeline_mode<synchronous>, transform_indices = @transform_0, window_bounds = array<i64: 576, 128>}, {transform_indices = @transform_1, window_bounds = array<i64: 128, 576>}, {transform_indices = @transform_2, window_bounds = array<i64: 128, 1>}, {transform_indices = @transform_3, window_bounds = array<i64: 128, 1>}, {transform_indices = @transform_4, window_bounds = array<i64: 128, 128>}]} {
    %c0 = arith.constant 0 : index
    %c0_0 = arith.constant 0 : index
    %0 = vector.load %arg2[%c0, %c0_0] : memref<128x576xf32, #tpu.memory_space<vmem>>, vector<128x576xf32>
    %c0_1 = arith.constant 0 : index
    %c0_2 = arith.constant 0 : index
    %1 = vector.load %arg1[%c0_1, %c0_2] : memref<576x128xf32, #tpu.memory_space<vmem>>, vector<576x128xf32>
    %cst = arith.constant dense<0.000000e+00> : vector<128x128xf32>
    %2 = tpu.matmul %0, %1, %cst {dimension_numbers = #tpu.dot_dimension_numbers<[1], [0], [0], [1], [0, 0, 1, 1], [], []>} : vector<128x576xf32>, vector<576x128xf32>, vector<128x128xf32> -> vector<128x128xf32>
    %cst_3 = arith.constant dense<0.000000e+00> : vector<128xf32>
    %3 = vector.multi_reduction <add>, %2, %cst_3 [1] : vector<128x128xf32> to vector<128xf32>
    %4 = vector.shape_cast %3 : vector<128xf32> to vector<128x1xf32>
    %5 = arith.mulf %2, %2 : vector<128x128xf32>
    %cst_4 = arith.constant dense<0.000000e+00> : vector<128xf32>
    %6 = vector.multi_reduction <add>, %5, %cst_4 [1] : vector<128x128xf32> to vector<128xf32>
    %7 = vector.shape_cast %6 : vector<128xf32> to vector<128x1xf32>
    %cst_5 = arith.constant 0.013888889 : f32
    %8 = vector.broadcast %cst_5 : f32 to vector<128x1xf32>
    %9 = arith.mulf %4, %8 : vector<128x1xf32>
    %cst_6 = arith.constant 0.013888889 : f32
    %10 = vector.broadcast %cst_6 : f32 to vector<128x1xf32>
    %11 = arith.mulf %7, %10 : vector<128x1xf32>
    %12 = arith.mulf %9, %9 : vector<128x1xf32>
    %13 = arith.subf %11, %12 : vector<128x1xf32>
    %cst_7 = arith.constant 0.000000e+00 : f32
    %14 = vector.broadcast %cst_7 : f32 to vector<128x1xf32>
    %15 = arith.maximumf %13, %14 : vector<128x1xf32>
    %c0_8 = arith.constant 0 : index
    %c0_9 = arith.constant 0 : index
    %16 = vector.load %arg3[%c0_8, %c0_9] : memref<128x1xf32, #tpu.memory_space<vmem>>, vector<128x1xf32>
    %cst_10 = arith.constant 9.99999974E-6 : f32
    %17 = vector.broadcast %cst_10 : f32 to vector<128x1xf32>
    %18 = arith.addf %15, %17 : vector<128x1xf32>
    %19 = math.rsqrt %18 : vector<128x1xf32>
    %20 = arith.mulf %16, %19 : vector<128x1xf32>
    %c0_11 = arith.constant 0 : index
    %c0_12 = arith.constant 0 : index
    %21 = vector.load %arg4[%c0_11, %c0_12] : memref<128x1xf32, #tpu.memory_space<vmem>>, vector<128x1xf32>
    %22 = arith.mulf %9, %20 : vector<128x1xf32>
    %23 = arith.subf %21, %22 : vector<128x1xf32>
    %24 = vector.broadcast %20 : vector<128x1xf32> to vector<128x128xf32>
    %25 = arith.mulf %2, %24 : vector<128x128xf32>
    %26 = vector.broadcast %23 : vector<128x1xf32> to vector<128x128xf32>
    %27 = arith.addf %25, %26 : vector<128x128xf32>
    %cst_13 = arith.constant 0.000000e+00 : f32
    %28 = vector.broadcast %cst_13 : f32 to vector<128x128xf32>
    %29 = arith.maximumf %27, %28 : vector<128x128xf32>
    %c0_14 = arith.constant 0 : index
    %c0_15 = arith.constant 0 : index
    %30 = vector.load %arg5[%c0_14, %c0_15] : memref<128x128xf32, #tpu.memory_space<vmem>>, vector<128x128xf32>
    tpu.vector_store %arg5[%c0_14, %c0_15], %29 {strides = array<i32>} : memref<128x128xf32, #tpu.memory_space<vmem>>, vector<128x128xf32>,
    return
  }
  func.func @transform_0(%arg0: i32) -> (i32, i32) {
    %c0_i32 = arith.constant 0 : i32
    %c0_i32_0 = arith.constant 0 : i32
    %c0_i32_1 = arith.constant 0 : i32
    return %c0_i32, %c0_i32_0 : i32, i32
  }
  func.func @transform_1(%arg0: i32) -> (i32, i32) {
    %c0_i32 = arith.constant 0 : i32
    %c0_i32_0 = arith.constant 0 : i32
    return %arg0, %c0_i32 : i32, i32
  }
  func.func @transform_2(%arg0: i32) -> (i32, i32) {
    %c0_i32 = arith.constant 0 : i32
    %c0_i32_0 = arith.constant 0 : i32
    return %arg0, %c0_i32 : i32, i32
  }
  func.func @transform_3(%arg0: i32) -> (i32, i32) {
    %c0_i32 = arith.constant 0 : i32
    %c0_i32_0 = arith.constant 0 : i32
    return %arg0, %c0_i32 : i32, i32
  }
  func.func @transform_4(%arg0: i32) -> (i32, i32) {
    %c0_i32 = arith.constant 0 : i32
    %c0_i32_0 = arith.constant 0 : i32
    return %arg0, %c0_i32 : i32, i32
  }
}

module attributes {stable_mosaic.version = 11 : i64} {
  func.func @_head_kernel(%arg0: i32, %arg1: memref<1152x128xf32, #tpu.memory_space<vmem>>, %arg2: memref<10x1152xf32, #tpu.memory_space<vmem>>, %arg3: memref<10x1xf32, #tpu.memory_space<vmem>>, %arg4: memref<10x1xf32, #tpu.memory_space<vmem>>, %arg5: memref<10x2xf32, #tpu.memory_space<vmem>>) attributes {dimension_semantics = [#tpu.dimension_semantics<arbitrary>], iteration_bounds = array<i64: 1>, scalar_prefetch = 0 : i64, scratch_operands = 0 : i64, tpu.core_type = #tpu.core_type<tc>, window_params = [{pipeline_mode = #tpu.pipeline_mode<synchronous>, transform_indices = @transform_0, window_bounds = array<i64: 1152, 128>}, {pipeline_mode = #tpu.pipeline_mode<synchronous>, transform_indices = @transform_1, window_bounds = array<i64: 10, 1152>}, {pipeline_mode = #tpu.pipeline_mode<synchronous>, transform_indices = @transform_2, window_bounds = array<i64: 10, 1>}, {pipeline_mode = #tpu.pipeline_mode<synchronous>, transform_indices = @transform_3, window_bounds = array<i64: 10, 1>}, {pipeline_mode = #tpu.pipeline_mode<synchronous>, transform_indices = @transform_4, window_bounds = array<i64: 10, 2>}]} {
    %c0 = arith.constant 0 : index
    %c0_0 = arith.constant 0 : index
    %0 = vector.load %arg2[%c0, %c0_0] : memref<10x1152xf32, #tpu.memory_space<vmem>>, vector<10x1152xf32>
    %c0_1 = arith.constant 0 : index
    %c0_2 = arith.constant 0 : index
    %1 = vector.load %arg1[%c0_1, %c0_2] : memref<1152x128xf32, #tpu.memory_space<vmem>>, vector<1152x128xf32>
    %cst = arith.constant dense<0.000000e+00> : vector<10x128xf32>
    %2 = tpu.matmul %0, %1, %cst {dimension_numbers = #tpu.dot_dimension_numbers<[1], [0], [0], [1], [0, 0, 1, 1], [], []>} : vector<10x1152xf32>, vector<1152x128xf32>, vector<10x128xf32> -> vector<10x128xf32>
    %cst_3 = arith.constant dense<0.000000e+00> : vector<10xf32>
    %3 = vector.multi_reduction <add>, %2, %cst_3 [1] : vector<10x128xf32> to vector<10xf32>
    %4 = vector.shape_cast %3 : vector<10xf32> to vector<10x1xf32>
    %5 = arith.mulf %2, %2 : vector<10x128xf32>
    %cst_4 = arith.constant dense<0.000000e+00> : vector<10xf32>
    %6 = vector.multi_reduction <add>, %5, %cst_4 [1] : vector<10x128xf32> to vector<10xf32>
    %7 = vector.shape_cast %6 : vector<10xf32> to vector<10x1xf32>
    %cst_5 = arith.constant 1.250000e-01 : f32
    %8 = vector.broadcast %cst_5 : f32 to vector<10x1xf32>
    %9 = arith.mulf %4, %8 : vector<10x1xf32>
    %cst_6 = arith.constant 1.250000e-01 : f32
    %10 = vector.broadcast %cst_6 : f32 to vector<10x1xf32>
    %11 = arith.mulf %7, %10 : vector<10x1xf32>
    %12 = arith.mulf %9, %9 : vector<10x1xf32>
    %13 = arith.subf %11, %12 : vector<10x1xf32>
    %cst_7 = arith.constant 0.000000e+00 : f32
    %14 = vector.broadcast %cst_7 : f32 to vector<10x1xf32>
    %15 = arith.maximumf %13, %14 : vector<10x1xf32>
    %c0_8 = arith.constant 0 : index
    %c0_9 = arith.constant 0 : index
    %16 = vector.load %arg3[%c0_8, %c0_9] : memref<10x1xf32, #tpu.memory_space<vmem>>, vector<10x1xf32>
    %cst_10 = arith.constant 9.99999974E-6 : f32
    %17 = vector.broadcast %cst_10 : f32 to vector<10x1xf32>
    %18 = arith.addf %15, %17 : vector<10x1xf32>
    %19 = math.rsqrt %18 : vector<10x1xf32>
    %20 = arith.mulf %16, %19 : vector<10x1xf32>
    %c0_11 = arith.constant 0 : index
    %c0_12 = arith.constant 0 : index
    %21 = vector.load %arg4[%c0_11, %c0_12] : memref<10x1xf32, #tpu.memory_space<vmem>>, vector<10x1xf32>
    %22 = arith.mulf %9, %20 : vector<10x1xf32>
    %23 = arith.subf %21, %22 : vector<10x1xf32>
    %24 = vector.broadcast %20 : vector<10x1xf32> to vector<10x128xf32>
    %25 = arith.mulf %2, %24 : vector<10x128xf32>
    %26 = vector.broadcast %23 : vector<10x1xf32> to vector<10x128xf32>
    %27 = arith.addf %25, %26 : vector<10x128xf32>
    %cst_13 = arith.constant 0.000000e+00 : f32
    %28 = vector.broadcast %cst_13 : f32 to vector<10x128xf32>
    %29 = arith.maximumf %27, %28 : vector<10x128xf32>
    %30 = vector.extract_strided_slice %29 {offsets = [0, 0], sizes = [10, 4], strides = [1, 1]} : vector<10x128xf32> to vector<10x4xf32>
    %cst_14 = arith.constant dense<0.000000e+00> : vector<10xf32>
    %31 = vector.multi_reduction <add>, %30, %cst_14 [1] : vector<10x4xf32> to vector<10xf32>
    %32 = vector.shape_cast %31 : vector<10xf32> to vector<10x1xf32>
    %cst_15 = arith.constant 2.500000e-01 : f32
    %33 = vector.broadcast %cst_15 : f32 to vector<10x1xf32>
    %34 = arith.mulf %33, %32 : vector<10x1xf32>
    %cst_16 = arith.constant dense<0xFF800000> : vector<1xf32>
    %35 = vector.multi_reduction <maximumf>, %34, %cst_16 [0] : vector<10x1xf32> to vector<1xf32>
    %36 = vector.shape_cast %35 : vector<1xf32> to vector<1x1xf32>
    %37 = vector.broadcast %36 : vector<1x1xf32> to vector<10x1xf32>
    %38 = arith.subf %34, %37 : vector<10x1xf32>
    %39 = math.exp %38 : vector<10x1xf32>
    %cst_17 = arith.constant dense<0.000000e+00> : vector<1xf32>
    %40 = vector.multi_reduction <add>, %39, %cst_17 [0] : vector<10x1xf32> to vector<1xf32>
    %41 = vector.shape_cast %40 : vector<1xf32> to vector<1x1xf32>
    %42 = math.log %41 : vector<1x1xf32>
    %43 = vector.broadcast %42 : vector<1x1xf32> to vector<10x1xf32>
    %44 = arith.subf %38, %43 : vector<10x1xf32>
    %c0_18 = arith.constant 0 : index
    %c0_19 = arith.constant 0 : index
    %45 = vector.load %arg5[%c0_18, %c0_19] : memref<10x2xf32, #tpu.memory_space<vmem>>, vector<10x1xf32>
    tpu.vector_store %arg5[%c0_18, %c0_19], %44 {strides = array<i32>} : memref<10x2xf32, #tpu.memory_space<vmem>>, vector<10x1xf32>,
    %46 = vector.extract_strided_slice %29 {offsets = [0, 4], sizes = [10, 4], strides = [1, 1]} : vector<10x128xf32> to vector<10x4xf32>
    %cst_20 = arith.constant dense<0.000000e+00> : vector<10xf32>
    %47 = vector.multi_reduction <add>, %46, %cst_20 [1] : vector<10x4xf32> to vector<10xf32>
    %48 = vector.shape_cast %47 : vector<10xf32> to vector<10x1xf32>
    %cst_21 = arith.constant 2.500000e-01 : f32
    %49 = vector.broadcast %cst_21 : f32 to vector<10x1xf32>
    %50 = arith.mulf %49, %48 : vector<10x1xf32>
    %cst_22 = arith.constant dense<0xFF800000> : vector<1xf32>
    %51 = vector.multi_reduction <maximumf>, %50, %cst_22 [0] : vector<10x1xf32> to vector<1xf32>
    %52 = vector.shape_cast %51 : vector<1xf32> to vector<1x1xf32>
    %53 = vector.broadcast %52 : vector<1x1xf32> to vector<10x1xf32>
    %54 = arith.subf %50, %53 : vector<10x1xf32>
    %55 = math.exp %54 : vector<10x1xf32>
    %cst_23 = arith.constant dense<0.000000e+00> : vector<1xf32>
    %56 = vector.multi_reduction <add>, %55, %cst_23 [0] : vector<10x1xf32> to vector<1xf32>
    %57 = vector.shape_cast %56 : vector<1xf32> to vector<1x1xf32>
    %58 = math.log %57 : vector<1x1xf32>
    %59 = vector.broadcast %58 : vector<1x1xf32> to vector<10x1xf32>
    %60 = arith.subf %54, %59 : vector<10x1xf32>
    %c0_24 = arith.constant 0 : index
    %c1 = arith.constant 1 : index
    %61 = vector.load %arg5[%c0_24, %c1] : memref<10x2xf32, #tpu.memory_space<vmem>>, vector<10x1xf32>
    tpu.vector_store %arg5[%c0_24, %c1], %60 {strides = array<i32>} : memref<10x2xf32, #tpu.memory_space<vmem>>, vector<10x1xf32>,
    return
  }
  func.func @transform_0(%arg0: i32) -> (i32, i32) {
    %c0_i32 = arith.constant 0 : i32
    %c0_i32_0 = arith.constant 0 : i32
    %c0_i32_1 = arith.constant 0 : i32
    return %c0_i32, %c0_i32_0 : i32, i32
  }
  func.func @transform_1(%arg0: i32) -> (i32, i32) {
    %c0_i32 = arith.constant 0 : i32
    %c0_i32_0 = arith.constant 0 : i32
    %c0_i32_1 = arith.constant 0 : i32
    return %c0_i32, %c0_i32_0 : i32, i32
  }
  func.func @transform_2(%arg0: i32) -> (i32, i32) {
    %c0_i32 = arith.constant 0 : i32
    %c0_i32_0 = arith.constant 0 : i32
    %c0_i32_1 = arith.constant 0 : i32
    return %c0_i32, %c0_i32_0 : i32, i32
  }
  func.func @transform_3(%arg0: i32) -> (i32, i32) {
    %c0_i32 = arith.constant 0 : i32
    %c0_i32_0 = arith.constant 0 : i32
    %c0_i32_1 = arith.constant 0 : i32
    return %c0_i32, %c0_i32_0 : i32, i32
  }
  func.func @transform_4(%arg0: i32) -> (i32, i32) {
    %c0_i32 = arith.constant 0 : i32
    %c0_i32_0 = arith.constant 0 : i32
    %c0_i32_1 = arith.constant 0 : i32
    return %c0_i32, %c0_i32_0 : i32, i32
  }
}

</mosaic_0001>

<bundles_post_ra>
// kernel: netconv_forward.13
= control target key start
LH: loop header
LB: loop body
LE: loop exit
PB: predicated region body
PF: predicated region fallthrough
CT: control target
= control target key end

     0   :  { %s8879_s0 = inlined_call_operand.hbm [shape: f32[16,9], index: 0, kind: input, shape index: {}]   ;;  %s8880_s1 = inlined_call_operand.vmem [shape: f32[16,1], index: 1, kind: input, shape index: {}]   ;;  %s8881_s2 = inlined_call_operand.vmem [shape: f32[16,1], index: 2, kind: input, shape index: {}]   ;;  %s8882_s3 = inlined_call_operand.vmem [shape: f32[9,7688], index: 3, kind: input, shape index: {}]   ;;  %s8883_s4 = inlined_call_operand.<no memory space> [shape: f32[], index: 4, kind: input, shape index: {}]   ;;  %s8884_s5 = inlined_call_operand.vmem [shape: f32[16,7808], index: 5, kind: output, shape index: {}]  }
   0x1   :  { %v5985_v0 = vstv %s8883_s4 }
   0x2   :  { %11 = vsyncpa [#allocation8], 0  ;;  %s5946_s20 = smov [#allocation7]   ;;  %s5922_s24 = scalar_lea.hbm %s8879_s0, 256 }
   0x3   :  { %s19_s21 = sshll.u32 %s5946_s20, 4  ;;  %p5923_p0 = scmp.ne.s32.totalorder %s8879_s0, %s5922_s24  ;;  %s20_s21 = int_to_ptr.vmem [resolvable:$true] %s19_s21 }
   0x4   :  { %p5926_p1 = scmp.lt.u32.totalorder %s5922_s24, %s8879_s0 }
   0x6   :  { %p5928_p2 = pnand %p5926_p1, %p5923_p0 }
   0x8   :  { %5931 = shalt.err (!%p5928_p2)
}
   0x9   :  { %s5932_s4 = scalar_lea.vmem %s20_s21, 256  ;;  %p5937_p4 = scmp.lt.s32.totalorder %s20_s21, %s20_s21 }
   0xa   :  { %p5933_p3 = scmp.ne.s32.totalorder %s20_s21, %s5932_s4  ;;  %p5938_p5 = scmp.lt.s32.totalorder %s5932_s4, %s5932_s4 }
   0xc   :  { %p5939_p6 = por %p5938_p5, %p5937_p4 }
   0xe   :  { %p5940_p7 = pnand %p5939_p6, %p5933_p3 }
  0x10   :  { %5943 = shalt.err (!%p5940_p7)
}
  0x11   :  { %s5947_s29 = smov 128   ;;  %s5948_s30 = smov 8  }
  0x12   :  { %25 = dma.hbm_to_vmem [thread:$0]  %s8879_s0, 256, %s20_s21, [#allocation8], %s5947_s29, %s5947_s29, %s5948_s30  }
  0x13   :  { %5944 = dma.done.wait [#allocation8], 256  }
  0x14   :  { %5945 = vsyncadd [#allocation8], 4294967040  ;;  %v938_v1 = vlaneseq  ;;  %v5949_v2 = vmov 0.0   ;;  %v6008_v5 = vld [vmem:[%s8882_s3 + $0x8] sm:$0xff]  ;;  %v5529_v6 = vld [vmem:[%s8882_s3 + $0x1f0] sm:$0xff]  ;;  %vm1992_vm1 = vcmask 1040384  }
  0x15   :  { %2240 = vmatprep.mubr.f32.mxu0 %v5949_v2  ;;  %2317 = vmatprep.mubr.f32.mxu1 %v5949_v2  ;;  %v6016_v7 = vld [vmem:[%s8882_s3] sm:$0xff]  ;;  %v5528_v9 = vld [vmem:[%s8882_s3 + $0x1e8] sm:$0xff]  ;;  %v6027_v10 = vld [vmem:[%s8882_s3 + $0x18] sm:$0xff]  ;;  %vm5950_vm2 = vmmov 1   ;;  %vm1985_vm4 = vcmask 72704  }
  0x16   :  { %v949_v3 = vshrl.u32 %v938_v1, 7  ;;  %v5531_v11 = vld [vmem:[%s8882_s3 + $0x200] sm:$0xff]  ;;  %v6041_v14 = vld [vmem:[%s8882_s3 + $0x10] sm:$0xff]  ;;  %v5530_v15 = vld [vmem:[%s8882_s3 + $0x1f8] sm:$0xff] }
  0x17   :  { %v6052_v17 = vld [vmem:[%s8882_s3 + $0x28] sm:$0xff]  ;;  %v5533_v18 = vld [vmem:[%s8882_s3 + $0x210] sm:$0xff]  ;;  %v6060_v19 = vld [vmem:[%s8882_s3 + $0x20] sm:$0xff] }
  0x18   :  { %v6002_v4 = vadd.s32 8, %v949_v3  ;;  %vm6063_vm3 = vmpackc.low %vm1992_vm1, %vm5950_vm2  ;;  %v5532_v22 = vld [vmem:[%s8882_s3 + $0x208] sm:$0xff]  ;;  %v6076_v23 = vld [vmem:[%s8882_s3 + $0x38] sm:$0xff] }
  0x19   :  { %v5535_v25 = vld [vmem:[%s8882_s3 + $0x220] sm:$0xff]  ;;  %v6087_v26 = vld [vmem:[%s8882_s3 + $0x30] sm:$0xff]  ;;  %v5534_v27 = vld [vmem:[%s8882_s3 + $0x218] sm:$0xff] }
  0x1a   :  { %vm951_vm0 = vcmp.lt.s32.totalorder %v6002_v4, 9  ;;  %v6101_v30 = vld [vmem:[%s8882_s3 + $0x48] sm:$0xff]  ;;  %v5537_v31 = vld [vmem:[%s8882_s3 + $0x230] sm:$0xff]  ;;  %v6109_v32 = vld [vmem:[%s8882_s3 + $0x40] sm:$0xff] }
  0x1b   :  { %v967_v8 = vsel %vm951_vm0, %v5529_v6, %v5985_v0  ;;  %v952_v12 = vsel %vm951_vm0, %v5528_v9, %v5985_v0  ;;  %v997_v13 = vsel %vm951_vm0, %v5531_v11, %v5985_v0  ;;  %v982_v16 = vsel %vm951_vm0, %v5530_v15, %v5985_v0  ;;  %v5536_v34 = vld [vmem:[%s8882_s3 + $0x228] sm:$0xff]  ;;  %v6120_v35 = vld [vmem:[%s8882_s3 + $0x58] sm:$0xff]  ;;  %v5539_v36 = vld [vmem:[%s8882_s3 + $0x240] sm:$0xff] }
  0x1c   :  { %975 = vst [vmem:[#allocation9 + $0x1f0] sm:$0xff] %v967_v8  ;;  %960 = vst [vmem:[#allocation9 + $0x1e8] sm:$0xff] %v952_v12  ;;  %v1027_v21 = vsel %vm951_vm0, %v5533_v18, %v5985_v0  ;;  %v1012_v24 = vsel %vm951_vm0, %v5532_v22, %v5985_v0  ;;  %v1057_v28 = vsel %vm951_vm0, %v5535_v25, %v5985_v0  ;;  %v6134_v39 = vld [vmem:[%s8882_s3 + $0x50] sm:$0xff]  ;;  %v5538_v40 = vld [vmem:[%s8882_s3 + $0x238] sm:$0xff] }
  0x1d   :  { %1005 = vst [vmem:[#allocation9 + $0x200] sm:$0xff] %v997_v13  ;;  %990 = vst [vmem:[#allocation9 + $0x1f8] sm:$0xff] %v982_v16  ;;  %v1042_v29 = vsel %vm951_vm0, %v5534_v27, %v5985_v0  ;;  %v1087_v33 = vsel %vm951_vm0, %v5537_v31, %v5985_v0  ;;  %v1072_v37 = vsel %vm951_vm0, %v5536_v34, %v5985_v0  ;;  %v6142_v41 = vld [vmem:[%s8882_s3 + $0x68] sm:$0xff]  ;;  %v5541_v44 = vld [vmem:[%s8882_s3 + $0x250] sm:$0xff] }
  0x1e   :  { %1035 = vst [vmem:[#allocation9 + $0x210] sm:$0xff] %v1027_v21  ;;  %1020 = vst [vmem:[#allocation9 + $0x208] sm:$0xff] %v1012_v24  ;;  %v1117_v38 = vsel %vm951_vm0, %v5539_v36, %v5985_v0  ;;  %v1102_v43 = vsel %vm951_vm0, %v5538_v40, %v5985_v0  ;;  %v6153_v45 = vld [vmem:[%s8882_s3 + $0x60] sm:$0xff]  ;;  %v1147_v49 = vsel %vm951_vm0, %v5541_v44, %v5985_v0  ;;  %v5540_v50 = vld [vmem:[%s8882_s3 + $0x248] sm:$0xff] }
  0x1f   :  { %1065 = vst [vmem:[#allocation9 + $0x220] sm:$0xff] %v1057_v28  ;;  %1050 = vst [vmem:[#allocation9 + $0x218] sm:$0xff] %v1042_v29  ;;  %v6164_v53 = vld [vmem:[#allocation7] sm:$0xff]  ;;  %v1132_v55 = vsel %vm951_vm0, %v5540_v50, %v5985_v0  ;;  %v6172_v56 = vld [vmem:[%s8882_s3 + $0x78] sm:$0xff] }
  0x20   :  { %1095 = vst [vmem:[#allocation9 + $0x230] sm:$0xff] %v1087_v33  ;;  %1080 = vst [vmem:[#allocation9 + $0x228] sm:$0xff] %v1072_v37  ;;  %v5543_v57 = vld [vmem:[%s8882_s3 + $0x260] sm:$0xff]  ;;  %v6186_v61 = vld [vmem:[%s8882_s3 + $0x70] sm:$0xff] }
  0x21   :  { %1125 = vst [vmem:[#allocation9 + $0x240] sm:$0xff] %v1117_v38  ;;  %1110 = vst [vmem:[#allocation9 + $0x238] sm:$0xff] %v1102_v43  ;;  %v1177_v60 = vsel %vm951_vm0, %v5543_v57, %v5985_v0  ;;  %v5542_v62 = vld [vmem:[%s8882_s3 + $0x258] sm:$0xff]  ;;  %v6202_v6 = vld [vmem:[%s8882_s3 + $0x88] sm:$0xff] }
  0x22   :  { %1155 = vst [vmem:[#allocation9 + $0x250] sm:$0xff] %v1147_v49  ;;  %1140 = vst [vmem:[#allocation9 + $0x248] sm:$0xff] %v1132_v55  ;;  %v6216_v12 = vld [vmem:[%s8882_s3 + $0x80] sm:$0xff]  ;;  %v5544_v16 = vld [vmem:[%s8882_s3 + $0x268] sm:$0xff] }
  0x23   :  { %v1925_v42 = vld [vmem:[#allocation9 + $0x1f0] sm:$0x1]  ;;  %v1924_v47 = vld [vmem:[#allocation9 + $0x1e8] sm:$0x1]  ;;  %1185 = vst [vmem:[#allocation9 + $0x260] sm:$0xff] %v1177_v60  ;;  %v1192_v21 = vsel %vm951_vm0, %v5544_v16, %v5985_v0  ;;  %v5549_v31 = vld [vmem:[%s8882_s3 + $0x290] sm:$0xff] }
  0x24   :  { %v5723_v46 = vpack.c.bf16 %v1925_v42, %v6008_v5  ;;  %v1927_v48 = vld [vmem:[#allocation9 + $0x200] sm:$0x1]  ;;  %v5726_v51 = vpack.c.bf16 %v1924_v47, %v6016_v7  ;;  %v1926_v54 = vld [vmem:[#allocation9 + $0x1f8] sm:$0x1]  ;;  %v1162_v5 = vsel %vm951_vm0, %v5542_v62, %v5985_v0  ;;  %v5547_v22 = vld [vmem:[%s8882_s3 + $0x280] sm:$0xff]  ;;  %1200 = vst [vmem:[#allocation9 + $0x268] sm:$0xff] %v1192_v21  ;;  %v1267_v34 = vsel %vm951_vm0, %v5549_v31, %v5985_v0 }
  0x25   :  { %v5729_v52 = vpack.c.bf16 %v1927_v48, %v6027_v10  ;;  %v5732_v58 = vpack.c.bf16 %v1926_v54, %v6041_v14  ;;  %v1929_v59 = vld [vmem:[#allocation9 + $0x210] sm:$0x1]  ;;  %v1928_v3 = vld [vmem:[#allocation9 + $0x208] sm:$0x1]  ;;  %v5545_v7 = vld [vmem:[%s8882_s3 + $0x270] sm:$0xff]  ;;  %1170 = vst [vmem:[#allocation9 + $0x258] sm:$0xff] %v1162_v5  ;;  %v1237_v25 = vsel %vm951_vm0, %v5547_v22, %v5985_v0 }
  0x26   :  { %5725 = vmatprep.subr.msk.bf16.mxu0 %vm6063_vm3, %v5723_v46  ;;  %v5735_v63 = vpack.c.bf16 %v1929_v59, %v6052_v17  ;;  %v5738_v8 = vpack.c.bf16 %v1928_v3, %v6060_v19  ;;  %v1931_v9 = vld [vmem:[#allocation9 + $0x220] sm:$0x1]  ;;  %v1930_v10 = vld [vmem:[#allocation9 + $0x218] sm:$0x1]  ;;  %v1207_v11 = vsel %vm951_vm0, %v5545_v7, %v5985_v0  ;;  %v6228_v17 = vld [vmem:[%s8882_s3 + $0x98] sm:$0xff]  ;;  %1245 = vst [vmem:[#allocation9 + $0x280] sm:$0xff] %v1237_v25 }
  0x27   :  { %5728 = vmatpush1.bf16.msk.msra.mxu0 %vm6063_vm3, %v5726_v51  ;;  %5731 = vmatprep.subr.msk.bf16.mxu1 %vm6063_vm3, %v5729_v52  ;;  %v5741_v13 = vpack.c.bf16 %v1931_v9, %v6076_v23  ;;  %v5744_v14 = vpack.c.bf16 %v1930_v10, %v6087_v26  ;;  %v1933_v15 = vld [vmem:[#allocation9 + $0x230] sm:$0x1]  ;;  %1215 = vst [vmem:[#allocation9 + $0x270] sm:$0xff] %v1207_v11  ;;  %v6242_v23 = vld [vmem:[#allocation7 + $0x8] sm:$0xff]  ;;  %v6251_v26 = vld [vmem:[%s8882_s3 + $0x90] sm:$0xff] }
  0x28   :  { %5734 = vmatpush1.bf16.msk.msra.mxu1 %vm6063_vm3, %v5732_v58  ;;  %5737 = vmatprep.subr.msk.bf16.mxu0 %vm6063_vm3, %v5735_v63  ;;  %v5747_v18 = vpack.c.bf16 %v1933_v15, %v6101_v30  ;;  %v1935_v19 = vld [vmem:[#allocation9 + $0x240] sm:$0x1]  ;;  %v5546_v27 = vld [vmem:[%s8882_s3 + $0x278] sm:$0xff]  ;;  %v6266_v30 = vld [vmem:[%s8882_s3 + $0xa8] sm:$0xff]  ;;  %1275 = vst [vmem:[#allocation9 + $0x290] sm:$0xff] %v1267_v34 }
  0x29   :  { %v5753_v24 = vpack.c.bf16 %v1935_v19, %v6120_v35  ;;  %5743 = vmatprep.subr.msk.bf16.mxu1 %vm6063_vm3, %v5741_v13  ;;  %v1932_v28 = vld [vmem:[#allocation9 + $0x228] sm:$0x1]  ;;  %v1222_v29 = vsel %vm951_vm0, %v5546_v27, %v5985_v0  ;;  %v1937_v33 = vld [vmem:[#allocation9 + $0x250] sm:$0x1]  ;;  %v5548_v36 = vld [vmem:[%s8882_s3 + $0x288] sm:$0xff] }
  0x2a   :  { %5591 = vmatmul.mubr.msk.f32.vlgmr.msra.gmra.mrb[0].mxu0 %vm1985_vm4, %v6164_v53  ;;  %1230 = vst [vmem:[#allocation9 + $0x278] sm:$0xff] %v1222_v29  ;;  %v6280_v35 = vld [vmem:[%s8882_s3 + $0xa0] sm:$0xff]  ;;  %v1934_v37 = vld [vmem:[#allocation9 + $0x238] sm:$0x1]  ;;  %v1252_v38 = vsel %vm951_vm0, %v5548_v36, %v5985_v0  ;;  %v6295_v40 = vld [vmem:[%s8882_s3 + $0xb8] sm:$0xff]  ;;  %v5750_v43 = vpack.c.bf16 %v1932_v28, %v6109_v32  ;;  %v5759_v32 = vpack.c.bf16 %v1937_v33, %v6142_v41 }
  0x2b   :  { %5740 = vmatpush1.bf16.msk.msra.mxu0 %vm6063_vm3, %v5738_v8  ;;  %2246 = vmatprep.mubr.f32.mxu0 %v5949_v2  ;;  %v5551_v42 = vld [vmem:[%s8882_s3 + $0x2a0] sm:$0xff]  ;;  %v1939_v44 = vld [vmem:[#allocation9 + $0x260] sm:$0x1]  ;;  %1260 = vst [vmem:[#allocation9 + $0x288] sm:$0xff] %v1252_v38  ;;  %v5550_v48 = vld [vmem:[%s8882_s3 + $0x298] sm:$0xff]  ;;  %v5756_v52 = vpack.c.bf16 %v1934_v37, %v6134_v39 }
  0x2c   :  { %5595 = vmatmul.mubr.msk.f32.vlgmr.msra.gmra.mrb[0].mxu1 %vm1985_vm4, %v6164_v53  ;;  %5749 = vmatprep.subr.msk.bf16.mxu0 %vm6063_vm3, %v5747_v18  ;;  %v1297_v46 = vsel %vm951_vm0, %v5551_v42, %v5985_v0  ;;  %v6310_v47 = vld [vmem:[%s8882_s3 + $0xb0] sm:$0xff]  ;;  %v1282_v49 = vsel %vm951_vm0, %v5550_v48, %v5985_v0  ;;  %v6324_v50 = vld [vmem:[%s8882_s3 + $0xc8] sm:$0xff]  ;;  %v6337_v54 = vld [vmem:[%s8882_s3 + $0xc0] sm:$0xff]  ;;  %v5765_v39 = vpack.c.bf16 %v1939_v44, %v6172_v56 }
  0x2d   :  { %2323 = vmatprep.mubr.f32.mxu1 %v5949_v2  ;;  %5746 = vmatpush1.bf16.msk.msra.mxu1 %vm6063_vm3, %v5744_v14  ;;  %1305 = vst [vmem:[#allocation9 + $0x2a0] sm:$0xff] %v1297_v46  ;;  %v5553_v51 = vld [vmem:[%s8882_s3 + $0x2b0] sm:$0xff]  ;;  %1290 = vst [vmem:[#allocation9 + $0x298] sm:$0xff] %v1282_v49  ;;  %v5552_v55 = vld [vmem:[%s8882_s3 + $0x2a8] sm:$0xff] }
  0x2e   :  { %5592 = vmatmul.mubr.msk.f32.gmra.mrb[2].mxu0 %vm1985_vm4, %v6242_v23  ;;  %5755 = vmatprep.subr.msk.bf16.mxu1 %vm6063_vm3, %v5753_v24  ;;  %v1327_v41 = vsel %vm951_vm0, %v5553_v51, %v5985_v0  ;;  %v6345_v57 = vld [vmem:[%s8882_s3 + $0xd8] sm:$0xff]  ;;  %v1312_v58 = vsel %vm951_vm0, %v5552_v55, %v5985_v0  ;;  %v5555_v59 = vld [vmem:[%s8882_s3 + $0x2c0] sm:$0xff]  ;;  %v6359_v60 = vld [vmem:[%s8882_s3 + $0xd0] sm:$0xff] }
  0x2f   :  { %2394 = vmatprep.mubr.f32.mxu0 %v5949_v2  ;;  %1335 = vst [vmem:[#allocation9 + $0x2b0] sm:$0xff] %v1327_v41  ;;  %1320 = vst [vmem:[#allocation9 + $0x2a8] sm:$0xff] %v1312_v58  ;;  %v1357_v56 = vsel %vm951_vm0, %v5555_v59, %v5985_v0  ;;  %v5554_v62 = vld [vmem:[%s8882_s3 + $0x2b8] sm:$0xff]  ;;  %v6373_v63 = vld [vmem:[%s8882_s3 + $0xe8] sm:$0xff] }
  0x30   :  { %5596 = vmatmul.mubr.msk.f32.gmra.mrb[2].mxu1 %vm1985_vm4, %v6242_v23  ;;  %v1936_v3 = vld [vmem:[#allocation9 + $0x248] sm:$0x1]  ;;  %1365 = vst [vmem:[#allocation9 + $0x2c0] sm:$0xff] %v1357_v56  ;;  %v1342_v5 = vsel %vm951_vm0, %v5554_v62, %v5985_v0  ;;  %v5557_v7 = vld [vmem:[%s8882_s3 + $0x2d0] sm:$0xff]  ;;  %v6388_v8 = vld [vmem:[%s8882_s3 + $0xe0] sm:$0xff] }
  0x31   :  { %2471 = vmatprep.mubr.f32.mxu1 %v5949_v2  ;;  %v1941_v9 = vld [vmem:[#allocation9 + $0x270] sm:$0x1]  ;;  %1350 = vst [vmem:[#allocation9 + $0x2b8] sm:$0xff] %v1342_v5  ;;  %v1387_v10 = vsel %vm951_vm0, %v5557_v7, %v5985_v0  ;;  %v5556_v11 = vld [vmem:[%s8882_s3 + $0x2c8] sm:$0xff]  ;;  %v6402_v13 = vld [vmem:[%s8882_s3 + $0xf8] sm:$0xff]  ;;  %v5762_v19 = vpack.c.bf16 %v1936_v3, %v6153_v45 }
  0x32   :  { %5599 = vmatmul.mubr.msk.f32.vlgmr.msra.gmra.mrb[4].mxu0 %vm1985_vm4, %v6164_v53  ;;  %v1938_v14 = vld [vmem:[#allocation9 + $0x258] sm:$0x1]  ;;  %1395 = vst [vmem:[#allocation9 + $0x2d0] sm:$0xff] %v1387_v10  ;;  %v1372_v15 = vsel %vm951_vm0, %v5556_v11, %v5985_v0  ;;  %v5559_v16 = vld [vmem:[%s8882_s3 + $0x2e0] sm:$0xff]  ;;  %v6417_v18 = vld [vmem:[%s8882_s3 + $0xf0] sm:$0xff]  ;;  %v5771_v45 = vpack.c.bf16 %v1941_v9, %v6202_v6 }
  0x33   :  { %5752 = vmatpush1.bf16.msk.msra.mxu0 %vm6063_vm3, %v5750_v43  ;;  %2400 = vmatprep.mubr.f32.mxu0 %v5949_v2  ;;  %v1943_v21 = vld [vmem:[#allocation9 + $0x280] sm:$0x1]  ;;  %1380 = vst [vmem:[#allocation9 + $0x2c8] sm:$0xff] %v1372_v15  ;;  %v1417_v22 = vsel %vm951_vm0, %v5559_v16, %v5985_v0  ;;  %v5558_v24 = vld [vmem:[%s8882_s3 + $0x2d8] sm:$0xff]  ;;  %v6430_v25 = vld [vmem:[%s8882_s3 + $0x108] sm:$0xff]  ;;  %v5768_v31 = vpack.c.bf16 %v1938_v14, %v6186_v61 }
  0x34   :  { %5603 = vmatmul.mubr.msk.f32.vlgmr.msra.gmra.mrb[4].mxu1 %vm1985_vm4, %v6164_v53  ;;  %5761 = vmatprep.subr.msk.bf16.mxu0 %vm6063_vm3, %v5759_v32  ;;  %1425 = vst [vmem:[#allocation9 + $0x2e0] sm:$0xff] %v1417_v22  ;;  %v1402_v27 = vsel %vm951_vm0, %v5558_v24, %v5985_v0  ;;  %v5561_v28 = vld [vmem:[%s8882_s3 + $0x2f0] sm:$0xff]  ;;  %v6444_v29 = vld [vmem:[%s8882_s3 + $0x100] sm:$0xff]  ;;  %v5560_v33 = vld [vmem:[%s8882_s3 + $0x2e8] sm:$0xff]  ;;  %v5777_v36 = vpack.c.bf16 %v1943_v21, %v6228_v17 }
  0x35   :  { %5758 = vmatpush1.bf16.msk.msra.mxu1 %vm6063_vm3, %v5756_v52  ;;  %2477 = vmatprep.mubr.f32.mxu1 %v5949_v2  ;;  %1410 = vst [vmem:[#allocation9 + $0x2d8] sm:$0xff] %v1402_v27  ;;  %v1447_v6 = vsel %vm951_vm0, %v5561_v28, %v5985_v0  ;;  %v6457_v34 = vld [vmem:[%s8882_s3 + $0x118] sm:$0xff]  ;;  %v1432_v61 = vsel %vm951_vm0, %v5560_v33, %v5985_v0  ;;  %v5563_v37 = vld [vmem:[%s8882_s3 + $0x300] sm:$0xff]  ;;  %v6471_v38 = vld [vmem:[%s8882_s3 + $0x110] sm:$0xff] }
  0x36   :  { %5600 = vmatmul.mubr.msk.f32.gmra.mrb[6].mxu0 %vm1985_vm4, %v6242_v23  ;;  %5767 = vmatprep.subr.msk.bf16.mxu1 %vm6063_vm3, %v5765_v39  ;;  %1455 = vst [vmem:[#allocation9 + $0x2f0] sm:$0xff] %v1447_v6  ;;  %1440 = vst [vmem:[#allocation9 + $0x2e8] sm:$0xff] %v1432_v61  ;;  %v1477_v17 = vsel %vm951_vm0, %v5563_v37, %v5985_v0  ;;  %v5562_v42 = vld [vmem:[%s8882_s3 + $0x2f8] sm:$0xff]  ;;  %v6485_v43 = vld [vmem:[%s8882_s3 + $0x128] sm:$0xff] }
  0x37   :  { %2548 = vmatprep.mubr.f32.mxu0 %v5949_v2  ;;  %v1940_v44 = vld [vmem:[#allocation9 + $0x268] sm:$0x1]  ;;  %1485 = vst [vmem:[#allocation9 + $0x300] sm:$0xff] %v1477_v17  ;;  %v1462_v46 = vsel %vm951_vm0, %v5562_v42, %v5985_v0  ;;  %v5565_v48 = vld [vmem:[%s8882_s3 + $0x310] sm:$0xff]  ;;  %v6500_v32 = vld [vmem:[%s8882_s3 + $0x120] sm:$0xff] }
  0x38   :  { %5604 = vmatmul.mubr.msk.f32.gmra.mrb[6].mxu1 %vm1985_vm4, %v6242_v23  ;;  %v1945_v49 = vld [vmem:[#allocation9 + $0x290] sm:$0x1]  ;;  %1470 = vst [vmem:[#allocation9 + $0x2f8] sm:$0xff] %v1462_v46  ;;  %v1507_v51 = vsel %vm951_vm0, %v5565_v48, %v5985_v0  ;;  %v5564_v52 = vld [vmem:[%s8882_s3 + $0x308] sm:$0xff]  ;;  %v6514_v41 = vld [vmem:[%s8882_s3 + $0x138] sm:$0xff]  ;;  %v5774_v56 = vpack.c.bf16 %v1940_v44, %v6216_v12 }
  0x39   :  { %2625 = vmatprep.mubr.f32.mxu1 %v5949_v2  ;;  %v1942_v55 = vld [vmem:[#allocation9 + $0x278] sm:$0x1]  ;;  %1515 = vst [vmem:[#allocation9 + $0x310] sm:$0xff] %v1507_v51  ;;  %v1492_v39 = vsel %vm951_vm0, %v5564_v52, %v5985_v0  ;;  %v5567_v58 = vld [vmem:[%s8882_s3 + $0x320] sm:$0xff]  ;;  %v6529_v59 = vld [vmem:[%s8882_s3 + $0x130] sm:$0xff]  ;;  %v5783_v12 = vpack.c.bf16 %v1945_v49, %v6266_v30 }
  0x3a   :  { %5607 = vmatmul.mubr.msk.f32.vlgmr.msra.gmra.mrb[8].mxu0 %vm1985_vm4, %v6164_v53  ;;  %v1947_v62 = vld [vmem:[#allocation9 + $0x2a0] sm:$0x1]  ;;  %1500 = vst [vmem:[#allocation9 + $0x308] sm:$0xff] %v1492_v39  ;;  %v1537_v3 = vsel %vm951_vm0, %v5567_v58, %v5985_v0  ;;  %v5566_v5 = vld [vmem:[%s8882_s3 + $0x318] sm:$0xff]  ;;  %v6542_v7 = vld [vmem:[%s8882_s3 + $0x148] sm:$0xff]  ;;  %v5780_v14 = vpack.c.bf16 %v1942_v55, %v6251_v26 }
  0x3b   :  { %5764 = vmatpush1.bf16.msk.msra.mxu0 %vm6063_vm3, %v5762_v19  ;;  %2554 = vmatprep.mubr.f32.mxu0 %v5949_v2  ;;  %1545 = vst [vmem:[#allocation9 + $0x320] sm:$0xff] %v1537_v3  ;;  %v1522_v9 = vsel %vm951_vm0, %v5566_v5, %v5985_v0  ;;  %v5569_v10 = vld [vmem:[%s8882_s3 + $0x330] sm:$0xff]  ;;  %v6556_v11 = vld [vmem:[%s8882_s3 + $0x140] sm:$0xff]  ;;  %v5568_v15 = vld [vmem:[%s8882_s3 + $0x328] sm:$0xff]  ;;  %v5789_v19 = vpack.c.bf16 %v1947_v62, %v6295_v40 }
  0x3c   :  { %5611 = vmatmul.mubr.msk.f32.vlgmr.msra.gmra.mrb[8].mxu1 %vm1985_vm4, %v6164_v53  ;;  %5773 = vmatprep.subr.msk.bf16.mxu0 %vm6063_vm3, %v5771_v45  ;;  %1530 = vst [vmem:[#allocation9 + $0x318] sm:$0xff] %v1522_v9  ;;  %v1567_v30 = vsel %vm951_vm0, %v5569_v10, %v5985_v0  ;;  %v6569_v16 = vld [vmem:[%s8882_s3 + $0x158] sm:$0xff]  ;;  %v1552_v26 = vsel %vm951_vm0, %v5568_v15, %v5985_v0  ;;  %v5571_v21 = vld [vmem:[%s8882_s3 + $0x340] sm:$0xff]  ;;  %v6583_v22 = vld [vmem:[%s8882_s3 + $0x150] sm:$0xff]  ;;  %v939_v15 = vand.u32 127, %v938_v1 }
  0x3d   :  { %5770 = vmatpush1.bf16.msk.msra.mxu1 %vm6063_vm3, %v5768_v31  ;;  %2631 = vmatprep.mubr.f32.mxu1 %v5949_v2  ;;  %1575 = vst [vmem:[#allocation9 + $0x330] sm:$0xff] %v1567_v30  ;;  %1560 = vst [vmem:[#allocation9 + $0x328] sm:$0xff] %v1552_v26  ;;  %v1597_v40 = vsel %vm951_vm0, %v5571_v21, %v5985_v0  ;;  %v5570_v24 = vld [vmem:[%s8882_s3 + $0x338] sm:$0xff]  ;;  %v6597_v45 = vld [vmem:[%s8882_s3 + $0x168] sm:$0xff] }
  0x3e   :  { %5608 = vmatmul.mubr.msk.f32.gmra.mrb[10].mxu0 %vm1985_vm4, %v6242_v23  ;;  %5779 = vmatprep.subr.msk.bf16.mxu1 %vm6063_vm3, %v5777_v36  ;;  %v1944_v27 = vld [vmem:[#allocation9 + $0x288] sm:$0x1]  ;;  %1605 = vst [vmem:[#allocation9 + $0x340] sm:$0xff] %v1597_v40  ;;  %v1582_v28 = vsel %vm951_vm0, %v5570_v24, %v5985_v0  ;;  %v5573_v31 = vld [vmem:[%s8882_s3 + $0x350] sm:$0xff]  ;;  %v6612_v6 = vld [vmem:[%s8882_s3 + $0x160] sm:$0xff] }
  0x3f   :  { %2702 = vmatprep.mubr.f32.mxu0 %v5949_v2  ;;  %v1949_v33 = vld [vmem:[#allocation9 + $0x2b0] sm:$0x1]  ;;  %1590 = vst [vmem:[#allocation9 + $0x338] sm:$0xff] %v1582_v28  ;;  %v1627_v36 = vsel %vm951_vm0, %v5573_v31, %v5985_v0  ;;  %v5572_v61 = vld [vmem:[%s8882_s3 + $0x348] sm:$0xff]  ;;  %v6626_v37 = vld [vmem:[%s8882_s3 + $0x178] sm:$0xff]  ;;  %v5786_v48 = vpack.c.bf16 %v1944_v27, %v6280_v35 }
  0x40   :  { %5612 = vmatmul.mubr.msk.f32.gmra.mrb[10].mxu1 %vm1985_vm4, %v6242_v23  ;;  %v1946_v17 = vld [vmem:[#allocation9 + $0x298] sm:$0x1]  ;;  %1635 = vst [vmem:[#allocation9 + $0x350] sm:$0xff] %v1627_v36  ;;  %v1612_v42 = vsel %vm951_vm0, %v5572_v61, %v5985_v0  ;;  %v5575_v44 = vld [vmem:[%s8882_s3 + $0x360] sm:$0xff]  ;;  %v6641_v46 = vld [vmem:[%s8882_s3 + $0x170] sm:$0xff]  ;;  %v5795_v35 = vpack.c.bf16 %v1949_v33, %v6324_v50 }
  0x41   :  { %2779 = vmatprep.mubr.f32.mxu1 %v5949_v2  ;;  %v1951_v49 = vld [vmem:[#allocation9 + $0x2c0] sm:$0x1]  ;;  %1620 = vst [vmem:[#allocation9 + $0x348] sm:$0xff] %v1612_v42  ;;  %v1657_v51 = vsel %vm951_vm0, %v5575_v44, %v5985_v0  ;;  %v5574_v52 = vld [vmem:[%s8882_s3 + $0x358] sm:$0xff]  ;;  %v6654_v55 = vld [vmem:[%s8882_s3 + $0x188] sm:$0xff]  ;;  %v5792_v62 = vpack.c.bf16 %v1946_v17, %v6310_v47 }
  0x42   :  { %5615 = vmatmul.mubr.msk.f32.vlgmr.msra.gmra.mrb[12].mxu0 %vm1985_vm4, %v6164_v53  ;;  %1665 = vst [vmem:[#allocation9 + $0x360] sm:$0xff] %v1657_v51  ;;  %v1642_v39 = vsel %vm951_vm0, %v5574_v52, %v5985_v0  ;;  %v5577_v58 = vld [vmem:[%s8882_s3 + $0x370] sm:$0xff]  ;;  %v5576_v3 = vld [vmem:[%s8882_s3 + $0x368] sm:$0xff]  ;;  %v6681_v5 = vld [vmem:[%s8882_s3 + $0x198] sm:$0xff]  ;;  %v940_v51 = vadd.s32 7680, %v939_v15 }
  0x43   :  { %5776 = vmatpush1.bf16.msk.msra.mxu0 %vm6063_vm3, %v5774_v56  ;;  %2708 = vmatprep.mubr.f32.mxu0 %v5949_v2  ;;  %v6668_v56 = vld [vmem:[%s8882_s3 + $0x180] sm:$0xff]  ;;  %1650 = vst [vmem:[#allocation9 + $0x358] sm:$0xff] %v1642_v39  ;;  %v1687_v50 = vsel %vm951_vm0, %v5577_v58, %v5985_v0  ;;  %v1672_v47 = vsel %vm951_vm0, %v5576_v3, %v5985_v0  ;;  %v6695_v10 = vld [vmem:[%s8882_s3 + $0x190] sm:$0xff]  ;;  %v6709_v30 = vld [vmem:[%s8882_s3 + $0x1a8] sm:$0xff] }
  0x44   :  { %5619 = vmatmul.mubr.msk.f32.vlgmr.msra.gmra.mrb[12].mxu1 %vm1985_vm4, %v6164_v53  ;;  %5785 = vmatprep.subr.msk.bf16.mxu0 %vm6063_vm3, %v5783_v12  ;;  %v5801_v12 = vpack.c.bf16 %v1951_v49, %v6345_v57  ;;  %1695 = vst [vmem:[#allocation9 + $0x370] sm:$0xff] %v1687_v50  ;;  %v5579_v9 = vld [vmem:[%s8882_s3 + $0x380] sm:$0xff]  ;;  %1680 = vst [vmem:[#allocation9 + $0x368] sm:$0xff] %v1672_v47  ;;  %v5581_v21 = vld [vmem:[%s8882_s3 + $0x390] sm:$0xff]  ;;  %vm941_vm5 = vcmp.lt.s32.totalorder %v940_v51, 7688 }
  0x45   :  { %5782 = vmatpush1.bf16.msk.msra.mxu1 %vm6063_vm3, %v5780_v14  ;;  %2785 = vmatprep.mubr.f32.mxu1 %v5949_v2  ;;  %v1717_v57 = vsel %vm951_vm0, %v5579_v9, %v5985_v0  ;;  %v5578_v14 = vld [vmem:[%s8882_s3 + $0x378] sm:$0xff]  ;;  %v6725_v1 = vld [vmem:[%s8882_s3 + $0x1a0] sm:$0xff]  ;;  %v1747_v24 = vsel %vm951_vm0, %v5581_v21, %v5985_v0  ;;  %v5580_v27 = vld [vmem:[%s8882_s3 + $0x388] sm:$0xff] }
  0x46   :  { %5616 = vmatmul.mubr.msk.f32.gmra.mrb[14].mxu0 %vm1985_vm4, %v6242_v23  ;;  %5791 = vmatprep.subr.msk.bf16.mxu1 %vm6063_vm3, %v5789_v19  ;;  %v1948_v19 = vld [vmem:[#allocation9 + $0x2a8] sm:$0x1]  ;;  %1725 = vst [vmem:[#allocation9 + $0x380] sm:$0xff] %v1717_v57  ;;  %v1702_v26 = vsel %vm951_vm0, %v5578_v14, %v5985_v0  ;;  %v1953_v40 = vld [vmem:[#allocation9 + $0x2d0] sm:$0x1]  ;;  %1755 = vst [vmem:[#allocation9 + $0x390] sm:$0xff] %v1747_v24  ;;  %v1732_v33 = vsel %vm951_vm0, %v5580_v27, %v5985_v0 }
  0x47   :  { %2856 = vmatprep.mubr.f32.mxu0 %v5949_v2  ;;  %1710 = vst [vmem:[#allocation9 + $0x378] sm:$0xff] %v1702_v26  ;;  %v6739_v28 = vld [vmem:[%s8882_s3 + $0x1b8] sm:$0xff]  ;;  %v1950_v31 = vld [vmem:[#allocation9 + $0x2b8] sm:$0x1]  ;;  %v5583_v36 = vld [vmem:[%s8882_s3 + $0x3a0] sm:$0xff]  ;;  %v5798_v17 = vpack.c.bf16 %v1948_v19, %v6337_v54  ;;  %v5807_v54 = vpack.c.bf16 %v1953_v40, %v6373_v63 }
  0x48   :  { %5620 = vmatmul.mubr.msk.f32.gmra.mrb[14].mxu1 %vm1985_vm4, %v6242_v23  ;;  %v6754_v61 = vld [vmem:[%s8882_s3 + $0x1b0] sm:$0xff]  ;;  %1740 = vst [vmem:[#allocation9 + $0x388] sm:$0xff] %v1732_v33  ;;  %v1777_v44 = vsel %vm951_vm0, %v5583_v36, %v5985_v0  ;;  %v6767_v49 = vld [vmem:[%s8882_s3 + $0x1c8] sm:$0xff]  ;;  %v6781_v39 = vld [vmem:[%s8882_s3 + $0x1c0] sm:$0xff]  ;;  %v5804_v58 = vpack.c.bf16 %v1950_v31, %v6359_v60 }
  0x49   :  { %2933 = vmatprep.mubr.f32.mxu1 %v5949_v2  ;;  %v1955_v42 = vld [vmem:[#allocation9 + $0x2e0] sm:$0x1]  ;;  %1785 = vst [vmem:[#allocation9 + $0x3a0] sm:$0xff] %v1777_v44  ;;  %v6794_v50 = vld [vmem:[%s8882_s3 + $0x1d8] sm:$0xff]  ;;  %v5527_v57 = vld [vmem:[%s8882_s3 + $0x1e0] sm:$0xff] }
  0x4a   :  { %5623 = vmatmul.mubr.msk.f32.vlgmr.msra.gmra.mrb[16].mxu0 %vm1985_vm4, %v6164_v53  ;;  %v5813_v3 = vpack.c.bf16 %v1955_v42, %v6402_v13  ;;  %v6808_v47 = vld [vmem:[%s8882_s3 + $0x1d0] sm:$0xff]  ;;  %v5586_v9 = vld [vmem:[%s8882_s3 + $0x3b8] sm:$0xff]  ;;  %v6831_v19 = vsel %vm941_vm5, %v5527_v57, %v5985_v0  ;;  %v5588_v26 = vld [vmem:[%s8882_s3 + $0x3c8] sm:$0xff] }
  0x4b   :  { %5788 = vmatpush1.bf16.msk.msra.mxu0 %vm6063_vm3, %v5786_v48  ;;  %2862 = vmatprep.mubr.f32.mxu0 %v5949_v2  ;;  %v5582_v48 = vld [vmem:[%s8882_s3 + $0x398] sm:$0xff]  ;;  %v1822_v15 = vsel %vm951_vm0, %v5586_v9, %v5985_v0  ;;  %v1957_v21 = vld [vmem:[#allocation9 + $0x2f0] sm:$0x1]  ;;  %v1852_v40 = vsel %vm951_vm0, %v5588_v26, %v5985_v0  ;;  %v1954_v24 = vld [vmem:[#allocation9 + $0x2d8] sm:$0x1] }
  0x4c   :  { %5627 = vmatmul.mubr.msk.f32.vlgmr.msra.gmra.mrb[16].mxu1 %vm1985_vm4, %v6164_v53  ;;  %5797 = vmatprep.subr.msk.bf16.mxu0 %vm6063_vm3, %v5795_v35  ;;  %v1762_v52 = vsel %vm951_vm0, %v5582_v48, %v5985_v0  ;;  %v5585_v35 = vld [vmem:[%s8882_s3 + $0x3b0] sm:$0xff]  ;;  %v1952_v14 = vld [vmem:[#allocation9 + $0x2c8] sm:$0x1]  ;;  %1830 = vst [vmem:[#allocation9 + $0x3b8] sm:$0xff] %v1822_v15  ;;  %v1857_v27 = vsel %vm941_vm5, %v1852_v40, %v5985_v0 }
  0x4d   :  { %5794 = vmatpush1.bf16.msk.msra.mxu1 %vm6063_vm3, %v5792_v62  ;;  %2939 = vmatprep.mubr.f32.mxu1 %v5949_v2  ;;  %1770 = vst [vmem:[#allocation9 + $0x398] sm:$0xff] %v1762_v52  ;;  %v1807_v63 = vsel %vm951_vm0, %v5585_v35, %v5985_v0  ;;  %v5584_v62 = vld [vmem:[%s8882_s3 + $0x3a8] sm:$0xff]  ;;  %v5810_v31 = vpack.c.bf16 %v1952_v14, %v6388_v8  ;;  %v1959_v33 = vld [vmem:[#allocation9 + $0x300] sm:$0x1]  ;;  %1860 = vst [vmem:[#allocation9 + $0x3c8] sm:$0xff] %v1857_v27 }
  0x4e   :  { %5624 = vmatmul.mubr.msk.f32.gmra.mrb[18].mxu0 %vm1985_vm4, %v6242_v23  ;;  %5803 = vmatprep.subr.msk.bf16.mxu1 %vm6063_vm3, %v5801_v12  ;;  %1815 = vst [vmem:[#allocation9 + $0x3b0] sm:$0xff] %v1807_v63  ;;  %v1792_v60 = vsel %vm951_vm0, %v5584_v62, %v5985_v0  ;;  %v5587_v12 = vld [vmem:[%s8882_s3 + $0x3c0] sm:$0xff]  ;;  %v5819_v4 = vpack.c.bf16 %v1957_v21, %v6430_v25  ;;  %v1956_v8 = vld [vmem:[#allocation9 + $0x2e8] sm:$0x1]  ;;  %v1958_v25 = vld [vmem:[#allocation9 + $0x2f8] sm:$0x1] }
  0x4f   :  { %3010 = vmatprep.mubr.f32.mxu0 %v5949_v2  ;;  %1800 = vst [vmem:[#allocation9 + $0x3a8] sm:$0xff] %v1792_v60  ;;  %v1837_v13 = vsel %vm951_vm0, %v5587_v12, %v5985_v0  ;;  %v5816_v36 = vpack.c.bf16 %v1954_v24, %v6417_v18  ;;  %v5825_v0 = vpack.c.bf16 %v1959_v33, %v6457_v34  ;;  %v1961_v18 = vld [vmem:[#allocation9 + $0x310] sm:$0x1]  ;;  %v1967_v51 = vld [vmem:[#allocation9 + $0x340] sm:$0x1] }
  0x50   :  { %5628 = vmatmul.mubr.msk.f32.gmra.mrb[18].mxu1 %vm1985_vm4, %v6242_v23  ;;  %1845 = vst [vmem:[#allocation9 + $0x3c0] sm:$0xff] %v1837_v13  ;;  %v5822_v34 = vpack.c.bf16 %v1956_v8, %v6444_v29  ;;  %v5831_v42 = vpack.c.bf16 %v1961_v18, %v6485_v43  ;;  %v5828_v44 = vpack.c.bf16 %v1958_v25, %v6471_v38  ;;  %v1960_v29 = vld [vmem:[#allocation9 + $0x308] sm:$0x1]  ;;  %v1965_v38 = vld [vmem:[#allocation9 + $0x330] sm:$0x1] }
  0x51   :  { %3087 = vmatprep.mubr.f32.mxu1 %v5949_v2  ;;  %v1962_v43 = vld [vmem:[#allocation9 + $0x318] sm:$0x1]  ;;  %v5849_v35 = vpack.c.bf16 %v1967_v51, %v6569_v16  ;;  %v1975_v60 = vld [vmem:[#allocation9 + $0x380] sm:$0x1]  ;;  %v5921_v33 = vld [vmem:[#allocation7] sm:$0xff] }
  0x52   :  { %5631 = vmatmul.mubr.msk.f32.vlgmr.msra.gmra.mrb[20].mxu0 %vm1985_vm4, %v6164_v53  ;;  %v5840_v52 = vpack.c.bf16 %v1962_v43, %v6529_v59  ;;  %v1969_v59 = vld [vmem:[#allocation9 + $0x350] sm:$0x1]  ;;  %v5873_v9 = vpack.c.bf16 %v1975_v60, %v6681_v5  ;;  %v1979_v57 = vld [vmem:[#allocation9 + $0x3a0] sm:$0x1] }
  0x53   :  { %5800 = vmatpush1.bf16.msk.msra.mxu0 %vm6063_vm3, %v5798_v17  ;;  %3016 = vmatprep.mubr.f32.mxu0 %v5949_v2  ;;  %v1963_v17 = vld [vmem:[#allocation9 + $0x320] sm:$0x1]  ;;  %v5855_v63 = vpack.c.bf16 %v1969_v59, %v6597_v45  ;;  %v1970_v45 = vld [vmem:[#allocation9 + $0x358] sm:$0x1]  ;;  %v5885_v26 = vpack.c.bf16 %v1979_v57, %v6739_v28 }
  0x54   :  { %5635 = vmatmul.mubr.msk.f32.vlgmr.msra.gmra.mrb[20].mxu1 %vm1985_vm4, %v6164_v53  ;;  %5809 = vmatprep.subr.msk.bf16.mxu0 %vm6063_vm3, %v5807_v54  ;;  %v5837_v48 = vpack.c.bf16 %v1963_v17, %v6514_v41  ;;  %v5834_v41 = vpack.c.bf16 %v1960_v29, %v6500_v32  ;;  %v5843_v54 = vpack.c.bf16 %v1965_v38, %v6542_v7  ;;  %v1964_v32 = vld [vmem:[#allocation9 + $0x328] sm:$0x1]  ;;  %v1966_v7 = vld [vmem:[#allocation9 + $0x338] sm:$0x1] }
  0x55   :  { %5806 = vmatpush1.bf16.msk.msra.mxu1 %vm6063_vm3, %v5804_v58  ;;  %3093 = vmatprep.mubr.f32.mxu1 %v5949_v2  ;;  %v5846_v16 = vpack.c.bf16 %v1964_v32, %v6556_v11  ;;  %v1971_v58 = vld [vmem:[#allocation9 + $0x360] sm:$0x1]  ;;  %v5852_v62 = vpack.c.bf16 %v1966_v7, %v6583_v22  ;;  %v1968_v11 = vld [vmem:[#allocation9 + $0x348] sm:$0x1]  ;;  %v1973_v22 = vld [vmem:[#allocation9 + $0x370] sm:$0x1]  ;;  %v5864_v13 = vpack.c.bf16 %v1970_v45, %v6641_v46 }
  0x56   :  { %5632 = vmatmul.mubr.msk.f32.gmra.mrb[22].mxu0 %vm1985_vm4, %v6242_v23  ;;  %5815 = vmatprep.subr.msk.bf16.mxu1 %vm6063_vm3, %v5813_v3  ;;  %v5861_v3 = vpack.c.bf16 %v1971_v58, %v6626_v37  ;;  %v5858_v37 = vpack.c.bf16 %v1968_v11, %v6612_v6  ;;  %v5867_v12 = vpack.c.bf16 %v1973_v22, %v6654_v55  ;;  %v1972_v6 = vld [vmem:[#allocation9 + $0x368] sm:$0x1]  ;;  %v1977_v46 = vld [vmem:[#allocation9 + $0x390] sm:$0x1]  ;;  %v1974_v55 = vld [vmem:[#allocation9 + $0x378] sm:$0x1] }
  0x57   :  { %3164 = vmatprep.mubr.f32.mxu0 %v5949_v2  ;;  %v5870_v5 = vpack.c.bf16 %v1972_v6, %v6668_v56  ;;  %v5879_v14 = vpack.c.bf16 %v1977_v46, %v6709_v30  ;;  %v5876_v15 = vpack.c.bf16 %v1974_v55, %v6695_v10  ;;  %v1976_v56 = vld [vmem:[#allocation9 + $0x388] sm:$0x1]  ;;  %v1981_v10 = vld [vmem:[#allocation9 + $0x3b0] sm:$0x1]  ;;  %v1978_v30 = vld [vmem:[#allocation9 + $0x398] sm:$0x1] }
  0x58   :  { %5636 = vmatmul.mubr.msk.f32.gmra.mrb[22].mxu1 %vm1985_vm4, %v6242_v23  ;;  %v5882_v28 = vpack.c.bf16 %v1976_v56, %v6725_v1  ;;  %v1983_v21 = vld [vmem:[#allocation9 + $0x3c0] sm:$0x1]  ;;  %v5891_v40 = vpack.c.bf16 %v1981_v10, %v6767_v49  ;;  %v5888_v24 = vpack.c.bf16 %v1978_v30, %v6754_v61  ;;  %v1980_v1 = vld [vmem:[#allocation9 + $0x3a8] sm:$0x1]  ;;  %v1982_v49 = vld [vmem:[#allocation9 + $0x3b8] sm:$0x1] }
  0x59   :  { %3241 = vmatprep.mubr.f32.mxu1 %v5949_v2  ;;  %v5897_v27 = vpack.c.bf16 %v1983_v21, %v6794_v50  ;;  %v1984_v61 = vld [vmem:[#allocation9 + $0x3c8] sm:$0x1] }
  0x5a   :  { %5639 = vmatmul.mubr.msk.f32.vlgmr.msra.gmra.mrb[24].mxu0 %vm1985_vm4, %v6164_v53  ;;  %v5903_v50 = vpack.c.bf16 %v1984_v61, %v6831_v19 }
  0x5b   :  { %5812 = vmatpush1.bf16.msk.msra.mxu0 %vm6063_vm3, %v5810_v31  ;;  %3170 = vmatprep.mubr.f32.mxu0 %v5949_v2  ;;  %v5900_v31 = vpack.c.bf16 %v1982_v49, %v6808_v47 }
  0x5c   :  { %5643 = vmatmul.mubr.msk.f32.vlgmr.msra.gmra.mrb[24].mxu1 %vm1985_vm4, %v6164_v53  ;;  %5821 = vmatprep.subr.msk.bf16.mxu0 %vm6063_vm3, %v5819_v4 }
  0x5d   :  { %5818 = vmatpush1.bf16.msk.msra.mxu1 %vm6063_vm3, %v5816_v36  ;;  %3247 = vmatprep.mubr.f32.mxu1 %v5949_v2 }
  0x5e   :  { %5640 = vmatmul.mubr.msk.f32.gmra.mrb[26].mxu0 %vm1985_vm4, %v6242_v23  ;;  %5827 = vmatprep.subr.msk.bf16.mxu1 %vm6063_vm3, %v5825_v0 }
  0x5f   :  { %3318 = vmatprep.mubr.f32.mxu0 %v5949_v2 }
  0x60   :  { %5644 = vmatmul.mubr.msk.f32.gmra.mrb[26].mxu1 %vm1985_vm4, %v6242_v23 }
  0x61   :  { %3395 = vmatprep.mubr.f32.mxu1 %v5949_v2 }
  0x62   :  { %5647 = vmatmul.mubr.msk.f32.vlgmr.msra.gmra.mrb[28].mxu0 %vm1985_vm4, %v6164_v53 }
  0x63   :  { %5824 = vmatpush1.bf16.msk.msra.mxu0 %vm6063_vm3, %v5822_v34  ;;  %3324 = vmatprep.mubr.f32.mxu0 %v5949_v2 }
  0x64   :  { %5651 = vmatmul.mubr.msk.f32.vlgmr.msra.gmra.mrb[28].mxu1 %vm1985_vm4, %v6164_v53  ;;  %5833 = vmatprep.subr.msk.bf16.mxu0 %vm6063_vm3, %v5831_v42 }
  0x65   :  { %5830 = vmatpush1.bf16.msk.msra.mxu1 %vm6063_vm3, %v5828_v44  ;;  %3401 = vmatprep.mubr.f32.mxu1 %v5949_v2 }
  0x66   :  { %5648 = vmatmul.mubr.msk.f32.gmra.mrb[30].mxu0 %vm1985_vm4, %v6242_v23  ;;  %5839 = vmatprep.subr.msk.bf16.mxu1 %vm6063_vm3, %v5837_v48 }
  0x67   :  { %3472 = vmatprep.mubr.f32.mxu0 %v5949_v2 }
  0x68   :  { %5652 = vmatmul.mubr.msk.f32.gmra.mrb[30].mxu1 %vm1985_vm4, %v6242_v23 }
  0x69   :  { %3549 = vmatprep.mubr.f32.mxu1 %v5949_v2 }
  0x6a   :  { %5655 = vmatmul.mubr.msk.f32.vlgmr.msra.gmra.mrb[32].mxu0 %vm1985_vm4, %v6164_v53 }
  0x6b   :  { %5836 = vmatpush1.bf16.msk.msra.mxu0 %vm6063_vm3, %v5834_v41  ;;  %3478 = vmatprep.mubr.f32.mxu0 %v5949_v2 }
  0x6c   :  { %5659 = vmatmul.mubr.msk.f32.vlgmr.msra.gmra.mrb[32].mxu1 %vm1985_vm4, %v6164_v53  ;;  %5845 = vmatprep.subr.msk.bf16.mxu0 %vm6063_vm3, %v5843_v54 }
  0x6d   :  { %5842 = vmatpush1.bf16.msk.msra.mxu1 %vm6063_vm3, %v5840_v52  ;;  %3555 = vmatprep.mubr.f32.mxu1 %v5949_v2 }
  0x6e   :  { %5656 = vmatmul.mubr.msk.f32.gmra.mrb[34].mxu0 %vm1985_vm4, %v6242_v23  ;;  %5851 = vmatprep.subr.msk.bf16.mxu1 %vm6063_vm3, %v5849_v35 }
  0x6f   :  { %3626 = vmatprep.mubr.f32.mxu0 %v5949_v2 }
  0x70   :  { %5660 = vmatmul.mubr.msk.f32.gmra.mrb[34].mxu1 %vm1985_vm4, %v6242_v23 }
  0x71   :  { %3703 = vmatprep.mubr.f32.mxu1 %v5949_v2 }
  0x72   :  { %5663 = vmatmul.mubr.msk.f32.vlgmr.msra.gmra.mrb[36].mxu0 %vm1985_vm4, %v6164_v53 }
  0x73   :  { %5848 = vmatpush1.bf16.msk.msra.mxu0 %vm6063_vm3, %v5846_v16  ;;  %3632 = vmatprep.mubr.f32.mxu0 %v5949_v2 }
  0x74   :  { %5667 = vmatmul.mubr.msk.f32.vlgmr.msra.gmra.mrb[36].mxu1 %vm1985_vm4, %v6164_v53  ;;  %5857 = vmatprep.subr.msk.bf16.mxu0 %vm6063_vm3, %v5855_v63 }
  0x75   :  { %5854 = vmatpush1.bf16.msk.msra.mxu1 %vm6063_vm3, %v5852_v62  ;;  %3709 = vmatprep.mubr.f32.mxu1 %v5949_v2 }
  0x76   :  { %5664 = vmatmul.mubr.msk.f32.gmra.mrb[38].mxu0 %vm1985_vm4, %v6242_v23  ;;  %5863 = vmatprep.subr.msk.bf16.mxu1 %vm6063_vm3, %v5861_v3 }
  0x77   :  { %3780 = vmatprep.mubr.f32.mxu0 %v5949_v2 }
  0x78   :  { %5668 = vmatmul.mubr.msk.f32.gmra.mrb[38].mxu1 %vm1985_vm4, %v6242_v23 }
  0x79   :  { %3857 = vmatprep.mubr.f32.mxu1 %v5949_v2 }
  0x7a   :  { %5671 = vmatmul.mubr.msk.f32.vlgmr.msra.gmra.mrb[40].mxu0 %vm1985_vm4, %v6164_v53 }
  0x7b   :  { %5860 = vmatpush1.bf16.msk.msra.mxu0 %vm6063_vm3, %v5858_v37  ;;  %3786 = vmatprep.mubr.f32.mxu0 %v5949_v2 }
  0x7c   :  { %5675 = vmatmul.mubr.msk.f32.vlgmr.msra.gmra.mrb[40].mxu1 %vm1985_vm4, %v6164_v53  ;;  %5869 = vmatprep.subr.msk.bf16.mxu0 %vm6063_vm3, %v5867_v12 }
  0x7d   :  { %5866 = vmatpush1.bf16.msk.msra.mxu1 %vm6063_vm3, %v5864_v13  ;;  %3863 = vmatprep.mubr.f32.mxu1 %v5949_v2 }
  0x7e   :  { %5672 = vmatmul.mubr.msk.f32.gmra.mrb[42].mxu0 %vm1985_vm4, %v6242_v23  ;;  %5875 = vmatprep.subr.msk.bf16.mxu1 %vm6063_vm3, %v5873_v9 }
  0x7f   :  { %3934 = vmatprep.mubr.f32.mxu0 %v5949_v2 }
  0x80   :  { %5676 = vmatmul.mubr.msk.f32.gmra.mrb[42].mxu1 %vm1985_vm4, %v6242_v23 }
  0x81   :  { %4011 = vmatprep.mubr.f32.mxu1 %v5949_v2 }
  0x82   :  { %5679 = vmatmul.mubr.msk.f32.vlgmr.msra.gmra.mrb[44].mxu0 %vm1985_vm4, %v6164_v53 }
  0x83   :  { %5872 = vmatpush1.bf16.msk.msra.mxu0 %vm6063_vm3, %v5870_v5  ;;  %3940 = vmatprep.mubr.f32.mxu0 %v5949_v2 }
  0x84   :  { %5683 = vmatmul.mubr.msk.f32.vlgmr.msra.gmra.mrb[44].mxu1 %vm1985_vm4, %v6164_v53  ;;  %5881 = vmatprep.subr.msk.bf16.mxu0 %vm6063_vm3, %v5879_v14 }
  0x85   :  { %5878 = vmatpush1.bf16.msk.msra.mxu1 %vm6063_vm3, %v5876_v15  ;;  %4017 = vmatprep.mubr.f32.mxu1 %v5949_v2 }
  0x86   :  { %5680 = vmatmul.mubr.msk.f32.gmra.mrb[46].mxu0 %vm1985_vm4, %v6242_v23  ;;  %5887 = vmatprep.subr.msk.bf16.mxu1 %vm6063_vm3, %v5885_v26 }
  0x87   :  { %4088 = vmatprep.mubr.f32.mxu0 %v5949_v2 }
  0x88   :  { %5684 = vmatmul.mubr.msk.f32.gmra.mrb[46].mxu1 %vm1985_vm4, %v6242_v23 }
  0x89   :  { %4165 = vmatprep.mubr.f32.mxu1 %v5949_v2 }
  0x8a   :  { %5687 = vmatmul.mubr.msk.f32.vlgmr.msra.gmra.mrb[48].mxu0 %vm1985_vm4, %v6164_v53 }
  0x8b   :  { %5884 = vmatpush1.bf16.msk.msra.mxu0 %vm6063_vm3, %v5882_v28  ;;  %4094 = vmatprep.mubr.f32.mxu0 %v5949_v2 }
  0x8c   :  { %5691 = vmatmul.mubr.msk.f32.vlgmr.msra.gmra.mrb[48].mxu1 %vm1985_vm4, %v6164_v53  ;;  %5893 = vmatprep.subr.msk.bf16.mxu0 %vm6063_vm3, %v5891_v40  ;;  %v5894_v53 = vpack.c.bf16 %v1980_v1, %v6781_v39 }
  0x8d   :  { %5890 = vmatpush1.bf16.msk.msra.mxu1 %vm6063_vm3, %v5888_v24  ;;  %4171 = vmatprep.mubr.f32.mxu1 %v5949_v2 }
  0x8e   :  { %5688 = vmatmul.mubr.msk.f32.gmra.mrb[50].mxu0 %vm1985_vm4, %v6242_v23  ;;  %5899 = vmatprep.subr.msk.bf16.mxu1 %vm6063_vm3, %v5897_v27 }
  0x8f   :  { %4242 = vmatprep.mubr.f32.mxu0 %v5949_v2 }
  0x90   :  { %5692 = vmatmul.mubr.msk.f32.gmra.mrb[50].mxu1 %vm1985_vm4, %v6242_v23 }
  0x91   :  { %4319 = vmatprep.mubr.f32.mxu1 %v5949_v2 }
  0x92   :  { %5695 = vmatmul.mubr.msk.f32.vlgmr.msra.gmra.mrb[52].mxu0 %vm1985_vm4, %v5921_v33 }
  0x93   :  { %5896 = vmatpush1.bf16.msk.msra.mxu0 %vm6063_vm3, %v5894_v53  ;;  %4248 = vmatprep.mubr.f32.mxu0 %v5949_v2 }
  0x94   :  { %5699 = vmatmul.mubr.msk.f32.vlgmr.msra.gmra.mrb[52].mxu1 %vm1985_vm4, %v5921_v33  ;;  %5905 = vmatprep.subr.msk.bf16.mxu0 %vm6063_vm3, %v5903_v50 }
  0x95   :  { %5902 = vmatpush1.bf16.msk.msra.mxu1 %vm6063_vm3, %v5900_v31  ;;  %4325 = vmatprep.mubr.f32.mxu1 %v5949_v2 }
  0x96   :  { %5696 = vmatmul.mubr.msk.f32.gmra.mrb[54].mxu0 %vm1985_vm4, %v6242_v23 }
  0x97   :  { %4396 = vmatprep.mubr.f32.mxu0 %v5949_v2 }
  0x98   :  { %5700 = vmatmul.mubr.msk.f32.gmra.mrb[54].mxu1 %vm1985_vm4, %v6242_v23 }
  0x99   :  { %4473 = vmatprep.mubr.f32.mxu1 %v5949_v2 }
  0x9a   :  { %5703 = vmatmul.mubr.msk.f32.vlgmr.msra.gmra.mrb[56].mxu0 %vm1985_vm4, %v5921_v33 }
  0x9b   :  { %5908 = vmatpush3.bf16.msk.msra.mxu0 %vm6063_vm3, %v5903_v50  ;;  %4402 = vmatprep.mubr.f32.mxu0 %v5949_v2 }
  0x9c   :  { %5707 = vmatmul.mubr.msk.f32.vlgmr.msra.gmra.mrb[56].mxu1 %vm1985_vm4, %v5921_v33 }
  0x9d   :  { %4479 = vmatprep.mubr.f32.mxu1 %v5949_v2 }
  0x9e   :  { %5704 = vmatmul.mubr.msk.f32.gmra.mrb[58].mxu0 %vm1985_vm4, %v6242_v23 }
  0x9f   :  { %5720 = vmatprep.mubr.msk.f32.mxu0 %vm1985_vm4, %v5921_v33 }
  0xa0   :  { %5708 = vmatmul.mubr.msk.f32.gmra.mrb[58].mxu1 %vm1985_vm4, %v6242_v23 }
  0xa2   :  { %5721 = vmatmul.mubr.msk.f32.vlgmr.msra.gmra.mrb[60].mxu0 %vm1985_vm4, %v6242_v23 }
  0xfd   :  { %v7052_v39 = vpop.f32.mrb[0].mxu0 }
  0xfe   :  { %v4685_v20 = vmul.f32 %v7052_v39, %v7052_v39  ;;  %v7056_v47 = vpop.f32.mrb[1].mxu0 }
  0xff   :  { %v4561_v2 = vadd.f32 %v7056_v47, %v7052_v39  ;;  %v4686_v19 = vmul.f32 %v7056_v47, %v7056_v47  ;;  %v7062_v4 = vpop.f32.mrb[0].mxu1 }
 0x100   :  { %v4687_v36 = vmul.f32 %v7062_v4, %v7062_v4  ;;  %v7066_v0 = vpop.f32.mrb[1].mxu1 }
 0x101   :  { %v4807_v23 = vadd.f32 %v4686_v19, %v4685_v20  ;;  %v4562_v8 = vadd.f32 %v4561_v2, %v7062_v4  ;;  %v7069_v18 = vpop.f32.mrb[2].mxu0  ;;  %v4688_v25 = vmul.f32 %v7066_v0, %v7066_v0 }
 0x102   :  { %8968 = vst [vmem:[#allocation11_spill] sm:$0xff] %v7069_v18  ;;  %v4746_v34 = vmul.f32 %v7069_v18, %v7069_v18  ;;  %v7075_v17 = vpop.f32.mrb[3].mxu0 }
 0x103   :  { %8969 = vst [vmem:[#allocation12_spill] sm:$0xff] %v7075_v17  ;;  %v4808_v42 = vadd.f32 %v4807_v23, %v4687_v36  ;;  %v4623_v44 = vadd.f32 %v7075_v17, %v7069_v18  ;;  %v4747_v48 = vmul.f32 %v7075_v17, %v7075_v17  ;;  %v4563_v29 = vadd.f32 %v4562_v8, %v7066_v0  ;;  %v7082_v38 = vpop.f32.mrb[2].mxu1 }
 0x104   :  { %8970 = vst [vmem:[#allocation13_spill] sm:$0xff] %v7082_v38  ;;  %v4748_v43 = vmul.f32 %v7082_v38, %v7082_v38  ;;  %v7086_v41 = vpop.f32.mrb[3].mxu1 }
 0x105   :  { %8971 = vst [vmem:[#allocation14_spill] sm:$0xff] %v7086_v41  ;;  %v4869_v51 = vadd.f32 %v4747_v48, %v4746_v34  ;;  %v4809_v54 = vadd.f32 %v4808_v42, %v4688_v25  ;;  %v4624_v52 = vadd.f32 %v4623_v44, %v7082_v38  ;;  %v7089_v35 = vpop.f32.mrb[4].mxu0  ;;  %v4749_v32 = vmul.f32 %v7086_v41, %v7086_v41 }
 0x106   :  { %v4564_v59 = vadd.f32 %v4563_v29, %v7089_v35  ;;  %v4689_v7 = vmul.f32 %v7089_v35, %v7089_v35  ;;  %v7096_v16 = vpop.f32.mrb[5].mxu0 }
 0x107   :  { %v4870_v58 = vadd.f32 %v4869_v51, %v4748_v43  ;;  %v4625_v63 = vadd.f32 %v4624_v52, %v7086_v41  ;;  %v4690_v62 = vmul.f32 %v7096_v16, %v7096_v16  ;;  %v7101_v3 = vpop.f32.mrb[4].mxu1 }
 0x108   :  { %v4810_v11 = vadd.f32 %v4809_v54, %v4689_v7  ;;  %v4565_v22 = vadd.f32 %v4564_v59, %v7096_v16  ;;  %v4691_v45 = vmul.f32 %v7101_v3, %v7101_v3  ;;  %v7106_v37 = vpop.f32.mrb[5].mxu1 }
 0x109   :  { %v4871_v60 = vadd.f32 %v4870_v58, %v4749_v32  ;;  %v7108_v12 = vpop.f32.mrb[6].mxu0  ;;  %v4692_v13 = vmul.f32 %v7106_v37, %v7106_v37 }
 0x10a   :  { %8972 = vst [vmem:[#allocation15_spill] sm:$0xff] %v7108_v12  ;;  %v4811_v9 = vadd.f32 %v4810_v11, %v4690_v62  ;;  %v4626_v6 = vadd.f32 %v4625_v63, %v7108_v12  ;;  %v4750_v46 = vmul.f32 %v7108_v12, %v7108_v12  ;;  %v4566_v55 = vadd.f32 %v4565_v22, %v7101_v3  ;;  %v7116_v5 = vpop.f32.mrb[7].mxu0 }
 0x10b   :  { %8973 = vst [vmem:[#allocation16_spill] sm:$0xff] %v7116_v5  ;;  %v4751_v57 = vmul.f32 %v7116_v5, %v7116_v5  ;;  %v7120_v14 = vpop.f32.mrb[6].mxu1 }
 0x10c   :  { %8974 = vst [vmem:[#allocation17_spill] sm:$0xff] %v7120_v14  ;;  %v4872_v15 = vadd.f32 %v4871_v60, %v4750_v46  ;;  %v4812_v26 = vadd.f32 %v4811_v9, %v4691_v45  ;;  %v4627_v56 = vadd.f32 %v4626_v6, %v7116_v5  ;;  %v4567_v10 = vadd.f32 %v4566_v55, %v7106_v37  ;;  %v7124_v30 = vpop.f32.mrb[7].mxu1 }
 0x10d   :  { %8975 = vst [vmem:[#allocation18_spill] sm:$0xff] %v7124_v30  ;;  %v4752_v28 = vmul.f32 %v7120_v14, %v7120_v14  ;;  %v7128_v21 = vpop.f32.mrb[8].mxu0  ;;  %v4753_v40 = vmul.f32 %v7124_v30, %v7124_v30 }
 0x10e   :  { %v4873_v24 = vadd.f32 %v4872_v15, %v4751_v57  ;;  %v4813_v27 = vadd.f32 %v4812_v26, %v4692_v13  ;;  %v4628_v1 = vadd.f32 %v4627_v56, %v7120_v14  ;;  %v4568_v61 = vadd.f32 %v4567_v10, %v7128_v21  ;;  %v7134_v49 = vpop.f32.mrb[9].mxu0 }
 0x10f   :  { %v4693_v53 = vmul.f32 %v7128_v21, %v7128_v21  ;;  %v4694_v50 = vmul.f32 %v7134_v49, %v7134_v49  ;;  %v7140_v31 = vpop.f32.mrb[8].mxu1 }
 0x110   :  { %v4874_v33 = vadd.f32 %v4873_v24, %v4752_v28  ;;  %v4569_v20 = vadd.f32 %v4568_v61, %v7134_v49  ;;  %v4629_v2 = vadd.f32 %v4628_v1, %v7124_v30  ;;  %v7144_v19 = vpop.f32.mrb[9].mxu1  ;;  %v4695_v8 = vmul.f32 %v7140_v31, %v7140_v31 }
 0x111   :  { %v4814_v36 = vadd.f32 %v4813_v27, %v4693_v53  ;;  %v7146_v23 = vpop.f32.mrb[10].mxu0  ;;  %v4696_v51 = vmul.f32 %v7144_v19, %v7144_v19 }
 0x112   :  { %8976 = vst [vmem:[#allocation19_spill] sm:$0xff] %v7146_v23  ;;  %v4875_v25 = vadd.f32 %v4874_v33, %v4753_v40  ;;  %v4630_v34 = vadd.f32 %v4629_v2, %v7146_v23  ;;  %v4754_v42 = vmul.f32 %v7146_v23, %v7146_v23  ;;  %v4570_v44 = vadd.f32 %v4569_v20, %v7140_v31  ;;  %v7154_v48 = vpop.f32.mrb[11].mxu0 }
 0x113   :  { %8977 = vst [vmem:[#allocation20_spill] sm:$0xff] %v7154_v48  ;;  %v4815_v29 = vadd.f32 %v4814_v36, %v4694_v50  ;;  %v4755_v43 = vmul.f32 %v7154_v48, %v7154_v48  ;;  %v7160_v54 = vpop.f32.mrb[10].mxu1 }
 0x114   :  { %8978 = vst [vmem:[#allocation21_spill] sm:$0xff] %v7160_v54  ;;  %v4876_v52 = vadd.f32 %v4875_v25, %v4754_v42  ;;  %v4631_v32 = vadd.f32 %v4630_v34, %v7154_v48  ;;  %v4571_v59 = vadd.f32 %v4570_v44, %v7144_v19  ;;  %v4756_v7 = vmul.f32 %v7160_v54, %v7160_v54  ;;  %v7166_v58 = vpop.f32.mrb[11].mxu1 }
 0x115   :  { %8979 = vst [vmem:[#allocation22_spill] sm:$0xff] %v7166_v58  ;;  %v4816_v63 = vadd.f32 %v4815_v29, %v4695_v8  ;;  %v7168_v62 = vpop.f32.mrb[12].mxu0  ;;  %v4757_v11 = vmul.f32 %v7166_v58, %v7166_v58 }
 0x116   :  { %v4877_v22 = vadd.f32 %v4876_v52, %v4755_v43  ;;  %v4632_v45 = vadd.f32 %v4631_v32, %v7160_v54  ;;  %v4572_v60 = vadd.f32 %v4571_v59, %v7168_v62  ;;  %v4697_v13 = vmul.f32 %v7168_v62, %v7168_v62  ;;  %v7176_v9 = vpop.f32.mrb[13].mxu0 }
 0x117   :  { %v4817_v6 = vadd.f32 %v4816_v63, %v4696_v51  ;;  %v4698_v46 = vmul.f32 %v7176_v9, %v7176_v9  ;;  %v7180_v55 = vpop.f32.mrb[12].mxu1 }
 0x118   :  { %v4878_v57 = vadd.f32 %v4877_v22, %v4756_v7  ;;  %v4573_v15 = vadd.f32 %v4572_v60, %v7176_v9  ;;  %v4633_v26 = vadd.f32 %v4632_v45, %v7166_v58  ;;  %v7184_v56 = vpop.f32.mrb[13].mxu1  ;;  %v4699_v40 = vmul.f32 %v7180_v55, %v7180_v55 }
 0x119   :  { %v4818_v10 = vadd.f32 %v4817_v6, %v4697_v13  ;;  %v7186_v28 = vpop.f32.mrb[14].mxu0  ;;  %v4700_v20 = vmul.f32 %v7184_v56, %v7184_v56 }
 0x11a   :  { %8980 = vst [vmem:[#allocation23_spill] sm:$0xff] %v7186_v28  ;;  %v4879_v24 = vadd.f32 %v4878_v57, %v4757_v11  ;;  %v4634_v27 = vadd.f32 %v4633_v26, %v7186_v28  ;;  %v4758_v1 = vmul.f32 %v7186_v28, %v7186_v28  ;;  %v4574_v61 = vadd.f32 %v4573_v15, %v7180_v55  ;;  %v7194_v53 = vpop.f32.mrb[15].mxu0 }
 0x11b   :  { %8981 = vst [vmem:[#allocation24_spill] sm:$0xff] %v7194_v53  ;;  %v4819_v50 = vadd.f32 %v4818_v10, %v4698_v46  ;;  %v4759_v33 = vmul.f32 %v7194_v53, %v7194_v53  ;;  %v7200_v2 = vpop.f32.mrb[14].mxu1 }
 0x11c   :  { %8982 = vst [vmem:[#allocation25_spill] sm:$0xff] %v7200_v2  ;;  %v4880_v36 = vadd.f32 %v4879_v24, %v4758_v1  ;;  %v4635_v8 = vadd.f32 %v4634_v27, %v7194_v53  ;;  %v4575_v25 = vadd.f32 %v4574_v61, %v7184_v56  ;;  %v4760_v34 = vmul.f32 %v7200_v2, %v7200_v2  ;;  %v7206_v42 = vpop.f32.mrb[15].mxu1 }
 0x11d   :  { %8983 = vst [vmem:[#allocation26_spill] sm:$0xff] %v7206_v42  ;;  %v4820_v44 = vadd.f32 %v4819_v50, %v4699_v40  ;;  %v7208_v29 = vpop.f32.mrb[16].mxu0  ;;  %v4761_v43 = vmul.f32 %v7206_v42, %v7206_v42 }
 0x11e   :  { %v4881_v51 = vadd.f32 %v4880_v36, %v4759_v33  ;;  %v4636_v52 = vadd.f32 %v4635_v8, %v7200_v2  ;;  %v4576_v32 = vadd.f32 %v4575_v25, %v7208_v29  ;;  %v4701_v59 = vmul.f32 %v7208_v29, %v7208_v29  ;;  %v7216_v7 = vpop.f32.mrb[17].mxu0 }
 0x11f   :  { %v4821_v63 = vadd.f32 %v4820_v44, %v4700_v20  ;;  %v4702_v11 = vmul.f32 %v7216_v7, %v7216_v7  ;;  %v7220_v22 = vpop.f32.mrb[16].mxu1 }
 0x120   :  { %v4882_v45 = vadd.f32 %v4881_v51, %v4760_v34  ;;  %v4577_v60 = vadd.f32 %v4576_v32, %v7216_v7  ;;  %v4637_v13 = vadd.f32 %v4636_v52, %v7206_v42  ;;  %v7224_v6 = vpop.f32.mrb[17].mxu1  ;;  %v4703_v15 = vmul.f32 %v7220_v22, %v7220_v22 }
 0x121   :  { %v4822_v46 = vadd.f32 %v4821_v63, %v4701_v59  ;;  %v7226_v57 = vpop.f32.mrb[18].mxu0  ;;  %v4704_v50 = vmul.f32 %v7224_v6, %v7224_v6 }
 0x122   :  { %8984 = vst [vmem:[#allocation27_spill] sm:$0xff] %v7226_v57  ;;  %v4883_v26 = vadd.f32 %v4882_v45, %v4761_v43  ;;  %v4638_v10 = vadd.f32 %v4637_v13, %v7226_v57  ;;  %v4762_v40 = vmul.f32 %v7226_v57, %v7226_v57  ;;  %v4578_v24 = vadd.f32 %v4577_v60, %v7220_v22  ;;  %v7234_v27 = vpop.f32.mrb[19].mxu0 }
 0x123   :  { %8985 = vst [vmem:[#allocation28_spill] sm:$0xff] %v7234_v27  ;;  %v4823_v1 = vadd.f32 %v4822_v46, %v4702_v11  ;;  %v4763_v61 = vmul.f32 %v7234_v27, %v7234_v27  ;;  %v7240_v33 = vpop.f32.mrb[18].mxu1 }
 0x124   :  { %8986 = vst [vmem:[#allocation29_spill] sm:$0xff] %v7240_v33  ;;  %v4884_v20 = vadd.f32 %v4883_v26, %v4762_v40  ;;  %v4639_v36 = vadd.f32 %v4638_v10, %v7234_v27  ;;  %v4579_v8 = vadd.f32 %v4578_v24, %v7224_v6  ;;  %v4764_v25 = vmul.f32 %v7240_v33, %v7240_v33  ;;  %v7246_v34 = vpop.f32.mrb[19].mxu1 }
 0x125   :  { %8987 = vst [vmem:[#allocation30_spill] sm:$0xff] %v7246_v34  ;;  %v4824_v44 = vadd.f32 %v4823_v1, %v4703_v15  ;;  %v7248_v43 = vpop.f32.mrb[20].mxu0  ;;  %v4765_v51 = vmul.f32 %v7246_v34, %v7246_v34 }
 0x126   :  { %v4885_v52 = vadd.f32 %v4884_v20, %v4763_v61  ;;  %v4640_v32 = vadd.f32 %v4639_v36, %v7240_v33  ;;  %v4580_v59 = vadd.f32 %v4579_v8, %v7248_v43  ;;  %v4705_v63 = vmul.f32 %v7248_v43, %v7248_v43  ;;  %v7256_v11 = vpop.f32.mrb[21].mxu0 }
 0x127   :  { %v4825_v45 = vadd.f32 %v4824_v44, %v4704_v50  ;;  %v4706_v60 = vmul.f32 %v7256_v11, %v7256_v11  ;;  %v7260_v13 = vpop.f32.mrb[20].mxu1 }
 0x128   :  { %v4886_v46 = vadd.f32 %v4885_v52, %v4764_v25  ;;  %v4581_v15 = vadd.f32 %v4580_v59, %v7256_v11  ;;  %v4641_v26 = vadd.f32 %v4640_v32, %v7246_v34  ;;  %v7264_v10 = vpop.f32.mrb[21].mxu1  ;;  %v4707_v1 = vmul.f32 %v7260_v13, %v7260_v13 }
 0x129   :  { %v4826_v40 = vadd.f32 %v4825_v45, %v4705_v63  ;;  %v7266_v24 = vpop.f32.mrb[22].mxu0  ;;  %v4708_v52 = vmul.f32 %v7264_v10, %v7264_v10 }
 0x12a   :  { %8988 = vst [vmem:[#allocation31_spill] sm:$0xff] %v7266_v24  ;;  %v4887_v61 = vadd.f32 %v4886_v46, %v4765_v51  ;;  %v4642_v50 = vadd.f32 %v4641_v26, %v7266_v24  ;;  %v4766_v20 = vmul.f32 %v7266_v24, %v7266_v24  ;;  %v4582_v36 = vadd.f32 %v4581_v15, %v7260_v13  ;;  %v7274_v8 = vpop.f32.mrb[23].mxu0 }
 0x12b   :  { %8989 = vst [vmem:[#allocation32_spill] sm:$0xff] %v7274_v8  ;;  %v4827_v25 = vadd.f32 %v4826_v40, %v4706_v60  ;;  %v4767_v44 = vmul.f32 %v7274_v8, %v7274_v8  ;;  %v7280_v32 = vpop.f32.mrb[22].mxu1 }
 0x12c   :  { %8990 = vst [vmem:[#allocation33_spill] sm:$0xff] %v7280_v32  ;;  %v4888_v59 = vadd.f32 %v4887_v61, %v4766_v20  ;;  %v4643_v51 = vadd.f32 %v4642_v50, %v7274_v8  ;;  %v4583_v63 = vadd.f32 %v4582_v36, %v7264_v10  ;;  %v4768_v45 = vmul.f32 %v7280_v32, %v7280_v32  ;;  %v7286_v46 = vpop.f32.mrb[23].mxu1 }
 0x12d   :  { %8991 = vst [vmem:[#allocation34_spill] sm:$0xff] %v7286_v46  ;;  %v4828_v15 = vadd.f32 %v4827_v25, %v4707_v1  ;;  %v7288_v60 = vpop.f32.mrb[24].mxu0  ;;  %v4769_v26 = vmul.f32 %v7286_v46, %v7286_v46 }
 0x12e   :  { %v4889_v40 = vadd.f32 %v4888_v59, %v4767_v44  ;;  %v4644_v24 = vadd.f32 %v4643_v51, %v7280_v32  ;;  %v4584_v61 = vadd.f32 %v4583_v63, %v7288_v60  ;;  %v4709_v50 = vmul.f32 %v7288_v60, %v7288_v60  ;;  %v7296_v20 = vpop.f32.mrb[25].mxu0 }
 0x12f   :  { %v4829_v36 = vadd.f32 %v4828_v15, %v4708_v52  ;;  %v4710_v8 = vmul.f32 %v7296_v20, %v7296_v20  ;;  %v7300_v1 = vpop.f32.mrb[24].mxu1 }
 0x130   :  { %v4890_v25 = vadd.f32 %v4889_v40, %v4768_v45  ;;  %v4585_v34 = vadd.f32 %v4584_v61, %v7296_v20  ;;  %v4645_v44 = vadd.f32 %v4644_v24, %v7286_v46  ;;  %v7304_v59 = vpop.f32.mrb[25].mxu1  ;;  %v4711_v32 = vmul.f32 %v7300_v1, %v7300_v1 }
 0x131   :  { %v4830_v51 = vadd.f32 %v4829_v36, %v4709_v50  ;;  %v7306_v63 = vpop.f32.mrb[26].mxu0  ;;  %v4712_v50 = vmul.f32 %v7304_v59, %v7304_v59 }
 0x132   :  { %8992 = vst [vmem:[#allocation35_spill] sm:$0xff] %v7306_v63  ;;  %v4891_v33 = vadd.f32 %v4890_v25, %v4769_v26  ;;  %v4646_v52 = vadd.f32 %v4645_v44, %v7306_v63  ;;  %v4770_v15 = vmul.f32 %v7306_v63, %v7306_v63  ;;  %v4586_v45 = vadd.f32 %v4585_v34, %v7300_v1  ;;  %v7314_v40 = vpop.f32.mrb[27].mxu0 }
 0x133   :  { %8993 = vst [vmem:[#allocation36_spill] sm:$0xff] %v7314_v40  ;;  %v4831_v61 = vadd.f32 %v4830_v51, %v4710_v8  ;;  %v4771_v24 = vmul.f32 %v7314_v40, %v7314_v40  ;;  %v7320_v36 = vpop.f32.mrb[26].mxu1 }
 0x134   :  { %8994 = vst [vmem:[#allocation37_spill] sm:$0xff] %v7320_v36  ;;  %v4892_v46 = vadd.f32 %v4891_v33, %v4770_v15  ;;  %v4647_v26 = vadd.f32 %v4646_v52, %v7314_v40  ;;  %v4587_v25 = vadd.f32 %v4586_v45, %v7304_v59  ;;  %v4772_v44 = vmul.f32 %v7320_v36, %v7320_v36  ;;  %v7326_v34 = vpop.f32.mrb[27].mxu1 }
 0x135   :  { %8995 = vst [vmem:[#allocation38_spill] sm:$0xff] %v7326_v34  ;;  %v4832_v63 = vadd.f32 %v4831_v61, %v4711_v32  ;;  %v7328_v8 = vpop.f32.mrb[28].mxu0  ;;  %v4773_v51 = vmul.f32 %v7326_v34, %v7326_v34 }
 0x136   :  { %v4893_v27 = vadd.f32 %v4892_v46, %v4771_v24  ;;  %v4648_v57 = vadd.f32 %v4647_v26, %v7320_v36  ;;  %v4588_v33 = vadd.f32 %v4587_v25, %v7328_v8  ;;  %v4713_v52 = vmul.f32 %v7328_v8, %v7328_v8  ;;  %v7336_v15 = vpop.f32.mrb[29].mxu0 }
 0x137   :  { %v4833_v45 = vadd.f32 %v4832_v63, %v4712_v50  ;;  %v4714_v40 = vmul.f32 %v7336_v15, %v7336_v15  ;;  %v7340_v32 = vpop.f32.mrb[28].mxu1 }
 0x138   :  { %v4894_v61 = vadd.f32 %v4893_v27, %v4772_v44  ;;  %v4589_v42 = vadd.f32 %v4588_v33, %v7336_v15  ;;  %v4649_v46 = vadd.f32 %v4648_v57, %v7326_v34  ;;  %v7344_v24 = vpop.f32.mrb[29].mxu1  ;;  %v4715_v36 = vmul.f32 %v7340_v32, %v7340_v32 }
 0x139   :  { %v4834_v26 = vadd.f32 %v4833_v45, %v4713_v52  ;;  %v7346_v25 = vpop.f32.mrb[30].mxu0  ;;  %v4716_v52 = vmul.f32 %v7344_v24, %v7344_v24 }
 0x13a   :  { %8996 = vst [vmem:[#allocation39_spill] sm:$0xff] %v7346_v25  ;;  %v4895_v2 = vadd.f32 %v4894_v61, %v4773_v51  ;;  %v4650_v63 = vadd.f32 %v4649_v46, %v7346_v25  ;;  %v4774_v50 = vmul.f32 %v7346_v25, %v7346_v25  ;;  %v4590_v27 = vadd.f32 %v4589_v42, %v7340_v32  ;;  %v7354_v44 = vpop.f32.mrb[31].mxu0 }
 0x13b   :  { %8997 = vst [vmem:[#allocation40_spill] sm:$0xff] %v7354_v44  ;;  %v4835_v33 = vadd.f32 %v4834_v26, %v4714_v40  ;;  %v4775_v57 = vmul.f32 %v7354_v44, %v7354_v44  ;;  %v7360_v45 = vpop.f32.mrb[30].mxu1 }
 0x13c   :  { %8998 = vst [vmem:[#allocation41_spill] sm:$0xff] %v7360_v45  ;;  %v4896_v34 = vadd.f32 %v4895_v2, %v4774_v50  ;;  %v4651_v51 = vadd.f32 %v4650_v63, %v7354_v44  ;;  %v4591_v61 = vadd.f32 %v4590_v27, %v7344_v24  ;;  %v4776_v46 = vmul.f32 %v7360_v45, %v7360_v45  ;;  %v7366_v42 = vpop.f32.mrb[31].mxu1 }
 0x13d   :  { %8999 = vst [vmem:[#allocation42_spill] sm:$0xff] %v7366_v42  ;;  %v4836_v25 = vadd.f32 %v4835_v33, %v4715_v36  ;;  %v7368_v40 = vpop.f32.mrb[32].mxu0  ;;  %v4777_v26 = vmul.f32 %v7366_v42, %v7366_v42 }
 0x13e   :  { %v4897_v53 = vadd.f32 %v4896_v34, %v4775_v57  ;;  %v4652_v28 = vadd.f32 %v4651_v51, %v7360_v45  ;;  %v4592_v2 = vadd.f32 %v4591_v61, %v7368_v40  ;;  %v4717_v63 = vmul.f32 %v7368_v40, %v7368_v40  ;;  %v7376_v50 = vpop.f32.mrb[33].mxu0 }
 0x13f   :  { %v4837_v27 = vadd.f32 %v4836_v25, %v4716_v52  ;;  %v4718_v44 = vmul.f32 %v7376_v50, %v7376_v50  ;;  %v7380_v36 = vpop.f32.mrb[32].mxu1 }
 0x140   :  { %v4898_v33 = vadd.f32 %v4897_v53, %v4776_v46  ;;  %v4593_v58 = vadd.f32 %v4592_v2, %v7376_v50  ;;  %v4653_v34 = vadd.f32 %v4652_v28, %v7366_v42  ;;  %v7384_v57 = vpop.f32.mrb[33].mxu1  ;;  %v4719_v45 = vmul.f32 %v7380_v36, %v7380_v36 }
 0x141   :  { %v4838_v51 = vadd.f32 %v4837_v27, %v4717_v63  ;;  %v7386_v61 = vpop.f32.mrb[34].mxu0  ;;  %v4720_v63 = vmul.f32 %v7384_v57, %v7384_v57 }
 0x142   :  { %9000 = vst [vmem:[#allocation43_spill] sm:$0xff] %v7386_v61  ;;  %v4899_v54 = vadd.f32 %v4898_v33, %v4777_v26  ;;  %v4654_v25 = vadd.f32 %v4653_v34, %v7386_v61  ;;  %v4778_v52 = vmul.f32 %v7386_v61, %v7386_v61  ;;  %v4594_v53 = vadd.f32 %v4593_v58, %v7380_v36  ;;  %v7394_v46 = vpop.f32.mrb[35].mxu0 }
 0x143   :  { %9001 = vst [vmem:[#allocation44_spill] sm:$0xff] %v7394_v46  ;;  %v4839_v2 = vadd.f32 %v4838_v51, %v4718_v44  ;;  %v4779_v28 = vmul.f32 %v7394_v46, %v7394_v46  ;;  %v7400_v27 = vpop.f32.mrb[34].mxu1 }
 0x144   :  { %9002 = vst [vmem:[#allocation45_spill] sm:$0xff] %v7400_v27  ;;  %v4900_v42 = vadd.f32 %v4899_v54, %v4778_v52  ;;  %v4655_v26 = vadd.f32 %v4654_v25, %v7394_v46  ;;  %v4595_v33 = vadd.f32 %v4594_v53, %v7384_v57  ;;  %v4780_v34 = vmul.f32 %v7400_v27, %v7400_v27  ;;  %v7406_v58 = vpop.f32.mrb[35].mxu1 }
 0x145   :  { %9003 = vst [vmem:[#allocation46_spill] sm:$0xff] %v7406_v58  ;;  %v4840_v61 = vadd.f32 %v4839_v2, %v4719_v45  ;;  %v7408_v44 = vpop.f32.mrb[36].mxu0  ;;  %v4781_v51 = vmul.f32 %v7406_v58, %v7406_v58 }
 0x146   :  { %v4901_v48 = vadd.f32 %v4900_v42, %v4779_v28  ;;  %v4656_v23 = vadd.f32 %v4655_v26, %v7400_v27  ;;  %v4596_v54 = vadd.f32 %v4595_v33, %v7408_v44  ;;  %v4721_v25 = vmul.f32 %v7408_v44, %v7408_v44  ;;  %v7416_v52 = vpop.f32.mrb[37].mxu0 }
 0x147   :  { %v4841_v53 = vadd.f32 %v4840_v61, %v4720_v63  ;;  %v4722_v46 = vmul.f32 %v7416_v52, %v7416_v52  ;;  %v7420_v45 = vpop.f32.mrb[36].mxu1 }
 0x148   :  { %v4902_v2 = vadd.f32 %v4901_v48, %v4780_v34  ;;  %v4597_v30 = vadd.f32 %v4596_v54, %v7416_v52  ;;  %v4657_v42 = vadd.f32 %v4656_v23, %v7406_v58  ;;  %v7424_v28 = vpop.f32.mrb[37].mxu1  ;;  %v4723_v27 = vmul.f32 %v7420_v45, %v7420_v45 }
 0x149   :  { %v4842_v26 = vadd.f32 %v4841_v53, %v4721_v25  ;;  %v7426_v33 = vpop.f32.mrb[38].mxu0  ;;  %v4724_v25 = vmul.f32 %v7424_v28, %v7424_v28 }
 0x14a   :  { %9004 = vst [vmem:[#allocation47_spill] sm:$0xff] %v7426_v33  ;;  %v4903_v14 = vadd.f32 %v4902_v2, %v4781_v51  ;;  %v4658_v61 = vadd.f32 %v4657_v42, %v7426_v33  ;;  %v4782_v63 = vmul.f32 %v7426_v33, %v7426_v33  ;;  %v4598_v48 = vadd.f32 %v4597_v30, %v7420_v45  ;;  %v7434_v34 = vpop.f32.mrb[39].mxu0 }
 0x14b   :  { %9005 = vst [vmem:[#allocation48_spill] sm:$0xff] %v7434_v34  ;;  %v4843_v54 = vadd.f32 %v4842_v26, %v4722_v46  ;;  %v4783_v23 = vmul.f32 %v7434_v34, %v7434_v34  ;;  %v7440_v53 = vpop.f32.mrb[38].mxu1 }
 0x14c   :  { %9006 = vst [vmem:[#allocation49_spill] sm:$0xff] %v7440_v53  ;;  %v4904_v58 = vadd.f32 %v4903_v14, %v4782_v63  ;;  %v4659_v51 = vadd.f32 %v4658_v61, %v7434_v34  ;;  %v4599_v2 = vadd.f32 %v4598_v48, %v7424_v28  ;;  %v4784_v42 = vmul.f32 %v7440_v53, %v7440_v53  ;;  %v7446_v30 = vpop.f32.mrb[39].mxu1 }
 0x14d   :  { %9007 = vst [vmem:[#allocation50_spill] sm:$0xff] %v7446_v30  ;;  %v4844_v33 = vadd.f32 %v4843_v54, %v4723_v27  ;;  %v7448_v46 = vpop.f32.mrb[40].mxu0  ;;  %v4785_v26 = vmul.f32 %v7446_v30, %v7446_v30 }
 0x14e   :  { %v4905_v5 = vadd.f32 %v4904_v58, %v4783_v23  ;;  %v4660_v12 = vadd.f32 %v4659_v51, %v7440_v53  ;;  %v4600_v14 = vadd.f32 %v4599_v2, %v7448_v46  ;;  %v4725_v61 = vmul.f32 %v7448_v46, %v7448_v46  ;;  %v7456_v63 = vpop.f32.mrb[41].mxu0 }
 0x14f   :  { %v4845_v48 = vadd.f32 %v4844_v33, %v4724_v25  ;;  %v4726_v34 = vmul.f32 %v7456_v63, %v7456_v63  ;;  %v7460_v27 = vpop.f32.mrb[40].mxu1 }
 0x150   :  { %9008 = vst [vmem:[#allocation51_spill] sm:$0xff] %v7460_v27  ;;  %v4906_v54 = vadd.f32 %v4905_v5, %v4784_v42  ;;  %v4601_v41 = vadd.f32 %v4600_v14, %v7456_v63  ;;  %v4661_v58 = vadd.f32 %v4660_v12, %v7446_v30  ;;  %v7464_v23 = vpop.f32.mrb[41].mxu1  ;;  %v4727_v53 = vmul.f32 %v7460_v27, %v7460_v27 }
 0x151   :  { %9009 = vst [vmem:[#allocation52_spill] sm:$0xff] %v7464_v23  ;;  %v4846_v51 = vadd.f32 %v4845_v48, %v4725_v61  ;;  %v7466_v2 = vpop.f32.mrb[42].mxu0  ;;  %v4728_v61 = vmul.f32 %v7464_v23, %v7464_v23 }
 0x152   :  { %9010 = vst [vmem:[#allocation53_spill] sm:$0xff] %v7466_v2  ;;  %v4907_v38 = vadd.f32 %v4906_v54, %v4785_v26  ;;  %v4662_v33 = vadd.f32 %v4661_v58, %v7466_v2  ;;  %v4786_v25 = vmul.f32 %v7466_v2, %v7466_v2  ;;  %v4602_v5 = vadd.f32 %v4601_v41, %v7460_v27  ;;  %v7474_v42 = vpop.f32.mrb[43].mxu0 }
 0x153   :  { %9011 = vst [vmem:[#allocation54_spill] sm:$0xff] %v7474_v42  ;;  %v4847_v14 = vadd.f32 %v4846_v51, %v4726_v34  ;;  %v4787_v12 = vmul.f32 %v7474_v42, %v7474_v42  ;;  %v7480_v48 = vpop.f32.mrb[42].mxu1 }
 0x154   :  { %9012 = vst [vmem:[#allocation55_spill] sm:$0xff] %v7480_v48  ;;  %v4908_v30 = vadd.f32 %v4907_v38, %v4786_v25  ;;  %v4663_v26 = vadd.f32 %v4662_v33, %v7474_v42  ;;  %v4603_v54 = vadd.f32 %v4602_v5, %v7464_v23  ;;  %v4788_v58 = vmul.f32 %v7480_v48, %v7480_v48  ;;  %v7486_v41 = vpop.f32.mrb[43].mxu1 }
 0x155   :  { %9013 = vst [vmem:[#allocation56_spill] sm:$0xff] %v7486_v41  ;;  %v4848_v2 = vadd.f32 %v4847_v14, %v4727_v53  ;;  %v7488_v34 = vpop.f32.mrb[44].mxu0  ;;  %v4789_v51 = vmul.f32 %v7486_v41, %v7486_v41 }
 0x156   :  { %9014 = vst [vmem:[#allocation57_spill] sm:$0xff] %v7488_v34  ;;  %v4909_v17 = vadd.f32 %v4908_v30, %v4787_v12  ;;  %v4664_v18 = vadd.f32 %v4663_v26, %v7480_v48  ;;  %v4604_v38 = vadd.f32 %v4603_v54, %v7488_v34  ;;  %v4729_v33 = vmul.f32 %v7488_v34, %v7488_v34  ;;  %v7496_v25 = vpop.f32.mrb[45].mxu0 }
 0x157   :  { %9015 = vst [vmem:[#allocation58_spill] sm:$0xff] %v7496_v25  ;;  %v4849_v5 = vadd.f32 %v4848_v2, %v4728_v61  ;;  %v4730_v42 = vmul.f32 %v7496_v25, %v7496_v25  ;;  %v7500_v53 = vpop.f32.mrb[44].mxu1 }
 0x158   :  { %9016 = vst [vmem:[#allocation59_spill] sm:$0xff] %v7500_v53  ;;  %v4910_v14 = vadd.f32 %v4909_v17, %v4788_v58  ;;  %v4605_v23 = vadd.f32 %v4604_v38, %v7496_v25  ;;  %v4665_v30 = vadd.f32 %v4664_v18, %v7486_v41  ;;  %v7504_v12 = vpop.f32.mrb[45].mxu1  ;;  %v4731_v48 = vmul.f32 %v7500_v53, %v7500_v53 }
 0x159   :  { %9017 = vst [vmem:[#allocation60_spill] sm:$0xff] %v7504_v12  ;;  %v4850_v26 = vadd.f32 %v4849_v5, %v4729_v33  ;;  %v7506_v54 = vpop.f32.mrb[46].mxu0  ;;  %v4732_v33 = vmul.f32 %v7504_v12, %v7504_v12 }
 0x15a   :  { %9018 = vst [vmem:[#allocation61_spill] sm:$0xff] %v7506_v54  ;;  %v4911_v34 = vadd.f32 %v4910_v14, %v4789_v51  ;;  %v4666_v2 = vadd.f32 %v4665_v30, %v7506_v54  ;;  %v4790_v61 = vmul.f32 %v7506_v54, %v7506_v54  ;;  %v4606_v17 = vadd.f32 %v4605_v23, %v7500_v53  ;;  %v7514_v58 = vpop.f32.mrb[47].mxu0 }
 0x15b   :  { %9019 = vst [vmem:[#allocation62_spill] sm:$0xff] %v7514_v58  ;;  %v4851_v38 = vadd.f32 %v4850_v26, %v4730_v42  ;;  %v4791_v18 = vmul.f32 %v7514_v58, %v7514_v58  ;;  %v7520_v5 = vpop.f32.mrb[46].mxu1 }
 0x15c   :  { %9020 = vst [vmem:[#allocation63_spill] sm:$0xff] %v7520_v5  ;;  %v4912_v41 = vadd.f32 %v4911_v34, %v4790_v61  ;;  %v4667_v51 = vadd.f32 %v4666_v2, %v7514_v58  ;;  %v4607_v14 = vadd.f32 %v4606_v17, %v7504_v12  ;;  %v4792_v30 = vmul.f32 %v7520_v5, %v7520_v5  ;;  %v7526_v23 = vpop.f32.mrb[47].mxu1 }
 0x15d   :  { %9021 = vst [vmem:[#allocation64_spill] sm:$0xff] %v7526_v23  ;;  %v4852_v54 = vadd.f32 %v4851_v38, %v4731_v48  ;;  %v7528_v42 = vpop.f32.mrb[48].mxu0  ;;  %v4793_v26 = vmul.f32 %v7526_v23, %v7526_v23 }
 0x15e   :  { %9022 = vst [vmem:[#allocation65_spill] sm:$0xff] %v7528_v42  ;;  %v4913_v53 = vadd.f32 %v4912_v41, %v4791_v18  ;;  %v4668_v25 = vadd.f32 %v4667_v51, %v7520_v5  ;;  %v4608_v34 = vadd.f32 %v4607_v14, %v7528_v42  ;;  %v4733_v2 = vmul.f32 %v7528_v42, %v7528_v42  ;;  %v7536_v61 = vpop.f32.mrb[49].mxu0 }
 0x15f   :  { %9023 = vst [vmem:[#allocation66_spill] sm:$0xff] %v7536_v61  ;;  %v4853_v17 = vadd.f32 %v4852_v54, %v4732_v33  ;;  %v4734_v58 = vmul.f32 %v7536_v61, %v7536_v61  ;;  %v7540_v48 = vpop.f32.mrb[48].mxu1 }
 0x160   :  { %9024 = vst [vmem:[#allocation67_spill] sm:$0xff] %v7540_v48  ;;  %v4914_v38 = vadd.f32 %v4913_v53, %v4792_v30  ;;  %v4609_v12 = vadd.f32 %v4608_v34, %v7536_v61  ;;  %v4669_v41 = vadd.f32 %v4668_v25, %v7526_v23  ;;  %v7544_v18 = vpop.f32.mrb[49].mxu1  ;;  %v4735_v5 = vmul.f32 %v7540_v48, %v7540_v48 }
 0x161   :  { %9025 = vst [vmem:[#allocation68_spill] sm:$0xff] %v7544_v18  ;;  %v4854_v51 = vadd.f32 %v4853_v17, %v4733_v2  ;;  %v7546_v14 = vpop.f32.mrb[50].mxu0  ;;  %v4736_v2 = vmul.f32 %v7544_v18, %v7544_v18 }
 0x162   :  { %9026 = vst [vmem:[#allocation69_spill] sm:$0xff] %v7546_v14  ;;  %v4915_v42 = vadd.f32 %v4914_v38, %v4793_v26  ;;  %v4670_v54 = vadd.f32 %v4669_v41, %v7546_v14  ;;  %v4794_v33 = vmul.f32 %v7546_v14, %v7546_v14  ;;  %v4610_v53 = vadd.f32 %v4609_v12, %v7540_v48  ;;  %v7554_v30 = vpop.f32.mrb[51].mxu0 }
 0x163   :  { %9027 = vst [vmem:[#allocation70_spill] sm:$0xff] %v7554_v30  ;;  %v4855_v34 = vadd.f32 %v4854_v51, %v4734_v58  ;;  %v4795_v25 = vmul.f32 %v7554_v30, %v7554_v30  ;;  %v7560_v17 = vpop.f32.mrb[50].mxu1 }
 0x164   :  { %9028 = vst [vmem:[#allocation71_spill] sm:$0xff] %v7560_v17  ;;  %v4916_v23 = vadd.f32 %v4915_v42, %v4794_v33  ;;  %v4671_v26 = vadd.f32 %v4670_v54, %v7554_v30  ;;  %v4611_v38 = vadd.f32 %v4610_v53, %v7544_v18  ;;  %v4796_v41 = vmul.f32 %v7560_v17, %v7560_v17  ;;  %v7566_v12 = vpop.f32.mrb[51].mxu1 }
 0x165   :  { %9029 = vst [vmem:[#allocation72_spill] sm:$0xff] %v7566_v12  ;;  %v4856_v14 = vadd.f32 %v4855_v34, %v4735_v5  ;;  %v7568_v58 = vpop.f32.mrb[52].mxu0  ;;  %v4797_v51 = vmul.f32 %v7566_v12, %v7566_v12 }
 0x166   :  { %9030 = vst [vmem:[#allocation73_spill] sm:$0xff] %v7568_v58  ;;  %v4917_v48 = vadd.f32 %v4916_v23, %v4795_v25  ;;  %v4672_v61 = vadd.f32 %v4671_v26, %v7560_v17  ;;  %v4612_v42 = vadd.f32 %v4611_v38, %v7568_v58  ;;  %v4737_v54 = vmul.f32 %v7568_v58, %v7568_v58  ;;  %v7576_v33 = vpop.f32.mrb[53].mxu0 }
 0x167   :  { %9031 = vst [vmem:[#allocation74_spill] sm:$0xff] %v7576_v33  ;;  %v4857_v53 = vadd.f32 %v4856_v14, %v4736_v2  ;;  %v4738_v30 = vmul.f32 %v7576_v33, %v7576_v33  ;;  %v7580_v5 = vpop.f32.mrb[52].mxu1 }
 0x168   :  { %9032 = vst [vmem:[#allocation75_spill] sm:$0xff] %v7580_v5  ;;  %v4918_v34 = vadd.f32 %v4917_v48, %v4796_v41  ;;  %v4613_v18 = vadd.f32 %v4612_v42, %v7576_v33  ;;  %v4673_v23 = vadd.f32 %v4672_v61, %v7566_v12  ;;  %v7584_v25 = vpop.f32.mrb[53].mxu1  ;;  %v4739_v17 = vmul.f32 %v7580_v5, %v7580_v5 }
 0x169   :  { %9033 = vst [vmem:[#allocation76_spill] sm:$0xff] %v7584_v25  ;;  %v4858_v26 = vadd.f32 %v4857_v53, %v4737_v54  ;;  %v7586_v38 = vpop.f32.mrb[54].mxu0  ;;  %v4740_v54 = vmul.f32 %v7584_v25, %v7584_v25 }
 0x16a   :  { %9034 = vst [vmem:[#allocation77_spill] sm:$0xff] %v7586_v38  ;;  %v4919_v58 = vadd.f32 %v4918_v34, %v4797_v51  ;;  %v4674_v14 = vadd.f32 %v4673_v23, %v7586_v38  ;;  %v4798_v2 = vmul.f32 %v7586_v38, %v7586_v38  ;;  %v4614_v48 = vadd.f32 %v4613_v18, %v7580_v5  ;;  %v7594_v41 = vpop.f32.mrb[55].mxu0 }
 0x16b   :  { %9035 = vst [vmem:[#allocation78_spill] sm:$0xff] %v7594_v41  ;;  %v4859_v42 = vadd.f32 %v4858_v26, %v4738_v30  ;;  %v4799_v61 = vmul.f32 %v7594_v41, %v7594_v41  ;;  %v7600_v53 = vpop.f32.mrb[54].mxu1 }
 0x16c   :  { %9036 = vst [vmem:[#allocation79_spill] sm:$0xff] %v7600_v53  ;;  %v4920_v12 = vadd.f32 %v4919_v58, %v4798_v2  ;;  %v4675_v51 = vadd.f32 %v4674_v14, %v7594_v41  ;;  %v4615_v34 = vadd.f32 %v4614_v48, %v7584_v25  ;;  %v4800_v23 = vmul.f32 %v7600_v53, %v7600_v53  ;;  %v7606_v18 = vpop.f32.mrb[55].mxu1 }
 0x16d   :  { %9037 = vst [vmem:[#allocation80_spill] sm:$0xff] %v7606_v18  ;;  %v4860_v38 = vadd.f32 %v4859_v42, %v4739_v17  ;;  %v7608_v30 = vpop.f32.mrb[56].mxu0  ;;  %v4801_v26 = vmul.f32 %v7606_v18, %v7606_v18 }
 0x16e   :  { %9038 = vst [vmem:[#allocation81_spill] sm:$0xff] %v7608_v30  ;;  %v4921_v5 = vadd.f32 %v4920_v12, %v4799_v61  ;;  %v4676_v33 = vadd.f32 %v4675_v51, %v7600_v53  ;;  %v4616_v58 = vadd.f32 %v4615_v34, %v7608_v30  ;;  %v4741_v14 = vmul.f32 %v7608_v30, %v7608_v30  ;;  %v7616_v2 = vpop.f32.mrb[57].mxu0 }
 0x16f   :  { %9039 = vst [vmem:[#allocation82_spill] sm:$0xff] %v7616_v2  ;;  %v4861_v48 = vadd.f32 %v4860_v38, %v4740_v54  ;;  %v4742_v41 = vmul.f32 %v7616_v2, %v7616_v2  ;;  %v7620_v17 = vpop.f32.mrb[56].mxu1 }
 0x170   :  { %9040 = vst [vmem:[#allocation83_spill] sm:$0xff] %v7620_v17  ;;  %v4922_v42 = vadd.f32 %v4921_v5, %v4800_v23  ;;  %v4617_v25 = vadd.f32 %v4616_v58, %v7616_v2  ;;  %v4677_v12 = vadd.f32 %v4676_v33, %v7606_v18  ;;  %v7624_v61 = vpop.f32.mrb[57].mxu1  ;;  %v4743_v53 = vmul.f32 %v7620_v17, %v7620_v17 }
 0x171   :  { %9041 = vst [vmem:[#allocation84_spill] sm:$0xff] %v7624_v61  ;;  %v4862_v51 = vadd.f32 %v4861_v48, %v4741_v14  ;;  %v7626_v34 = vpop.f32.mrb[58].mxu0  ;;  %v4744_v14 = vmul.f32 %v7624_v61, %v7624_v61 }
 0x172   :  { %9042 = vst [vmem:[#allocation85_spill] sm:$0xff] %v7626_v34  ;;  %v4923_v30 = vadd.f32 %v4922_v42, %v4801_v26  ;;  %v4678_v38 = vadd.f32 %v4677_v12, %v7626_v34  ;;  %v4802_v54 = vmul.f32 %v7626_v34, %v7626_v34  ;;  %v4618_v5 = vadd.f32 %v4617_v25, %v7620_v17  ;;  %v7634_v23 = vpop.f32.mrb[59].mxu0 }
 0x173   :  { %9043 = vst [vmem:[#allocation86_spill] sm:$0xff] %v7634_v23  ;;  %v4863_v58 = vadd.f32 %v4862_v51, %v4742_v41  ;;  %v4803_v33 = vmul.f32 %v7634_v23, %v7634_v23  ;;  %v7640_v48 = vpop.f32.mrb[58].mxu1 }
 0x174   :  { %9044 = vst [vmem:[#allocation87_spill] sm:$0xff] %v7640_v48  ;;  %v4924_v18 = vadd.f32 %v4923_v30, %v4802_v54  ;;  %v4679_v26 = vadd.f32 %v4678_v38, %v7634_v23  ;;  %v4804_v42 = vmul.f32 %v7640_v48, %v7640_v48  ;;  %v7645_v12 = vpop.f32.mrb[59].mxu1  ;;  %v4619_v25 = vadd.f32 %v4618_v5, %v7624_v61 }
 0x175   :  { %9045 = vst [vmem:[#allocation88_spill] sm:$0xff] %v7645_v12  ;;  %v7648_v34 = vpop.f32.mrb[60].mxu0  ;;  %v4864_v41 = vadd.f32 %v4863_v58, %v4743_v53  ;;  %v4805_v30 = vmul.f32 %v7645_v12, %v7645_v12 }
 0x176   :  { %9046 = vst [vmem:[#allocation89_spill] sm:$0xff] %v7648_v34  ;;  %v4925_v51 = vadd.f32 %v4924_v18, %v4803_v33  ;;  %v4680_v17 = vadd.f32 %v4679_v26, %v7640_v48  ;;  %v7651_v2 = vpop.f32.mrb[61].mxu0  ;;  %v4806_v18 = vmul.f32 %v7648_v34, %v7648_v34  ;;  %v5951_v26 = vmov 0   ;;  %v9065_v48 = vld [vmem:[#allocation74_spill] sm:$0xff] }
 0x177   :  { %v4745_v38 = vmul.f32 %v7651_v2, %v7651_v2  ;;  %v4620_v54 = vadd.f32 %v4619_v25, %v7651_v2  ;;  %v4865_v23 = vadd.f32 %v4864_v41, %v4744_v14  ;;  %5915 = vset.pattern.permute.xlu0 %v5951_v26  ;;  %5916 = vset.pattern.permute.xlu1 %v5951_v26  ;;  %v4942_v26 = vld [vmem:[%s8880_s1 + $0x8] sm:$0xff] }
 0x178   :  { %v4681_v27 = vadd.f32 %v4680_v17, %v7645_v12  ;;  %v4926_v5 = vadd.f32 %v4925_v51, %v4804_v42 }
 0x179   :  { %4621 = vadd.xlane.f32.xlu0 %v4620_v54  ;;  %v4866_v61 = vadd.f32 %v4865_v23, %v4745_v38 }
 0x17a   :  { %v4682_v53 = vadd.f32 %v7648_v34, %v4681_v27  ;;  %v4927_v58 = vadd.f32 %v4926_v5, %v4805_v30 }
 0x17b   :  { %4867 = vadd.xlane.f32.xlu1 %v4866_v61 }
 0x17c   :  { %v4928_v33 = vadd.f32 %v4927_v58, %v4806_v18  ;;  %v4941_v18 = vld [vmem:[%s8880_s1] sm:$0xff] }
 0x17d   :  { %4683 = vadd.xlane.f32.xlu0 %v4682_v53 }
 0x17f   :  { %4929 = vadd.xlane.f32.xlu1 %v4928_v33 }
 0x206   :  { %v4622_v25 = vpop.xlane.xlu0 %4621 }
 0x207   :  { %v4931_v14 = vmul.f32 0.00013007285, %v4622_v25 }
 0x208   :  { %v4868_v41 = vpop.xlane.xlu1 %4867 }
 0x209   :  { %v4935_v17 = vmul.f32 %v4931_v14, %v4931_v14  ;;  %v4933_v42 = vmul.f32 0.00013007285, %v4868_v41 }
 0x20a   :  { %v4684_v51 = vpop.xlane.xlu0 %4683 }
 0x20b   :  { %v4937_v23 = vsub.f32 %v4933_v42, %v4935_v17  ;;  %v4932_v38 = vmul.f32 0.00013007285, %v4684_v51  ;;  %v4950_v51 = vld [vmem:[%s8881_s2 + $0x8] sm:$0xff] }
 0x20c   :  { %v4930_v27 = vpop.xlane.xlu1 %4929 }
 0x20d   :  { %v4939_v54 = vmax.f32 %v4937_v23, 0.0  ;;  %v4936_v12 = vmul.f32 %v4932_v38, %v4932_v38  ;;  %v4934_v34 = vmul.f32 0.00013007285, %v4930_v27 }
 0x20f   :  { %v4943_v30 = vadd.f32 1e-05, %v4939_v54  ;;  %v4938_v61 = vsub.f32 %v4934_v34, %v4936_v12  ;;  %v4949_v34 = vld [vmem:[%s8881_s2] sm:$0xff] }
 0x211   :  { %5917 = vrsqrt.f32 %v4943_v30  ;;  %v4940_v5 = vmax.f32 %v4938_v61, 0.0 }
 0x213   :  { %v4944_v53 = vadd.f32 1e-05, %v4940_v5 }
 0x215   :  { %5919 = vrsqrt.f32 %v4944_v53 }
 0x21b   :  { %v5918_v58 = vpop.eup %5917 }
 0x21c   :  { %v4947_v33 = vmul.f32 %v5918_v58, %v4941_v18  ;;  %v9054_v58 = vld [vmem:[#allocation51_spill] sm:$0xff] }
 0x21e   :  { %4957 = vperm.xlu0 %5915, %v4947_v33   ;;  %v4951_v17 = vmul.f32 %v4947_v33, %v4931_v14  ;;  %v9055_v33 = vld [vmem:[#allocation52_spill] sm:$0xff] }
 0x21f   :  { %v5920_v25 = vpop.eup %5919 }
 0x220   :  { %v4948_v41 = vmul.f32 %v5920_v25, %v4942_v26  ;;  %v4953_v12 = vsub.f32 %v4949_v34, %v4951_v17  ;;  %v9056_v26 = vld [vmem:[#allocation57_spill] sm:$0xff]  ;;  %v9057_v25 = vld [vmem:[#allocation58_spill] sm:$0xff]  ;;  %v9059_v17 = vld [vmem:[#allocation60_spill] sm:$0xff] }
 0x221   :  { %v9060_v34 = vld [vmem:[#allocation65_spill] sm:$0xff] }
 0x222   :  { %4962 = vperm.xlu1 %5916, %v4948_v41   ;;  %v4952_v42 = vmul.f32 %v4948_v41, %v4932_v38  ;;  %v9058_v41 = vld [vmem:[#allocation59_spill] sm:$0xff] }
 0x224   :  { %v4954_v23 = vsub.f32 %v4950_v51, %v4952_v42  ;;  %v9062_v51 = vld [vmem:[#allocation67_spill] sm:$0xff] }
 0x226   :  { %5089 = vperm.xlu1 %5916, %v4953_v12   ;;  %v9061_v12 = vld [vmem:[#allocation66_spill] sm:$0xff] }
 0x22a   :  { %5094 = vperm.xlu1 %5916, %v4954_v23  }
 0x29d   :  { %v7674_v27 = vpop.permute.xlu0 %4957 }
 0x29e   :  { %v7678_v54 = vmul.f32 %v7674_v27, %v7052_v39  ;;  %v7682_v14 = vmul.f32 %v7674_v27, %v7056_v47  ;;  %v7686_v38 = vmul.f32 %v7674_v27, %v7062_v4  ;;  %v7690_v30 = vmul.f32 %v7674_v27, %v7066_v0 }
 0x29f   :  { %v7694_v61 = vmul.f32 %v7674_v27, %v7089_v35  ;;  %v7698_v39 = vmul.f32 %v7674_v27, %v7096_v16  ;;  %v7702_v47 = vmul.f32 %v7674_v27, %v7101_v3  ;;  %v7706_v4 = vmul.f32 %v7674_v27, %v7106_v37 }
 0x2a0   :  { %v7710_v0 = vmul.f32 %v7674_v27, %v7128_v21  ;;  %v7714_v35 = vmul.f32 %v7674_v27, %v7134_v49  ;;  %v7718_v16 = vmul.f32 %v7674_v27, %v7140_v31  ;;  %v7722_v3 = vmul.f32 %v7674_v27, %v7144_v19 }
 0x2a1   :  { %v7726_v37 = vmul.f32 %v7674_v27, %v7168_v62  ;;  %v7730_v21 = vmul.f32 %v7674_v27, %v7176_v9  ;;  %v7734_v49 = vmul.f32 %v7674_v27, %v7180_v55  ;;  %v7738_v31 = vmul.f32 %v7674_v27, %v7184_v56  ;;  %v7788_v5 = vpop.permute.xlu1 %4962 }
 0x2a2   :  { %v7742_v19 = vmul.f32 %v7674_v27, %v7208_v29  ;;  %v7746_v62 = vmul.f32 %v7674_v27, %v7216_v7  ;;  %v7750_v9 = vmul.f32 %v7674_v27, %v7220_v22  ;;  %v7754_v55 = vmul.f32 %v7674_v27, %v7224_v6  ;;  %9053 = vst [vmem:[#allocation96_spill] sm:$0xff] %v7788_v5  ;;  %v9066_v5 = vld [vmem:[#allocation75_spill] sm:$0xff] }
 0x2a3   :  { %v7758_v56 = vmul.f32 %v7674_v27, %v7248_v43  ;;  %v7762_v29 = vmul.f32 %v7674_v27, %v7256_v11  ;;  %v7766_v7 = vmul.f32 %v7674_v27, %v7260_v13  ;;  %v7770_v22 = vmul.f32 %v7674_v27, %v7264_v10 }
 0x2a4   :  { %v7774_v6 = vmul.f32 %v7674_v27, %v7288_v60  ;;  %v7778_v43 = vmul.f32 %v7674_v27, %v7296_v20  ;;  %v7782_v11 = vmul.f32 %v7674_v27, %v7300_v1  ;;  %v7786_v13 = vmul.f32 %v7674_v27, %v7304_v59 }
 0x2a5   :  { %9047 = vst [vmem:[#allocation90_spill] sm:$0xff] %v7766_v7  ;;  %9048 = vst [vmem:[#allocation91_spill] sm:$0xff] %v7770_v22  ;;  %v4993_v10 = vmul.f32 %v7674_v27, %v7328_v8  ;;  %v4994_v60 = vmul.f32 %v7674_v27, %v7336_v15  ;;  %v4995_v20 = vmul.f32 %v7674_v27, %v7340_v32  ;;  %v9071_v7 = vld [vmem:[#allocation84_spill] sm:$0xff] }
 0x2a6   :  { %9049 = vst [vmem:[#allocation92_spill] sm:$0xff] %v7774_v6  ;;  %9050 = vst [vmem:[#allocation93_spill] sm:$0xff] %v7778_v43  ;;  %v4996_v53 = vmul.f32 %v7674_v27, %v7344_v24  ;;  %v4997_v1 = vmul.f32 %v7674_v27, %v7368_v40  ;;  %v4998_v59 = vmul.f32 %v7674_v27, %v7376_v50  ;;  %v9069_v43 = vld [vmem:[#allocation82_spill] sm:$0xff]  ;;  %v9070_v6 = vld [vmem:[#allocation83_spill] sm:$0xff] }
 0x2a7   :  { %9051 = vst [vmem:[#allocation94_spill] sm:$0xff] %v7782_v11  ;;  %9052 = vst [vmem:[#allocation95_spill] sm:$0xff] %v7786_v13  ;;  %v4999_v18 = vmul.f32 %v7674_v27, %v7380_v36  ;;  %v5000_v8 = vmul.f32 %v7674_v27, %v7384_v57  ;;  %v5001_v15 = vmul.f32 %v7674_v27, %v7408_v44  ;;  %v9067_v13 = vld [vmem:[#allocation76_spill] sm:$0xff]  ;;  %v9068_v11 = vld [vmem:[#allocation81_spill] sm:$0xff] }
 0x2a8   :  { %v5002_v32 = vmul.f32 %v7674_v27, %v7416_v52  ;;  %v5003_v24 = vmul.f32 %v7674_v27, %v7420_v45  ;;  %v5004_v40 = vmul.f32 %v7674_v27, %v7424_v28  ;;  %v5005_v50 = vmul.f32 %v7674_v27, %v7448_v46 }
 0x2a9   :  { %v5006_v36 = vmul.f32 %v7674_v27, %v7456_v63  ;;  %v5007_v57 = vmul.f32 %v7674_v27, %v9054_v58  ;;  %v5008_v44 = vmul.f32 %v7674_v27, %v9055_v33  ;;  %v5009_v52 = vmul.f32 %v7674_v27, %v9056_v26  ;;  %v9063_v58 = vld [vmem:[#allocation68_spill] sm:$0xff]  ;;  %v7838_v26 = vpop.permute.xlu1 %5089 }
 0x2aa   :  { %v5010_v45 = vmul.f32 %v7674_v27, %v9057_v25  ;;  %v5011_v28 = vmul.f32 %v7674_v27, %v9058_v41  ;;  %v5012_v46 = vmul.f32 %v7674_v27, %v9059_v17  ;;  %v5013_v63 = vmul.f32 %v7674_v27, %v9060_v34  ;;  %v9064_v25 = vld [vmem:[#allocation73_spill] sm:$0xff] }
 0x2ab   :  { %v5014_v42 = vmul.f32 %v7674_v27, %v9061_v12  ;;  %v5015_v23 = vmul.f32 %v7674_v27, %v9062_v51  ;;  %v5016_v33 = vmul.f32 %v7674_v27, %v9063_v58  ;;  %v5017_v41 = vmul.f32 %v7674_v27, %v9064_v25 }
 0x2ac   :  { %v5018_v17 = vmul.f32 %v7674_v27, %v9065_v48  ;;  %v5019_v34 = vmul.f32 %v7674_v27, %v9066_v5  ;;  %v5020_v12 = vmul.f32 %v7674_v27, %v9067_v13  ;;  %v5021_v51 = vmul.f32 %v7674_v27, %v9068_v11 }
 0x2ad   :  { %v5022_v58 = vmul.f32 %v7674_v27, %v9069_v43  ;;  %v5023_v22 = vmul.f32 %v7674_v27, %v9070_v6  ;;  %v5024_v25 = vmul.f32 %v7674_v27, %v9071_v7  ;;  %v5025_v48 = vmul.f32 %v7674_v27, %v7651_v2  ;;  %v9078_v11 = vld [vmem:[#allocation92_spill] sm:$0xff] }
 0x2ae   :  { %v7860_v5 = vadd.f32 %v7838_v26, %v7678_v54  ;;  %v7864_v13 = vadd.f32 %v7838_v26, %v7682_v14  ;;  %v7868_v43 = vadd.f32 %v7838_v26, %v7686_v38  ;;  %v7872_v6 = vadd.f32 %v7838_v26, %v7690_v30 }
 0x2af   :  { %v7876_v7 = vadd.f32 %v7838_v26, %v7694_v61  ;;  %v7880_v2 = vadd.f32 %v7838_v26, %v7698_v39  ;;  %v7884_v27 = vadd.f32 %v7838_v26, %v7702_v47  ;;  %v7888_v54 = vadd.f32 %v7838_v26, %v7706_v4 }
 0x2b0   :  { %v7892_v14 = vadd.f32 %v7838_v26, %v7710_v0  ;;  %v7896_v38 = vadd.f32 %v7838_v26, %v7714_v35  ;;  %v7900_v30 = vadd.f32 %v7838_v26, %v7718_v16  ;;  %v7904_v61 = vadd.f32 %v7838_v26, %v7722_v3 }
 0x2b1   :  { %v7908_v39 = vadd.f32 %v7838_v26, %v7726_v37  ;;  %v7912_v47 = vadd.f32 %v7838_v26, %v7730_v21  ;;  %v7916_v4 = vadd.f32 %v7838_v26, %v7734_v49  ;;  %v7920_v0 = vadd.f32 %v7838_v26, %v7738_v31  ;;  %v9075_v31 = vld [vmem:[#allocation90_spill] sm:$0xff] }
 0x2b2   :  { %v7924_v35 = vadd.f32 %v7838_v26, %v7742_v19  ;;  %v7928_v16 = vadd.f32 %v7838_v26, %v7746_v62  ;;  %v7932_v3 = vadd.f32 %v7838_v26, %v7750_v9  ;;  %v7936_v37 = vadd.f32 %v7838_v26, %v7754_v55  ;;  %v9077_v62 = vld [vmem:[#allocation91_spill] sm:$0xff] }
 0x2b3   :  { %v7940_v21 = vadd.f32 %v7838_v26, %v7758_v56  ;;  %v7944_v49 = vadd.f32 %v7838_v26, %v7762_v29  ;;  %v7948_v19 = vadd.f32 %v7838_v26, %v9075_v31  ;;  %v7952_v9 = vadd.f32 %v7838_v26, %v9077_v62 }
 0x2b4   :  { %9072 = vst [vmem:[#allocation51_spill] sm:$0xff] %v7936_v37  ;;  %v7956_v55 = vadd.f32 %v7838_v26, %v9078_v11  ;;  %v9079_v37 = vld [vmem:[#allocation93_spill] sm:$0xff]  ;;  %v7974_v62 = vadd.f32 %v7838_v26, %v4994_v60  ;;  %v7977_v11 = vadd.f32 %v7838_v26, %v4995_v20  ;;  %v7995_v60 = vadd.f32 %v7838_v26, %v5001_v15 }
 0x2b5   :  { %9073 = vst [vmem:[#allocation52_spill] sm:$0xff] %v7940_v21  ;;  %9074 = vst [vmem:[#allocation57_spill] sm:$0xff] %v7944_v49  ;;  %v7960_v56 = vadd.f32 %v7838_v26, %v9079_v37  ;;  %v9081_v21 = vld [vmem:[#allocation94_spill] sm:$0xff]  ;;  %v9082_v49 = vld [vmem:[#allocation95_spill] sm:$0xff]  ;;  %v7980_v37 = vadd.f32 %v7838_v26, %v4996_v53  ;;  %v7998_v20 = vadd.f32 %v7838_v26, %v5002_v32 }
 0x2b6   :  { %9076 = vst [vmem:[#allocation58_spill] sm:$0xff] %v7948_v19  ;;  %v7964_v29 = vadd.f32 %v7838_v26, %v9081_v21  ;;  %v7968_v31 = vadd.f32 %v7838_v26, %v9082_v49  ;;  %v7971_v19 = vadd.f32 %v7838_v26, %v4993_v10  ;;  %v7986_v21 = vadd.f32 %v7838_v26, %v4998_v59 }
 0x2b7   :  { %9080 = vst [vmem:[#allocation59_spill] sm:$0xff] %v7960_v56  ;;  %v7983_v56 = vadd.f32 %v7838_v26, %v4997_v1  ;;  %v7989_v49 = vadd.f32 %v7838_v26, %v4999_v18  ;;  %v7992_v10 = vadd.f32 %v7838_v26, %v5000_v8  ;;  %v8001_v53 = vadd.f32 %v7838_v26, %v5003_v24 }
 0x2b8   :  { %v8004_v1 = vadd.f32 %v7838_v26, %v5004_v40  ;;  %v8007_v59 = vadd.f32 %v7838_v26, %v5005_v50  ;;  %v8010_v18 = vadd.f32 %v7838_v26, %v5006_v36  ;;  %v8013_v8 = vadd.f32 %v7838_v26, %v5007_v57 }
 0x2b9   :  { %v8016_v15 = vadd.f32 %v7838_v26, %v5008_v44  ;;  %v8019_v32 = vadd.f32 %v7838_v26, %v5009_v52  ;;  %v8022_v24 = vadd.f32 %v7838_v26, %v5010_v45  ;;  %v8025_v40 = vadd.f32 %v7838_v26, %v5011_v28 }
 0x2ba   :  { %v8028_v50 = vadd.f32 %v7838_v26, %v5012_v46  ;;  %v8031_v36 = vadd.f32 %v7838_v26, %v5013_v63  ;;  %v8034_v57 = vadd.f32 %v7838_v26, %v5014_v42  ;;  %v8037_v44 = vadd.f32 %v7838_v26, %v5015_v23 }
 0x2bb   :  { %v8040_v52 = vadd.f32 %v7838_v26, %v5016_v33  ;;  %v8043_v45 = vadd.f32 %v7838_v26, %v5017_v41  ;;  %v8046_v28 = vadd.f32 %v7838_v26, %v5018_v17  ;;  %v8049_v46 = vadd.f32 %v7838_v26, %v5019_v34 }
 0x2bc   :  { %v8052_v63 = vadd.f32 %v7838_v26, %v5020_v12  ;;  %v8055_v42 = vadd.f32 %v7838_v26, %v5021_v51  ;;  %v8058_v23 = vadd.f32 %v7838_v26, %v5022_v58  ;;  %v8061_v33 = vadd.f32 %v7838_v26, %v5023_v22 }
 0x2bd   :  { %v8064_v41 = vadd.f32 %v7838_v26, %v5024_v25  ;;  %v8067_v17 = vadd.f32 %v7838_v26, %v5025_v48  ;;  %v5219_v34 = vmax.f32 %v7860_v5, 0.0  ;;  %v5220_v12 = vmax.f32 %v7864_v13, 0.0 }
 0x2be   :  { %9083 = vst [vmem:[#allocation60_spill] sm:$0xff] %v8052_v63  ;;  %9084 = vst [vmem:[#allocation65_spill] sm:$0xff] %v8058_v23  ;;  %v5221_v63 = vmax.f32 %v7868_v43, 0.0  ;;  %v5222_v51 = vmax.f32 %v7872_v6, 0.0  ;;  %v5223_v58 = vmax.f32 %v7876_v7, 0.0  ;;  %v5224_v23 = vmax.f32 %v7880_v2, 0.0 }
 0x2bf   :  { %9085 = vst [vmem:[#allocation66_spill] sm:$0xff] %v8064_v41  ;;  %v5225_v22 = vmax.f32 %v7884_v27, 0.0  ;;  %v5226_v25 = vmax.f32 %v7888_v54, 0.0  ;;  %v5227_v41 = vmax.f32 %v7892_v14, 0.0  ;;  %v5228_v26 = vmax.f32 %v7896_v38, 0.0  ;;  %5341 = vst [vmem:[%s8884_s5] sm:$0xff] %v5219_v34  ;;  %v9086_v14 = vld [vmem:[#allocation51_spill] sm:$0xff] }
 0x2c0   :  { %5342 = vst [vmem:[%s8884_s5 + $0x8] sm:$0xff] %v5220_v12  ;;  %v5229_v48 = vmax.f32 %v7900_v30, 0.0  ;;  %v5230_v5 = vmax.f32 %v7904_v61, 0.0  ;;  %v5231_v13 = vmax.f32 %v7908_v39, 0.0  ;;  %v5232_v43 = vmax.f32 %v7912_v47, 0.0  ;;  %5343 = vst [vmem:[%s8884_s5 + $0x10] sm:$0xff] %v5221_v63 }
 0x2c1   :  { %5344 = vst [vmem:[%s8884_s5 + $0x18] sm:$0xff] %v5222_v51  ;;  %5345 = vst [vmem:[%s8884_s5 + $0x20] sm:$0xff] %v5223_v58  ;;  %v5233_v6 = vmax.f32 %v7916_v4, 0.0  ;;  %v5234_v7 = vmax.f32 %v7920_v0, 0.0  ;;  %v5235_v2 = vmax.f32 %v7924_v35, 0.0  ;;  %v5236_v27 = vmax.f32 %v7928_v16, 0.0 }
 0x2c2   :  { %5346 = vst [vmem:[%s8884_s5 + $0x28] sm:$0xff] %v5224_v23  ;;  %5347 = vst [vmem:[%s8884_s5 + $0x30] sm:$0xff] %v5225_v22  ;;  %v5237_v54 = vmax.f32 %v7932_v3, 0.0  ;;  %v5238_v38 = vmax.f32 %v9086_v14, 0.0  ;;  %v9087_v30 = vld [vmem:[#allocation52_spill] sm:$0xff]  ;;  %v9088_v39 = vld [vmem:[#allocation57_spill] sm:$0xff] }
 0x2c3   :  { %5348 = vst [vmem:[%s8884_s5 + $0x38] sm:$0xff] %v5226_v25  ;;  %5349 = vst [vmem:[%s8884_s5 + $0x40] sm:$0xff] %v5227_v41  ;;  %v5239_v61 = vmax.f32 %v9087_v30, 0.0  ;;  %v5240_v47 = vmax.f32 %v9088_v39, 0.0  ;;  %v9089_v4 = vld [vmem:[#allocation58_spill] sm:$0xff]  ;;  %v5242_v35 = vmax.f32 %v7952_v9, 0.0 }
 0x2c4   :  { %5350 = vst [vmem:[%s8884_s5 + $0x48] sm:$0xff] %v5228_v26  ;;  %5351 = vst [vmem:[%s8884_s5 + $0x50] sm:$0xff] %v5229_v48  ;;  %v5241_v0 = vmax.f32 %v9089_v4, 0.0  ;;  %v5243_v16 = vmax.f32 %v7956_v55, 0.0  ;;  %v9090_v3 = vld [vmem:[#allocation59_spill] sm:$0xff]  ;;  %v5245_v9 = vmax.f32 %v7964_v29, 0.0 }
 0x2c5   :  { %5352 = vst [vmem:[%s8884_s5 + $0x58] sm:$0xff] %v5230_v5  ;;  %5353 = vst [vmem:[%s8884_s5 + $0x60] sm:$0xff] %v5231_v13  ;;  %v5244_v63 = vmax.f32 %v9090_v3, 0.0  ;;  %v5246_v55 = vmax.f32 %v7968_v31, 0.0  ;;  %v5247_v23 = vmax.f32 %v7971_v19, 0.0  ;;  %v5248_v41 = vmax.f32 %v7974_v62, 0.0 }
 0x2c6   :  { %5354 = vst [vmem:[%s8884_s5 + $0x68] sm:$0xff] %v5232_v43  ;;  %5355 = vst [vmem:[%s8884_s5 + $0x70] sm:$0xff] %v5233_v6  ;;  %v5249_v19 = vmax.f32 %v7977_v11, 0.0  ;;  %v5250_v29 = vmax.f32 %v7980_v37, 0.0  ;;  %v5251_v31 = vmax.f32 %v7983_v56, 0.0  ;;  %v5252_v62 = vmax.f32 %v7986_v21, 0.0 }
 0x2c7   :  { %5356 = vst [vmem:[%s8884_s5 + $0x78] sm:$0xff] %v5234_v7  ;;  %5357 = vst [vmem:[%s8884_s5 + $0x80] sm:$0xff] %v5235_v2  ;;  %v5253_v56 = vmax.f32 %v7989_v49, 0.0  ;;  %v5254_v11 = vmax.f32 %v7992_v10, 0.0  ;;  %v5255_v37 = vmax.f32 %v7995_v60, 0.0  ;;  %v5256_v21 = vmax.f32 %v7998_v20, 0.0 }
 0x2c8   :  { %5358 = vst [vmem:[%s8884_s5 + $0x88] sm:$0xff] %v5236_v27  ;;  %5359 = vst [vmem:[%s8884_s5 + $0x90] sm:$0xff] %v5237_v54  ;;  %v5257_v49 = vmax.f32 %v8001_v53, 0.0  ;;  %v5258_v10 = vmax.f32 %v8004_v1, 0.0  ;;  %v5259_v60 = vmax.f32 %v8007_v59, 0.0  ;;  %v5260_v20 = vmax.f32 %v8010_v18, 0.0 }
 0x2c9   :  { %5360 = vst [vmem:[%s8884_s5 + $0x98] sm:$0xff] %v5238_v38  ;;  %5361 = vst [vmem:[%s8884_s5 + $0xa0] sm:$0xff] %v5239_v61  ;;  %v5261_v53 = vmax.f32 %v8013_v8, 0.0  ;;  %v5262_v1 = vmax.f32 %v8016_v15, 0.0  ;;  %v5263_v59 = vmax.f32 %v8019_v32, 0.0  ;;  %v5264_v18 = vmax.f32 %v8022_v24, 0.0 }
 0x2ca   :  { %5362 = vst [vmem:[%s8884_s5 + $0xa8] sm:$0xff] %v5240_v47  ;;  %5363 = vst [vmem:[%s8884_s5 + $0xb0] sm:$0xff] %v5241_v0  ;;  %v5265_v8 = vmax.f32 %v8025_v40, 0.0  ;;  %v5266_v15 = vmax.f32 %v8028_v50, 0.0  ;;  %v5267_v32 = vmax.f32 %v8031_v36, 0.0  ;;  %v5268_v24 = vmax.f32 %v8034_v57, 0.0 }
 0x2cb   :  { %5364 = vst [vmem:[%s8884_s5 + $0xb8] sm:$0xff] %v5242_v35  ;;  %5365 = vst [vmem:[%s8884_s5 + $0xc0] sm:$0xff] %v5243_v16  ;;  %v5269_v40 = vmax.f32 %v8037_v44, 0.0  ;;  %v5270_v50 = vmax.f32 %v8040_v52, 0.0  ;;  %v5271_v36 = vmax.f32 %v8043_v45, 0.0  ;;  %v5272_v57 = vmax.f32 %v8046_v28, 0.0 }
 0x2cc   :  { %5366 = vst [vmem:[%s8884_s5 + $0xc8] sm:$0xff] %v5244_v63  ;;  %5367 = vst [vmem:[%s8884_s5 + $0xd0] sm:$0xff] %v5245_v9  ;;  %v5273_v44 = vmax.f32 %v8049_v46, 0.0  ;;  %v9091_v52 = vld [vmem:[#allocation60_spill] sm:$0xff]  ;;  %v5275_v28 = vmax.f32 %v8055_v42, 0.0  ;;  %v9092_v34 = vld [vmem:[#allocation65_spill] sm:$0xff] }
 0x2cd   :  { %5368 = vst [vmem:[%s8884_s5 + $0xd8] sm:$0xff] %v5246_v55  ;;  %5369 = vst [vmem:[%s8884_s5 + $0xe0] sm:$0xff] %v5247_v23  ;;  %v5274_v45 = vmax.f32 %v9091_v52, 0.0  ;;  %v5276_v12 = vmax.f32 %v9092_v34, 0.0  ;;  %v5277_v46 = vmax.f32 %v8061_v33, 0.0  ;;  %v9093_v42 = vld [vmem:[#allocation66_spill] sm:$0xff] }
 0x2ce   :  { %5370 = vst [vmem:[%s8884_s5 + $0xe8] sm:$0xff] %v5248_v41  ;;  %5371 = vst [vmem:[%s8884_s5 + $0xf0] sm:$0xff] %v5249_v19  ;;  %v5278_v51 = vmax.f32 %v9093_v42, 0.0  ;;  %v5279_v58 = vmax.f32 %v8067_v17, 0.0  ;;  %v9094_v33 = vld [vmem:[#allocation11_spill] sm:$0xff]  ;;  %v9095_v22 = vld [vmem:[#allocation96_spill] sm:$0xff] }
 0x2cf   :  { %5372 = vst [vmem:[%s8884_s5 + $0xf8] sm:$0xff] %v5250_v29  ;;  %5373 = vst [vmem:[%s8884_s5 + $0x100] sm:$0xff] %v5251_v31  ;;  %v8294_v25 = vmul.f32 %v9095_v22, %v9094_v33  ;;  %v9097_v17 = vld [vmem:[#allocation12_spill] sm:$0xff]  ;;  %v9099_v48 = vld [vmem:[#allocation13_spill] sm:$0xff] }
 0x2d0   :  { %5374 = vst [vmem:[%s8884_s5 + $0x108] sm:$0xff] %v5252_v62  ;;  %5375 = vst [vmem:[%s8884_s5 + $0x110] sm:$0xff] %v5253_v56  ;;  %v8310_v26 = vmul.f32 %v9095_v22, %v9097_v17  ;;  %v8314_v5 = vmul.f32 %v9095_v22, %v9099_v48  ;;  %v9101_v13 = vld [vmem:[#allocation14_spill] sm:$0xff]  ;;  %v9103_v6 = vld [vmem:[#allocation15_spill] sm:$0xff] }
 0x2d1   :  { %5376 = vst [vmem:[%s8884_s5 + $0x118] sm:$0xff] %v5254_v11  ;;  %5377 = vst [vmem:[%s8884_s5 + $0x120] sm:$0xff] %v5255_v37  ;;  %v8318_v43 = vmul.f32 %v9095_v22, %v9101_v13  ;;  %v8322_v7 = vmul.f32 %v9095_v22, %v9103_v6  ;;  %v9105_v2 = vld [vmem:[#allocation16_spill] sm:$0xff]  ;;  %v9106_v54 = vld [vmem:[#allocation17_spill] sm:$0xff] }
 0x2d2   :  { %5378 = vst [vmem:[%s8884_s5 + $0x128] sm:$0xff] %v5256_v21  ;;  %5379 = vst [vmem:[%s8884_s5 + $0x130] sm:$0xff] %v5257_v49  ;;  %v5031_v27 = vmul.f32 %v9095_v22, %v9105_v2  ;;  %v5032_v14 = vmul.f32 %v9095_v22, %v9106_v54  ;;  %v9107_v38 = vld [vmem:[#allocation18_spill] sm:$0xff]  ;;  %v9108_v61 = vld [vmem:[#allocation19_spill] sm:$0xff] }
 0x2d3   :  { %5380 = vst [vmem:[%s8884_s5 + $0x138] sm:$0xff] %v5258_v10  ;;  %5381 = vst [vmem:[%s8884_s5 + $0x140] sm:$0xff] %v5259_v60  ;;  %v5033_v30 = vmul.f32 %v9095_v22, %v9107_v38  ;;  %v5034_v39 = vmul.f32 %v9095_v22, %v9108_v61  ;;  %v9109_v47 = vld [vmem:[#allocation20_spill] sm:$0xff]  ;;  %v9110_v0 = vld [vmem:[#allocation21_spill] sm:$0xff] }
 0x2d4   :  { %5382 = vst [vmem:[%s8884_s5 + $0x148] sm:$0xff] %v5260_v20  ;;  %5383 = vst [vmem:[%s8884_s5 + $0x150] sm:$0xff] %v5261_v53  ;;  %v5035_v4 = vmul.f32 %v9095_v22, %v9109_v47  ;;  %v5036_v35 = vmul.f32 %v9095_v22, %v9110_v0  ;;  %v9111_v16 = vld [vmem:[#allocation22_spill] sm:$0xff]  ;;  %v9112_v63 = vld [vmem:[#allocation23_spill] sm:$0xff] }
 0x2d5   :  { %5384 = vst [vmem:[%s8884_s5 + $0x158] sm:$0xff] %v5262_v1  ;;  %5385 = vst [vmem:[%s8884_s5 + $0x160] sm:$0xff] %v5263_v59  ;;  %v5037_v3 = vmul.f32 %v9095_v22, %v9111_v16  ;;  %v5038_v9 = vmul.f32 %v9095_v22, %v9112_v63  ;;  %v9113_v55 = vld [vmem:[#allocation24_spill] sm:$0xff]  ;;  %v9114_v41 = vld [vmem:[#allocation25_spill] sm:$0xff] }
 0x2d6   :  { %5386 = vst [vmem:[%s8884_s5 + $0x168] sm:$0xff] %v5264_v18  ;;  %5387 = vst [vmem:[%s8884_s5 + $0x170] sm:$0xff] %v5265_v8  ;;  %v5039_v23 = vmul.f32 %v9095_v22, %v9113_v55  ;;  %v5040_v19 = vmul.f32 %v9095_v22, %v9114_v41  ;;  %v9115_v29 = vld [vmem:[#allocation26_spill] sm:$0xff]  ;;  %v9116_v62 = vld [vmem:[#allocation27_spill] sm:$0xff] }
 0x2d7   :  { %5388 = vst [vmem:[%s8884_s5 + $0x178] sm:$0xff] %v5266_v15  ;;  %5389 = vst [vmem:[%s8884_s5 + $0x180] sm:$0xff] %v5267_v32  ;;  %v5041_v31 = vmul.f32 %v9095_v22, %v9115_v29  ;;  %v5042_v56 = vmul.f32 %v9095_v22, %v9116_v62  ;;  %v9117_v11 = vld [vmem:[#allocation28_spill] sm:$0xff]  ;;  %v9118_v21 = vld [vmem:[#allocation29_spill] sm:$0xff] }
 0x2d8   :  { %5390 = vst [vmem:[%s8884_s5 + $0x188] sm:$0xff] %v5268_v24  ;;  %5391 = vst [vmem:[%s8884_s5 + $0x190] sm:$0xff] %v5269_v40  ;;  %v5043_v37 = vmul.f32 %v9095_v22, %v9117_v11  ;;  %v5044_v49 = vmul.f32 %v9095_v22, %v9118_v21  ;;  %v9119_v10 = vld [vmem:[#allocation30_spill] sm:$0xff]  ;;  %v9120_v20 = vld [vmem:[#allocation31_spill] sm:$0xff] }
 0x2d9   :  { %5392 = vst [vmem:[%s8884_s5 + $0x198] sm:$0xff] %v5270_v50  ;;  %5393 = vst [vmem:[%s8884_s5 + $0x1a0] sm:$0xff] %v5271_v36  ;;  %v5045_v60 = vmul.f32 %v9095_v22, %v9119_v10  ;;  %v5046_v53 = vmul.f32 %v9095_v22, %v9120_v20  ;;  %v9121_v1 = vld [vmem:[#allocation32_spill] sm:$0xff]  ;;  %v9122_v18 = vld [vmem:[#allocation33_spill] sm:$0xff] }
 0x2da   :  { %5394 = vst [vmem:[%s8884_s5 + $0x1a8] sm:$0xff] %v5272_v57  ;;  %9096 = vst [vmem:[#allocation67_spill] sm:$0xff] %v8294_v25  ;;  %v5047_v59 = vmul.f32 %v9095_v22, %v9121_v1  ;;  %v5048_v8 = vmul.f32 %v9095_v22, %v9122_v18  ;;  %v9123_v15 = vld [vmem:[#allocation34_spill] sm:$0xff]  ;;  %v9124_v24 = vld [vmem:[#allocation35_spill] sm:$0xff] }
 0x2db   :  { %5395 = vst [vmem:[%s8884_s5 + $0x1b0] sm:$0xff] %v5273_v44  ;;  %5396 = vst [vmem:[%s8884_s5 + $0x1b8] sm:$0xff] %v5274_v45  ;;  %v5049_v32 = vmul.f32 %v9095_v22, %v9123_v15  ;;  %v5050_v40 = vmul.f32 %v9095_v22, %v9124_v24  ;;  %v9125_v50 = vld [vmem:[#allocation36_spill] sm:$0xff]  ;;  %v9126_v57 = vld [vmem:[#allocation37_spill] sm:$0xff] }
 0x2dc   :  { %5397 = vst [vmem:[%s8884_s5 + $0x1c0] sm:$0xff] %v5275_v28  ;;  %5398 = vst [vmem:[%s8884_s5 + $0x1c8] sm:$0xff] %v5276_v12  ;;  %v5051_v36 = vmul.f32 %v9095_v22, %v9125_v50  ;;  %v5052_v44 = vmul.f32 %v9095_v22, %v9126_v57  ;;  %v9127_v52 = vld [vmem:[#allocation38_spill] sm:$0xff]  ;;  %v9128_v28 = vld [vmem:[#allocation39_spill] sm:$0xff] }
 0x2dd   :  { %9098 = vst [vmem:[#allocation68_spill] sm:$0xff] %v8310_v26  ;;  %9100 = vst [vmem:[#allocation73_spill] sm:$0xff] %v8314_v5  ;;  %v5053_v45 = vmul.f32 %v9095_v22, %v9127_v52  ;;  %v5054_v34 = vmul.f32 %v9095_v22, %v9128_v28  ;;  %v9129_v12 = vld [vmem:[#allocation40_spill] sm:$0xff]  ;;  %v9130_v42 = vld [vmem:[#allocation41_spill] sm:$0xff] }
 0x2de   :  { %9102 = vst [vmem:[#allocation74_spill] sm:$0xff] %v8318_v43  ;;  %9104 = vst [vmem:[#allocation75_spill] sm:$0xff] %v8322_v7  ;;  %v9132_v17 = vld [vmem:[#allocation43_spill] sm:$0xff]  ;;  %v9133_v13 = vld [vmem:[#allocation44_spill] sm:$0xff] }
 0x2df   :  { %5399 = vst [vmem:[%s8884_s5 + $0x1d0] sm:$0xff] %v5277_v46  ;;  %5400 = vst [vmem:[%s8884_s5 + $0x1d8] sm:$0xff] %v5278_v51  ;;  %v5055_v46 = vmul.f32 %v9095_v22, %v9129_v12  ;;  %v5056_v51 = vmul.f32 %v9095_v22, %v9130_v42  ;;  %v5058_v48 = vmul.f32 %v9095_v22, %v9132_v17  ;;  %v9134_v2 = vld [vmem:[#allocation45_spill] sm:$0xff]  ;;  %v9135_v38 = vld [vmem:[#allocation46_spill] sm:$0xff] }
 0x2e0   :  { %5401 = vst [vmem:[%s8884_s5 + $0x1e0] sm:$0xff] %v5279_v58  ;;  %v9131_v58 = vld [vmem:[#allocation42_spill] sm:$0xff]  ;;  %v5059_v6 = vmul.f32 %v9095_v22, %v9133_v13  ;;  %v5060_v54 = vmul.f32 %v9095_v22, %v9134_v2  ;;  %v5061_v61 = vmul.f32 %v9095_v22, %v9135_v38  ;;  %v9136_v47 = vld [vmem:[#allocation47_spill] sm:$0xff]  ;;  %v9137_v16 = vld [vmem:[#allocation48_spill] sm:$0xff] }
 0x2e1   :  { %v5057_v33 = vmul.f32 %v9095_v22, %v9131_v58  ;;  %v5062_v0 = vmul.f32 %v9095_v22, %v9136_v47  ;;  %v5063_v63 = vmul.f32 %v9095_v22, %v9137_v16  ;;  %v9138_v55 = vld [vmem:[#allocation49_spill] sm:$0xff]  ;;  %v9139_v29 = vld [vmem:[#allocation50_spill] sm:$0xff]  ;;  %v9142_v1 = vld [vmem:[#allocation55_spill] sm:$0xff] }
 0x2e2   :  { %v5064_v41 = vmul.f32 %v9095_v22, %v9138_v55  ;;  %v5065_v62 = vmul.f32 %v9095_v22, %v9139_v29  ;;  %v9140_v11 = vld [vmem:[#allocation53_spill] sm:$0xff]  ;;  %v9141_v10 = vld [vmem:[#allocation54_spill] sm:$0xff]  ;;  %v5068_v18 = vmul.f32 %v9095_v22, %v9142_v1  ;;  %v9143_v15 = vld [vmem:[#allocation56_spill] sm:$0xff] }
 0x2e3   :  { %v5066_v21 = vmul.f32 %v9095_v22, %v9140_v11  ;;  %v5067_v20 = vmul.f32 %v9095_v22, %v9141_v10  ;;  %v5069_v24 = vmul.f32 %v9095_v22, %v9143_v15  ;;  %v9144_v50 = vld [vmem:[#allocation61_spill] sm:$0xff]  ;;  %v9145_v52 = vld [vmem:[#allocation62_spill] sm:$0xff]  ;;  %v9146_v12 = vld [vmem:[#allocation63_spill] sm:$0xff]  ;;  %v8429_v15 = vpop.permute.xlu1 %5094 }
 0x2e4   :  { %v5070_v57 = vmul.f32 %v9095_v22, %v9144_v50  ;;  %v5071_v28 = vmul.f32 %v9095_v22, %v9145_v52  ;;  %v5072_v42 = vmul.f32 %v9095_v22, %v9146_v12  ;;  %v9147_v58 = vld [vmem:[#allocation64_spill] sm:$0xff]  ;;  %v9148_v13 = vld [vmem:[#allocation69_spill] sm:$0xff]  ;;  %v9149_v38 = vld [vmem:[#allocation70_spill] sm:$0xff]  ;;  %9153 = vst [vmem:[#allocation76_spill] sm:$0xff] %v8429_v15 }
 0x2e5   :  { %v5073_v17 = vmul.f32 %v9095_v22, %v9147_v58  ;;  %v5074_v2 = vmul.f32 %v9095_v22, %v9148_v13  ;;  %v5075_v47 = vmul.f32 %v9095_v22, %v9149_v38  ;;  %v9150_v16 = vld [vmem:[#allocation71_spill] sm:$0xff]  ;;  %v9151_v29 = vld [vmem:[#allocation72_spill] sm:$0xff]  ;;  %v9152_v10 = vld [vmem:[#allocation77_spill] sm:$0xff] }
 0x2e6   :  { %v5076_v55 = vmul.f32 %v9095_v22, %v9150_v16  ;;  %v5077_v11 = vmul.f32 %v9095_v22, %v9151_v29  ;;  %v5078_v1 = vmul.f32 %v9095_v22, %v9152_v10  ;;  %v9154_v50 = vld [vmem:[#allocation78_spill] sm:$0xff]  ;;  %v9155_v12 = vld [vmem:[#allocation79_spill] sm:$0xff]  ;;  %v9156_v13 = vld [vmem:[#allocation80_spill] sm:$0xff] }
 0x2e7   :  { %v5079_v52 = vmul.f32 %v9095_v22, %v9154_v50  ;;  %v5080_v58 = vmul.f32 %v9095_v22, %v9155_v12  ;;  %v5081_v38 = vmul.f32 %v9095_v22, %v9156_v13  ;;  %v9157_v7 = vld [vmem:[#allocation85_spill] sm:$0xff]  ;;  %v9158_v43 = vld [vmem:[#allocation86_spill] sm:$0xff]  ;;  %v9159_v5 = vld [vmem:[#allocation87_spill] sm:$0xff] }
 0x2e8   :  { %v5082_v16 = vmul.f32 %v9095_v22, %v9157_v7  ;;  %v5083_v29 = vmul.f32 %v9095_v22, %v9158_v43  ;;  %v5084_v10 = vmul.f32 %v9095_v22, %v9159_v5  ;;  %v9160_v26 = vld [vmem:[#allocation88_spill] sm:$0xff]  ;;  %v9161_v50 = vld [vmem:[#allocation89_spill] sm:$0xff]  ;;  %v9162_v12 = vld [vmem:[#allocation67_spill] sm:$0xff] }
 0x2e9   :  { %v5085_v15 = vmul.f32 %v9095_v22, %v9160_v26  ;;  %v5086_v25 = vmul.f32 %v9161_v50, %v9095_v22  ;;  %v9165_v43 = vld [vmem:[#allocation68_spill] sm:$0xff]  ;;  %v9167_v26 = vld [vmem:[#allocation73_spill] sm:$0xff]  ;;  %v9169_v50 = vld [vmem:[#allocation74_spill] sm:$0xff] }
 0x2eb   :  { %v9163_v13 = vld [vmem:[#allocation76_spill] sm:$0xff] }
 0x2ec   :  { %v8449_v7 = vadd.f32 %v9163_v13, %v9162_v12  ;;  %v8453_v5 = vadd.f32 %v9163_v13, %v9165_v43  ;;  %v8457_v22 = vadd.f32 %v9163_v13, %v9167_v26  ;;  %v8461_v12 = vadd.f32 %v9163_v13, %v9169_v50 }
 0x2ed   :  { %v8471_v26 = vadd.f32 %v9163_v13, %v5032_v14  ;;  %v8477_v50 = vadd.f32 %v9163_v13, %v5034_v39  ;;  %v8492_v14 = vadd.f32 %v9163_v13, %v5039_v23  ;;  %v8498_v39 = vadd.f32 %v9163_v13, %v5041_v31 }
 0x2ee   :  { %9164 = vst [vmem:[#allocation81_spill] sm:$0xff] %v8449_v7  ;;  %9166 = vst [vmem:[#allocation82_spill] sm:$0xff] %v8453_v5  ;;  %v9171_v7 = vld [vmem:[#allocation75_spill] sm:$0xff]  ;;  %v8468_v5 = vadd.f32 %v9163_v13, %v5031_v27  ;;  %v8489_v27 = vadd.f32 %v9163_v13, %v5038_v9  ;;  %v8510_v9 = vadd.f32 %v9163_v13, %v5045_v60 }
 0x2ef   :  { %9168 = vst [vmem:[#allocation83_spill] sm:$0xff] %v8457_v22  ;;  %9170 = vst [vmem:[#allocation84_spill] sm:$0xff] %v8461_v12  ;;  %v8465_v43 = vadd.f32 %v9163_v13, %v9171_v7  ;;  %v8474_v22 = vadd.f32 %v9163_v13, %v5033_v30  ;;  %v8480_v12 = vadd.f32 %v9163_v13, %v5035_v4 }
 0x2f0   :  { %v8483_v7 = vadd.f32 %v9163_v13, %v5036_v35  ;;  %v8495_v30 = vadd.f32 %v9163_v13, %v5040_v19  ;;  %v8501_v4 = vadd.f32 %v9163_v13, %v5042_v56  ;;  %v8504_v35 = vadd.f32 %v9163_v13, %v5043_v37 }
 0x2f1   :  { %9172 = vst [vmem:[#allocation90_spill] sm:$0xff] %v8465_v43  ;;  %v8486_v43 = vadd.f32 %v9163_v13, %v5037_v3  ;;  %v8507_v3 = vadd.f32 %v9163_v13, %v5044_v49  ;;  %v8513_v23 = vadd.f32 %v9163_v13, %v5046_v53  ;;  %v8516_v19 = vadd.f32 %v9163_v13, %v5047_v59 }
 0x2f2   :  { %v8519_v31 = vadd.f32 %v9163_v13, %v5048_v8  ;;  %v8522_v56 = vadd.f32 %v9163_v13, %v5049_v32  ;;  %v8525_v37 = vadd.f32 %v9163_v13, %v5050_v40  ;;  %v8528_v49 = vadd.f32 %v9163_v13, %v5051_v36 }
 0x2f3   :  { %v8531_v60 = vadd.f32 %v9163_v13, %v5052_v44  ;;  %v8534_v53 = vadd.f32 %v9163_v13, %v5053_v45  ;;  %v8537_v59 = vadd.f32 %v9163_v13, %v5054_v34  ;;  %v8540_v8 = vadd.f32 %v9163_v13, %v5055_v46 }
 0x2f4   :  { %v8543_v32 = vadd.f32 %v9163_v13, %v5056_v51  ;;  %v8546_v40 = vadd.f32 %v9163_v13, %v5057_v33  ;;  %v8549_v36 = vadd.f32 %v9163_v13, %v5058_v48  ;;  %v8552_v44 = vadd.f32 %v9163_v13, %v5059_v6 }
 0x2f5   :  { %v8555_v45 = vadd.f32 %v9163_v13, %v5060_v54  ;;  %v8558_v34 = vadd.f32 %v9163_v13, %v5061_v61  ;;  %v8561_v46 = vadd.f32 %v9163_v13, %v5062_v0  ;;  %v8564_v51 = vadd.f32 %v9163_v13, %v5063_v63 }
 0x2f6   :  { %v8567_v33 = vadd.f32 %v9163_v13, %v5064_v41  ;;  %v8570_v48 = vadd.f32 %v9163_v13, %v5065_v62  ;;  %v8573_v6 = vadd.f32 %v9163_v13, %v5066_v21  ;;  %v8576_v54 = vadd.f32 %v9163_v13, %v5067_v20 }
 0x2f7   :  { %v8579_v61 = vadd.f32 %v9163_v13, %v5068_v18  ;;  %v8582_v0 = vadd.f32 %v9163_v13, %v5069_v24  ;;  %v8585_v63 = vadd.f32 %v9163_v13, %v5070_v57  ;;  %v8588_v41 = vadd.f32 %v9163_v13, %v5071_v28 }
 0x2f8   :  { %v8591_v62 = vadd.f32 %v9163_v13, %v5072_v42  ;;  %v8594_v21 = vadd.f32 %v9163_v13, %v5073_v17  ;;  %v8597_v20 = vadd.f32 %v9163_v13, %v5074_v2  ;;  %v8600_v18 = vadd.f32 %v9163_v13, %v5075_v47 }
 0x2f9   :  { %v8603_v24 = vadd.f32 %v9163_v13, %v5076_v55  ;;  %v8606_v57 = vadd.f32 %v9163_v13, %v5077_v11  ;;  %v8609_v28 = vadd.f32 %v9163_v13, %v5078_v1  ;;  %v8612_v42 = vadd.f32 %v9163_v13, %v5079_v52 }
 0x2fa   :  { %v8615_v17 = vadd.f32 %v9163_v13, %v5080_v58  ;;  %v8618_v2 = vadd.f32 %v9163_v13, %v5081_v38  ;;  %v8621_v47 = vadd.f32 %v9163_v13, %v5082_v16  ;;  %v8624_v55 = vadd.f32 %v9163_v13, %v5083_v29  ;;  %v9181_v58 = vld [vmem:[#allocation81_spill] sm:$0xff]  ;;  %v9184_v16 = vld [vmem:[#allocation84_spill] sm:$0xff] }
 0x2fb   :  { %9173 = vst [vmem:[#allocation91_spill] sm:$0xff] %v8606_v57  ;;  %9174 = vst [vmem:[#allocation92_spill] sm:$0xff] %v8609_v28  ;;  %v8627_v11 = vadd.f32 %v9163_v13, %v5084_v10  ;;  %v8630_v1 = vadd.f32 %v9163_v13, %v5085_v15  ;;  %v8633_v52 = vadd.f32 %v9163_v13, %v5086_v25  ;;  %v9185_v57 = vld [vmem:[#allocation90_spill] sm:$0xff]  ;;  %v5286_v10 = vmax.f32 %v8471_v26, 0.0 }
 0x2fc   :  { %9175 = vst [vmem:[#allocation93_spill] sm:$0xff] %v8612_v42  ;;  %9176 = vst [vmem:[#allocation94_spill] sm:$0xff] %v8615_v17  ;;  %v5280_v17 = vmax.f32 %v9181_v58, 0.0  ;;  %v9182_v42 = vld [vmem:[#allocation82_spill] sm:$0xff]  ;;  %v5284_v29 = vmax.f32 %v9185_v57, 0.0  ;;  %v5287_v15 = vmax.f32 %v8474_v22, 0.0 }
 0x2fd   :  { %9177 = vst [vmem:[#allocation95_spill] sm:$0xff] %v8618_v2  ;;  %9178 = vst [vmem:[#allocation51_spill] sm:$0xff] %v8621_v47  ;;  %v5281_v38 = vmax.f32 %v9182_v42, 0.0  ;;  %v9183_v2 = vld [vmem:[#allocation83_spill] sm:$0xff]  ;;  %v5283_v47 = vmax.f32 %v9184_v16, 0.0  ;;  %v5289_v25 = vmax.f32 %v8480_v12, 0.0 }
 0x2fe   :  { %9179 = vst [vmem:[#allocation52_spill] sm:$0xff] %v8624_v55  ;;  %9180 = vst [vmem:[#allocation57_spill] sm:$0xff] %v8630_v1  ;;  %v5282_v28 = vmax.f32 %v9183_v2, 0.0  ;;  %v5285_v55 = vmax.f32 %v8468_v5, 0.0  ;;  %v5288_v1 = vmax.f32 %v8477_v50, 0.0  ;;  %v5290_v13 = vmax.f32 %v8483_v7, 0.0 }
 0x2ff   :  { %5402 = vst [vmem:[%s8884_s5 + $0x1e8] sm:$0xff] %v5280_v17  ;;  %5403 = vst [vmem:[%s8884_s5 + $0x1f0] sm:$0xff] %v5281_v38  ;;  %v5291_v5 = vmax.f32 %v8486_v43, 0.0  ;;  %v5292_v22 = vmax.f32 %v8489_v27, 0.0  ;;  %v5293_v12 = vmax.f32 %v8492_v14, 0.0  ;;  %v5294_v26 = vmax.f32 %v8495_v30, 0.0 }
 0x300   :  { %5404 = vst [vmem:[%s8884_s5 + $0x1f8] sm:$0xff] %v5282_v28  ;;  %5405 = vst [vmem:[%s8884_s5 + $0x200] sm:$0xff] %v5283_v47  ;;  %v5295_v43 = vmax.f32 %v8498_v39, 0.0  ;;  %v5296_v50 = vmax.f32 %v8501_v4, 0.0  ;;  %v5297_v7 = vmax.f32 %v8504_v35, 0.0  ;;  %v5298_v27 = vmax.f32 %v8507_v3, 0.0 }
 0x301   :  { %5406 = vst [vmem:[%s8884_s5 + $0x208] sm:$0xff] %v5284_v29  ;;  %5407 = vst [vmem:[%s8884_s5 + $0x210] sm:$0xff] %v5285_v55  ;;  %v5299_v14 = vmax.f32 %v8510_v9, 0.0  ;;  %v5300_v30 = vmax.f32 %v8513_v23, 0.0  ;;  %v5301_v39 = vmax.f32 %v8516_v19, 0.0  ;;  %v5302_v4 = vmax.f32 %v8519_v31, 0.0 }
 0x302   :  { %5408 = vst [vmem:[%s8884_s5 + $0x218] sm:$0xff] %v5286_v10  ;;  %5409 = vst [vmem:[%s8884_s5 + $0x220] sm:$0xff] %v5287_v15  ;;  %v5303_v35 = vmax.f32 %v8522_v56, 0.0  ;;  %v5304_v3 = vmax.f32 %v8525_v37, 0.0  ;;  %v5305_v9 = vmax.f32 %v8528_v49, 0.0  ;;  %v5306_v23 = vmax.f32 %v8531_v60, 0.0 }
 0x303   :  { %5410 = vst [vmem:[%s8884_s5 + $0x228] sm:$0xff] %v5288_v1  ;;  %5411 = vst [vmem:[%s8884_s5 + $0x230] sm:$0xff] %v5289_v25  ;;  %v5307_v19 = vmax.f32 %v8534_v53, 0.0  ;;  %v5308_v31 = vmax.f32 %v8537_v59, 0.0  ;;  %v5309_v56 = vmax.f32 %v8540_v8, 0.0  ;;  %v5310_v37 = vmax.f32 %v8543_v32, 0.0 }
 0x304   :  { %5412 = vst [vmem:[%s8884_s5 + $0x238] sm:$0xff] %v5290_v13  ;;  %5413 = vst [vmem:[%s8884_s5 + $0x240] sm:$0xff] %v5291_v5  ;;  %v5311_v49 = vmax.f32 %v8546_v40, 0.0  ;;  %v5312_v60 = vmax.f32 %v8549_v36, 0.0  ;;  %v5313_v53 = vmax.f32 %v8552_v44, 0.0  ;;  %v5314_v59 = vmax.f32 %v8555_v45, 0.0 }
 0x305   :  { %5414 = vst [vmem:[%s8884_s5 + $0x248] sm:$0xff] %v5292_v22  ;;  %5415 = vst [vmem:[%s8884_s5 + $0x250] sm:$0xff] %v5293_v12  ;;  %v5315_v8 = vmax.f32 %v8558_v34, 0.0  ;;  %v5316_v32 = vmax.f32 %v8561_v46, 0.0  ;;  %v5317_v40 = vmax.f32 %v8564_v51, 0.0  ;;  %v5318_v36 = vmax.f32 %v8567_v33, 0.0 }
 0x306   :  { %5416 = vst [vmem:[%s8884_s5 + $0x258] sm:$0xff] %v5294_v26  ;;  %5417 = vst [vmem:[%s8884_s5 + $0x260] sm:$0xff] %v5295_v43  ;;  %v5319_v44 = vmax.f32 %v8570_v48, 0.0  ;;  %v5320_v45 = vmax.f32 %v8573_v6, 0.0  ;;  %v5321_v34 = vmax.f32 %v8576_v54, 0.0  ;;  %v5322_v46 = vmax.f32 %v8579_v61, 0.0 }
 0x307   :  { %5418 = vst [vmem:[%s8884_s5 + $0x268] sm:$0xff] %v5296_v50  ;;  %5419 = vst [vmem:[%s8884_s5 + $0x270] sm:$0xff] %v5297_v7  ;;  %v5323_v51 = vmax.f32 %v8582_v0, 0.0  ;;  %v5324_v33 = vmax.f32 %v8585_v63, 0.0  ;;  %v5325_v48 = vmax.f32 %v8588_v41, 0.0  ;;  %v5326_v6 = vmax.f32 %v8591_v62, 0.0 }
 0x308   :  { %5420 = vst [vmem:[%s8884_s5 + $0x278] sm:$0xff] %v5298_v27  ;;  %5421 = vst [vmem:[%s8884_s5 + $0x280] sm:$0xff] %v5299_v14  ;;  %v5327_v54 = vmax.f32 %v8594_v21, 0.0  ;;  %v5328_v61 = vmax.f32 %v8597_v20, 0.0  ;;  %v5329_v0 = vmax.f32 %v8600_v18, 0.0  ;;  %v5330_v63 = vmax.f32 %v8603_v24, 0.0 }
 0x309   :  { %5422 = vst [vmem:[%s8884_s5 + $0x288] sm:$0xff] %v5300_v30  ;;  %5423 = vst [vmem:[%s8884_s5 + $0x290] sm:$0xff] %v5301_v39  ;;  %v9186_v41 = vld [vmem:[#allocation91_spill] sm:$0xff]  ;;  %v9187_v21 = vld [vmem:[#allocation92_spill] sm:$0xff]  ;;  %v5338_v58 = vmax.f32 %v8627_v11, 0.0  ;;  %v5340_v11 = vmax.f32 %v8633_v52, 0.0 }
 0x30a   :  { %5424 = vst [vmem:[%s8884_s5 + $0x298] sm:$0xff] %v5302_v4  ;;  %5425 = vst [vmem:[%s8884_s5 + $0x2a0] sm:$0xff] %v5303_v35  ;;  %v5331_v62 = vmax.f32 %v9186_v41, 0.0  ;;  %v5332_v20 = vmax.f32 %v9187_v21, 0.0  ;;  %v9188_v18 = vld [vmem:[#allocation93_spill] sm:$0xff]  ;;  %v9189_v57 = vld [vmem:[#allocation94_spill] sm:$0xff] }
 0x30b   :  { %5426 = vst [vmem:[%s8884_s5 + $0x2a8] sm:$0xff] %v5304_v3  ;;  %5427 = vst [vmem:[%s8884_s5 + $0x2b0] sm:$0xff] %v5305_v9  ;;  %v5333_v24 = vmax.f32 %v9188_v18, 0.0  ;;  %v5334_v28 = vmax.f32 %v9189_v57, 0.0  ;;  %v9190_v42 = vld [vmem:[#allocation95_spill] sm:$0xff]  ;;  %v9192_v55 = vld [vmem:[#allocation52_spill] sm:$0xff] }
 0x30c   :  { %5428 = vst [vmem:[%s8884_s5 + $0x2b8] sm:$0xff] %v5306_v23  ;;  %5429 = vst [vmem:[%s8884_s5 + $0x2c0] sm:$0xff] %v5307_v19  ;;  %v5335_v17 = vmax.f32 %v9190_v42, 0.0  ;;  %v9191_v2 = vld [vmem:[#allocation51_spill] sm:$0xff]  ;;  %v5337_v1 = vmax.f32 %v9192_v55, 0.0  ;;  %v9193_v38 = vld [vmem:[#allocation57_spill] sm:$0xff] }
 0x30d   :  { %5430 = vst [vmem:[%s8884_s5 + $0x2c8] sm:$0xff] %v5308_v31  ;;  %5431 = vst [vmem:[%s8884_s5 + $0x2d0] sm:$0xff] %v5309_v56  ;;  %v5336_v47 = vmax.f32 %v9191_v2, 0.0  ;;  %v5339_v16 = vmax.f32 %v9193_v38, 0.0 }
 0x30e   :  { %5432 = vst [vmem:[%s8884_s5 + $0x2d8] sm:$0xff] %v5310_v37  ;;  %5433 = vst [vmem:[%s8884_s5 + $0x2e0] sm:$0xff] %v5311_v49 }
 0x30f   :  { %5434 = vst [vmem:[%s8884_s5 + $0x2e8] sm:$0xff] %v5312_v60  ;;  %5435 = vst [vmem:[%s8884_s5 + $0x2f0] sm:$0xff] %v5313_v53 }
 0x310   :  { %5436 = vst [vmem:[%s8884_s5 + $0x2f8] sm:$0xff] %v5314_v59  ;;  %5437 = vst [vmem:[%s8884_s5 + $0x300] sm:$0xff] %v5315_v8 }
 0x311   :  { %5438 = vst [vmem:[%s8884_s5 + $0x308] sm:$0xff] %v5316_v32  ;;  %5439 = vst [vmem:[%s8884_s5 + $0x310] sm:$0xff] %v5317_v40 }
 0x312   :  { %5440 = vst [vmem:[%s8884_s5 + $0x318] sm:$0xff] %v5318_v36  ;;  %5441 = vst [vmem:[%s8884_s5 + $0x320] sm:$0xff] %v5319_v44 }
 0x313   :  { %5442 = vst [vmem:[%s8884_s5 + $0x328] sm:$0xff] %v5320_v45  ;;  %5443 = vst [vmem:[%s8884_s5 + $0x330] sm:$0xff] %v5321_v34 }
 0x314   :  { %5444 = vst [vmem:[%s8884_s5 + $0x338] sm:$0xff] %v5322_v46  ;;  %5445 = vst [vmem:[%s8884_s5 + $0x340] sm:$0xff] %v5323_v51 }
 0x315   :  { %5446 = vst [vmem:[%s8884_s5 + $0x348] sm:$0xff] %v5324_v33  ;;  %5447 = vst [vmem:[%s8884_s5 + $0x350] sm:$0xff] %v5325_v48 }
 0x316   :  { %5448 = vst [vmem:[%s8884_s5 + $0x358] sm:$0xff] %v5326_v6  ;;  %5449 = vst [vmem:[%s8884_s5 + $0x360] sm:$0xff] %v5327_v54 }
 0x317   :  { %5450 = vst [vmem:[%s8884_s5 + $0x368] sm:$0xff] %v5328_v61  ;;  %5451 = vst [vmem:[%s8884_s5 + $0x370] sm:$0xff] %v5329_v0 }
 0x318   :  { %5452 = vst [vmem:[%s8884_s5 + $0x378] sm:$0xff] %v5330_v63  ;;  %5453 = vst [vmem:[%s8884_s5 + $0x380] sm:$0xff] %v5331_v62 }
 0x319   :  { %5454 = vst [vmem:[%s8884_s5 + $0x388] sm:$0xff] %v5332_v20  ;;  %5455 = vst [vmem:[%s8884_s5 + $0x390] sm:$0xff] %v5333_v24 }
 0x31a   :  { %5456 = vst [vmem:[%s8884_s5 + $0x398] sm:$0xff] %v5334_v28  ;;  %5457 = vst [vmem:[%s8884_s5 + $0x3a0] sm:$0xff] %v5335_v17 }
 0x31b   :  { %5458 = vst [vmem:[%s8884_s5 + $0x3a8] sm:$0xff] %v5336_v47  ;;  %5459 = vst [vmem:[%s8884_s5 + $0x3b0] sm:$0xff] %v5337_v1 }
 0x31c   :  { %5460 = vst [vmem:[%s8884_s5 + $0x3b8] sm:$0xff] %v5338_v58  ;;  %5461 = vst [vmem:[%s8884_s5 + $0x3c0] sm:$0xff] %v5339_v16 }
 0x31d   :  { %5462 = vst [vmem:[%s8884_s5 + $0x3c8] sm:$0xff] %v5340_v11 }
 0x31e   :  { %5467 = vsyncpa [#allocation8], 1 }

// kernel: netconv_forward.10
= control target key start
LH: loop header
LB: loop body
LE: loop exit
PB: predicated region body
PF: predicated region fallthrough
CT: control target
= control target key end

     0   :  { %s6509_s0 = inlined_call_operand.vmem [shape: f32[32,144], index: 0, kind: input, shape index: {}]   ;;  %s6510_s1 = inlined_call_operand.vmem [shape: f32[32,1], index: 1, kind: input, shape index: {}]   ;;  %s6511_s2 = inlined_call_operand.vmem [shape: f32[32,1], index: 2, kind: input, shape index: {}]   ;;  %s6512_s3 = inlined_call_operand.vmem [shape: f32[144,1800], index: 3, kind: input, shape index: {}]   ;;  %s6513_s4 = inlined_call_operand.<no memory space> [shape: f32[], index: 4, kind: input, shape index: {}]   ;;  %s6514_s5 = inlined_call_operand.vmem [shape: f32[32,1920], index: 5, kind: output, shape index: {}]  }
   0x1   :  { %v4863_v0 = vstv %s6513_s4 }
   0x2   :  { %v4236_v1 = vld [vmem:[%s6512_s3 + $0x8] sm:$0xff]  ;;  %v4251_v2 = vld [vmem:[%s6512_s3 + $0x80] sm:$0xff]  ;;  %v4250_v5 = vld [vmem:[%s6512_s3 + $0x78] sm:$0xff]  ;;  %vm2995_vm0 = vcmask 130048  }
   0x3   :  { %v19_v3 = vld [vmem:[%s6512_s3] sm:$0xff]  ;;  %v4537_v4 = vpack.c.bf16 %v4251_v2, %v4236_v1  ;;  %v4238_v6 = vld [vmem:[%s6512_s3 + $0x18] sm:$0xff]  ;;  %v4253_v7 = vld [vmem:[%s6512_s3 + $0x90] sm:$0xff] }
   0x4   :  { %v4539_v8 = vpack.c.bf16 %v4250_v5, %v19_v3  ;;  %v4573_v9 = vpack.c.bf16 %v4253_v7, %v4238_v6  ;;  %v4266_v10 = vld [vmem:[%s6512_s3 + $0xf8] sm:$0xff]  ;;  %v4281_v11 = vld [vmem:[%s6512_s3 + $0x170] sm:$0xff]  ;;  %v4252_v14 = vld [vmem:[%s6512_s3 + $0x88] sm:$0xff] }
   0x5   :  { %v4237_v12 = vld [vmem:[%s6512_s3 + $0x10] sm:$0xff]  ;;  %4538 = vmatprep.subr.bf16.mxu0 %v4537_v4  ;;  %v4541_v13 = vpack.c.bf16 %v4281_v11, %v4266_v10  ;;  %v4280_v16 = vld [vmem:[%s6512_s3 + $0x168] sm:$0xff]  ;;  %v4283_v20 = vld [vmem:[%s6512_s3 + $0x180] sm:$0xff] }
   0x6   :  { %v4265_v15 = vld [vmem:[%s6512_s3 + $0xf0] sm:$0xff]  ;;  %4540 = vmatpush1.bf16.msra.mxu0 %v4539_v8  ;;  %4574 = vmatprep.subr.bf16.mxu1 %v4573_v9  ;;  %v4575_v17 = vpack.c.bf16 %v4252_v14, %v4237_v12  ;;  %v4268_v19 = vld [vmem:[%s6512_s3 + $0x108] sm:$0xff]  ;;  %v4311_v23 = vld [vmem:[%s6512_s3 + $0x260] sm:$0xff] }
   0x7   :  { %v4543_v18 = vpack.c.bf16 %v4280_v16, %v4265_v15  ;;  %v4296_v21 = vld [vmem:[%s6512_s3 + $0x1e8] sm:$0xff]  ;;  %4542 = vmatprep.subr.bf16.mxu0 %v4541_v13  ;;  %v4577_v22 = vpack.c.bf16 %v4283_v20, %v4268_v19  ;;  %v4267_v24 = vld [vmem:[%s6512_s3 + $0x100] sm:$0xff]  ;;  %v4282_v25 = vld [vmem:[%s6512_s3 + $0x178] sm:$0xff] }
   0x8   :  { %4576 = vmatpush1.bf16.msra.mxu1 %v4575_v17  ;;  %v4545_v26 = vpack.c.bf16 %v4311_v23, %v4296_v21  ;;  %v4579_v27 = vpack.c.bf16 %v4282_v25, %v4267_v24  ;;  %v4295_v28 = vld [vmem:[%s6512_s3 + $0x1e0] sm:$0xff]  ;;  %v4310_v29 = vld [vmem:[%s6512_s3 + $0x258] sm:$0xff]  ;;  %v4313_v31 = vld [vmem:[%s6512_s3 + $0x270] sm:$0xff] }
   0x9   :  { %v4298_v30 = vld [vmem:[%s6512_s3 + $0x1f8] sm:$0xff]  ;;  %4578 = vmatprep.subr.bf16.mxu1 %v4577_v22  ;;  %v4341_v33 = vld [vmem:[%s6512_s3 + $0x350] sm:$0xff]  ;;  %v4547_v34 = vpack.c.bf16 %v4310_v29, %v4295_v28  ;;  %v4312_v37 = vld [vmem:[%s6512_s3 + $0x268] sm:$0xff] }
   0xa   :  { %v4326_v32 = vld [vmem:[%s6512_s3 + $0x2d8] sm:$0xff]  ;;  %4544 = vmatpush1.bf16.msra.mxu0 %v4543_v18  ;;  %v4581_v35 = vpack.c.bf16 %v4313_v31, %v4298_v30  ;;  %v4297_v36 = vld [vmem:[%s6512_s3 + $0x1f0] sm:$0xff]  ;;  %v4340_v40 = vld [vmem:[%s6512_s3 + $0x348] sm:$0xff] }
   0xb   :  { %v4325_v38 = vld [vmem:[%s6512_s3 + $0x2d0] sm:$0xff]  ;;  %4546 = vmatprep.subr.bf16.mxu0 %v4545_v26  ;;  %v4549_v39 = vpack.c.bf16 %v4341_v33, %v4326_v32  ;;  %v4328_v41 = vld [vmem:[%s6512_s3 + $0x2e8] sm:$0xff]  ;;  %v4343_v42 = vld [vmem:[%s6512_s3 + $0x360] sm:$0xff]  ;;  %v4583_v43 = vpack.c.bf16 %v4312_v37, %v4297_v36 }
   0xc   :  { %4580 = vmatpush1.bf16.msra.mxu1 %v4579_v27  ;;  %v4356_v44 = vld [vmem:[%s6512_s3 + $0x3c8] sm:$0xff]  ;;  %v4371_v45 = vld [vmem:[%s6512_s3 + $0x440] sm:$0xff]  ;;  %v4585_v46 = vpack.c.bf16 %v4343_v42, %v4328_v41  ;;  %v4342_v48 = vld [vmem:[%s6512_s3 + $0x358] sm:$0xff]  ;;  %v4551_v49 = vpack.c.bf16 %v4340_v40, %v4325_v38 }
   0xd   :  { %4582 = vmatprep.subr.bf16.mxu1 %v4581_v35  ;;  %v4327_v47 = vld [vmem:[%s6512_s3 + $0x2e0] sm:$0xff]  ;;  %v4358_v50 = vld [vmem:[%s6512_s3 + $0x3d8] sm:$0xff]  ;;  %v4373_v51 = vld [vmem:[%s6512_s3 + $0x450] sm:$0xff]  ;;  %v4553_v52 = vpack.c.bf16 %v4371_v45, %v4356_v44 }
   0xe   :  { %4548 = vmatpush1.bf16.msra.mxu0 %v4547_v34  ;;  %v4355_v53 = vld [vmem:[%s6512_s3 + $0x3c0] sm:$0xff]  ;;  %v4370_v54 = vld [vmem:[%s6512_s3 + $0x438] sm:$0xff]  ;;  %v4587_v55 = vpack.c.bf16 %v4342_v48, %v4327_v47  ;;  %v4401_v57 = vld [vmem:[%s6512_s3 + $0x530] sm:$0xff]  ;;  %v4589_v58 = vpack.c.bf16 %v4373_v51, %v4358_v50 }
   0xf   :  { %4550 = vmatprep.subr.bf16.mxu0 %v4549_v39  ;;  %v4386_v56 = vld [vmem:[%s6512_s3 + $0x4b8] sm:$0xff]  ;;  %v4357_v59 = vld [vmem:[%s6512_s3 + $0x3d0] sm:$0xff]  ;;  %v4372_v60 = vld [vmem:[%s6512_s3 + $0x448] sm:$0xff]  ;;  %v4555_v61 = vpack.c.bf16 %v4370_v54, %v4355_v53 }
  0x10   :  { %4584 = vmatpush1.bf16.msra.mxu1 %v4583_v43  ;;  %v4388_v62 = vld [vmem:[%s6512_s3 + $0x4c8] sm:$0xff]  ;;  %v4403_v63 = vld [vmem:[%s6512_s3 + $0x540] sm:$0xff]  ;;  %v4557_v1 = vpack.c.bf16 %v4401_v57, %v4386_v56  ;;  %v4385_v2 = vld [vmem:[%s6512_s3 + $0x4b0] sm:$0xff]  ;;  %v4591_v4 = vpack.c.bf16 %v4372_v60, %v4357_v59 }
  0x11   :  { %4586 = vmatprep.subr.bf16.mxu1 %v4585_v46  ;;  %v4400_v3 = vld [vmem:[%s6512_s3 + $0x528] sm:$0xff]  ;;  %v4431_v6 = vld [vmem:[%s6512_s3 + $0x620] sm:$0xff]  ;;  %v4593_v7 = vpack.c.bf16 %v4403_v63, %v4388_v62  ;;  %v4402_v9 = vld [vmem:[%s6512_s3 + $0x538] sm:$0xff] }
  0x12   :  { %4552 = vmatpush1.bf16.msra.mxu0 %v4551_v49  ;;  %v4416_v5 = vld [vmem:[%s6512_s3 + $0x5a8] sm:$0xff]  ;;  %v4387_v8 = vld [vmem:[%s6512_s3 + $0x4c0] sm:$0xff]  ;;  %v4559_v10 = vpack.c.bf16 %v4400_v3, %v4385_v2  ;;  %v4418_v11 = vld [vmem:[%s6512_s3 + $0x5b8] sm:$0xff] }
  0x13   :  { %4554 = vmatprep.subr.bf16.mxu0 %v4553_v52  ;;  %v4433_v12 = vld [vmem:[%s6512_s3 + $0x630] sm:$0xff]  ;;  %v4561_v13 = vpack.c.bf16 %v4431_v6, %v4416_v5  ;;  %v4415_v14 = vld [vmem:[%s6512_s3 + $0x5a0] sm:$0xff]  ;;  %v4430_v15 = vld [vmem:[%s6512_s3 + $0x618] sm:$0xff]  ;;  %v4595_v16 = vpack.c.bf16 %v4402_v9, %v4387_v8 }
  0x14   :  { %4588 = vmatpush1.bf16.msra.mxu1 %v4587_v55  ;;  %v4446_v17 = vld [vmem:[%s6512_s3 + $0x698] sm:$0xff]  ;;  %v4461_v18 = vld [vmem:[%s6512_s3 + $0x710] sm:$0xff]  ;;  %v5036_v19 = vld [vmem:[%s6509_s0 + $0x8] sm:$0xff]  ;;  %v4597_v20 = vpack.c.bf16 %v4433_v12, %v4418_v11  ;;  %v4563_v23 = vpack.c.bf16 %v4430_v15, %v4415_v14 }
  0x15   :  { %4590 = vmatprep.subr.bf16.mxu1 %v4589_v58  ;;  %v4417_v21 = vld [vmem:[%s6512_s3 + $0x5b0] sm:$0xff]  ;;  %v4432_v22 = vld [vmem:[%s6512_s3 + $0x628] sm:$0xff]  ;;  %4505 = vmatprep.mubr.msk.f32.mxu0 %vm2995_vm0, %v5036_v19  ;;  %v4463_v25 = vld [vmem:[%s6512_s3 + $0x720] sm:$0xff]  ;;  %v4565_v26 = vpack.c.bf16 %v4461_v18, %v4446_v17 }
  0x16   :  { %4556 = vmatpush1.bf16.msra.mxu0 %v4555_v61  ;;  %v4448_v24 = vld [vmem:[%s6512_s3 + $0x6a8] sm:$0xff]  ;;  %4509 = vmatprep.mubr.msk.f32.mxu1 %vm2995_vm0, %v5036_v19  ;;  %v4445_v27 = vld [vmem:[%s6512_s3 + $0x690] sm:$0xff]  ;;  %v4599_v29 = vpack.c.bf16 %v4432_v22, %v4417_v21  ;;  %v4491_v31 = vld [vmem:[%s6512_s3 + $0x800] sm:$0xff] }
  0x17   :  { %4558 = vmatprep.subr.bf16.mxu0 %v4557_v1  ;;  %v4460_v28 = vld [vmem:[%s6512_s3 + $0x708] sm:$0xff]  ;;  %v4601_v32 = vpack.c.bf16 %v4463_v25, %v4448_v24  ;;  %v4447_v33 = vld [vmem:[%s6512_s3 + $0x6a0] sm:$0xff]  ;;  %v4462_v34 = vld [vmem:[%s6512_s3 + $0x718] sm:$0xff] }
  0x18   :  { %4592 = vmatpush1.bf16.msra.mxu1 %v4591_v4  ;;  %v4476_v30 = vld [vmem:[%s6512_s3 + $0x788] sm:$0xff]  ;;  %v4567_v35 = vpack.c.bf16 %v4460_v28, %v4445_v27  ;;  %v4478_v36 = vld [vmem:[%s6512_s3 + $0x798] sm:$0xff]  ;;  %v4493_v37 = vld [vmem:[%s6512_s3 + $0x810] sm:$0xff]  ;;  %v4603_v41 = vpack.c.bf16 %v4462_v34, %v4447_v33 }
  0x19   :  { %4594 = vmatprep.subr.bf16.mxu1 %v4593_v7  ;;  %v4569_v38 = vpack.c.bf16 %v4491_v31, %v4476_v30  ;;  %v4475_v39 = vld [vmem:[%s6512_s3 + $0x780] sm:$0xff]  ;;  %v4490_v40 = vld [vmem:[%s6512_s3 + $0x7f8] sm:$0xff]  ;;  %v4240_v42 = vld [vmem:[%s6512_s3 + $0x28] sm:$0xff]  ;;  %v4605_v44 = vpack.c.bf16 %v4493_v37, %v4478_v36 }
  0x1a   :  { %4560 = vmatpush1.bf16.msra.mxu0 %v4559_v10  ;;  %v4255_v43 = vld [vmem:[%s6512_s3 + $0xa0] sm:$0xff]  ;;  %v4477_v45 = vld [vmem:[%s6512_s3 + $0x790] sm:$0xff]  ;;  %v4492_v46 = vld [vmem:[%s6512_s3 + $0x808] sm:$0xff]  ;;  %v4571_v47 = vpack.c.bf16 %v4490_v40, %v4475_v39 }
  0x1b   :  { %4562 = vmatprep.subr.bf16.mxu0 %v4561_v13  ;;  %v4242_v48 = vld [vmem:[%s6512_s3 + $0x38] sm:$0xff]  ;;  %v4257_v49 = vld [vmem:[%s6512_s3 + $0xb0] sm:$0xff]  ;;  %v4609_v50 = vpack.c.bf16 %v4255_v43, %v4240_v42  ;;  %v4239_v51 = vld [vmem:[%s6512_s3 + $0x20] sm:$0xff]  ;;  %v4607_v53 = vpack.c.bf16 %v4492_v46, %v4477_v45 }
  0x1c   :  { %4596 = vmatpush1.bf16.msra.mxu1 %v4595_v16  ;;  %v4254_v52 = vld [vmem:[%s6512_s3 + $0x98] sm:$0xff]  ;;  %v4285_v55 = vld [vmem:[%s6512_s3 + $0x190] sm:$0xff]  ;;  %v4645_v56 = vpack.c.bf16 %v4257_v49, %v4242_v48  ;;  %v4256_v58 = vld [vmem:[%s6512_s3 + $0xa8] sm:$0xff] }
  0x1d   :  { %4598 = vmatprep.subr.bf16.mxu1 %v4597_v20  ;;  %v4270_v54 = vld [vmem:[%s6512_s3 + $0x118] sm:$0xff]  ;;  %v4241_v57 = vld [vmem:[%s6512_s3 + $0x30] sm:$0xff]  ;;  %v5123_v59 = vld [vmem:[%s6509_s0] sm:$0xff]  ;;  %v4611_v60 = vpack.c.bf16 %v4254_v52, %v4239_v51 }
  0x1e   :  { %4564 = vmatpush1.bf16.msra.mxu0 %v4563_v23  ;;  %v4272_v61 = vld [vmem:[%s6512_s3 + $0x128] sm:$0xff]  ;;  %v4287_v62 = vld [vmem:[%s6512_s3 + $0x1a0] sm:$0xff]  ;;  %v4613_v63 = vpack.c.bf16 %v4285_v55, %v4270_v54  ;;  %v4269_v1 = vld [vmem:[%s6512_s3 + $0x110] sm:$0xff]  ;;  %v4647_v3 = vpack.c.bf16 %v4256_v58, %v4241_v57 }
  0x1f   :  { %4566 = vmatprep.subr.bf16.mxu0 %v4565_v26  ;;  %v4284_v2 = vld [vmem:[%s6512_s3 + $0x188] sm:$0xff]  ;;  %v4315_v5 = vld [vmem:[%s6512_s3 + $0x280] sm:$0xff]  ;;  %v4649_v6 = vpack.c.bf16 %v4287_v62, %v4272_v61  ;;  %v4286_v8 = vld [vmem:[%s6512_s3 + $0x198] sm:$0xff] }
  0x20   :  { %4600 = vmatpush1.bf16.msra.mxu1 %v4599_v29  ;;  %v4300_v4 = vld [vmem:[%s6512_s3 + $0x208] sm:$0xff]  ;;  %v4271_v7 = vld [vmem:[%s6512_s3 + $0x120] sm:$0xff]  ;;  %v5153_v9 = vld [vmem:[%s6509_s0 + $0x18] sm:$0xff]  ;;  %v4615_v10 = vpack.c.bf16 %v4284_v2, %v4269_v1 }
  0x21   :  { %4602 = vmatprep.subr.bf16.mxu1 %v4601_v32  ;;  %v4302_v11 = vld [vmem:[%s6512_s3 + $0x218] sm:$0xff]  ;;  %v4317_v12 = vld [vmem:[%s6512_s3 + $0x290] sm:$0xff]  ;;  %v4617_v14 = vpack.c.bf16 %v4315_v5, %v4300_v4  ;;  %v4299_v15 = vld [vmem:[%s6512_s3 + $0x200] sm:$0xff]  ;;  %v4651_v17 = vpack.c.bf16 %v4286_v8, %v4271_v7 }
  0x22   :  { %4568 = vmatpush1.bf16.msra.mxu0 %v4567_v35  ;;  %v5166_v13 = vld [vmem:[%s6509_s0 + $0x10] sm:$0xff]  ;;  %v4314_v16 = vld [vmem:[%s6512_s3 + $0x278] sm:$0xff]  ;;  %v5186_v21 = vld [vmem:[%s6509_s0 + $0x28] sm:$0xff]  ;;  %v4653_v22 = vpack.c.bf16 %v4317_v12, %v4302_v11 }
  0x23   :  { %4570 = vmatprep.subr.bf16.mxu0 %v4569_v38  ;;  %v4330_v18 = vld [vmem:[%s6512_s3 + $0x2f8] sm:$0xff]  ;;  %v4345_v20 = vld [vmem:[%s6512_s3 + $0x370] sm:$0xff]  ;;  %v4316_v24 = vld [vmem:[%s6512_s3 + $0x288] sm:$0xff]  ;;  %v4619_v25 = vpack.c.bf16 %v4314_v16, %v4299_v15 }
  0x24   :  { %4604 = vmatpush1.bf16.msra.mxu1 %v4603_v41  ;;  %v4301_v23 = vld [vmem:[%s6512_s3 + $0x210] sm:$0xff]  ;;  %v4332_v26 = vld [vmem:[%s6512_s3 + $0x308] sm:$0xff]  ;;  %v4347_v27 = vld [vmem:[%s6512_s3 + $0x380] sm:$0xff]  ;;  %v4621_v29 = vpack.c.bf16 %v4345_v20, %v4330_v18 }
  0x25   :  { %4606 = vmatprep.subr.bf16.mxu1 %v4605_v44  ;;  %v5206_v28 = vld [vmem:[%s6509_s0 + $0x20] sm:$0xff]  ;;  %v4329_v30 = vld [vmem:[%s6512_s3 + $0x2f0] sm:$0xff]  ;;  %v4344_v31 = vld [vmem:[%s6512_s3 + $0x368] sm:$0xff]  ;;  %v4655_v32 = vpack.c.bf16 %v4316_v24, %v4301_v23  ;;  %v4657_v36 = vpack.c.bf16 %v4347_v27, %v4332_v26 }
  0x26   :  { %4572 = vmatpush1.bf16.msra.mxu0 %v4571_v47  ;;  %v4360_v33 = vld [vmem:[%s6512_s3 + $0x3e8] sm:$0xff]  ;;  %v4375_v34 = vld [vmem:[%s6512_s3 + $0x460] sm:$0xff]  ;;  %v5226_v35 = vld [vmem:[%s6509_s0 + $0x38] sm:$0xff]  ;;  %v4623_v39 = vpack.c.bf16 %v4344_v31, %v4329_v30 }
  0x27   :  { %4610 = vmatprep.subr.bf16.mxu0 %v4609_v50  ;;  %v4331_v37 = vld [vmem:[%s6512_s3 + $0x300] sm:$0xff]  ;;  %v4346_v38 = vld [vmem:[%s6512_s3 + $0x378] sm:$0xff]  ;;  %v4377_v41 = vld [vmem:[%s6512_s3 + $0x470] sm:$0xff]  ;;  %v4625_v43 = vpack.c.bf16 %v4375_v34, %v4360_v33 }
  0x28   :  { %4608 = vmatpush1.bf16.msra.mxu1 %v4607_v53  ;;  %v4362_v40 = vld [vmem:[%s6512_s3 + $0x3f8] sm:$0xff]  ;;  %v5246_v42 = vld [vmem:[%s6509_s0 + $0x30] sm:$0xff]  ;;  %v4359_v44 = vld [vmem:[%s6512_s3 + $0x3e0] sm:$0xff]  ;;  %v4659_v46 = vpack.c.bf16 %v4346_v38, %v4331_v37 }
  0x29   :  { %3073 = vmatmul.mubr.f32.vlgmr.msra.gmra.mrb[0].mxu0 %v5123_v59  ;;  %4646 = vmatprep.subr.bf16.mxu1 %v4645_v56  ;;  %v4374_v45 = vld [vmem:[%s6512_s3 + $0x458] sm:$0xff]  ;;  %v4405_v48 = vld [vmem:[%s6512_s3 + $0x550] sm:$0xff]  ;;  %v4661_v49 = vpack.c.bf16 %v4377_v41, %v4362_v40  ;;  %v4376_v51 = vld [vmem:[%s6512_s3 + $0x468] sm:$0xff] }
  0x2a   :  { %4612 = vmatpush1.bf16.msra.mxu0 %v4611_v60  ;;  %4506 = vmatprep.mubr.msk.f32.mxu0 %vm2995_vm0, %v5153_v9  ;;  %v4390_v47 = vld [vmem:[%s6512_s3 + $0x4d8] sm:$0xff]  ;;  %v4361_v50 = vld [vmem:[%s6512_s3 + $0x3f0] sm:$0xff]  ;;  %v4627_v52 = vpack.c.bf16 %v4374_v45, %v4359_v44  ;;  %v4392_v53 = vld [vmem:[%s6512_s3 + $0x4e8] sm:$0xff] }
  0x2b   :  { %3162 = vmatmul.mubr.f32.vlgmr.msra.gmra.mrb[0].mxu1 %v5123_v59  ;;  %4614 = vmatprep.subr.bf16.mxu0 %v4613_v63  ;;  %v4407_v54 = vld [vmem:[%s6512_s3 + $0x560] sm:$0xff]  ;;  %v4629_v55 = vpack.c.bf16 %v4405_v48, %v4390_v47  ;;  %v4389_v56 = vld [vmem:[%s6512_s3 + $0x4d0] sm:$0xff]  ;;  %v4404_v57 = vld [vmem:[%s6512_s3 + $0x548] sm:$0xff]  ;;  %v4663_v58 = vpack.c.bf16 %v4376_v51, %v4361_v50 }
  0x2c   :  { %4648 = vmatpush1.bf16.msra.mxu1 %v4647_v3  ;;  %4510 = vmatprep.mubr.msk.f32.mxu1 %vm2995_vm0, %v5153_v9  ;;  %v4420_v60 = vld [vmem:[%s6512_s3 + $0x5c8] sm:$0xff]  ;;  %v4435_v61 = vld [vmem:[%s6512_s3 + $0x640] sm:$0xff]  ;;  %v4665_v62 = vpack.c.bf16 %v4407_v54, %v4392_v53  ;;  %v4406_v1 = vld [vmem:[%s6512_s3 + $0x558] sm:$0xff]  ;;  %v4631_v2 = vpack.c.bf16 %v4404_v57, %v4389_v56 }
  0x2d   :  { %4650 = vmatprep.subr.bf16.mxu1 %v4649_v6  ;;  %3079 = vmatmul.mubr.f32.gmra.mrb[2].mxu0 %v5166_v13  ;;  %v4391_v63 = vld [vmem:[%s6512_s3 + $0x4e0] sm:$0xff]  ;;  %v4422_v3 = vld [vmem:[%s6512_s3 + $0x5d8] sm:$0xff]  ;;  %v4437_v4 = vld [vmem:[%s6512_s3 + $0x650] sm:$0xff]  ;;  %v4633_v5 = vpack.c.bf16 %v4435_v61, %v4420_v60 }
  0x2e   :  { %4616 = vmatpush1.bf16.msra.mxu0 %v4615_v10  ;;  %4507 = vmatprep.mubr.msk.f32.mxu0 %vm2995_vm0, %v5186_v21  ;;  %v4419_v6 = vld [vmem:[%s6512_s3 + $0x5c0] sm:$0xff]  ;;  %v4434_v7 = vld [vmem:[%s6512_s3 + $0x638] sm:$0xff]  ;;  %v4667_v8 = vpack.c.bf16 %v4406_v1, %v4391_v63  ;;  %v4465_v11 = vld [vmem:[%s6512_s3 + $0x730] sm:$0xff]  ;;  %v4669_v12 = vpack.c.bf16 %v4437_v4, %v4422_v3 }
  0x2f   :  { %4618 = vmatprep.subr.bf16.mxu0 %v4617_v14  ;;  %3168 = vmatmul.mubr.f32.gmra.mrb[2].mxu1 %v5166_v13  ;;  %v4450_v10 = vld [vmem:[%s6512_s3 + $0x6b8] sm:$0xff]  ;;  %v4421_v14 = vld [vmem:[%s6512_s3 + $0x5d0] sm:$0xff]  ;;  %v4436_v15 = vld [vmem:[%s6512_s3 + $0x648] sm:$0xff]  ;;  %v4635_v16 = vpack.c.bf16 %v4434_v7, %v4419_v6 }
  0x30   :  { %4652 = vmatpush1.bf16.msra.mxu1 %v4651_v17  ;;  %4511 = vmatprep.mubr.msk.f32.mxu1 %vm2995_vm0, %v5186_v21  ;;  %v4452_v17 = vld [vmem:[%s6512_s3 + $0x6c8] sm:$0xff]  ;;  %v4467_v18 = vld [vmem:[%s6512_s3 + $0x740] sm:$0xff]  ;;  %v4637_v20 = vpack.c.bf16 %v4465_v11, %v4450_v10  ;;  %v4671_v24 = vpack.c.bf16 %v4436_v15, %v4421_v14  ;;  %v4466_v30 = vld [vmem:[%s6512_s3 + $0x738] sm:$0xff] }
  0x31   :  { %4654 = vmatprep.subr.bf16.mxu1 %v4653_v22  ;;  %3085 = vmatmul.mubr.f32.gmra.mrb[4].mxu0 %v5206_v28  ;;  %v4449_v22 = vld [vmem:[%s6512_s3 + $0x6b0] sm:$0xff]  ;;  %v4464_v23 = vld [vmem:[%s6512_s3 + $0x728] sm:$0xff]  ;;  %v4495_v26 = vld [vmem:[%s6512_s3 + $0x820] sm:$0xff]  ;;  %v4673_v27 = vpack.c.bf16 %v4467_v18, %v4452_v17 }
  0x32   :  { %4620 = vmatpush1.bf16.msra.mxu0 %v4619_v25  ;;  %4508 = vmatprep.mubr.msk.f32.mxu0 %vm2995_vm0, %v5226_v35  ;;  %v4480_v25 = vld [vmem:[%s6512_s3 + $0x7a8] sm:$0xff]  ;;  %v4639_v31 = vpack.c.bf16 %v4464_v23, %v4449_v22  ;;  %v4497_v33 = vld [vmem:[%s6512_s3 + $0x830] sm:$0xff]  ;;  %v4494_v37 = vld [vmem:[%s6512_s3 + $0x818] sm:$0xff] }
  0x33   :  { %4622 = vmatprep.subr.bf16.mxu0 %v4621_v29  ;;  %3174 = vmatmul.mubr.f32.gmra.mrb[4].mxu1 %v5206_v28  ;;  %v4451_v29 = vld [vmem:[%s6512_s3 + $0x6c0] sm:$0xff]  ;;  %v4641_v34 = vpack.c.bf16 %v4495_v26, %v4480_v25  ;;  %v4496_v44 = vld [vmem:[%s6512_s3 + $0x828] sm:$0xff]  ;;  %v4261_v47 = vld [vmem:[%s6512_s3 + $0xd0] sm:$0xff] }
  0x34   :  { %4656 = vmatpush1.bf16.msra.mxu1 %v4655_v32  ;;  %4512 = vmatprep.mubr.msk.f32.mxu1 %vm2995_vm0, %v5226_v35  ;;  %v4482_v32 = vld [vmem:[%s6512_s3 + $0x7b8] sm:$0xff]  ;;  %v4675_v38 = vpack.c.bf16 %v4466_v30, %v4451_v29  ;;  %v4259_v40 = vld [vmem:[%s6512_s3 + $0xc0] sm:$0xff]  ;;  %v4289_v53 = vld [vmem:[%s6512_s3 + $0x1b0] sm:$0xff] }
  0x35   :  { %4658 = vmatprep.subr.bf16.mxu1 %v4657_v36  ;;  %3091 = vmatmul.mubr.f32.gmra.mrb[6].mxu0 %v5246_v42  ;;  %v4479_v36 = vld [vmem:[%s6512_s3 + $0x7a0] sm:$0xff]  ;;  %v4677_v41 = vpack.c.bf16 %v4497_v33, %v4482_v32  ;;  %v4258_v50 = vld [vmem:[%s6512_s3 + $0xb8] sm:$0xff]  ;;  %v4260_v56 = vld [vmem:[%s6512_s3 + $0xc8] sm:$0xff] }
  0x36   :  { %4624 = vmatpush1.bf16.msra.mxu0 %v4623_v39  ;;  %4513 = vmatprep.mubr.msk.f32.mxu0 %vm2995_vm0, %v5036_v19  ;;  %v4244_v39 = vld [vmem:[%s6512_s3 + $0x48] sm:$0xff]  ;;  %v4643_v45 = vpack.c.bf16 %v4494_v37, %v4479_v36  ;;  %v4291_v60 = vld [vmem:[%s6512_s3 + $0x1c0] sm:$0xff]  ;;  %v4290_v6 = vld [vmem:[%s6512_s3 + $0x1b8] sm:$0xff] }
  0x37   :  { %4626 = vmatprep.subr.bf16.mxu0 %v4625_v43  ;;  %3180 = vmatmul.mubr.f32.gmra.mrb[6].mxu1 %v5246_v42  ;;  %v4481_v43 = vld [vmem:[%s6512_s3 + $0x7b0] sm:$0xff]  ;;  %v4681_v48 = vpack.c.bf16 %v4259_v40, %v4244_v39  ;;  %v4288_v63 = vld [vmem:[%s6512_s3 + $0x1a8] sm:$0xff]  ;;  %v4319_v3 = vld [vmem:[%s6512_s3 + $0x2a0] sm:$0xff] }
  0x38   :  { %4660 = vmatpush1.bf16.msra.mxu1 %v4659_v46  ;;  %4517 = vmatprep.mubr.msk.f32.mxu1 %vm2995_vm0, %v5036_v19  ;;  %v4246_v46 = vld [vmem:[%s6512_s3 + $0x58] sm:$0xff]  ;;  %v4679_v51 = vpack.c.bf16 %v4496_v44, %v4481_v43  ;;  %v4321_v10 = vld [vmem:[%s6512_s3 + $0x2b0] sm:$0xff]  ;;  %v4320_v22 = vld [vmem:[%s6512_s3 + $0x2a8] sm:$0xff] }
  0x39   :  { %4662 = vmatprep.subr.bf16.mxu1 %v4661_v49  ;;  %v4243_v49 = vld [vmem:[%s6512_s3 + $0x40] sm:$0xff]  ;;  %v4717_v54 = vpack.c.bf16 %v4261_v47, %v4246_v46  ;;  %v4318_v14 = vld [vmem:[%s6512_s3 + $0x298] sm:$0xff]  ;;  %v4349_v17 = vld [vmem:[%s6512_s3 + $0x390] sm:$0xff] }
  0x3a   :  { %4628 = vmatpush1.bf16.msra.mxu0 %v4627_v52  ;;  %v4274_v52 = vld [vmem:[%s6512_s3 + $0x138] sm:$0xff]  ;;  %v4683_v57 = vpack.c.bf16 %v4258_v50, %v4243_v49  ;;  %v4351_v25 = vld [vmem:[%s6512_s3 + $0x3a0] sm:$0xff]  ;;  %v4348_v29 = vld [vmem:[%s6512_s3 + $0x388] sm:$0xff] }
  0x3b   :  { %4630 = vmatprep.subr.bf16.mxu0 %v4629_v55  ;;  %v4245_v55 = vld [vmem:[%s6512_s3 + $0x50] sm:$0xff]  ;;  %v4685_v61 = vpack.c.bf16 %v4289_v53, %v4274_v52  ;;  %v4379_v32 = vld [vmem:[%s6512_s3 + $0x480] sm:$0xff]  ;;  %v4350_v36 = vld [vmem:[%s6512_s3 + $0x398] sm:$0xff] }
  0x3c   :  { %4664 = vmatpush1.bf16.msra.mxu1 %v4663_v58  ;;  %v4276_v58 = vld [vmem:[%s6512_s3 + $0x148] sm:$0xff]  ;;  %v4719_v1 = vpack.c.bf16 %v4260_v56, %v4245_v55  ;;  %v4381_v39 = vld [vmem:[%s6512_s3 + $0x490] sm:$0xff]  ;;  %v4378_v43 = vld [vmem:[%s6512_s3 + $0x478] sm:$0xff] }
  0x3d   :  { %4666 = vmatprep.subr.bf16.mxu1 %v4665_v62  ;;  %v4273_v62 = vld [vmem:[%s6512_s3 + $0x130] sm:$0xff]  ;;  %v4721_v4 = vpack.c.bf16 %v4291_v60, %v4276_v58  ;;  %v4380_v49 = vld [vmem:[%s6512_s3 + $0x488] sm:$0xff]  ;;  %v4411_v52 = vld [vmem:[%s6512_s3 + $0x580] sm:$0xff] }
  0x3e   :  { %4632 = vmatpush1.bf16.msra.mxu0 %v4631_v2  ;;  %v4304_v2 = vld [vmem:[%s6512_s3 + $0x228] sm:$0xff]  ;;  %v4687_v7 = vpack.c.bf16 %v4288_v63, %v4273_v62  ;;  %v4409_v46 = vld [vmem:[%s6512_s3 + $0x570] sm:$0xff]  ;;  %v4439_v58 = vld [vmem:[%s6512_s3 + $0x660] sm:$0xff] }
  0x3f   :  { %4634 = vmatprep.subr.bf16.mxu0 %v4633_v5  ;;  %v4275_v5 = vld [vmem:[%s6512_s3 + $0x140] sm:$0xff]  ;;  %v4689_v11 = vpack.c.bf16 %v4319_v3, %v4304_v2  ;;  %v4408_v55 = vld [vmem:[%s6512_s3 + $0x568] sm:$0xff]  ;;  %v4410_v62 = vld [vmem:[%s6512_s3 + $0x578] sm:$0xff]  ;;  %v159_v3 = vlaneseq }
  0x40   :  { %4668 = vmatpush1.bf16.msra.mxu1 %v4667_v8  ;;  %v4306_v8 = vld [vmem:[%s6512_s3 + $0x238] sm:$0xff]  ;;  %v4723_v15 = vpack.c.bf16 %v4290_v6, %v4275_v5  ;;  %v4441_v2 = vld [vmem:[%s6512_s3 + $0x670] sm:$0xff]  ;;  %v4423_v5 = vld [vmem:[%s6512_s3 + $0x5e0] sm:$0xff] }
  0x41   :  { %4670 = vmatprep.subr.bf16.mxu1 %v4669_v12  ;;  %v4303_v12 = vld [vmem:[%s6512_s3 + $0x220] sm:$0xff]  ;;  %v4725_v18 = vpack.c.bf16 %v4321_v10, %v4306_v8  ;;  %v4438_v6 = vld [vmem:[%s6512_s3 + $0x658] sm:$0xff]  ;;  %v4469_v10 = vld [vmem:[%s6512_s3 + $0x750] sm:$0xff] }
  0x42   :  { %4636 = vmatpush1.bf16.msra.mxu0 %v4635_v16  ;;  %v4334_v16 = vld [vmem:[%s6512_s3 + $0x318] sm:$0xff]  ;;  %v4691_v23 = vpack.c.bf16 %v4318_v14, %v4303_v12  ;;  %v4425_v12 = vld [vmem:[%s6512_s3 + $0x5f0] sm:$0xff]  ;;  %v4440_v14 = vld [vmem:[%s6512_s3 + $0x668] sm:$0xff] }
  0x43   :  { %4638 = vmatprep.subr.bf16.mxu0 %v4637_v20  ;;  %v4305_v20 = vld [vmem:[%s6512_s3 + $0x230] sm:$0xff]  ;;  %v4693_v26 = vpack.c.bf16 %v4349_v17, %v4334_v16  ;;  %v4454_v8 = vld [vmem:[%s6512_s3 + $0x6d8] sm:$0xff]  ;;  %v4456_v16 = vld [vmem:[%s6512_s3 + $0x6e8] sm:$0xff] }
  0x44   :  { %4672 = vmatpush1.bf16.msra.mxu1 %v4671_v24  ;;  %v4336_v24 = vld [vmem:[%s6512_s3 + $0x328] sm:$0xff]  ;;  %v4727_v30 = vpack.c.bf16 %v4320_v22, %v4305_v20  ;;  %v4471_v17 = vld [vmem:[%s6512_s3 + $0x760] sm:$0xff]  ;;  %v4709_v20 = vpack.c.bf16 %v4469_v10, %v4454_v8  ;;  %v4453_v22 = vld [vmem:[%s6512_s3 + $0x6d0] sm:$0xff] }
  0x45   :  { %4674 = vmatprep.subr.bf16.mxu1 %v4673_v27  ;;  %v4333_v27 = vld [vmem:[%s6512_s3 + $0x310] sm:$0xff]  ;;  %v4729_v33 = vpack.c.bf16 %v4351_v25, %v4336_v24  ;;  %v4743_v24 = vpack.c.bf16 %v4440_v14, %v4425_v12  ;;  %v4484_v25 = vld [vmem:[%s6512_s3 + $0x7c8] sm:$0xff]  ;;  %v4307_v12 = vld [vmem:[%s6512_s3 + $0x240] sm:$0xff] }
  0x46   :  { %4640 = vmatpush1.bf16.msra.mxu0 %v4639_v31  ;;  %v4364_v31 = vld [vmem:[%s6512_s3 + $0x408] sm:$0xff]  ;;  %v4695_v37 = vpack.c.bf16 %v4348_v29, %v4333_v27  ;;  %v4745_v27 = vpack.c.bf16 %v4471_v17, %v4456_v16  ;;  %v4455_v29 = vld [vmem:[%s6512_s3 + $0x6e0] sm:$0xff]  ;;  %v4309_v8 = vld [vmem:[%s6512_s3 + $0x250] sm:$0xff] }
  0x47   :  { %4642 = vmatprep.subr.bf16.mxu0 %v4641_v34  ;;  %v4335_v34 = vld [vmem:[%s6512_s3 + $0x320] sm:$0xff]  ;;  %v4697_v40 = vpack.c.bf16 %v4379_v32, %v4364_v31  ;;  %v4486_v32 = vld [vmem:[%s6512_s3 + $0x7d8] sm:$0xff]  ;;  %v4324_v10 = vld [vmem:[%s6512_s3 + $0x2c8] sm:$0xff] }
  0x48   :  { %4676 = vmatpush1.bf16.msra.mxu1 %v4675_v38  ;;  %v4366_v38 = vld [vmem:[%s6512_s3 + $0x418] sm:$0xff]  ;;  %v4731_v44 = vpack.c.bf16 %v4350_v36, %v4335_v34  ;;  %v4353_v17 = vld [vmem:[%s6512_s3 + $0x3b0] sm:$0xff] }
  0x49   :  { %4678 = vmatprep.subr.bf16.mxu1 %v4677_v41  ;;  %v4363_v41 = vld [vmem:[%s6512_s3 + $0x400] sm:$0xff]  ;;  %v4733_v47 = vpack.c.bf16 %v4381_v39, %v4366_v38  ;;  %v4498_v38 = vld [vmem:[%s6512_s3 + $0x838] sm:$0xff] }
  0x4a   :  { %4644 = vmatpush1.bf16.msra.mxu0 %v4643_v45  ;;  %v4394_v45 = vld [vmem:[%s6512_s3 + $0x4f8] sm:$0xff]  ;;  %v4699_v50 = vpack.c.bf16 %v4378_v43, %v4363_v41  ;;  %v4263_v41 = vld [vmem:[%s6512_s3 + $0xe0] sm:$0xff] }
  0x4b   :  { %4682 = vmatprep.subr.bf16.mxu0 %v4681_v48  ;;  %v4365_v48 = vld [vmem:[%s6512_s3 + $0x410] sm:$0xff]  ;;  %v4701_v53 = vpack.c.bf16 %v4409_v46, %v4394_v45  ;;  %v4500_v45 = vld [vmem:[%s6512_s3 + $0x848] sm:$0xff]  ;;  %v4322_v14 = vld [vmem:[%s6512_s3 + $0x2b8] sm:$0xff] }
  0x4c   :  { %4680 = vmatpush1.bf16.msra.mxu1 %v4679_v51  ;;  %v4396_v51 = vld [vmem:[%s6512_s3 + $0x508] sm:$0xff]  ;;  %v4735_v56 = vpack.c.bf16 %v4380_v49, %v4365_v48  ;;  %v4338_v16 = vld [vmem:[%s6512_s3 + $0x338] sm:$0xff] }
  0x4d   :  { %3251 = vmatmul.mubr.f32.vlgmr.msra.gmra.mrb[8].mxu0 %v5123_v59  ;;  %4718 = vmatprep.subr.bf16.mxu1 %v4717_v54  ;;  %v4393_v54 = vld [vmem:[%s6512_s3 + $0x4f0] sm:$0xff]  ;;  %v4737_v60 = vpack.c.bf16 %v4411_v52, %v4396_v51  ;;  %v4264_v48 = vld [vmem:[%s6512_s3 + $0xe8] sm:$0xff]  ;;  %v4262_v51 = vld [vmem:[%s6512_s3 + $0xd8] sm:$0xff] }
  0x4e   :  { %4684 = vmatpush1.bf16.msra.mxu0 %v4683_v57  ;;  %4514 = vmatprep.mubr.msk.f32.mxu0 %vm2995_vm0, %v5153_v9  ;;  %v4424_v57 = vld [vmem:[%s6512_s3 + $0x5e8] sm:$0xff]  ;;  %v4703_v63 = vpack.c.bf16 %v4408_v55, %v4393_v54  ;;  %v4293_v54 = vld [vmem:[%s6512_s3 + $0x1d0] sm:$0xff] }
  0x4f   :  { %3340 = vmatmul.mubr.f32.vlgmr.msra.gmra.mrb[8].mxu1 %v5123_v59  ;;  %4686 = vmatprep.subr.bf16.mxu0 %v4685_v61  ;;  %v4395_v61 = vld [vmem:[%s6512_s3 + $0x500] sm:$0xff] }
  0x50   :  { %4720 = vmatpush1.bf16.msra.mxu1 %v4719_v1  ;;  %4518 = vmatprep.mubr.msk.f32.mxu1 %vm2995_vm0, %v5153_v9  ;;  %v4426_v1 = vld [vmem:[%s6512_s3 + $0x5f8] sm:$0xff] }
  0x51   :  { %3257 = vmatmul.mubr.f32.gmra.mrb[10].mxu0 %v5166_v13  ;;  %4722 = vmatprep.subr.bf16.mxu1 %v4721_v4  ;;  %v4705_v4 = vpack.c.bf16 %v4439_v58, %v4424_v57  ;;  %v4279_v58 = vld [vmem:[%s6512_s3 + $0x160] sm:$0xff] }
  0x52   :  { %4688 = vmatpush1.bf16.msra.mxu0 %v4687_v7  ;;  %4515 = vmatprep.mubr.msk.f32.mxu0 %vm2995_vm0, %v5186_v21  ;;  %v4739_v7 = vpack.c.bf16 %v4410_v62, %v4395_v61  ;;  %v4277_v62 = vld [vmem:[%s6512_s3 + $0x150] sm:$0xff] }
  0x53   :  { %3346 = vmatmul.mubr.f32.gmra.mrb[10].mxu1 %v5166_v13  ;;  %4690 = vmatprep.subr.bf16.mxu0 %v4689_v11  ;;  %v4741_v11 = vpack.c.bf16 %v4441_v2, %v4426_v1  ;;  %v4308_v2 = vld [vmem:[%s6512_s3 + $0x248] sm:$0xff] }
  0x54   :  { %4724 = vmatpush1.bf16.msra.mxu1 %v4723_v15  ;;  %4519 = vmatprep.mubr.msk.f32.mxu1 %vm2995_vm0, %v5186_v21  ;;  %v4707_v15 = vpack.c.bf16 %v4438_v6, %v4423_v5 }
  0x55   :  { %3263 = vmatmul.mubr.f32.gmra.mrb[12].mxu0 %v5206_v28  ;;  %4726 = vmatprep.subr.bf16.mxu1 %v4725_v18  ;;  %v160_v18 = vand.u32 127, %v159_v3  ;;  %v4323_v3 = vld [vmem:[%s6512_s3 + $0x2c0] sm:$0xff] }
  0x56   :  { %4692 = vmatpush1.bf16.msra.mxu0 %v4691_v23  ;;  %4516 = vmatprep.mubr.msk.f32.mxu0 %vm2995_vm0, %v5226_v35  ;;  %v4468_v23 = vld [vmem:[%s6512_s3 + $0x748] sm:$0xff] }
  0x57   :  { %3352 = vmatmul.mubr.f32.gmra.mrb[12].mxu1 %v5206_v28  ;;  %4694 = vmatprep.subr.bf16.mxu0 %v4693_v26  ;;  %v4499_v26 = vld [vmem:[%s6512_s3 + $0x840] sm:$0xff]  ;;  %v4711_v31 = vpack.c.bf16 %v4468_v23, %v4453_v22  ;;  %v5593_v34 = vadd.s32 1792, %v160_v18  ;;  %v4763_v22 = vpack.c.bf16 %v4322_v14, %v4307_v12  ;;  %v4457_v14 = vld [vmem:[%s6512_s3 + $0x6f0] sm:$0xff] }
  0x58   :  { %4728 = vmatpush1.bf16.msra.mxu1 %v4727_v30  ;;  %4520 = vmatprep.mubr.msk.f32.mxu1 %vm2995_vm0, %v5226_v35  ;;  %v4470_v30 = vld [vmem:[%s6512_s3 + $0x758] sm:$0xff]  ;;  %v4713_v36 = vpack.c.bf16 %v4499_v26, %v4484_v25  ;;  %v4339_v23 = vld [vmem:[%s6512_s3 + $0x340] sm:$0xff]  ;;  %v4765_v25 = vpack.c.bf16 %v4353_v17, %v4338_v16  ;;  %v4337_v26 = vld [vmem:[%s6512_s3 + $0x330] sm:$0xff] }
  0x59   :  { %3269 = vmatmul.mubr.f32.gmra.mrb[14].mxu0 %v5246_v42  ;;  %4730 = vmatprep.subr.bf16.mxu1 %v4729_v33  ;;  %v4501_v33 = vld [vmem:[%s6512_s3 + $0x850] sm:$0xff]  ;;  %v4747_v39 = vpack.c.bf16 %v4470_v30, %v4455_v29  ;;  %vm162_vm1 = vcmp.lt.s32.totalorder %v5593_v34, 1800  ;;  %v4368_v30 = vld [vmem:[%s6512_s3 + $0x428] sm:$0xff] }
  0x5a   :  { %4696 = vmatpush1.bf16.msra.mxu0 %v4695_v37  ;;  %4521 = vmatprep.mubr.msk.f32.mxu0 %vm2995_vm0, %v5036_v19  ;;  %v4483_v37 = vld [vmem:[%s6512_s3 + $0x7c0] sm:$0xff]  ;;  %v4749_v43 = vpack.c.bf16 %v4501_v33, %v4486_v32  ;;  %v463_v5 = vsel %vm162_vm1, %v4279_v58, %v4863_v0  ;;  %v763_v18 = vsel %vm162_vm1, %v4309_v8, %v4863_v0  ;;  %v4488_v17 = vld [vmem:[%s6512_s3 + $0x7e8] sm:$0xff] }
  0x5b   :  { %3358 = vmatmul.mubr.f32.gmra.mrb[14].mxu1 %v5246_v42  ;;  %4698 = vmatprep.subr.bf16.mxu0 %v4697_v40  ;;  %v4248_v40 = vld [vmem:[%s6512_s3 + $0x68] sm:$0xff]  ;;  %v4715_v46 = vpack.c.bf16 %v4498_v38, %v4483_v37  ;;  %v1063_v32 = vsel %vm162_vm1, %v4339_v23, %v4863_v0  ;;  %v4369_v37 = vld [vmem:[%s6512_s3 + $0x430] sm:$0xff] }
  0x5c   :  { %4732 = vmatpush1.bf16.msra.mxu1 %v4731_v44  ;;  %4525 = vmatprep.mubr.msk.f32.mxu1 %vm2995_vm0, %v5036_v19  ;;  %v4485_v44 = vld [vmem:[%s6512_s3 + $0x7d0] sm:$0xff]  ;;  %v4753_v49 = vpack.c.bf16 %v4263_v41, %v4248_v40  ;;  %v4384_v38 = vld [vmem:[%s6512_s3 + $0x4a8] sm:$0xff]  ;;  %v4367_v40 = vld [vmem:[%s6512_s3 + $0x420] sm:$0xff] }
  0x5d   :  { %4734 = vmatprep.subr.bf16.mxu1 %v4733_v47  ;;  %v4249_v47 = vld [vmem:[%s6512_s3 + $0x70] sm:$0xff]  ;;  %v4751_v52 = vpack.c.bf16 %v4500_v45, %v4485_v44  ;;  %v4382_v41 = vld [vmem:[%s6512_s3 + $0x498] sm:$0xff] }
  0x5e   :  { %4700 = vmatpush1.bf16.msra.mxu0 %v4699_v50  ;;  %v4247_v50 = vld [vmem:[%s6512_s3 + $0x60] sm:$0xff]  ;;  %v163_v55 = vsel %vm162_vm1, %v4249_v47, %v4863_v0  ;;  %v4398_v44 = vld [vmem:[%s6512_s3 + $0x518] sm:$0xff]  ;;  %v4413_v45 = vld [vmem:[%s6512_s3 + $0x590] sm:$0xff]  ;;  %v1513_v47 = vsel %vm162_vm1, %v4384_v38, %v4863_v0 }
  0x5f   :  { %4702 = vmatprep.subr.bf16.mxu0 %v4701_v53  ;;  %v4278_v53 = vld [vmem:[%s6512_s3 + $0x158] sm:$0xff]  ;;  %v4755_v57 = vpack.c.bf16 %v4262_v51, %v4247_v50  ;;  %v4773_v51 = vpack.c.bf16 %v4413_v45, %v4398_v44 }
  0x60   :  { %4736 = vmatpush1.bf16.msra.mxu1 %v4735_v56  ;;  %v313_v56 = vsel %vm162_vm1, %v4264_v48, %v4863_v0  ;;  %v4757_v61 = vpack.c.bf16 %v4293_v54, %v4278_v53  ;;  %v4771_v48 = vpack.c.bf16 %v4382_v41, %v4367_v40  ;;  %v4414_v50 = vld [vmem:[%s6512_s3 + $0x598] sm:$0xff]  ;;  %v4412_v53 = vld [vmem:[%s6512_s3 + $0x588] sm:$0xff] }
  0x61   :  { %4738 = vmatprep.subr.bf16.mxu1 %v4737_v60  ;;  %v4294_v60 = vld [vmem:[%s6512_s3 + $0x1d8] sm:$0xff]  ;;  %v4790_v1 = vpack.c.bf16 %v313_v56, %v163_v55  ;;  %v4428_v55 = vld [vmem:[%s6512_s3 + $0x608] sm:$0xff]  ;;  %v4443_v56 = vld [vmem:[%s6512_s3 + $0x680] sm:$0xff]  ;;  %v1813_v58 = vsel %vm162_vm1, %v4414_v50, %v4863_v0 }
  0x62   :  { %4704 = vmatpush1.bf16.msra.mxu0 %v4703_v63  ;;  %v4292_v63 = vld [vmem:[%s6512_s3 + $0x1c8] sm:$0xff]  ;;  %v613_v6 = vsel %vm162_vm1, %v4294_v60, %v4863_v0 }
  0x63   :  { %4706 = vmatprep.subr.bf16.mxu0 %v4705_v4  ;;  %v4828_v4 = vmov 0.0|0.0  }
  0x64   :  { %4740 = vmatpush1.bf16.msra.mxu1 %v4739_v7  ;;  %v4759_v7 = vpack.c.bf16 %v4292_v63, %v4277_v62  ;;  %v4777_v62 = vpack.c.bf16 %v4443_v56, %v4428_v55  ;;  %v4427_v63 = vld [vmem:[%s6512_s3 + $0x600] sm:$0xff] }
  0x65   :  { %4742 = vmatprep.subr.bf16.mxu1 %v4741_v11  ;;  %v4761_v11 = vpack.c.bf16 %v4323_v3, %v4308_v2  ;;  %v4458_v3 = vld [vmem:[%s6512_s3 + $0x6f8] sm:$0xff] }
  0x66   :  { %4708 = vmatpush1.bf16.msra.mxu0 %v4707_v15  ;;  %v4793_v15 = vpack.c.bf16 %v613_v6, %v463_v5  ;;  %v4473_v5 = vld [vmem:[%s6512_s3 + $0x770] sm:$0xff] }
  0x67   :  { %4710 = vmatprep.subr.bf16.mxu0 %v4709_v20  ;;  %v913_v20 = vsel %vm162_vm1, %v4324_v10, %v4863_v0  ;;  %v4459_v10 = vld [vmem:[%s6512_s3 + $0x700] sm:$0xff]  ;;  %v4781_v12 = vpack.c.bf16 %v4473_v5, %v4458_v3 }
  0x68   :  { %4744 = vmatpush1.bf16.msra.mxu1 %v4743_v24  ;;  %v4354_v24 = vld [vmem:[%s6512_s3 + $0x3b8] sm:$0xff]  ;;  %v4796_v29 = vpack.c.bf16 %v913_v20, %v763_v18  ;;  %v4503_v18 = vld [vmem:[%s6512_s3 + $0x860] sm:$0xff]  ;;  %v2263_v20 = vsel %vm162_vm1, %v4459_v10, %v4863_v0 }
  0x69   :  { %4746 = vmatprep.subr.bf16.mxu1 %v4745_v27  ;;  %v4352_v27 = vld [vmem:[%s6512_s3 + $0x3a8] sm:$0xff]  ;;  %v1213_v33 = vsel %vm162_vm1, %v4354_v24, %v4863_v0  ;;  %v4489_v24 = vld [vmem:[%s6512_s3 + $0x7f0] sm:$0xff] }
  0x6a   :  { %4712 = vmatpush1.bf16.msra.mxu0 %v4711_v31  ;;  %v4383_v31 = vld [vmem:[%s6512_s3 + $0x4a0] sm:$0xff] }
  0x6b   :  { %4714 = vmatprep.subr.bf16.mxu0 %v4713_v36  ;;  %v4767_v36 = vpack.c.bf16 %v4352_v27, %v4337_v26  ;;  %v4785_v26 = vpack.c.bf16 %v4503_v18, %v4488_v17  ;;  %v4487_v27 = vld [vmem:[%s6512_s3 + $0x7e0] sm:$0xff] }
  0x6c   :  { %4748 = vmatpush1.bf16.msra.mxu1 %v4747_v39  ;;  %v4769_v39 = vpack.c.bf16 %v4383_v31, %v4368_v30  ;;  %v2563_v31 = vsel %vm162_vm1, %v4489_v24, %v4863_v0 }
  0x6d   :  { %4750 = vmatprep.subr.bf16.mxu1 %v4749_v43  ;;  %v4799_v43 = vpack.c.bf16 %v1213_v33, %v1063_v32 }
  0x6e   :  { %4716 = vmatpush1.bf16.msra.mxu0 %v4715_v46  ;;  %v1363_v46 = vsel %vm162_vm1, %v4369_v37, %v4863_v0 }
  0x6f   :  { %4754 = vmatprep.subr.bf16.mxu0 %v4753_v49  ;;  %v4399_v49 = vld [vmem:[%s6512_s3 + $0x520] sm:$0xff]  ;;  %v4802_v54 = vpack.c.bf16 %v1513_v47, %v1363_v46 }
  0x70   :  { %4752 = vmatpush1.bf16.msra.mxu1 %v4751_v52  ;;  %v4397_v52 = vld [vmem:[%s6512_s3 + $0x510] sm:$0xff] }
  0x71   :  { %3429 = vmatmul.mubr.f32.vlgmr.msra.gmra.mrb[16].mxu0 %v5123_v59  ;;  %4789 = vmatprep.subr.bf16.mxu1 %v4828_v4  ;;  %v4775_v60 = vpack.c.bf16 %v4412_v53, %v4397_v52 }
  0x72   :  { %4756 = vmatpush1.bf16.msra.mxu0 %v4755_v57  ;;  %4522 = vmatprep.mubr.msk.f32.mxu0 %vm2995_vm0, %v5153_v9  ;;  %v1663_v57 = vsel %vm162_vm1, %v4399_v49, %v4863_v0 }
  0x73   :  { %3518 = vmatmul.mubr.f32.vlgmr.msra.gmra.mrb[16].mxu1 %v5123_v59  ;;  %4758 = vmatprep.subr.bf16.mxu0 %v4757_v61  ;;  %v4429_v61 = vld [vmem:[%s6512_s3 + $0x610] sm:$0xff]  ;;  %v4805_v2 = vpack.c.bf16 %v1813_v58, %v1663_v57 }
  0x74   :  { %4791 = vmatpush1.bf16.msra.mxu1 %v4790_v1  ;;  %4526 = vmatprep.mubr.msk.f32.mxu1 %vm2995_vm0, %v5153_v9  ;;  %v4442_v1 = vld [vmem:[%s6512_s3 + $0x678] sm:$0xff]  ;;  %v1963_v6 = vsel %vm162_vm1, %v4429_v61, %v4863_v0 }
  0x75   :  { %3435 = vmatmul.mubr.f32.gmra.mrb[18].mxu0 %v5166_v13  ;;  %4792 = vmatprep.subr.bf16.mxu1 %v4828_v4  ;;  %v4779_v8 = vpack.c.bf16 %v4442_v1, %v4427_v63 }
  0x76   :  { %4760 = vmatpush1.bf16.msra.mxu0 %v4759_v7  ;;  %4523 = vmatprep.mubr.msk.f32.mxu0 %vm2995_vm0, %v5186_v21 }
  0x77   :  { %3524 = vmatmul.mubr.f32.gmra.mrb[18].mxu1 %v5166_v13  ;;  %4762 = vmatprep.subr.bf16.mxu0 %v4761_v11  ;;  %v4474_v11 = vld [vmem:[%s6512_s3 + $0x778] sm:$0xff] }
  0x78   :  { %4794 = vmatpush1.bf16.msra.mxu1 %v4793_v15  ;;  %4527 = vmatprep.mubr.msk.f32.mxu1 %vm2995_vm0, %v5186_v21  ;;  %v4472_v15 = vld [vmem:[%s6512_s3 + $0x768] sm:$0xff] }
  0x79   :  { %3441 = vmatmul.mubr.f32.gmra.mrb[20].mxu0 %v5206_v28  ;;  %4795 = vmatprep.subr.bf16.mxu1 %v4828_v4  ;;  %v4783_v23 = vpack.c.bf16 %v4472_v15, %v4457_v14 }
  0x7a   :  { %4764 = vmatpush1.bf16.msra.mxu0 %v4763_v22  ;;  %4524 = vmatprep.mubr.msk.f32.mxu0 %vm2995_vm0, %v5226_v35  ;;  %v2413_v22 = vsel %vm162_vm1, %v4474_v11, %v4863_v0 }
  0x7b   :  { %3530 = vmatmul.mubr.f32.gmra.mrb[20].mxu1 %v5206_v28  ;;  %4766 = vmatprep.subr.bf16.mxu0 %v4765_v25  ;;  %v4504_v25 = vld [vmem:[%s6512_s3 + $0x868] sm:$0xff]  ;;  %v4811_v30 = vpack.c.bf16 %v2413_v22, %v2263_v20 }
  0x7c   :  { %4797 = vmatpush1.bf16.msra.mxu1 %v4796_v29  ;;  %4528 = vmatprep.mubr.msk.f32.mxu1 %vm2995_vm0, %v5226_v35  ;;  %v4502_v29 = vld [vmem:[%s6512_s3 + $0x858] sm:$0xff]  ;;  %v2713_v32 = vsel %vm162_vm1, %v4504_v25, %v4863_v0 }
  0x7d   :  { %3447 = vmatmul.mubr.f32.gmra.mrb[22].mxu0 %v5246_v42  ;;  %4798 = vmatprep.subr.bf16.mxu1 %v4828_v4  ;;  %v4787_v33 = vpack.c.bf16 %v4502_v29, %v4487_v27 }
  0x7e   :  { %4768 = vmatpush1.bf16.msra.mxu0 %v4767_v36  ;;  %4529 = vmatprep.mubr.msk.f32.mxu0 %vm2995_vm0, %v5036_v19  ;;  %v4814_v36 = vpack.c.bf16 %v2713_v32, %v2563_v31 }
  0x7f   :  { %3536 = vmatmul.mubr.f32.gmra.mrb[22].mxu1 %v5246_v42  ;;  %4770 = vmatprep.subr.bf16.mxu0 %v4769_v39 }
  0x80   :  { %4800 = vmatpush1.bf16.msra.mxu1 %v4799_v43  ;;  %4533 = vmatprep.mubr.msk.f32.mxu1 %vm2995_vm0, %v5036_v19  ;;  %v4444_v19 = vld [vmem:[%s6512_s3 + $0x688] sm:$0xff] }
  0x81   :  { %4801 = vmatprep.subr.bf16.mxu1 %v4828_v4  ;;  %v2113_v7 = vsel %vm162_vm1, %v4444_v19, %v4863_v0 }
  0x82   :  { %4772 = vmatpush1.bf16.msra.mxu0 %v4771_v48  ;;  %v4808_v16 = vpack.c.bf16 %v2113_v7, %v1963_v6 }
  0x83   :  { %4774 = vmatprep.subr.bf16.mxu0 %v4773_v51 }
  0x84   :  { %4803 = vmatpush1.bf16.msra.mxu1 %v4802_v54 }
  0x85   :  { %4804 = vmatprep.subr.bf16.mxu1 %v4828_v4 }
  0x86   :  { %4776 = vmatpush1.bf16.msra.mxu0 %v4775_v60 }
  0x87   :  { %4778 = vmatprep.subr.bf16.mxu0 %v4777_v62 }
  0x88   :  { %4806 = vmatpush1.bf16.msra.mxu1 %v4805_v2 }
  0x89   :  { %4807 = vmatprep.subr.bf16.mxu1 %v4828_v4 }
  0x8a   :  { %4780 = vmatpush1.bf16.msra.mxu0 %v4779_v8 }
  0x8b   :  { %4782 = vmatprep.subr.bf16.mxu0 %v4781_v12 }
  0x8c   :  { %4809 = vmatpush1.bf16.msra.mxu1 %v4808_v16 }
  0x8d   :  { %4810 = vmatprep.subr.bf16.mxu1 %v4828_v4 }
  0x8e   :  { %4784 = vmatpush1.bf16.msra.mxu0 %v4783_v23 }
  0x8f   :  { %4786 = vmatprep.subr.bf16.mxu0 %v4785_v26 }
  0x90   :  { %4812 = vmatpush1.bf16.msra.mxu1 %v4811_v30 }
  0x91   :  { %4813 = vmatprep.subr.bf16.mxu1 %v4828_v4 }
  0x92   :  { %4788 = vmatpush1.bf16.msra.mxu0 %v4787_v33 }
  0x94   :  { %4815 = vmatpush1.bf16.msra.mxu1 %v4814_v36 }
  0x95   :  { %3607 = vmatmul.mubr.f32.vlgmr.msra.gmra.mrb[24].mxu0 %v5123_v59 }
  0x96   :  { %4530 = vmatprep.mubr.msk.f32.mxu0 %vm2995_vm0, %v5153_v9 }
  0x97   :  { %3696 = vmatmul.mubr.f32.vlgmr.msra.gmra.mrb[24].mxu1 %v5123_v59 }
  0x98   :  { %4534 = vmatprep.mubr.msk.f32.mxu1 %vm2995_vm0, %v5153_v9 }
  0x99   :  { %3613 = vmatmul.mubr.f32.gmra.mrb[26].mxu0 %v5166_v13 }
  0x9a   :  { %4531 = vmatprep.mubr.msk.f32.mxu0 %vm2995_vm0, %v5186_v21 }
  0x9b   :  { %3701 = vmatmul.mubr.f32.gmra.mrb[26].mxu1 %v5166_v13 }
  0x9c   :  { %4535 = vmatprep.mubr.msk.f32.mxu1 %vm2995_vm0, %v5186_v21 }
  0x9d   :  { %3619 = vmatmul.mubr.f32.gmra.mrb[28].mxu0 %v5206_v28 }
  0x9e   :  { %4532 = vmatprep.mubr.msk.f32.mxu0 %vm2995_vm0, %v5226_v35 }
  0x9f   :  { %3706 = vmatmul.mubr.f32.gmra.mrb[28].mxu1 %v5206_v28 }
  0xa0   :  { %4536 = vmatprep.mubr.msk.f32.mxu1 %vm2995_vm0, %v5226_v35 }
  0xa1   :  { %3625 = vmatmul.mubr.f32.gmra.mrb[30].mxu0 %v5246_v42 }
  0xa3   :  { %3711 = vmatmul.mubr.f32.gmra.mrb[30].mxu1 %v5246_v42 }
  0xfc   :  { %v5877_v0 = vpop.f32.mrb[0].mxu0 }
  0xfd   :  { %v3780_v59 = vmul.f32 %v5877_v0, %v5877_v0  ;;  %v5881_v9 = vpop.f32.mrb[1].mxu0 }
  0xfe   :  { %v3716_v13 = vadd.f32 %v5881_v9, %v5877_v0  ;;  %v3781_v21 = vmul.f32 %v5881_v9, %v5881_v9  ;;  %v5887_v28 = vpop.f32.mrb[0].mxu1 }
  0xff   :  { %v3782_v35 = vmul.f32 %v5887_v28, %v5887_v28  ;;  %v5891_v34 = vpop.f32.mrb[1].mxu1 }
 0x100   :  { %v3840_v42 = vadd.f32 %v3781_v21, %v3780_v59  ;;  %v3717_v4 = vadd.f32 %v3716_v13, %v5887_v28  ;;  %v3783_v37 = vmul.f32 %v5891_v34, %v5891_v34  ;;  %v5896_v38 = vpop.f32.mrb[2].mxu0 }
 0x101   :  { %v3795_v39 = vmul.f32 %v5896_v38, %v5896_v38  ;;  %v5900_v40 = vpop.f32.mrb[3].mxu0 }
 0x102   :  { %v3841_v41 = vadd.f32 %v3840_v42, %v3782_v35  ;;  %v3718_v43 = vadd.f32 %v3717_v4, %v5891_v34  ;;  %v3732_v44 = vadd.f32 %v5900_v40, %v5896_v38  ;;  %v3796_v45 = vmul.f32 %v5900_v40, %v5900_v40  ;;  %v5907_v46 = vpop.f32.mrb[2].mxu1 }
 0x103   :  { %v3797_v47 = vmul.f32 %v5907_v46, %v5907_v46  ;;  %v5911_v48 = vpop.f32.mrb[3].mxu1 }
 0x104   :  { %v3842_v49 = vadd.f32 %v3841_v41, %v3783_v37  ;;  %v3856_v50 = vadd.f32 %v3796_v45, %v3795_v39  ;;  %v3733_v51 = vadd.f32 %v3732_v44, %v5907_v46  ;;  %v5914_v52 = vpop.f32.mrb[4].mxu0  ;;  %v3798_v53 = vmul.f32 %v5911_v48, %v5911_v48 }
 0x105   :  { %v3810_v54 = vmul.f32 %v5914_v52, %v5914_v52  ;;  %v5920_v55 = vpop.f32.mrb[5].mxu0 }
 0x106   :  { %v3857_v56 = vadd.f32 %v3856_v50, %v3797_v47  ;;  %v3748_v57 = vadd.f32 %v5920_v55, %v5914_v52  ;;  %v3811_v58 = vmul.f32 %v5920_v55, %v5920_v55  ;;  %v3734_v60 = vadd.f32 %v3733_v51, %v5911_v48  ;;  %v5927_v61 = vpop.f32.mrb[4].mxu1 }
 0x107   :  { %v3812_v19 = vmul.f32 %v5927_v61, %v5927_v61  ;;  %v5931_v62 = vpop.f32.mrb[5].mxu1 }
 0x108   :  { %v3872_v63 = vadd.f32 %v3811_v58, %v3810_v54  ;;  %v3858_v1 = vadd.f32 %v3857_v56, %v3798_v53  ;;  %v3749_v2 = vadd.f32 %v3748_v57, %v5927_v61  ;;  %v5934_v3 = vpop.f32.mrb[6].mxu0  ;;  %v3813_v5 = vmul.f32 %v5931_v62, %v5931_v62 }
 0x109   :  { %6534 = vst [vmem:[#allocation8_spill] sm:$0xff] %v5934_v3  ;;  %v3825_v6 = vmul.f32 %v5934_v3, %v5934_v3  ;;  %v5940_v7 = vpop.f32.mrb[7].mxu0 }
 0x10a   :  { %6535 = vst [vmem:[#allocation9_spill] sm:$0xff] %v5940_v7  ;;  %v3873_v8 = vadd.f32 %v3872_v63, %v3812_v19  ;;  %v3764_v10 = vadd.f32 %v5940_v7, %v5934_v3  ;;  %v3826_v11 = vmul.f32 %v5940_v7, %v5940_v7  ;;  %v3750_v12 = vadd.f32 %v3749_v2, %v5931_v62  ;;  %v5947_v14 = vpop.f32.mrb[6].mxu1 }
 0x10b   :  { %6536 = vst [vmem:[#allocation10_spill] sm:$0xff] %v5947_v14  ;;  %v3827_v15 = vmul.f32 %v5947_v14, %v5947_v14  ;;  %v5951_v16 = vpop.f32.mrb[7].mxu1 }
 0x10c   :  { %6537 = vst [vmem:[#allocation11_spill] sm:$0xff] %v5951_v16  ;;  %v3888_v17 = vadd.f32 %v3826_v11, %v3825_v6  ;;  %v3874_v18 = vadd.f32 %v3873_v8, %v3813_v5  ;;  %v3765_v20 = vadd.f32 %v3764_v10, %v5947_v14  ;;  %v3828_v22 = vmul.f32 %v5951_v16, %v5951_v16 }
 0x10e   :  { %v3889_v23 = vadd.f32 %v3888_v17, %v3827_v15  ;;  %v3766_v24 = vadd.f32 %v3765_v20, %v5951_v16 }
 0x110   :  { %v3890_v25 = vadd.f32 %v3889_v23, %v3828_v22 }
 0x120   :  { %v5957_v26 = vpop.f32.mrb[8].mxu0 }
 0x121   :  { %v3719_v27 = vadd.f32 %v3718_v43, %v5957_v26  ;;  %v3784_v29 = vmul.f32 %v5957_v26, %v5957_v26  ;;  %v5962_v30 = vpop.f32.mrb[9].mxu0 }
 0x122   :  { %v3785_v31 = vmul.f32 %v5962_v30, %v5962_v30  ;;  %v5966_v32 = vpop.f32.mrb[8].mxu1 }
 0x123   :  { %v3843_v33 = vadd.f32 %v3842_v49, %v3784_v29  ;;  %v3720_v36 = vadd.f32 %v3719_v27, %v5962_v30  ;;  %v3786_v59 = vmul.f32 %v5966_v32, %v5966_v32  ;;  %v5971_v13 = vpop.f32.mrb[9].mxu1 }
 0x124   :  { %v5973_v21 = vpop.f32.mrb[10].mxu0  ;;  %v3787_v35 = vmul.f32 %v5971_v13, %v5971_v13 }
 0x125   :  { %v3844_v42 = vadd.f32 %v3843_v33, %v3785_v31  ;;  %v3735_v4 = vadd.f32 %v3734_v60, %v5973_v21  ;;  %v3799_v37 = vmul.f32 %v5973_v21, %v5973_v21  ;;  %v3721_v39 = vadd.f32 %v3720_v36, %v5966_v32  ;;  %v5981_v41 = vpop.f32.mrb[11].mxu0 }
 0x126   :  { %v3800_v43 = vmul.f32 %v5981_v41, %v5981_v41  ;;  %v5985_v44 = vpop.f32.mrb[10].mxu1 }
 0x127   :  { %v3859_v45 = vadd.f32 %v3858_v1, %v3799_v37  ;;  %v3845_v47 = vadd.f32 %v3844_v42, %v3786_v59  ;;  %v3722_v49 = vadd.f32 %v3721_v39, %v5971_v13  ;;  %v3736_v50 = vadd.f32 %v3735_v4, %v5981_v41  ;;  %v5989_v51 = vpop.f32.mrb[11].mxu1 }
 0x128   :  { %v5991_v53 = vpop.f32.mrb[12].mxu0  ;;  %v3801_v54 = vmul.f32 %v5985_v44, %v5985_v44  ;;  %v3802_v56 = vmul.f32 %v5989_v51, %v5989_v51 }
 0x129   :  { %v3846_v57 = vadd.f32 %v3845_v47, %v3787_v35  ;;  %v3860_v58 = vadd.f32 %v3859_v45, %v3800_v43  ;;  %v3751_v60 = vadd.f32 %v3750_v12, %v5991_v53  ;;  %v3814_v19 = vmul.f32 %v5991_v53, %v5991_v53  ;;  %v6000_v63 = vpop.f32.mrb[13].mxu0 }
 0x12a   :  { %v3737_v1 = vadd.f32 %v3736_v50, %v5985_v44  ;;  %v3815_v2 = vmul.f32 %v6000_v63, %v6000_v63  ;;  %v6005_v5 = vpop.f32.mrb[12].mxu1 }
 0x12b   :  { %v3875_v6 = vadd.f32 %v3874_v18, %v3814_v19  ;;  %v3861_v8 = vadd.f32 %v3860_v58, %v3801_v54  ;;  %v3752_v10 = vadd.f32 %v3751_v60, %v6000_v63  ;;  %v3816_v11 = vmul.f32 %v6005_v5, %v6005_v5  ;;  %v6010_v12 = vpop.f32.mrb[13].mxu1 }
 0x12c   :  { %v3738_v15 = vadd.f32 %v3737_v1, %v5989_v51  ;;  %v6013_v17 = vpop.f32.mrb[14].mxu0  ;;  %v3817_v20 = vmul.f32 %v6010_v12, %v6010_v12 }
 0x12d   :  { %6538 = vst [vmem:[#allocation12_spill] sm:$0xff] %v6013_v17  ;;  %v3876_v22 = vadd.f32 %v3875_v6, %v3815_v2  ;;  %v3862_v23 = vadd.f32 %v3861_v8, %v3802_v56  ;;  %v3767_v27 = vadd.f32 %v3766_v24, %v6013_v17  ;;  %v3829_v18 = vmul.f32 %v6013_v17, %v6013_v17  ;;  %v6020_v29 = vpop.f32.mrb[15].mxu0 }
 0x12e   :  { %6539 = vst [vmem:[#allocation13_spill] sm:$0xff] %v6020_v29  ;;  %v3753_v31 = vadd.f32 %v3752_v10, %v6005_v5  ;;  %v3830_v33 = vmul.f32 %v6020_v29, %v6020_v29  ;;  %v6025_v36 = vpop.f32.mrb[14].mxu1 }
 0x12f   :  { %6540 = vst [vmem:[#allocation14_spill] sm:$0xff] %v6025_v36  ;;  %v3891_v59 = vadd.f32 %v3890_v25, %v3829_v18  ;;  %v3877_v35 = vadd.f32 %v3876_v22, %v3816_v11  ;;  %v3768_v42 = vadd.f32 %v3767_v27, %v6020_v29  ;;  %v3831_v4 = vmul.f32 %v6025_v36, %v6025_v36  ;;  %v6030_v24 = vpop.f32.mrb[15].mxu1 }
 0x130   :  { %6541 = vst [vmem:[#allocation15_spill] sm:$0xff] %v6030_v24  ;;  %v3754_v37 = vadd.f32 %v3753_v31, %v6010_v12  ;;  %v3832_v47 = vmul.f32 %v6030_v24, %v6030_v24 }
 0x131   :  { %v3892_v39 = vadd.f32 %v3891_v59, %v3830_v33  ;;  %v3878_v43 = vadd.f32 %v3877_v35, %v3817_v20  ;;  %v3769_v45 = vadd.f32 %v3768_v42, %v6025_v36 }
 0x133   :  { %v3893_v50 = vadd.f32 %v3892_v39, %v3831_v4  ;;  %v3770_v25 = vadd.f32 %v3769_v45, %v6030_v24 }
 0x135   :  { %v3894_v54 = vadd.f32 %v3893_v50, %v3832_v47 }
 0x144   :  { %v6037_v56 = vpop.f32.mrb[16].mxu0 }
 0x145   :  { %v3723_v58 = vadd.f32 %v3722_v49, %v6037_v56  ;;  %v3788_v60 = vmul.f32 %v6037_v56, %v6037_v56  ;;  %v6042_v19 = vpop.f32.mrb[17].mxu0 }
 0x146   :  { %v3789_v1 = vmul.f32 %v6042_v19, %v6042_v19  ;;  %v6046_v2 = vpop.f32.mrb[16].mxu1 }
 0x147   :  { %v3847_v6 = vadd.f32 %v3846_v57, %v3788_v60  ;;  %v3724_v8 = vadd.f32 %v3723_v58, %v6042_v19  ;;  %v3790_v10 = vmul.f32 %v6046_v2, %v6046_v2  ;;  %v6051_v11 = vpop.f32.mrb[17].mxu1 }
 0x148   :  { %v6053_v20 = vpop.f32.mrb[18].mxu0  ;;  %v3791_v49 = vmul.f32 %v6051_v11, %v6051_v11 }
 0x149   :  { %v3848_v22 = vadd.f32 %v3847_v6, %v3789_v1  ;;  %v3739_v27 = vadd.f32 %v3738_v15, %v6053_v20  ;;  %v3803_v18 = vmul.f32 %v6053_v20, %v6053_v20  ;;  %v3725_v57 = vadd.f32 %v3724_v8, %v6046_v2  ;;  %v6061_v31 = vpop.f32.mrb[19].mxu0 }
 0x14a   :  { %v3804_v33 = vmul.f32 %v6061_v31, %v6061_v31  ;;  %v6065_v59 = vpop.f32.mrb[18].mxu1 }
 0x14b   :  { %v3863_v35 = vadd.f32 %v3862_v23, %v3803_v18  ;;  %v3849_v42 = vadd.f32 %v3848_v22, %v3790_v10  ;;  %v3726_v4 = vadd.f32 %v3725_v57, %v6051_v11  ;;  %v3740_v39 = vadd.f32 %v3739_v27, %v6061_v31  ;;  %v6069_v45 = vpop.f32.mrb[19].mxu1 }
 0x14c   :  { %v6071_v15 = vpop.f32.mrb[20].mxu0  ;;  %v3805_v47 = vmul.f32 %v6065_v59, %v6065_v59  ;;  %v3806_v50 = vmul.f32 %v6069_v45, %v6069_v45 }
 0x14d   :  { %v3850_v58 = vadd.f32 %v3849_v42, %v3791_v49  ;;  %v3864_v60 = vadd.f32 %v3863_v35, %v3804_v33  ;;  %v3755_v1 = vadd.f32 %v3754_v37, %v6071_v15  ;;  %v3818_v23 = vmul.f32 %v6071_v15, %v6071_v15  ;;  %v6080_v6 = vpop.f32.mrb[21].mxu0 }
 0x14e   :  { %v3741_v8 = vadd.f32 %v3740_v39, %v6065_v59  ;;  %v3819_v10 = vmul.f32 %v6080_v6, %v6080_v6  ;;  %v6085_v22 = vpop.f32.mrb[20].mxu1 }
 0x14f   :  { %v3879_v27 = vadd.f32 %v3878_v43, %v3818_v23  ;;  %v3865_v18 = vadd.f32 %v3864_v60, %v3805_v47  ;;  %v3756_v57 = vadd.f32 %v3755_v1, %v6080_v6  ;;  %v3820_v49 = vmul.f32 %v6085_v22, %v6085_v22  ;;  %v6090_v37 = vpop.f32.mrb[21].mxu1 }
 0x150   :  { %6542 = vst [vmem:[#allocation16_spill] sm:$0xff] %v6090_v37  ;;  %v3742_v33 = vadd.f32 %v3741_v8, %v6069_v45  ;;  %v6093_v35 = vpop.f32.mrb[22].mxu0  ;;  %v3821_v42 = vmul.f32 %v6090_v37, %v6090_v37 }
 0x151   :  { %6543 = vst [vmem:[#allocation17_spill] sm:$0xff] %v6093_v35  ;;  %v3880_v39 = vadd.f32 %v3879_v27, %v3819_v10  ;;  %v3866_v24 = vadd.f32 %v3865_v18, %v3806_v50  ;;  %v3771_v36 = vadd.f32 %v3770_v25, %v6093_v35  ;;  %v3833_v43 = vmul.f32 %v6093_v35, %v6093_v35  ;;  %v6100_v47 = vpop.f32.mrb[23].mxu0 }
 0x152   :  { %6544 = vst [vmem:[#allocation18_spill] sm:$0xff] %v6100_v47  ;;  %v3757_v60 = vadd.f32 %v3756_v57, %v6085_v22  ;;  %v3834_v1 = vmul.f32 %v6100_v47, %v6100_v47  ;;  %v6105_v23 = vpop.f32.mrb[22].mxu1 }
 0x153   :  { %6545 = vst [vmem:[#allocation19_spill] sm:$0xff] %v6105_v23  ;;  %v3895_v8 = vadd.f32 %v3894_v54, %v3833_v43  ;;  %v3881_v29 = vadd.f32 %v3880_v39, %v3820_v49  ;;  %v3772_v17 = vadd.f32 %v3771_v36, %v6100_v47  ;;  %v3835_v50 = vmul.f32 %v6105_v23, %v6105_v23  ;;  %v6110_v25 = vpop.f32.mrb[23].mxu1 }
 0x154   :  { %6546 = vst [vmem:[#allocation20_spill] sm:$0xff] %v6110_v25  ;;  %v3758_v10 = vadd.f32 %v3757_v60, %v6090_v37  ;;  %v3836_v35 = vmul.f32 %v6110_v25, %v6110_v25 }
 0x155   :  { %v3896_v27 = vadd.f32 %v3895_v8, %v3834_v1  ;;  %v3882_v18 = vadd.f32 %v3881_v29, %v3821_v42  ;;  %v3773_v57 = vadd.f32 %v3772_v17, %v6105_v23 }
 0x157   :  { %v3897_v16 = vadd.f32 %v3896_v27, %v3835_v50  ;;  %v3774_v54 = vadd.f32 %v3773_v57, %v6110_v25 }
 0x159   :  { %v3898_v49 = vadd.f32 %v3897_v16, %v3836_v35 }
 0x168   :  { %v6117_v39 = vpop.f32.mrb[24].mxu0 }
 0x169   :  { %v3727_v36 = vadd.f32 %v3726_v4, %v6117_v39  ;;  %v3792_v43 = vmul.f32 %v6117_v39, %v6117_v39  ;;  %v6122_v47 = vpop.f32.mrb[25].mxu0 }
 0x16a   :  { %v3793_v29 = vmul.f32 %v6122_v47, %v6122_v47  ;;  %v6126_v17 = vpop.f32.mrb[24].mxu1 }
 0x16b   :  { %v3699_v42 = vpop.f32.mrb[25].mxu1  ;;  %v3728_v60 = vadd.f32 %v3727_v36, %v6122_v47  ;;  %v3794_v16 = vmul.f32 %v6126_v17, %v6126_v17  ;;  %v3851_v35 = vadd.f32 %v3850_v58, %v3792_v43 }
 0x16c   :  { %v6131_v1 = vpop.f32.mrb[26].mxu0 }
 0x16d   :  { %v3743_v4 = vadd.f32 %v3742_v33, %v6131_v1  ;;  %v3807_v8 = vmul.f32 %v6131_v1, %v6131_v1  ;;  %v6136_v50 = vpop.f32.mrb[27].mxu0  ;;  %v3729_v27 = vadd.f32 %v3728_v60, %v6126_v17  ;;  %v3852_v57 = vadd.f32 %v3851_v35, %v3793_v29 }
 0x16e   :  { %v3808_v42 = vmul.f32 %v6136_v50, %v6136_v50  ;;  %v6141_v36 = vpop.f32.mrb[26].mxu1 }
 0x16f   :  { %3730 = vadd.xlane.f32.xlu0 %v3729_v27  ;;  %v3704_v25 = vpop.f32.mrb[27].mxu1  ;;  %v3853_v58 = vadd.f32 %v3852_v57, %v3794_v16  ;;  %v3809_v43 = vmul.f32 %v6141_v36, %v6141_v36  ;;  %v3867_v33 = vadd.f32 %v3866_v24, %v3807_v8  ;;  %v3744_v23 = vadd.f32 %v3743_v4, %v6136_v50 }
 0x170   :  { %v6146_v14 = vpop.f32.mrb[28].mxu0 }
 0x171   :  { %6547 = vst [vmem:[#allocation21_spill] sm:$0xff] %v6146_v14  ;;  %v3759_v7 = vadd.f32 %v3758_v10, %v6146_v14  ;;  %v3822_v29 = vmul.f32 %v6146_v14, %v6146_v14  ;;  %v6151_v60 = vpop.f32.mrb[29].mxu0  ;;  %v3868_v35 = vadd.f32 %v3867_v33, %v3808_v42  ;;  %v3745_v27 = vadd.f32 %v3744_v23, %v6141_v36 }
 0x172   :  { %6548 = vst [vmem:[#allocation22_spill] sm:$0xff] %v6151_v60  ;;  %v3823_v25 = vmul.f32 %v6151_v60, %v6151_v60  ;;  %v6156_v16 = vpop.f32.mrb[28].mxu1 }
 0x173   :  { %6549 = vst [vmem:[#allocation23_spill] sm:$0xff] %v6156_v16  ;;  %3854 = vadd.xlane.f32.xlu0 %v3853_v58  ;;  %v3869_v24 = vadd.f32 %v3868_v35, %v3809_v43  ;;  %v3709_v4 = vpop.f32.mrb[29].mxu1  ;;  %v3760_v8 = vadd.f32 %v3759_v7, %v6151_v60  ;;  %v3824_v10 = vmul.f32 %v6156_v16, %v6156_v16 }
 0x174   :  { %v3883_v57 = vadd.f32 %v3882_v18, %v3822_v29  ;;  %v6161_v3 = vpop.f32.mrb[30].mxu0 }
 0x175   :  { %6550 = vst [vmem:[#allocation24_spill] sm:$0xff] %v6161_v3  ;;  %v3775_v42 = vadd.f32 %v3774_v54, %v6161_v3  ;;  %v3837_v23 = vmul.f32 %v6161_v3, %v6161_v3  ;;  %3870 = vadd.xlane.f32.xlu1 %v3869_v24  ;;  %v6166_v33 = vpop.f32.mrb[31].mxu0  ;;  %v3761_v58 = vadd.f32 %v3760_v8, %v6156_v16  ;;  %v4829_v8 = vmov 0  }
 0x176   :  { %6551 = vst [vmem:[#allocation25_spill] sm:$0xff] %v6166_v33  ;;  %v3884_v43 = vadd.f32 %v3883_v57, %v3823_v25  ;;  %v3838_v7 = vmul.f32 %v6166_v33, %v6166_v33  ;;  %v6171_v35 = vpop.f32.mrb[30].mxu1  ;;  %4818 = vset.pattern.permute.xlu0 %v4829_v8  ;;  %4819 = vset.pattern.permute.xlu1 %v4829_v8 }
 0x177   :  { %6552 = vst [vmem:[#allocation26_spill] sm:$0xff] %v6171_v35  ;;  %v3776_v18 = vadd.f32 %v3775_v42, %v6166_v33  ;;  %3746 = vadd.xlane.f32.xlu0 %v3745_v27  ;;  %v3839_v54 = vmul.f32 %v6171_v35, %v6171_v35  ;;  %v3899_v4 = vadd.f32 %v3898_v49, %v3837_v23  ;;  %v3714_v3 = vpop.f32.mrb[31].mxu1 }
 0x178   :  { %v3885_v29 = vadd.f32 %v3884_v43, %v3824_v10 }
 0x179   :  { %3762 = vadd.xlane.f32.xlu1 %v3761_v58  ;;  %v3777_v24 = vadd.f32 %v3776_v18, %v6171_v35  ;;  %v3900_v60 = vadd.f32 %v3899_v4, %v3838_v7 }
 0x17b   :  { %3886 = vadd.xlane.f32.xlu0 %v3885_v29  ;;  %v3901_v25 = vadd.f32 %v3900_v60, %v3839_v54 }
 0x17d   :  { %3778 = vadd.xlane.f32.xlu1 %v3777_v24 }
 0x181   :  { %3902 = vadd.xlane.f32.xlu1 %v3901_v25 }
 0x1fc   :  { %v3731_v57 = vpop.xlane.xlu0 %3730 }
 0x1fd   :  { %v3904_v42 = vmul.f32 0.00055555557, %v3731_v57 }
 0x1ff   :  { %v3912_v10 = vmul.f32 %v3904_v42, %v3904_v42 }
 0x200   :  { %v3855_v27 = vpop.xlane.xlu0 %3854 }
 0x201   :  { %v3908_v43 = vmul.f32 0.00055555557, %v3855_v27 }
 0x202   :  { %v3871_v33 = vpop.xlane.xlu1 %3870 }
 0x203   :  { %v3916_v16 = vsub.f32 %v3908_v43, %v3912_v10  ;;  %v3909_v7 = vmul.f32 0.00055555557, %v3871_v33  ;;  %v3924_v33 = vld [vmem:[%s6510_s1] sm:$0xff] }
 0x204   :  { %v3747_v49 = vpop.xlane.xlu0 %3746 }
 0x205   :  { %v3920_v3 = vmax.f32 %v3916_v16, 0.0  ;;  %v3905_v23 = vmul.f32 0.00055555557, %v3747_v49 }
 0x206   :  { %v3763_v58 = vpop.xlane.xlu1 %3762 }
 0x207   :  { %v3928_v18 = vadd.f32 1e-05, %v3920_v3  ;;  %v3913_v29 = vmul.f32 %v3905_v23, %v3905_v23  ;;  %v3906_v60 = vmul.f32 0.00055555557, %v3763_v58 }
 0x208   :  { %v3887_v54 = vpop.xlane.xlu0 %3886 }
 0x209   :  { %4820 = vrsqrt.f32 %v3928_v18  ;;  %v3917_v4 = vsub.f32 %v3909_v7, %v3913_v29  ;;  %v3914_v24 = vmul.f32 %v3906_v60, %v3906_v60  ;;  %v3910_v25 = vmul.f32 0.00055555557, %v3887_v54  ;;  %v3925_v29 = vld [vmem:[%s6510_s1 + $0x8] sm:$0xff] }
 0x20a   :  { %v3779_v8 = vpop.xlane.xlu1 %3778 }
 0x20b   :  { %v3921_v57 = vmax.f32 %v3917_v4, 0.0  ;;  %v3918_v35 = vsub.f32 %v3910_v25, %v3914_v24  ;;  %v3907_v14 = vmul.f32 0.00055555557, %v3779_v8 }
 0x20d   :  { %v3929_v27 = vadd.f32 1e-05, %v3921_v57  ;;  %v3922_v37 = vmax.f32 %v3918_v35, 0.0  ;;  %v3915_v16 = vmul.f32 %v3907_v14, %v3907_v14  ;;  %v3926_v57 = vld [vmem:[%s6510_s1 + $0x10] sm:$0xff] }
 0x20e   :  { %v3903_v10 = vpop.xlane.xlu1 %3902 }
 0x20f   :  { %4822 = vrsqrt.f32 %v3929_v27  ;;  %v3911_v43 = vmul.f32 0.00055555557, %v3903_v10  ;;  %v3930_v49 = vadd.f32 1e-05, %v3922_v37  ;;  %v3940_v37 = vld [vmem:[%s6511_s2] sm:$0xff] }
 0x211   :  { %v3919_v3 = vsub.f32 %v3911_v43, %v3915_v16  ;;  %4824 = vrsqrt.f32 %v3930_v49  ;;  %v3941_v16 = vld [vmem:[%s6511_s2 + $0x8] sm:$0xff]  ;;  %v3927_v49 = vld [vmem:[%s6510_s1 + $0x18] sm:$0xff] }
 0x213   :  { %v4821_v58 = vpop.eup %4820  ;;  %v3923_v7 = vmax.f32 %v3919_v3, 0.0 }
 0x214   :  { %v3936_v18 = vmul.f32 %v4821_v58, %v3924_v33  ;;  %v3942_v58 = vld [vmem:[%s6511_s2 + $0x10] sm:$0xff] }
 0x215   :  { %v3931_v54 = vadd.f32 1e-05, %v3923_v7  ;;  %v3943_v7 = vld [vmem:[%s6511_s2 + $0x18] sm:$0xff] }
 0x216   :  { %3954 = vperm.xlu0 %4818, %v3936_v18   ;;  %v3944_v24 = vmul.f32 %v3936_v18, %v3904_v42 }
 0x217   :  { %4826 = vrsqrt.f32 %v3931_v54 }
 0x218   :  { %v3948_v25 = vsub.f32 %v3940_v37, %v3944_v24 }
 0x219   :  { %v4823_v35 = vpop.eup %4822 }
 0x21a   :  { %v3937_v4 = vmul.f32 %v4823_v35, %v3925_v29 }
 0x21b   :  { %v4825_v8 = vpop.eup %4824 }
 0x21c   :  { %3959 = vperm.xlu1 %4819, %v3937_v4   ;;  %v3945_v27 = vmul.f32 %v3937_v4, %v3905_v23  ;;  %v3938_v10 = vmul.f32 %v4825_v8, %v3926_v57 }
 0x21e   :  { %v3949_v42 = vsub.f32 %v3941_v16, %v3945_v27  ;;  %v3946_v33 = vmul.f32 %v3938_v10, %v3906_v60 }
 0x220   :  { %4034 = vperm.xlu1 %4819, %v3948_v25   ;;  %v3950_v23 = vsub.f32 %v3942_v58, %v3946_v33 }
 0x221   :  { %v4827_v43 = vpop.eup %4826 }
 0x222   :  { %v3939_v3 = vmul.f32 %v4827_v43, %v3927_v49 }
 0x224   :  { %3964 = vperm.xlu1 %4819, %v3938_v10   ;;  %v3947_v18 = vmul.f32 %v3939_v3, %v3907_v14 }
 0x226   :  { %v3951_v29 = vsub.f32 %v3943_v7, %v3947_v18 }
 0x228   :  { %4039 = vperm.xlu1 %4819, %v3949_v42  }
 0x22c   :  { %3969 = vperm.xlu1 %4819, %v3939_v3  }
 0x230   :  { %4044 = vperm.xlu1 %4819, %v3950_v23  }
 0x234   :  { %4049 = vperm.xlu1 %4819, %v3951_v29  }
 0x295   :  { %v3955_v35 = vpop.permute.xlu0 %3954 }
 0x296   :  { %v3972_v54 = vmul.f32 %v3955_v35, %v5877_v0  ;;  %v3973_v4 = vmul.f32 %v3955_v35, %v5881_v9  ;;  %v3974_v60 = vmul.f32 %v3955_v35, %v5887_v28  ;;  %v3975_v24 = vmul.f32 %v3955_v35, %v5891_v34 }
 0x297   :  { %v3976_v37 = vmul.f32 %v3955_v35, %v5957_v26  ;;  %v3977_v14 = vmul.f32 %v3955_v35, %v5962_v30  ;;  %v3978_v25 = vmul.f32 %v3955_v35, %v5966_v32  ;;  %v3979_v8 = vmul.f32 %v3955_v35, %v5971_v13 }
 0x298   :  { %v3980_v57 = vmul.f32 %v3955_v35, %v6037_v56  ;;  %v3981_v27 = vmul.f32 %v3955_v35, %v6042_v19  ;;  %v3982_v0 = vmul.f32 %v3955_v35, %v6046_v2  ;;  %v3983_v9 = vmul.f32 %v3955_v35, %v6051_v11 }
 0x299   :  { %v3984_v28 = vmul.f32 %v3955_v35, %v6117_v39  ;;  %v3985_v34 = vmul.f32 %v3955_v35, %v6122_v47  ;;  %v3986_v26 = vmul.f32 %v3955_v35, %v6126_v17 }
 0x29b   :  { %v3960_v10 = vpop.permute.xlu1 %3959 }
 0x29c   :  { %v6217_v30 = vmul.f32 %v3960_v10, %v5896_v38  ;;  %v6220_v32 = vmul.f32 %v3960_v10, %v5900_v40  ;;  %v6223_v13 = vmul.f32 %v3960_v10, %v5907_v46  ;;  %v6226_v56 = vmul.f32 %v3960_v10, %v5911_v48 }
 0x29d   :  { %v6229_v19 = vmul.f32 %v3960_v10, %v5973_v21  ;;  %v6232_v2 = vmul.f32 %v3960_v10, %v5981_v41  ;;  %v6235_v11 = vmul.f32 %v3960_v10, %v5985_v44  ;;  %v6238_v38 = vmul.f32 %v3960_v10, %v5989_v51 }
 0x29e   :  { %v6241_v40 = vmul.f32 %v3960_v10, %v6053_v20  ;;  %v6244_v46 = vmul.f32 %v3960_v10, %v6061_v31  ;;  %v6247_v48 = vmul.f32 %v3960_v10, %v6065_v59  ;;  %v6250_v21 = vmul.f32 %v3960_v10, %v6069_v45 }
 0x29f   :  { %v6253_v41 = vmul.f32 %v3960_v10, %v6131_v1  ;;  %v6256_v44 = vmul.f32 %v3960_v10, %v6136_v50  ;;  %v6259_v51 = vmul.f32 %v3960_v10, %v6141_v36  ;;  %v4035_v20 = vpop.permute.xlu1 %4034 }
 0x2a0   :  { %v4052_v47 = vadd.f32 %v4035_v20, %v3972_v54  ;;  %v4053_v39 = vadd.f32 %v4035_v20, %v3973_v4  ;;  %v4054_v31 = vadd.f32 %v4035_v20, %v3974_v60  ;;  %v4055_v17 = vadd.f32 %v4035_v20, %v3975_v24 }
 0x2a1   :  { %v4056_v16 = vadd.f32 %v4035_v20, %v3976_v37  ;;  %v4057_v59 = vadd.f32 %v4035_v20, %v3977_v14  ;;  %v4058_v42 = vadd.f32 %v4035_v20, %v3978_v25  ;;  %v4059_v43 = vadd.f32 %v4035_v20, %v3979_v8 }
 0x2a2   :  { %v4060_v45 = vadd.f32 %v4035_v20, %v3980_v57  ;;  %v4061_v49 = vadd.f32 %v4035_v20, %v3981_v27  ;;  %v4062_v3 = vadd.f32 %v4035_v20, %v3982_v0  ;;  %v4063_v1 = vadd.f32 %v4035_v20, %v3983_v9 }
 0x2a3   :  { %v4064_v33 = vadd.f32 %v4035_v20, %v3984_v28  ;;  %v4065_v58 = vadd.f32 %v4035_v20, %v3985_v34  ;;  %v4066_v50 = vadd.f32 %v4035_v20, %v3986_v26  ;;  %v4112_v23 = vmax.f32 %v4052_v47, 0.0  ;;  %v3965_v18 = vpop.permute.xlu1 %3964 }
 0x2a4   :  { %v4113_v36 = vmax.f32 %v4053_v39, 0.0  ;;  %v4114_v7 = vmax.f32 %v4054_v31, 0.0  ;;  %v4115_v29 = vmax.f32 %v4055_v17, 0.0  ;;  %v4116_v35 = vmax.f32 %v4056_v16, 0.0  ;;  %v6554_v39 = vld [vmem:[#allocation21_spill] sm:$0xff]  ;;  %v6555_v17 = vld [vmem:[#allocation22_spill] sm:$0xff] }
 0x2a5   :  { %v4117_v54 = vmax.f32 %v4057_v59, 0.0  ;;  %v4118_v4 = vmax.f32 %v4058_v42, 0.0  ;;  %v4119_v60 = vmax.f32 %v4059_v43, 0.0  ;;  %v4120_v24 = vmax.f32 %v4060_v45, 0.0  ;;  %4172 = vst [vmem:[%s6514_s5] sm:$0xff] %v4112_v23  ;;  %v6556_v59 = vld [vmem:[#allocation23_spill] sm:$0xff] }
 0x2a6   :  { %v4121_v37 = vmax.f32 %v4061_v49, 0.0  ;;  %v4122_v14 = vmax.f32 %v4062_v3, 0.0  ;;  %v4123_v25 = vmax.f32 %v4063_v1, 0.0  ;;  %v4124_v8 = vmax.f32 %v4064_v33, 0.0  ;;  %4173 = vst [vmem:[%s6514_s5 + $0x8] sm:$0xff] %v4113_v36  ;;  %4174 = vst [vmem:[%s6514_s5 + $0x10] sm:$0xff] %v4114_v7 }
 0x2a7   :  { %4175 = vst [vmem:[%s6514_s5 + $0x18] sm:$0xff] %v4115_v29  ;;  %4176 = vst [vmem:[%s6514_s5 + $0x20] sm:$0xff] %v4116_v35  ;;  %v4125_v57 = vmax.f32 %v4065_v58, 0.0  ;;  %v4126_v27 = vmax.f32 %v4066_v50, 0.0  ;;  %v4002_v0 = vmul.f32 %v3965_v18, %v5914_v52  ;;  %v6290_v9 = vmul.f32 %v3965_v18, %v5920_v55  ;;  %v4040_v28 = vpop.permute.xlu1 %4039 }
 0x2a8   :  { %4177 = vst [vmem:[%s6514_s5 + $0x28] sm:$0xff] %v4117_v54  ;;  %4178 = vst [vmem:[%s6514_s5 + $0x30] sm:$0xff] %v4118_v4  ;;  %v4004_v52 = vmul.f32 %v3965_v18, %v5927_v61  ;;  %v4005_v55 = vmul.f32 %v3965_v18, %v5931_v62  ;;  %v4006_v34 = vmul.f32 %v3965_v18, %v5991_v53 }
 0x2a9   :  { %4179 = vst [vmem:[%s6514_s5 + $0x38] sm:$0xff] %v4119_v60  ;;  %4180 = vst [vmem:[%s6514_s5 + $0x40] sm:$0xff] %v4120_v24  ;;  %v6308_v10 = vmul.f32 %v3965_v18, %v6000_v63  ;;  %v4008_v26 = vmul.f32 %v3965_v18, %v6005_v5  ;;  %v4009_v20 = vmul.f32 %v3965_v18, %v6010_v12  ;;  %v6553_v63 = vld [vmem:[#allocation16_spill] sm:$0xff] }
 0x2aa   :  { %4181 = vst [vmem:[%s6514_s5 + $0x48] sm:$0xff] %v4121_v37  ;;  %4182 = vst [vmem:[%s6514_s5 + $0x50] sm:$0xff] %v4122_v14  ;;  %v4010_v61 = vmul.f32 %v3965_v18, %v6071_v15  ;;  %v4011_v62 = vmul.f32 %v3965_v18, %v6080_v6  ;;  %v4012_v53 = vmul.f32 %v3965_v18, %v6085_v22 }
 0x2ab   :  { %4183 = vst [vmem:[%s6514_s5 + $0x58] sm:$0xff] %v4123_v25  ;;  %4184 = vst [vmem:[%s6514_s5 + $0x60] sm:$0xff] %v4124_v8  ;;  %v4013_v47 = vmul.f32 %v3965_v18, %v6553_v63  ;;  %v4014_v31 = vmul.f32 %v3965_v18, %v6554_v39  ;;  %v4015_v16 = vmul.f32 %v3965_v18, %v6555_v17  ;;  %v6328_v45 = vpop.permute.xlu1 %3969 }
 0x2ac   :  { %4185 = vst [vmem:[%s6514_s5 + $0x68] sm:$0xff] %v4125_v57  ;;  %4186 = vst [vmem:[%s6514_s5 + $0x70] sm:$0xff] %v4126_v27  ;;  %v4016_v42 = vmul.f32 %v3965_v18, %v6556_v59  ;;  %v4067_v43 = vadd.f32 %v4040_v28, %v6217_v30  ;;  %v4068_v5 = vadd.f32 %v4040_v28, %v6220_v32 }
 0x2ad   :  { %v4069_v12 = vadd.f32 %v4040_v28, %v6223_v13  ;;  %v4070_v15 = vadd.f32 %v4040_v28, %v6226_v56  ;;  %v4071_v6 = vadd.f32 %v4040_v28, %v6229_v19  ;;  %v4072_v22 = vadd.f32 %v4040_v28, %v6232_v2 }
 0x2ae   :  { %v4073_v49 = vadd.f32 %v4040_v28, %v6235_v11  ;;  %v4074_v3 = vadd.f32 %v4040_v28, %v6238_v38  ;;  %v4075_v1 = vadd.f32 %v4040_v28, %v6241_v40  ;;  %v4076_v30 = vadd.f32 %v4040_v28, %v6244_v46 }
 0x2af   :  { %v4077_v32 = vadd.f32 %v4040_v28, %v6247_v48  ;;  %v4078_v13 = vadd.f32 %v4040_v28, %v6250_v21  ;;  %v4079_v33 = vadd.f32 %v4040_v28, %v6253_v41  ;;  %v4080_v56 = vadd.f32 %v4040_v28, %v6256_v44  ;;  %v4045_v23 = vpop.permute.xlu1 %4044 }
 0x2b0   :  { %v4081_v19 = vadd.f32 %v4040_v28, %v6259_v51  ;;  %v4127_v58 = vmax.f32 %v4067_v43, 0.0  ;;  %v4128_v2 = vmax.f32 %v4068_v5, 0.0  ;;  %v4129_v50 = vmax.f32 %v4069_v12, 0.0 }
 0x2b1   :  { %v4130_v11 = vmax.f32 %v4070_v15, 0.0  ;;  %v4131_v38 = vmax.f32 %v4071_v6, 0.0  ;;  %v4132_v18 = vmax.f32 %v4072_v22, 0.0  ;;  %v4133_v40 = vmax.f32 %v4073_v49, 0.0  ;;  %v6560_v6 = vld [vmem:[#allocation11_spill] sm:$0xff]  ;;  %v6561_v49 = vld [vmem:[#allocation12_spill] sm:$0xff] }
 0x2b2   :  { %v4134_v36 = vmax.f32 %v4074_v3, 0.0  ;;  %v4135_v46 = vmax.f32 %v4075_v1, 0.0  ;;  %v4136_v7 = vmax.f32 %v4076_v30, 0.0  ;;  %v4137_v48 = vmax.f32 %v4077_v32, 0.0  ;;  %4187 = vst [vmem:[%s6514_s5 + $0x78] sm:$0xff] %v4127_v58  ;;  %4188 = vst [vmem:[%s6514_s5 + $0x80] sm:$0xff] %v4128_v2 }
 0x2b3   :  { %v4138_v29 = vmax.f32 %v4078_v13, 0.0  ;;  %4189 = vst [vmem:[%s6514_s5 + $0x88] sm:$0xff] %v4129_v50  ;;  %4190 = vst [vmem:[%s6514_s5 + $0x90] sm:$0xff] %v4130_v11  ;;  %v4139_v21 = vmax.f32 %v4079_v33, 0.0  ;;  %v4140_v41 = vmax.f32 %v4080_v56, 0.0  ;;  %v4141_v44 = vmax.f32 %v4081_v19, 0.0  ;;  %v4050_v33 = vpop.permute.xlu1 %4049 }
 0x2b4   :  { %4191 = vst [vmem:[%s6514_s5 + $0x98] sm:$0xff] %v4131_v38  ;;  %4192 = vst [vmem:[%s6514_s5 + $0xa0] sm:$0xff] %v4132_v18  ;;  %v4082_v51 = vadd.f32 %v4045_v23, %v4002_v0  ;;  %v4083_v35 = vadd.f32 %v4045_v23, %v6290_v9  ;;  %v4084_v54 = vadd.f32 %v4045_v23, %v4004_v52  ;;  %v6562_v1 = vld [vmem:[#allocation13_spill] sm:$0xff]  ;;  %v6563_v32 = vld [vmem:[#allocation14_spill] sm:$0xff] }
 0x2b5   :  { %4193 = vst [vmem:[%s6514_s5 + $0xa8] sm:$0xff] %v4133_v40  ;;  %4194 = vst [vmem:[%s6514_s5 + $0xb0] sm:$0xff] %v4134_v36  ;;  %v4085_v4 = vadd.f32 %v4045_v23, %v4005_v55  ;;  %v4086_v60 = vadd.f32 %v4045_v23, %v4006_v34  ;;  %v4087_v24 = vadd.f32 %v4045_v23, %v6308_v10  ;;  %v6564_v56 = vld [vmem:[#allocation15_spill] sm:$0xff]  ;;  %v6565_v58 = vld [vmem:[#allocation17_spill] sm:$0xff] }
 0x2b6   :  { %4195 = vst [vmem:[%s6514_s5 + $0xb8] sm:$0xff] %v4135_v46  ;;  %4196 = vst [vmem:[%s6514_s5 + $0xc0] sm:$0xff] %v4136_v7  ;;  %v4088_v37 = vadd.f32 %v4045_v23, %v4008_v26  ;;  %v4089_v14 = vadd.f32 %v4045_v23, %v4009_v20  ;;  %v4090_v25 = vadd.f32 %v4045_v23, %v4010_v61  ;;  %v4142_v52 = vmax.f32 %v4082_v51, 0.0  ;;  %v6566_v50 = vld [vmem:[#allocation18_spill] sm:$0xff]  ;;  %v6568_v18 = vld [vmem:[#allocation20_spill] sm:$0xff] }
 0x2b7   :  { %4197 = vst [vmem:[%s6514_s5 + $0xc8] sm:$0xff] %v4137_v48  ;;  %4198 = vst [vmem:[%s6514_s5 + $0xd0] sm:$0xff] %v4138_v29  ;;  %v4091_v8 = vadd.f32 %v4045_v23, %v4011_v62  ;;  %v4092_v57 = vadd.f32 %v4045_v23, %v4012_v53  ;;  %v4093_v27 = vadd.f32 %v4045_v23, %v4013_v47  ;;  %v4143_v55 = vmax.f32 %v4083_v35, 0.0  ;;  %v6557_v53 = vld [vmem:[#allocation8_spill] sm:$0xff]  ;;  %v6570_v7 = vld [vmem:[#allocation25_spill] sm:$0xff] }
 0x2b8   :  { %4199 = vst [vmem:[%s6514_s5 + $0xd8] sm:$0xff] %v4139_v21  ;;  %4200 = vst [vmem:[%s6514_s5 + $0xe0] sm:$0xff] %v4140_v41  ;;  %v4094_v0 = vadd.f32 %v4045_v23, %v4014_v31  ;;  %v4095_v9 = vadd.f32 %v4045_v23, %v4015_v16  ;;  %v4096_v28 = vadd.f32 %v4045_v23, %v4016_v42  ;;  %v4144_v34 = vmax.f32 %v4084_v54, 0.0  ;;  %v6558_v31 = vld [vmem:[#allocation9_spill] sm:$0xff]  ;;  %v6559_v42 = vld [vmem:[#allocation10_spill] sm:$0xff] }
 0x2b9   :  { %4201 = vst [vmem:[%s6514_s5 + $0xe8] sm:$0xff] %v4141_v44  ;;  %v4145_v63 = vmax.f32 %v4085_v4, 0.0  ;;  %v4146_v39 = vmax.f32 %v4086_v60, 0.0  ;;  %v4147_v17 = vmax.f32 %v4087_v24, 0.0  ;;  %v4148_v59 = vmax.f32 %v4088_v37, 0.0  ;;  %4202 = vst [vmem:[%s6514_s5 + $0xf0] sm:$0xff] %v4142_v52 }
 0x2ba   :  { %v4149_v43 = vmax.f32 %v4089_v14, 0.0  ;;  %v4150_v5 = vmax.f32 %v4090_v25, 0.0  ;;  %v4151_v12 = vmax.f32 %v4091_v8, 0.0  ;;  %4203 = vst [vmem:[%s6514_s5 + $0xf8] sm:$0xff] %v4143_v55  ;;  %v4152_v10 = vmax.f32 %v4092_v57, 0.0  ;;  %4204 = vst [vmem:[%s6514_s5 + $0x100] sm:$0xff] %v4144_v34 }
 0x2bb   :  { %v4153_v26 = vmax.f32 %v4093_v27, 0.0  ;;  %v4154_v20 = vmax.f32 %v4094_v0, 0.0  ;;  %v4155_v61 = vmax.f32 %v4095_v9, 0.0  ;;  %4205 = vst [vmem:[%s6514_s5 + $0x108] sm:$0xff] %v4145_v63  ;;  %4206 = vst [vmem:[%s6514_s5 + $0x110] sm:$0xff] %v4146_v39  ;;  %v4156_v62 = vmax.f32 %v4096_v28, 0.0 }
 0x2bc   :  { %4207 = vst [vmem:[%s6514_s5 + $0x118] sm:$0xff] %v4147_v17  ;;  %4208 = vst [vmem:[%s6514_s5 + $0x120] sm:$0xff] %v4148_v59  ;;  %v4017_v47 = vmul.f32 %v6328_v45, %v6557_v53  ;;  %v4018_v16 = vmul.f32 %v6328_v45, %v6558_v31  ;;  %v4019_v15 = vmul.f32 %v6328_v45, %v6559_v42  ;;  %v6567_v23 = vld [vmem:[#allocation19_spill] sm:$0xff]  ;;  %v6569_v36 = vld [vmem:[#allocation24_spill] sm:$0xff] }
 0x2bd   :  { %4209 = vst [vmem:[%s6514_s5 + $0x128] sm:$0xff] %v4149_v43  ;;  %4210 = vst [vmem:[%s6514_s5 + $0x130] sm:$0xff] %v4150_v5  ;;  %v4020_v22 = vmul.f32 %v6328_v45, %v6560_v6  ;;  %v4021_v3 = vmul.f32 %v6328_v45, %v6561_v49  ;;  %v4022_v30 = vmul.f32 %v6328_v45, %v6562_v1  ;;  %v6571_v29 = vld [vmem:[#allocation26_spill] sm:$0xff] }
 0x2be   :  { %4211 = vst [vmem:[%s6514_s5 + $0x138] sm:$0xff] %v4151_v12  ;;  %4212 = vst [vmem:[%s6514_s5 + $0x140] sm:$0xff] %v4152_v10  ;;  %v4023_v13 = vmul.f32 %v6328_v45, %v6563_v32  ;;  %v4024_v19 = vmul.f32 %v6328_v45, %v6564_v56  ;;  %v4025_v2 = vmul.f32 %v6328_v45, %v6565_v58 }
 0x2bf   :  { %4213 = vst [vmem:[%s6514_s5 + $0x148] sm:$0xff] %v4153_v26  ;;  %4214 = vst [vmem:[%s6514_s5 + $0x150] sm:$0xff] %v4154_v20  ;;  %v4026_v11 = vmul.f32 %v6328_v45, %v6566_v50  ;;  %v4027_v38 = vmul.f32 %v6328_v45, %v6567_v23  ;;  %v4028_v40 = vmul.f32 %v6328_v45, %v6568_v18 }
 0x2c0   :  { %4215 = vst [vmem:[%s6514_s5 + $0x158] sm:$0xff] %v4155_v61  ;;  %4216 = vst [vmem:[%s6514_s5 + $0x160] sm:$0xff] %v4156_v62  ;;  %v4029_v46 = vmul.f32 %v6328_v45, %v6569_v36  ;;  %v4030_v48 = vmul.f32 %v6328_v45, %v6570_v7  ;;  %v4031_v21 = vmul.f32 %v6328_v45, %v6571_v29 }
 0x2c1   :  { %v4097_v41 = vadd.f32 %v4050_v33, %v4017_v47  ;;  %v4098_v44 = vadd.f32 %v4050_v33, %v4018_v16  ;;  %v4099_v51 = vadd.f32 %v4050_v33, %v4019_v15  ;;  %v4100_v35 = vadd.f32 %v4050_v33, %v4020_v22 }
 0x2c2   :  { %v4101_v54 = vadd.f32 %v4050_v33, %v4021_v3  ;;  %v4102_v4 = vadd.f32 %v4050_v33, %v4022_v30  ;;  %v4103_v60 = vadd.f32 %v4050_v33, %v4023_v13  ;;  %v4104_v24 = vadd.f32 %v4050_v33, %v4024_v19 }
 0x2c3   :  { %v4105_v37 = vadd.f32 %v4050_v33, %v4025_v2  ;;  %v4106_v14 = vadd.f32 %v4050_v33, %v4026_v11  ;;  %v4107_v25 = vadd.f32 %v4050_v33, %v4027_v38  ;;  %v4108_v8 = vadd.f32 %v4050_v33, %v4028_v40 }
 0x2c4   :  { %v4109_v57 = vadd.f32 %v4050_v33, %v4029_v46  ;;  %v4110_v27 = vadd.f32 %v4050_v33, %v4030_v48  ;;  %v4111_v0 = vadd.f32 %v4050_v33, %v4031_v21  ;;  %v4157_v9 = vmax.f32 %v4097_v41, 0.0 }
 0x2c5   :  { %v4158_v28 = vmax.f32 %v4098_v44, 0.0  ;;  %v4159_v52 = vmax.f32 %v4099_v51, 0.0  ;;  %v4160_v55 = vmax.f32 %v4100_v35, 0.0  ;;  %v4161_v45 = vmax.f32 %v4101_v54, 0.0 }
 0x2c6   :  { %v4162_v34 = vmax.f32 %v4102_v4, 0.0  ;;  %v4163_v63 = vmax.f32 %v4103_v60, 0.0  ;;  %v4164_v39 = vmax.f32 %v4104_v24, 0.0  ;;  %v4165_v17 = vmax.f32 %v4105_v37, 0.0  ;;  %4217 = vst [vmem:[%s6514_s5 + $0x168] sm:$0xff] %v4157_v9 }
 0x2c7   :  { %v4166_v59 = vmax.f32 %v4106_v14, 0.0  ;;  %v4167_v43 = vmax.f32 %v4107_v25, 0.0  ;;  %v4168_v5 = vmax.f32 %v4108_v8, 0.0  ;;  %v4169_v12 = vmax.f32 %v4109_v57, 0.0  ;;  %4218 = vst [vmem:[%s6514_s5 + $0x170] sm:$0xff] %v4158_v28  ;;  %4219 = vst [vmem:[%s6514_s5 + $0x178] sm:$0xff] %v4159_v52 }
 0x2c8   :  { %4220 = vst [vmem:[%s6514_s5 + $0x180] sm:$0xff] %v4160_v55  ;;  %4221 = vst [vmem:[%s6514_s5 + $0x188] sm:$0xff] %v4161_v45  ;;  %v4170_v10 = vmax.f32 %v4110_v27, 0.0  ;;  %v4171_v26 = vmax.f32 %v4111_v0, 0.0 }
 0x2c9   :  { %4222 = vst [vmem:[%s6514_s5 + $0x190] sm:$0xff] %v4162_v34  ;;  %4223 = vst [vmem:[%s6514_s5 + $0x198] sm:$0xff] %v4163_v63 }
 0x2ca   :  { %4224 = vst [vmem:[%s6514_s5 + $0x1a0] sm:$0xff] %v4164_v39  ;;  %4225 = vst [vmem:[%s6514_s5 + $0x1a8] sm:$0xff] %v4165_v17 }
 0x2cb   :  { %4226 = vst [vmem:[%s6514_s5 + $0x1b0] sm:$0xff] %v4166_v59  ;;  %4227 = vst [vmem:[%s6514_s5 + $0x1b8] sm:$0xff] %v4167_v43 }
 0x2cc   :  { %4228 = vst [vmem:[%s6514_s5 + $0x1c0] sm:$0xff] %v4168_v5  ;;  %4229 = vst [vmem:[%s6514_s5 + $0x1c8] sm:$0xff] %v4169_v12 }
 0x2cd   :  { %4230 = vst [vmem:[%s6514_s5 + $0x1d0] sm:$0xff] %v4170_v10  ;;  %4231 = vst [vmem:[%s6514_s5 + $0x1d8] sm:$0xff] %v4171_v26 }

// kernel: netconv_forward.12
= control target key start
LH: loop header
LB: loop body
LE: loop exit
PB: predicated region body
PF: predicated region fallthrough
CT: control target
= control target key end

     0   :  { %v49_v4 = vlaneseq  ;;  %vm1625_vm1 = vcmask 261120   ;;  %s3906_s0 = inlined_call_operand.vmem [shape: f32[64,288], index: 0, kind: input, shape index: {}]   ;;  %s3907_s1 = inlined_call_operand.vmem [shape: f32[64,1], index: 1, kind: input, shape index: {}]   ;;  %s3908_s2 = inlined_call_operand.vmem [shape: f32[64,1], index: 2, kind: input, shape index: {}]   ;;  %s3909_s3 = inlined_call_operand.vmem [shape: f32[288,392], index: 3, kind: input, shape index: {}]   ;;  %s3910_s4 = inlined_call_operand.<no memory space> [shape: f32[], index: 4, kind: input, shape index: {}]   ;;  %s3911_s5 = inlined_call_operand.vmem [shape: f32[64,512], index: 5, kind: output, shape index: {}]  }
   0x1   :  { %v2912_v0 = vstv %s3910_s4  ;;  %v2522_v1 = vld [vmem:[%s3909_s3 + $0x8] sm:$0xff]  ;;  %v19_v3 = vld [vmem:[%s3909_s3] sm:$0xff]  ;;  %v2524_v13 = vld [vmem:[%s3909_s3 + $0x18] sm:$0xff] }
   0x2   :  { %v2526_v2 = vld [vmem:[%s3909_s3 + $0x28] sm:$0xff]  ;;  %v2525_v6 = vld [vmem:[%s3909_s3 + $0x20] sm:$0xff]  ;;  %v50_v14 = vand.u32 127, %v49_v4  ;;  %v2528_v15 = vld [vmem:[%s3909_s3 + $0x38] sm:$0xff] }
   0x3   :  { %v2681_v5 = vpack.c.bf16 %v2526_v2, %v2522_v1  ;;  %v2530_v7 = vld [vmem:[%s3909_s3 + $0x48] sm:$0xff]  ;;  %v2683_v9 = vpack.c.bf16 %v2525_v6, %v19_v3  ;;  %v2529_v11 = vld [vmem:[%s3909_s3 + $0x40] sm:$0xff]  ;;  %v2523_v20 = vld [vmem:[%s3909_s3 + $0x10] sm:$0xff] }
   0x4   :  { %v2534_v8 = vld [vmem:[%s3909_s3 + $0x68] sm:$0xff]  ;;  %v2533_v12 = vld [vmem:[%s3909_s3 + $0x60] sm:$0xff]  ;;  %v2950_v19 = vadd.s32 384, %v50_v14  ;;  %v2527_v21 = vld [vmem:[%s3909_s3 + $0x30] sm:$0xff] }
   0x5   :  { %v2685_v10 = vpack.c.bf16 %v2534_v8, %v2530_v7  ;;  %2682 = vmatprep.subr.bf16.mxu0 %v2681_v5  ;;  %v2538_v16 = vld [vmem:[%s3909_s3 + $0x88] sm:$0xff]  ;;  %v2687_v18 = vpack.c.bf16 %v2533_v12, %v2529_v11  ;;  %v2537_v22 = vld [vmem:[%s3909_s3 + $0x80] sm:$0xff]  ;;  %v2532_v25 = vld [vmem:[%s3909_s3 + $0x58] sm:$0xff]  ;;  %v2755_v27 = vpack.c.bf16 %v2527_v21, %v2523_v20 }
   0x6   :  { %v2542_v17 = vld [vmem:[%s3909_s3 + $0xa8] sm:$0xff]  ;;  %2684 = vmatpush1.bf16.msra.mxu0 %v2683_v9  ;;  %v2541_v24 = vld [vmem:[%s3909_s3 + $0xa0] sm:$0xff]  ;;  %v2536_v26 = vld [vmem:[%s3909_s3 + $0x78] sm:$0xff]  ;;  %vm52_vm0 = vcmp.lt.s32.totalorder %v2950_v19, 392 }
   0x7   :  { %2686 = vmatprep.subr.bf16.mxu0 %v2685_v10  ;;  %v2689_v23 = vpack.c.bf16 %v2542_v17, %v2538_v16  ;;  %v2546_v28 = vld [vmem:[%s3909_s3 + $0xc8] sm:$0xff]  ;;  %v53_v30 = vsel %vm52_vm0, %v2524_v13, %v2912_v0  ;;  %v93_v31 = vsel %vm52_vm0, %v2528_v15, %v2912_v0  ;;  %v133_v32 = vsel %vm52_vm0, %v2532_v25, %v2912_v0  ;;  %v2531_v34 = vld [vmem:[%s3909_s3 + $0x50] sm:$0xff]  ;;  %v2540_v39 = vld [vmem:[%s3909_s3 + $0x98] sm:$0xff] }
   0x8   :  { %v2550_v29 = vld [vmem:[%s3909_s3 + $0xe8] sm:$0xff]  ;;  %v173_v33 = vsel %vm52_vm0, %v2536_v26, %v2912_v0  ;;  %v2753_v35 = vpack.c.bf16 %v93_v31, %v53_v30  ;;  %v2691_v36 = vpack.c.bf16 %v2541_v24, %v2537_v22  ;;  %v2535_v38 = vld [vmem:[%s3909_s3 + $0x70] sm:$0xff]  ;;  %v2544_v40 = vld [vmem:[%s3909_s3 + $0xb8] sm:$0xff]  ;;  %v213_v44 = vsel %vm52_vm0, %v2540_v39, %v2912_v0 }
   0x9   :  { %v2757_v37 = vpack.c.bf16 %v173_v33, %v133_v32  ;;  %v2693_v41 = vpack.c.bf16 %v2550_v29, %v2546_v28  ;;  %v2545_v42 = vld [vmem:[%s3909_s3 + $0xc0] sm:$0xff]  ;;  %v253_v45 = vsel %vm52_vm0, %v2544_v40, %v2912_v0  ;;  %v2554_v46 = vld [vmem:[%s3909_s3 + $0x108] sm:$0xff]  ;;  %v2548_v48 = vld [vmem:[%s3909_s3 + $0xd8] sm:$0xff]  ;;  %v2759_v49 = vpack.c.bf16 %v2535_v38, %v2531_v34 }
   0xa   :  { %2688 = vmatpush1.bf16.msra.mxu0 %v2687_v18  ;;  %v2549_v43 = vld [vmem:[%s3909_s3 + $0xe0] sm:$0xff]  ;;  %2754 = vmatprep.subr.bf16.mxu1 %v2753_v35  ;;  %v2558_v47 = vld [vmem:[%s3909_s3 + $0x128] sm:$0xff]  ;;  %v2552_v50 = vld [vmem:[%s3909_s3 + $0xf8] sm:$0xff]  ;;  %v2761_v52 = vpack.c.bf16 %v253_v45, %v213_v44  ;;  %v293_v58 = vsel %vm52_vm0, %v2548_v48, %v2912_v0 }
   0xb   :  { %2690 = vmatprep.subr.bf16.mxu0 %v2689_v23  ;;  %2756 = vmatpush1.bf16.msra.mxu1 %v2755_v27  ;;  %v2695_v51 = vpack.c.bf16 %v2549_v43, %v2545_v42  ;;  %v2539_v53 = vld [vmem:[%s3909_s3 + $0x90] sm:$0xff]  ;;  %v2697_v55 = vpack.c.bf16 %v2558_v47, %v2554_v46  ;;  %v2553_v56 = vld [vmem:[%s3909_s3 + $0x100] sm:$0xff]  ;;  %v333_v59 = vsel %vm52_vm0, %v2552_v50, %v2912_v0  ;;  %v2562_v60 = vld [vmem:[%s3909_s3 + $0x148] sm:$0xff] }
   0xc   :  { %2758 = vmatprep.subr.bf16.mxu1 %v2757_v37  ;;  %v2543_v54 = vld [vmem:[%s3909_s3 + $0xb0] sm:$0xff]  ;;  %v2557_v57 = vld [vmem:[%s3909_s3 + $0x120] sm:$0xff]  ;;  %v2566_v61 = vld [vmem:[%s3909_s3 + $0x168] sm:$0xff]  ;;  %v2765_v3 = vpack.c.bf16 %v333_v59, %v293_v58 }
   0xd   :  { %v2556_v62 = vld [vmem:[%s3909_s3 + $0x118] sm:$0xff]  ;;  %v2763_v1 = vpack.c.bf16 %v2543_v54, %v2539_v53  ;;  %v2699_v2 = vpack.c.bf16 %v2557_v57, %v2553_v56  ;;  %v2547_v4 = vld [vmem:[%s3909_s3 + $0xd0] sm:$0xff]  ;;  %v2701_v6 = vpack.c.bf16 %v2566_v61, %v2562_v60  ;;  %v2561_v7 = vld [vmem:[%s3909_s3 + $0x140] sm:$0xff] }
   0xe   :  { %2692 = vmatpush1.bf16.msra.mxu0 %v2691_v36  ;;  %v2560_v63 = vld [vmem:[%s3909_s3 + $0x138] sm:$0xff]  ;;  %v2551_v5 = vld [vmem:[%s3909_s3 + $0xf0] sm:$0xff]  ;;  %v2565_v8 = vld [vmem:[%s3909_s3 + $0x160] sm:$0xff]  ;;  %v373_v9 = vsel %vm52_vm0, %v2556_v62, %v2912_v0 }
   0xf   :  { %2694 = vmatprep.subr.bf16.mxu0 %v2693_v41  ;;  %2760 = vmatpush1.bf16.msra.mxu1 %v2759_v49  ;;  %v413_v10 = vsel %vm52_vm0, %v2560_v63, %v2912_v0  ;;  %v2570_v11 = vld [vmem:[%s3909_s3 + $0x188] sm:$0xff]  ;;  %v2564_v13 = vld [vmem:[%s3909_s3 + $0x158] sm:$0xff]  ;;  %v2767_v15 = vpack.c.bf16 %v2551_v5, %v2547_v4  ;;  %v2703_v16 = vpack.c.bf16 %v2565_v8, %v2561_v7  ;;  %v2555_v18 = vld [vmem:[%s3909_s3 + $0x110] sm:$0xff] }
  0x10   :  { %2762 = vmatprep.subr.bf16.mxu1 %v2761_v52  ;;  %v2574_v12 = vld [vmem:[%s3909_s3 + $0x1a8] sm:$0xff]  ;;  %v2568_v14 = vld [vmem:[%s3909_s3 + $0x178] sm:$0xff]  ;;  %v2769_v17 = vpack.c.bf16 %v413_v10, %v373_v9  ;;  %v2559_v20 = vld [vmem:[%s3909_s3 + $0x130] sm:$0xff]  ;;  %v453_v24 = vsel %vm52_vm0, %v2564_v13, %v2912_v0 }
  0x11   :  { %v2705_v21 = vpack.c.bf16 %v2574_v12, %v2570_v11  ;;  %v2569_v22 = vld [vmem:[%s3909_s3 + $0x180] sm:$0xff]  ;;  %v493_v25 = vsel %vm52_vm0, %v2568_v14, %v2912_v0  ;;  %v2578_v26 = vld [vmem:[%s3909_s3 + $0x1c8] sm:$0xff]  ;;  %v2572_v28 = vld [vmem:[%s3909_s3 + $0x198] sm:$0xff]  ;;  %v2771_v30 = vpack.c.bf16 %v2559_v20, %v2555_v18 }
  0x12   :  { %2696 = vmatpush1.bf16.msra.mxu0 %v2695_v51  ;;  %v2573_v23 = vld [vmem:[%s3909_s3 + $0x1a0] sm:$0xff]  ;;  %v2582_v27 = vld [vmem:[%s3909_s3 + $0x1e8] sm:$0xff]  ;;  %v2576_v29 = vld [vmem:[%s3909_s3 + $0x1b8] sm:$0xff]  ;;  %v2773_v32 = vpack.c.bf16 %v493_v25, %v453_v24  ;;  %v533_v38 = vsel %vm52_vm0, %v2572_v28, %v2912_v0 }
  0x13   :  { %2698 = vmatprep.subr.bf16.mxu0 %v2697_v55  ;;  %2764 = vmatpush1.bf16.msra.mxu1 %v2763_v1  ;;  %v2707_v31 = vpack.c.bf16 %v2573_v23, %v2569_v22  ;;  %v2563_v33 = vld [vmem:[%s3909_s3 + $0x150] sm:$0xff]  ;;  %v2709_v35 = vpack.c.bf16 %v2582_v27, %v2578_v26  ;;  %v2577_v36 = vld [vmem:[%s3909_s3 + $0x1c0] sm:$0xff]  ;;  %v573_v39 = vsel %vm52_vm0, %v2576_v29, %v2912_v0  ;;  %v2586_v40 = vld [vmem:[%s3909_s3 + $0x208] sm:$0xff] }
  0x14   :  { %2766 = vmatprep.subr.bf16.mxu1 %v2765_v3  ;;  %v2567_v34 = vld [vmem:[%s3909_s3 + $0x170] sm:$0xff]  ;;  %v2581_v37 = vld [vmem:[%s3909_s3 + $0x1e0] sm:$0xff]  ;;  %v2590_v41 = vld [vmem:[%s3909_s3 + $0x228] sm:$0xff]  ;;  %v2777_v46 = vpack.c.bf16 %v573_v39, %v533_v38 }
  0x15   :  { %v2580_v42 = vld [vmem:[%s3909_s3 + $0x1d8] sm:$0xff]  ;;  %v2775_v44 = vpack.c.bf16 %v2567_v34, %v2563_v33  ;;  %v2711_v45 = vpack.c.bf16 %v2581_v37, %v2577_v36  ;;  %v2571_v47 = vld [vmem:[%s3909_s3 + $0x190] sm:$0xff]  ;;  %v2713_v49 = vpack.c.bf16 %v2590_v41, %v2586_v40  ;;  %v2585_v50 = vld [vmem:[%s3909_s3 + $0x200] sm:$0xff] }
  0x16   :  { %2700 = vmatpush1.bf16.msra.mxu0 %v2699_v2  ;;  %v2584_v43 = vld [vmem:[%s3909_s3 + $0x1f8] sm:$0xff]  ;;  %v2575_v48 = vld [vmem:[%s3909_s3 + $0x1b0] sm:$0xff]  ;;  %v2589_v51 = vld [vmem:[%s3909_s3 + $0x220] sm:$0xff]  ;;  %v613_v52 = vsel %vm52_vm0, %v2580_v42, %v2912_v0 }
  0x17   :  { %2702 = vmatprep.subr.bf16.mxu0 %v2701_v6  ;;  %2768 = vmatpush1.bf16.msra.mxu1 %v2767_v15  ;;  %v653_v53 = vsel %vm52_vm0, %v2584_v43, %v2912_v0  ;;  %v2594_v54 = vld [vmem:[%s3909_s3 + $0x248] sm:$0xff]  ;;  %v2588_v56 = vld [vmem:[%s3909_s3 + $0x218] sm:$0xff]  ;;  %v2779_v58 = vpack.c.bf16 %v2575_v48, %v2571_v47  ;;  %v2715_v59 = vpack.c.bf16 %v2589_v51, %v2585_v50  ;;  %v2579_v61 = vld [vmem:[%s3909_s3 + $0x1d0] sm:$0xff] }
  0x18   :  { %2770 = vmatprep.subr.bf16.mxu1 %v2769_v17  ;;  %v2598_v55 = vld [vmem:[%s3909_s3 + $0x268] sm:$0xff]  ;;  %v2592_v57 = vld [vmem:[%s3909_s3 + $0x238] sm:$0xff]  ;;  %v2781_v60 = vpack.c.bf16 %v653_v53, %v613_v52  ;;  %v2583_v62 = vld [vmem:[%s3909_s3 + $0x1f0] sm:$0xff]  ;;  %v693_v3 = vsel %vm52_vm0, %v2588_v56, %v2912_v0 }
  0x19   :  { %v2717_v63 = vpack.c.bf16 %v2598_v55, %v2594_v54  ;;  %v2593_v1 = vld [vmem:[%s3909_s3 + $0x240] sm:$0xff]  ;;  %v733_v4 = vsel %vm52_vm0, %v2592_v57, %v2912_v0  ;;  %v2602_v5 = vld [vmem:[%s3909_s3 + $0x288] sm:$0xff]  ;;  %v2596_v7 = vld [vmem:[%s3909_s3 + $0x258] sm:$0xff]  ;;  %v2783_v9 = vpack.c.bf16 %v2583_v62, %v2579_v61 }
  0x1a   :  { %2704 = vmatpush1.bf16.msra.mxu0 %v2703_v16  ;;  %v2597_v2 = vld [vmem:[%s3909_s3 + $0x260] sm:$0xff]  ;;  %v2606_v6 = vld [vmem:[%s3909_s3 + $0x2a8] sm:$0xff]  ;;  %v2600_v8 = vld [vmem:[%s3909_s3 + $0x278] sm:$0xff]  ;;  %v2785_v11 = vpack.c.bf16 %v733_v4, %v693_v3  ;;  %v773_v17 = vsel %vm52_vm0, %v2596_v7, %v2912_v0 }
  0x1b   :  { %2706 = vmatprep.subr.bf16.mxu0 %v2705_v21  ;;  %2772 = vmatpush1.bf16.msra.mxu1 %v2771_v30  ;;  %v2719_v10 = vpack.c.bf16 %v2597_v2, %v2593_v1  ;;  %v2587_v12 = vld [vmem:[%s3909_s3 + $0x210] sm:$0xff]  ;;  %v2721_v14 = vpack.c.bf16 %v2606_v6, %v2602_v5  ;;  %v2601_v15 = vld [vmem:[%s3909_s3 + $0x280] sm:$0xff]  ;;  %v813_v18 = vsel %vm52_vm0, %v2600_v8, %v2912_v0  ;;  %v2610_v20 = vld [vmem:[%s3909_s3 + $0x2c8] sm:$0xff] }
  0x1c   :  { %2774 = vmatprep.subr.bf16.mxu1 %v2773_v32  ;;  %v2591_v13 = vld [vmem:[%s3909_s3 + $0x230] sm:$0xff]  ;;  %v2605_v16 = vld [vmem:[%s3909_s3 + $0x2a0] sm:$0xff]  ;;  %v2614_v21 = vld [vmem:[%s3909_s3 + $0x2e8] sm:$0xff]  ;;  %v2789_v26 = vpack.c.bf16 %v813_v18, %v773_v17 }
  0x1d   :  { %v2604_v22 = vld [vmem:[%s3909_s3 + $0x298] sm:$0xff]  ;;  %v2787_v24 = vpack.c.bf16 %v2591_v13, %v2587_v12  ;;  %v2723_v25 = vpack.c.bf16 %v2605_v16, %v2601_v15  ;;  %v2595_v27 = vld [vmem:[%s3909_s3 + $0x250] sm:$0xff]  ;;  %v1458_v29 = vld [vmem:[%s3906_s0 + $0x8] sm:$0xff]  ;;  %v2725_v30 = vpack.c.bf16 %v2614_v21, %v2610_v20 }
  0x1e   :  { %2708 = vmatpush1.bf16.msra.mxu0 %v2707_v31  ;;  %v2608_v23 = vld [vmem:[%s3909_s3 + $0x2b8] sm:$0xff]  ;;  %v2599_v28 = vld [vmem:[%s3909_s3 + $0x270] sm:$0xff]  ;;  %v2609_v31 = vld [vmem:[%s3909_s3 + $0x2c0] sm:$0xff]  ;;  %v853_v33 = vsel %vm52_vm0, %v2604_v22, %v2912_v0  ;;  %1714 = vmatprep.mubr.f32.mxu0 %v1458_v29 }
  0x1f   :  { %2710 = vmatprep.subr.bf16.mxu0 %v2709_v35  ;;  %2776 = vmatpush1.bf16.msra.mxu1 %v2775_v44  ;;  %v2613_v32 = vld [vmem:[%s3909_s3 + $0x2e0] sm:$0xff]  ;;  %v893_v34 = vsel %vm52_vm0, %v2608_v23, %v2912_v0  ;;  %v2618_v35 = vld [vmem:[%s3909_s3 + $0x308] sm:$0xff]  ;;  %v2612_v37 = vld [vmem:[%s3909_s3 + $0x2d8] sm:$0xff]  ;;  %v2791_v39 = vpack.c.bf16 %v2599_v28, %v2595_v27 }
  0x20   :  { %2778 = vmatprep.subr.bf16.mxu1 %v2777_v46  ;;  %v2622_v36 = vld [vmem:[%s3909_s3 + $0x328] sm:$0xff]  ;;  %v2616_v38 = vld [vmem:[%s3909_s3 + $0x2f8] sm:$0xff]  ;;  %1940 = vmatprep.mubr.f32.mxu1 %v1458_v29  ;;  %v2727_v40 = vpack.c.bf16 %v2613_v32, %v2609_v31  ;;  %v2793_v41 = vpack.c.bf16 %v893_v34, %v853_v33  ;;  %v2603_v42 = vld [vmem:[%s3909_s3 + $0x290] sm:$0xff]  ;;  %v933_v47 = vsel %vm52_vm0, %v2612_v37, %v2912_v0 }
  0x21   :  { %v2607_v43 = vld [vmem:[%s3909_s3 + $0x2b0] sm:$0xff]  ;;  %v2729_v44 = vpack.c.bf16 %v2622_v36, %v2618_v35  ;;  %v2621_v46 = vld [vmem:[%s3909_s3 + $0x320] sm:$0xff]  ;;  %v973_v48 = vsel %vm52_vm0, %v2616_v38, %v2912_v0  ;;  %v2630_v50 = vld [vmem:[%s3909_s3 + $0x368] sm:$0xff] }
  0x22   :  { %2712 = vmatpush1.bf16.msra.mxu0 %v2711_v45  ;;  %v2617_v45 = vld [vmem:[%s3909_s3 + $0x300] sm:$0xff]  ;;  %v2620_v51 = vld [vmem:[%s3909_s3 + $0x318] sm:$0xff]  ;;  %v2795_v53 = vpack.c.bf16 %v2607_v43, %v2603_v42  ;;  %v2797_v55 = vpack.c.bf16 %v973_v48, %v933_v47  ;;  %v2611_v56 = vld [vmem:[%s3909_s3 + $0x2d0] sm:$0xff] }
  0x23   :  { %2714 = vmatprep.subr.bf16.mxu0 %v2713_v49  ;;  %2780 = vmatpush1.bf16.msra.mxu1 %v2779_v58  ;;  %v2626_v49 = vld [vmem:[%s3909_s3 + $0x348] sm:$0xff]  ;;  %v2624_v52 = vld [vmem:[%s3909_s3 + $0x338] sm:$0xff]  ;;  %v2731_v54 = vpack.c.bf16 %v2621_v46, %v2617_v45  ;;  %v2615_v57 = vld [vmem:[%s3909_s3 + $0x2f0] sm:$0xff]  ;;  %v1013_v61 = vsel %vm52_vm0, %v2620_v51, %v2912_v0 }
  0x24   :  { %2782 = vmatprep.subr.bf16.mxu1 %v2781_v60  ;;  %v2733_v58 = vpack.c.bf16 %v2630_v50, %v2626_v49  ;;  %v2629_v60 = vld [vmem:[%s3909_s3 + $0x360] sm:$0xff]  ;;  %v1053_v62 = vsel %vm52_vm0, %v2624_v52, %v2912_v0  ;;  %v2638_v1 = vld [vmem:[%s3909_s3 + $0x3a8] sm:$0xff]  ;;  %v2628_v2 = vld [vmem:[%s3909_s3 + $0x358] sm:$0xff]  ;;  %v2799_v4 = vpack.c.bf16 %v2615_v57, %v2611_v56 }
  0x25   :  { %v2632_v3 = vld [vmem:[%s3909_s3 + $0x378] sm:$0xff]  ;;  %v2801_v6 = vpack.c.bf16 %v1053_v62, %v1013_v61  ;;  %v2619_v7 = vld [vmem:[%s3909_s3 + $0x310] sm:$0xff]  ;;  %v1093_v12 = vsel %vm52_vm0, %v2628_v2, %v2912_v0  ;;  %v2646_v15 = vld [vmem:[%s3909_s3 + $0x3e8] sm:$0xff] }
  0x26   :  { %2716 = vmatpush1.bf16.msra.mxu0 %v2715_v59  ;;  %v2625_v59 = vld [vmem:[%s3909_s3 + $0x340] sm:$0xff]  ;;  %v2623_v8 = vld [vmem:[%s3909_s3 + $0x330] sm:$0xff]  ;;  %v1133_v13 = vsel %vm52_vm0, %v2632_v3, %v2912_v0  ;;  %v2636_v16 = vld [vmem:[%s3909_s3 + $0x398] sm:$0xff] }
  0x27   :  { %2718 = vmatprep.subr.bf16.mxu0 %v2717_v63  ;;  %2784 = vmatpush1.bf16.msra.mxu1 %v2783_v9  ;;  %v2634_v63 = vld [vmem:[%s3909_s3 + $0x388] sm:$0xff]  ;;  %v2735_v5 = vpack.c.bf16 %v2629_v60, %v2625_v59  ;;  %v2640_v17 = vld [vmem:[%s3909_s3 + $0x3b8] sm:$0xff]  ;;  %v2803_v18 = vpack.c.bf16 %v2623_v8, %v2619_v7  ;;  %v2805_v21 = vpack.c.bf16 %v1133_v13, %v1093_v12  ;;  %v2627_v22 = vld [vmem:[%s3909_s3 + $0x350] sm:$0xff] }
  0x28   :  { %2786 = vmatprep.subr.bf16.mxu1 %v2785_v11  ;;  %v2737_v9 = vpack.c.bf16 %v2638_v1, %v2634_v63  ;;  %v2637_v11 = vld [vmem:[%s3909_s3 + $0x3a0] sm:$0xff]  ;;  %v2631_v23 = vld [vmem:[%s3909_s3 + $0x370] sm:$0xff]  ;;  %v1173_v27 = vsel %vm52_vm0, %v2636_v16, %v2912_v0  ;;  %v1213_v28 = vsel %vm52_vm0, %v2640_v17, %v2912_v0  ;;  %v2644_v29 = vld [vmem:[%s3909_s3 + $0x3d8] sm:$0xff] }
  0x29   :  { %v2650_v31 = vld [vmem:[%s3909_s3 + $0x408] sm:$0xff]  ;;  %v2807_v33 = vpack.c.bf16 %v2631_v23, %v2627_v22  ;;  %v2809_v35 = vpack.c.bf16 %v1213_v28, %v1173_v27  ;;  %v2635_v36 = vld [vmem:[%s3909_s3 + $0x390] sm:$0xff]  ;;  %v1253_v38 = vsel %vm52_vm0, %v2644_v29, %v2912_v0  ;;  %v2653_v42 = vld [vmem:[%s3909_s3 + $0x420] sm:$0xff]  ;;  %v2877_v22 = vmov 0.0  }
  0x2a   :  { %2720 = vmatpush1.bf16.msra.mxu0 %v2719_v10  ;;  %v2633_v10 = vld [vmem:[%s3909_s3 + $0x380] sm:$0xff]  ;;  %v2654_v32 = vld [vmem:[%s3909_s3 + $0x428] sm:$0xff]  ;;  %v2639_v37 = vld [vmem:[%s3909_s3 + $0x3b0] sm:$0xff] }
  0x2b   :  { %2722 = vmatprep.subr.bf16.mxu0 %v2721_v14  ;;  %2788 = vmatpush1.bf16.msra.mxu1 %v2787_v24  ;;  %v2642_v14 = vld [vmem:[%s3909_s3 + $0x3c8] sm:$0xff]  ;;  %v2739_v20 = vpack.c.bf16 %v2637_v11, %v2633_v10  ;;  %v2652_v43 = vld [vmem:[%s3909_s3 + $0x418] sm:$0xff]  ;;  %v2811_v45 = vpack.c.bf16 %v2639_v37, %v2635_v36  ;;  %v1457_v48 = vld [vmem:[%s3906_s0] sm:$0xff] }
  0x2c   :  { %2790 = vmatprep.subr.bf16.mxu1 %v2789_v26  ;;  %v2741_v24 = vpack.c.bf16 %v2646_v15, %v2642_v14  ;;  %v2645_v26 = vld [vmem:[%s3909_s3 + $0x3e0] sm:$0xff]  ;;  %v2658_v46 = vld [vmem:[%s3909_s3 + $0x448] sm:$0xff]  ;;  %v2643_v50 = vld [vmem:[%s3909_s3 + $0x3d0] sm:$0xff] }
  0x2d   :  { %v2662_v47 = vld [vmem:[%s3909_s3 + $0x468] sm:$0xff]  ;;  %v2647_v51 = vld [vmem:[%s3909_s3 + $0x3f0] sm:$0xff]  ;;  %v1461_v52 = vld [vmem:[%s3906_s0 + $0x20] sm:$0xff] }
  0x2e   :  { %2724 = vmatpush1.bf16.msra.mxu0 %v2723_v25  ;;  %v2641_v25 = vld [vmem:[%s3909_s3 + $0x3c0] sm:$0xff]  ;;  %v2749_v56 = vpack.c.bf16 %v2662_v47, %v2658_v46  ;;  %v2815_v59 = vpack.c.bf16 %v2647_v51, %v2643_v50  ;;  %v2660_v60 = vld [vmem:[%s3909_s3 + $0x458] sm:$0xff]  ;;  %v2651_v1 = vld [vmem:[%s3909_s3 + $0x410] sm:$0xff] }
  0x2f   :  { %2726 = vmatprep.subr.bf16.mxu0 %v2725_v30  ;;  %2792 = vmatpush1.bf16.msra.mxu1 %v2791_v39  ;;  %v2648_v30 = vld [vmem:[%s3909_s3 + $0x3f8] sm:$0xff]  ;;  %v2743_v34 = vpack.c.bf16 %v2645_v26, %v2641_v25  ;;  %v2657_v57 = vld [vmem:[%s3909_s3 + $0x440] sm:$0xff]  ;;  %v2655_v2 = vld [vmem:[%s3909_s3 + $0x430] sm:$0xff] }
  0x30   :  { %2794 = vmatprep.subr.bf16.mxu1 %v2793_v41  ;;  %v1293_v39 = vsel %vm52_vm0, %v2648_v30, %v2912_v0  ;;  %v2649_v41 = vld [vmem:[%s3909_s3 + $0x400] sm:$0xff]  ;;  %v2664_v61 = vld [vmem:[%s3909_s3 + $0x478] sm:$0xff]  ;;  %v2819_v7 = vpack.c.bf16 %v2655_v2, %v2651_v1  ;;  %v1463_v8 = vld [vmem:[%s3906_s0 + $0x30] sm:$0xff] }
  0x31   :  { %v2813_v49 = vpack.c.bf16 %v1293_v39, %v1253_v38  ;;  %v1460_v62 = vld [vmem:[%s3906_s0 + $0x18] sm:$0xff]  ;;  %v2659_v19 = vld [vmem:[%s3909_s3 + $0x450] sm:$0xff]  ;;  %v1466_v11 = vld [vmem:[%s3906_s0 + $0x48] sm:$0xff] }
  0x32   :  { %2728 = vmatpush1.bf16.msra.mxu0 %v2727_v40  ;;  %v2745_v40 = vpack.c.bf16 %v2654_v32, %v2650_v31  ;;  %v1464_v3 = vld [vmem:[%s3906_s0 + $0x38] sm:$0xff]  ;;  %v1470_v13 = vld [vmem:[%s3906_s0 + $0x68] sm:$0xff]  ;;  %v1469_v14 = vld [vmem:[%s3906_s0 + $0x60] sm:$0xff] }
  0x33   :  { %2730 = vmatprep.subr.bf16.mxu0 %v2729_v44  ;;  %2796 = vmatpush1.bf16.msra.mxu1 %v2795_v53  ;;  %v2656_v44 = vld [vmem:[%s3909_s3 + $0x438] sm:$0xff]  ;;  %v2747_v53 = vpack.c.bf16 %v2653_v42, %v2649_v41  ;;  %v1473_v15 = vld [vmem:[%s3906_s0 + $0x80] sm:$0xff]  ;;  %v1459_v23 = vld [vmem:[%s3906_s0 + $0x10] sm:$0xff] }
  0x34   :  { %2798 = vmatprep.subr.bf16.mxu1 %v2797_v55  ;;  %v1373_v55 = vsel %vm52_vm0, %v2656_v44, %v2912_v0  ;;  %v1472_v16 = vld [vmem:[%s3906_s0 + $0x78] sm:$0xff]  ;;  %v1465_v25 = vld [vmem:[%s3906_s0 + $0x40] sm:$0xff]  ;;  %v1471_v27 = vld [vmem:[%s3906_s0 + $0x70] sm:$0xff] }
  0x35   :  { %v1476_v17 = vld [vmem:[%s3906_s0 + $0x98] sm:$0xff]  ;;  %v1474_v28 = vld [vmem:[%s3906_s0 + $0x88] sm:$0xff]  ;;  %v1477_v29 = vld [vmem:[%s3906_s0 + $0xa0] sm:$0xff] }
  0x36   :  { %2732 = vmatpush1.bf16.msra.mxu0 %v2731_v54  ;;  %v1333_v54 = vsel %vm52_vm0, %v2652_v43, %v2912_v0  ;;  %v1468_v26 = vld [vmem:[%s3906_s0 + $0x58] sm:$0xff] }
  0x37   :  { %2734 = vmatprep.subr.bf16.mxu0 %v2733_v58  ;;  %2800 = vmatpush1.bf16.msra.mxu1 %v2799_v4  ;;  %v2661_v58 = vld [vmem:[%s3909_s3 + $0x460] sm:$0xff]  ;;  %v2817_v63 = vpack.c.bf16 %v1373_v55, %v1333_v54  ;;  %v1480_v30 = vld [vmem:[%s3906_s0 + $0xb8] sm:$0xff] }
  0x38   :  { %2802 = vmatprep.subr.bf16.mxu1 %v2801_v6  ;;  %v2751_v4 = vpack.c.bf16 %v2661_v58, %v2657_v57  ;;  %v1453_v6 = vsel %vm52_vm0, %v2664_v61, %v2912_v0 }
  0x3a   :  { %2736 = vmatpush1.bf16.msra.mxu0 %v2735_v5  ;;  %v1413_v5 = vsel %vm52_vm0, %v2660_v60, %v2912_v0  ;;  %v2663_v0 = vld [vmem:[%s3909_s3 + $0x470] sm:$0xff] }
  0x3b   :  { %2738 = vmatprep.subr.bf16.mxu0 %v2737_v9  ;;  %2804 = vmatpush1.bf16.msra.mxu1 %v2803_v18  ;;  %v1467_v9 = vld [vmem:[%s3906_s0 + $0x50] sm:$0xff]  ;;  %v2821_v10 = vpack.c.bf16 %v1453_v6, %v1413_v5  ;;  %v2823_v12 = vpack.c.bf16 %v2663_v0, %v2659_v19 }
  0x3c   :  { %2806 = vmatprep.subr.bf16.mxu1 %v2805_v21  ;;  %v1475_v18 = vld [vmem:[%s3906_s0 + $0x90] sm:$0xff]  ;;  %v1478_v21 = vld [vmem:[%s3906_s0 + $0xa8] sm:$0xff] }
  0x3e   :  { %2740 = vmatpush1.bf16.msra.mxu0 %v2739_v20  ;;  %v1479_v20 = vld [vmem:[%s3906_s0 + $0xb0] sm:$0xff] }
  0x3f   :  { %2742 = vmatprep.subr.bf16.mxu0 %v2741_v24  ;;  %2808 = vmatpush1.bf16.msra.mxu1 %v2807_v33  ;;  %v1462_v24 = vld [vmem:[%s3906_s0 + $0x28] sm:$0xff] }
  0x40   :  { %2810 = vmatprep.subr.bf16.mxu1 %v2809_v35 }
  0x42   :  { %2744 = vmatpush1.bf16.msra.mxu0 %v2743_v34 }
  0x43   :  { %2746 = vmatprep.subr.bf16.mxu0 %v2745_v40  ;;  %2812 = vmatpush1.bf16.msra.mxu1 %v2811_v45 }
  0x44   :  { %2814 = vmatprep.subr.bf16.mxu1 %v2813_v49 }
  0x45   :  { %1715 = vmatmul.mubr.f32.vlgmr.msra.gmra.mrb[0].mxu0 %v1457_v48 }
  0x46   :  { %1720 = vmatprep.mubr.f32.mxu0 %v1461_v52  ;;  %2748 = vmatpush1.bf16.msra.mxu0 %v2747_v53 }
  0x47   :  { %2750 = vmatprep.subr.bf16.mxu0 %v2749_v56  ;;  %2816 = vmatpush1.bf16.msra.mxu1 %v2815_v59 }
  0x48   :  { %2818 = vmatprep.subr.bf16.mxu1 %v2817_v63 }
  0x49   :  { %1721 = vmatmul.mubr.f32.gmra.mrb[2].mxu0 %v1460_v62 }
  0x4a   :  { %1726 = vmatprep.mubr.f32.mxu0 %v1464_v3  ;;  %2752 = vmatpush1.bf16.msra.mxu0 %v2751_v4 }
  0x4b   :  { %1941 = vmatmul.mubr.f32.vlgmr.msra.gmra.mrb[0].mxu1 %v1457_v48 }
  0x4c   :  { %2820 = vmatpush1.bf16.msra.mxu1 %v2819_v7  ;;  %1946 = vmatprep.mubr.f32.mxu1 %v1461_v52 }
  0x4d   :  { %1727 = vmatmul.mubr.f32.gmra.mrb[4].mxu0 %v1463_v8  ;;  %2822 = vmatprep.subr.bf16.mxu1 %v2821_v10 }
  0x4e   :  { %1732 = vmatprep.mubr.f32.mxu0 %v1467_v9 }
  0x4f   :  { %1947 = vmatmul.mubr.f32.gmra.mrb[2].mxu1 %v1460_v62 }
  0x50   :  { %1952 = vmatprep.mubr.f32.mxu1 %v1464_v3  ;;  %2824 = vmatpush1.bf16.msra.mxu1 %v2823_v12 }
  0x51   :  { %1733 = vmatmul.mubr.f32.gmra.mrb[6].mxu0 %v1466_v11 }
  0x52   :  { %1738 = vmatprep.mubr.f32.mxu0 %v1470_v13 }
  0x53   :  { %1953 = vmatmul.mubr.f32.gmra.mrb[4].mxu1 %v1463_v8 }
  0x54   :  { %1958 = vmatprep.mubr.f32.mxu1 %v1467_v9 }
  0x55   :  { %1739 = vmatmul.mubr.f32.gmra.mrb[8].mxu0 %v1469_v14 }
  0x56   :  { %1744 = vmatprep.mubr.f32.mxu0 %v1473_v15 }
  0x57   :  { %1959 = vmatmul.mubr.f32.gmra.mrb[6].mxu1 %v1466_v11 }
  0x58   :  { %1964 = vmatprep.mubr.f32.mxu1 %v1470_v13 }
  0x59   :  { %1745 = vmatmul.mubr.f32.gmra.mrb[10].mxu0 %v1472_v16 }
  0x5a   :  { %1750 = vmatprep.mubr.f32.mxu0 %v1476_v17 }
  0x5b   :  { %1965 = vmatmul.mubr.f32.gmra.mrb[8].mxu1 %v1469_v14 }
  0x5c   :  { %1970 = vmatprep.mubr.f32.mxu1 %v1473_v15 }
  0x5d   :  { %1751 = vmatmul.mubr.f32.gmra.mrb[12].mxu0 %v1475_v18 }
  0x5e   :  { %1756 = vmatprep.mubr.f32.mxu0 %v1479_v20 }
  0x5f   :  { %1971 = vmatmul.mubr.f32.gmra.mrb[10].mxu1 %v1472_v16 }
  0x60   :  { %1976 = vmatprep.mubr.f32.mxu1 %v1476_v17 }
  0x61   :  { %1757 = vmatmul.mubr.f32.gmra.mrb[14].mxu0 %v1478_v21 }
  0x62   :  { %1827 = vmatprep.mubr.f32.mxu0 %v2877_v22 }
  0x63   :  { %1977 = vmatmul.mubr.f32.gmra.mrb[12].mxu1 %v1475_v18 }
  0x64   :  { %1982 = vmatprep.mubr.f32.mxu1 %v1479_v20 }
  0x65   :  { %2665 = vmatmul.mubr.msk.f32.vlgmr.msra.gmra.mrb[0].mxu0 %vm1625_vm1, %v1459_v23 }
  0x66   :  { %1833 = vmatprep.mubr.f32.mxu0 %v2877_v22 }
  0x67   :  { %1983 = vmatmul.mubr.f32.gmra.mrb[14].mxu1 %v1478_v21 }
  0x68   :  { %2053 = vmatprep.mubr.f32.mxu1 %v2877_v22 }
  0x69   :  { %2666 = vmatmul.mubr.msk.f32.gmra.mrb[2].mxu0 %vm1625_vm1, %v1462_v24 }
  0x6a   :  { %1839 = vmatprep.mubr.f32.mxu0 %v2877_v22 }
  0x6b   :  { %2673 = vmatmul.mubr.msk.f32.vlgmr.msra.gmra.mrb[0].mxu1 %vm1625_vm1, %v1459_v23 }
  0x6c   :  { %2059 = vmatprep.mubr.f32.mxu1 %v2877_v22 }
  0x6d   :  { %2667 = vmatmul.mubr.msk.f32.gmra.mrb[4].mxu0 %vm1625_vm1, %v1465_v25 }
  0x6e   :  { %1845 = vmatprep.mubr.f32.mxu0 %v2877_v22 }
  0x6f   :  { %2674 = vmatmul.mubr.msk.f32.gmra.mrb[2].mxu1 %vm1625_vm1, %v1462_v24 }
  0x70   :  { %2065 = vmatprep.mubr.f32.mxu1 %v2877_v22 }
  0x71   :  { %2668 = vmatmul.mubr.msk.f32.gmra.mrb[6].mxu0 %vm1625_vm1, %v1468_v26 }
  0x72   :  { %1851 = vmatprep.mubr.f32.mxu0 %v2877_v22 }
  0x73   :  { %2675 = vmatmul.mubr.msk.f32.gmra.mrb[4].mxu1 %vm1625_vm1, %v1465_v25 }
  0x74   :  { %2071 = vmatprep.mubr.f32.mxu1 %v2877_v22 }
  0x75   :  { %2669 = vmatmul.mubr.msk.f32.gmra.mrb[8].mxu0 %vm1625_vm1, %v1471_v27 }
  0x76   :  { %1857 = vmatprep.mubr.f32.mxu0 %v2877_v22 }
  0x77   :  { %2676 = vmatmul.mubr.msk.f32.gmra.mrb[6].mxu1 %vm1625_vm1, %v1468_v26 }
  0x78   :  { %2077 = vmatprep.mubr.f32.mxu1 %v2877_v22 }
  0x79   :  { %2670 = vmatmul.mubr.msk.f32.gmra.mrb[10].mxu0 %vm1625_vm1, %v1474_v28 }
  0x7a   :  { %1863 = vmatprep.mubr.f32.mxu0 %v2877_v22 }
  0x7b   :  { %2677 = vmatmul.mubr.msk.f32.gmra.mrb[8].mxu1 %vm1625_vm1, %v1471_v27 }
  0x7c   :  { %2083 = vmatprep.mubr.f32.mxu1 %v2877_v22 }
  0x7d   :  { %2671 = vmatmul.mubr.msk.f32.gmra.mrb[12].mxu0 %vm1625_vm1, %v1477_v29 }
  0x7e   :  { %1869 = vmatprep.mubr.f32.mxu0 %v2877_v22 }
  0x7f   :  { %2678 = vmatmul.mubr.msk.f32.gmra.mrb[10].mxu1 %vm1625_vm1, %v1474_v28 }
  0x80   :  { %2089 = vmatprep.mubr.f32.mxu1 %v2877_v22 }
  0x81   :  { %2672 = vmatmul.mubr.msk.f32.gmra.mrb[14].mxu0 %vm1625_vm1, %v1480_v30 }
  0x83   :  { %2679 = vmatmul.mubr.msk.f32.gmra.mrb[12].mxu1 %vm1625_vm1, %v1477_v29 }
  0x84   :  { %2095 = vmatprep.mubr.f32.mxu1 %v2877_v22 }
  0x87   :  { %2680 = vmatmul.mubr.msk.f32.gmra.mrb[14].mxu1 %vm1625_vm1, %v1480_v30 }
 0x138   :  { %v3545_v31 = vpop.f32.mrb[0].mxu0 }
 0x139   :  { %v2142_v32 = vmul.f32 %v3545_v31, %v3545_v31  ;;  %v3549_v33 = vpop.f32.mrb[1].mxu0 }
 0x13a   :  { %v2102_v34 = vadd.f32 %v3549_v33, %v3545_v31  ;;  %v2143_v35 = vmul.f32 %v3549_v33, %v3549_v33 }
 0x13c   :  { %v3555_v36 = vpop.f32.mrb[2].mxu0  ;;  %v2174_v37 = vadd.f32 %v2143_v35, %v2142_v32 }
 0x13d   :  { %v2146_v38 = vmul.f32 %v3555_v36, %v3555_v36  ;;  %v3559_v39 = vpop.f32.mrb[3].mxu0 }
 0x13e   :  { %v2107_v40 = vadd.f32 %v3559_v39, %v3555_v36  ;;  %v2147_v41 = vmul.f32 %v3559_v39, %v3559_v39  ;;  %v3565_v42 = vpop.f32.mrb[0].mxu1 }
 0x13f   :  { %v2144_v43 = vmul.f32 %v3565_v42, %v3565_v42  ;;  %v3571_v45 = vpop.f32.mrb[1].mxu1  ;;  %v2103_v46 = vadd.f32 %v2102_v34, %v3565_v42 }
 0x140   :  { %v3569_v44 = vpop.f32.mrb[4].mxu0  ;;  %v2179_v47 = vadd.f32 %v2147_v41, %v2146_v38  ;;  %v2145_v50 = vmul.f32 %v3571_v45, %v3571_v45 }
 0x141   :  { %v2150_v48 = vmul.f32 %v3569_v44, %v3569_v44  ;;  %v3576_v49 = vpop.f32.mrb[5].mxu0  ;;  %v2104_v53 = vadd.f32 %v2103_v46, %v3571_v45  ;;  %v2175_v54 = vadd.f32 %v2174_v37, %v2144_v43 }
 0x142   :  { %v2112_v51 = vadd.f32 %v3576_v49, %v3569_v44  ;;  %v2151_v52 = vmul.f32 %v3576_v49, %v3576_v49  ;;  %v3585_v55 = vpop.f32.mrb[2].mxu1 }
 0x143   :  { %v2148_v56 = vmul.f32 %v3585_v55, %v3585_v55  ;;  %v3589_v57 = vpop.f32.mrb[3].mxu1  ;;  %2105 = vadd.xlane.f32.xlu0 %v2104_v53  ;;  %v2176_v59 = vadd.f32 %v2175_v54, %v2145_v50  ;;  %v2108_v60 = vadd.f32 %v2107_v40, %v3585_v55 }
 0x144   :  { %v3591_v58 = vpop.f32.mrb[6].mxu0  ;;  %v2184_v61 = vadd.f32 %v2151_v52, %v2150_v48  ;;  %v2149_v1 = vmul.f32 %v3589_v57, %v3589_v57 }
 0x145   :  { %v2154_v62 = vmul.f32 %v3591_v58, %v3591_v58  ;;  %v3596_v63 = vpop.f32.mrb[7].mxu0  ;;  %v2180_v4 = vadd.f32 %v2179_v47, %v2148_v56  ;;  %v2109_v5 = vadd.f32 %v2108_v60, %v3589_v57 }
 0x146   :  { %v2117_v2 = vadd.f32 %v3596_v63, %v3591_v58  ;;  %v2155_v3 = vmul.f32 %v3596_v63, %v3596_v63  ;;  %v3605_v6 = vpop.f32.mrb[4].mxu1 }
 0x147   :  { %v2152_v7 = vmul.f32 %v3605_v6, %v3605_v6  ;;  %v3609_v8 = vpop.f32.mrb[5].mxu1  ;;  %2177 = vadd.xlane.f32.xlu0 %v2176_v59  ;;  %v2181_v10 = vadd.f32 %v2180_v4, %v2149_v1  ;;  %v2113_v19 = vadd.f32 %v2112_v51, %v3605_v6 }
 0x148   :  { %v3611_v9 = vpop.f32.mrb[8].mxu0  ;;  %v2189_v0 = vadd.f32 %v2155_v3, %v2154_v62  ;;  %v2153_v13 = vmul.f32 %v3609_v8, %v3609_v8 }
 0x149   :  { %v2158_v11 = vmul.f32 %v3611_v9, %v3611_v9  ;;  %v3616_v12 = vpop.f32.mrb[9].mxu0  ;;  %2182 = vadd.xlane.f32.xlu1 %v2181_v10  ;;  %v2114_v16 = vadd.f32 %v2113_v19, %v3609_v8  ;;  %v2185_v17 = vadd.f32 %v2184_v61, %v2152_v7 }
 0x14a   :  { %v2122_v14 = vadd.f32 %v3616_v12, %v3611_v9  ;;  %v2159_v15 = vmul.f32 %v3616_v12, %v3616_v12  ;;  %v3625_v18 = vpop.f32.mrb[6].mxu1 }
 0x14b   :  { %v2156_v20 = vmul.f32 %v3625_v18, %v3625_v18  ;;  %v3629_v21 = vpop.f32.mrb[7].mxu1  ;;  %2110 = vadd.xlane.f32.xlu0 %v2109_v5  ;;  %v2186_v23 = vadd.f32 %v2185_v17, %v2153_v13  ;;  %v2118_v24 = vadd.f32 %v2117_v2, %v3625_v18 }
 0x14c   :  { %v3631_v22 = vpop.f32.mrb[10].mxu0  ;;  %v2194_v25 = vadd.f32 %v2159_v15, %v2158_v11  ;;  %v2157_v28 = vmul.f32 %v3629_v21, %v3629_v21 }
 0x14d   :  { %v2162_v26 = vmul.f32 %v3631_v22, %v3631_v22  ;;  %v3636_v27 = vpop.f32.mrb[11].mxu0  ;;  %2115 = vadd.xlane.f32.xlu1 %v2114_v16  ;;  %v2119_v32 = vadd.f32 %v2118_v24, %v3629_v21  ;;  %v2190_v34 = vadd.f32 %v2189_v0, %v2156_v20 }
 0x14e   :  { %v2127_v29 = vadd.f32 %v3636_v27, %v3631_v22  ;;  %v2163_v30 = vmul.f32 %v3636_v27, %v3636_v27  ;;  %v3645_v35 = vpop.f32.mrb[8].mxu1 }
 0x14f   :  { %v2160_v37 = vmul.f32 %v3645_v35, %v3645_v35  ;;  %v3649_v38 = vpop.f32.mrb[9].mxu1  ;;  %2187 = vadd.xlane.f32.xlu0 %v2186_v23  ;;  %v2123_v41 = vadd.f32 %v2122_v14, %v3645_v35  ;;  %v2191_v43 = vadd.f32 %v2190_v34, %v2157_v28 }
 0x150   :  { %v3651_v40 = vpop.f32.mrb[12].mxu0  ;;  %v2199_v46 = vadd.f32 %v2163_v30, %v2162_v26  ;;  %v2161_v50 = vmul.f32 %v3649_v38, %v3649_v38 }
 0x151   :  { %v2166_v47 = vmul.f32 %v3651_v40, %v3651_v40  ;;  %v3656_v48 = vpop.f32.mrb[13].mxu0  ;;  %2120 = vadd.xlane.f32.xlu1 %v2119_v32  ;;  %v2124_v53 = vadd.f32 %v2123_v41, %v3649_v38  ;;  %v2195_v54 = vadd.f32 %v2194_v25, %v2160_v37 }
 0x152   :  { %v2132_v51 = vadd.f32 %v3656_v48, %v3651_v40  ;;  %v2167_v52 = vmul.f32 %v3656_v48, %v3656_v48  ;;  %v3665_v56 = vpop.f32.mrb[10].mxu1 }
 0x153   :  { %v2164_v59 = vmul.f32 %v3665_v56, %v3665_v56  ;;  %v3669_v60 = vpop.f32.mrb[11].mxu1  ;;  %2125 = vadd.xlane.f32.xlu0 %v2124_v53  ;;  %v2196_v62 = vadd.f32 %v2195_v54, %v2161_v50  ;;  %v2128_v1 = vadd.f32 %v2127_v29, %v3665_v56 }
 0x154   :  { %v3671_v61 = vpop.f32.mrb[14].mxu0  ;;  %v2204_v2 = vadd.f32 %v2167_v52, %v2166_v47  ;;  %v2165_v5 = vmul.f32 %v3669_v60, %v3669_v60 }
 0x155   :  { %v2170_v3 = vmul.f32 %v3671_v61, %v3671_v61  ;;  %v3676_v4 = vpop.f32.mrb[15].mxu0  ;;  %2192 = vadd.xlane.f32.xlu1 %v2191_v43  ;;  %v2129_v19 = vadd.f32 %v2128_v1, %v3669_v60  ;;  %v2200_v0 = vadd.f32 %v2199_v46, %v2164_v59  ;;  %v2878_v43 = vmov 0  }
 0x156   :  { %v2137_v7 = vadd.f32 %v3676_v4, %v3671_v61  ;;  %v2171_v10 = vmul.f32 %v3676_v4, %v3676_v4  ;;  %v3685_v11 = vpop.f32.mrb[12].mxu1  ;;  %2859 = vset.pattern.permute.xlu0 %v2878_v43  ;;  %2860 = vset.pattern.permute.xlu1 %v2878_v43 }
 0x157   :  { %v2168_v14 = vmul.f32 %v3685_v11, %v3685_v11  ;;  %v3689_v15 = vpop.f32.mrb[13].mxu1  ;;  %2197 = vadd.xlane.f32.xlu0 %v2196_v62  ;;  %v2133_v16 = vadd.f32 %v2132_v51, %v3685_v11  ;;  %v2201_v17 = vadd.f32 %v2200_v0, %v2165_v5 }
 0x158   :  { %v2209_v13 = vadd.f32 %v2171_v10, %v2170_v3  ;;  %v2169_v20 = vmul.f32 %v3689_v15, %v3689_v15 }
 0x159   :  { %2130 = vadd.xlane.f32.xlu1 %v2129_v19  ;;  %v2134_v23 = vadd.f32 %v2133_v16, %v3689_v15  ;;  %v2205_v24 = vadd.f32 %v2204_v2, %v2168_v14 }
 0x15a   :  { %v3695_v25 = vpop.f32.mrb[14].mxu1 }
 0x15b   :  { %v2172_v26 = vmul.f32 %v3695_v25, %v3695_v25  ;;  %v3699_v28 = vpop.f32.mrb[15].mxu1  ;;  %2135 = vadd.xlane.f32.xlu0 %v2134_v23  ;;  %v2206_v29 = vadd.f32 %v2205_v24, %v2169_v20  ;;  %v2138_v30 = vadd.f32 %v2137_v7, %v3695_v25 }
 0x15c   :  { %v2173_v32 = vmul.f32 %v3699_v28, %v3699_v28 }
 0x15d   :  { %2202 = vadd.xlane.f32.xlu1 %v2201_v17  ;;  %v2139_v34 = vadd.f32 %v2138_v30, %v3699_v28  ;;  %v2210_v37 = vadd.f32 %v2209_v13, %v2172_v26 }
 0x15f   :  { %2207 = vadd.xlane.f32.xlu0 %v2206_v29  ;;  %v2211_v41 = vadd.f32 %v2210_v37, %v2173_v32 }
 0x161   :  { %2140 = vadd.xlane.f32.xlu1 %v2139_v34 }
 0x165   :  { %2212 = vadd.xlane.f32.xlu1 %v2211_v41 }
 0x1d0   :  { %v2106_v46 = vpop.xlane.xlu0 %2105 }
 0x1d1   :  { %v2214_v47 = vmul.f32 0.0025510204, %v2106_v46 }
 0x1d3   :  { %v2230_v51 = vmul.f32 %v2214_v47, %v2214_v47 }
 0x1d4   :  { %v2178_v50 = vpop.xlane.xlu0 %2177 }
 0x1d5   :  { %v2222_v52 = vmul.f32 0.0025510204, %v2178_v50 }
 0x1d6   :  { %v2183_v53 = vpop.xlane.xlu1 %2182 }
 0x1d7   :  { %v2238_v54 = vsub.f32 %v2222_v52, %v2230_v51  ;;  %v2223_v5 = vmul.f32 0.0025510204, %v2183_v53  ;;  %v2254_v51 = vld [vmem:[%s3907_s1] sm:$0xff] }
 0x1d8   :  { %v2111_v59 = vpop.xlane.xlu0 %2110 }
 0x1d9   :  { %v2246_v62 = vmax.f32 %v2238_v54, 0.0  ;;  %v2215_v1 = vmul.f32 0.0025510204, %v2111_v59 }
 0x1da   :  { %v2116_v2 = vpop.xlane.xlu1 %2115 }
 0x1db   :  { %v2262_v3 = vadd.f32 1e-05, %v2246_v62  ;;  %v2231_v7 = vmul.f32 %v2215_v1, %v2215_v1  ;;  %v3705_v10 = vmul.f32 0.0025510204, %v2116_v2 }
 0x1dc   :  { %v2188_v19 = vpop.xlane.xlu0 %2187 }
 0x1dd   :  { %2861 = vrsqrt.f32 %v2262_v3  ;;  %v2239_v0 = vsub.f32 %v2223_v5, %v2231_v7  ;;  %v2232_v13 = vmul.f32 %v3705_v10, %v3705_v10  ;;  %v2224_v14 = vmul.f32 0.0025510204, %v2188_v19 }
 0x1de   :  { %v2121_v16 = vpop.xlane.xlu1 %2120 }
 0x1df   :  { %v2247_v17 = vmax.f32 %v2239_v0, 0.0  ;;  %v2240_v20 = vsub.f32 %v2224_v14, %v2232_v13  ;;  %v3709_v23 = vmul.f32 0.0025510204, %v2121_v16  ;;  %v2255_v0 = vld [vmem:[%s3907_s1 + $0x8] sm:$0xff] }
 0x1e0   :  { %v2126_v24 = vpop.xlane.xlu0 %2125 }
 0x1e1   :  { %v2263_v26 = vadd.f32 1e-05, %v2247_v17  ;;  %v2248_v29 = vmax.f32 %v2240_v20, 0.0  ;;  %v2233_v32 = vmul.f32 %v3709_v23, %v3709_v23  ;;  %v3713_v34 = vmul.f32 0.0025510204, %v2126_v24 }
 0x1e2   :  { %v2193_v30 = vpop.xlane.xlu1 %2192 }
 0x1e3   :  { %2863 = vrsqrt.f32 %v2263_v26  ;;  %v2225_v37 = vmul.f32 0.0025510204, %v2193_v30  ;;  %v2264_v43 = vadd.f32 1e-05, %v2248_v29  ;;  %v2234_v54 = vmul.f32 %v3713_v34, %v3713_v34  ;;  %v2286_v30 = vld [vmem:[%s3908_s2] sm:$0xff] }
 0x1e4   :  { %v2198_v41 = vpop.xlane.xlu0 %2197 }
 0x1e5   :  { %v2241_v46 = vsub.f32 %v2225_v37, %v2233_v32  ;;  %v2226_v50 = vmul.f32 0.0025510204, %v2198_v41  ;;  %2865 = vrsqrt.f32 %v2264_v43 }
 0x1e6   :  { %v2131_v52 = vpop.xlane.xlu1 %2130 }
 0x1e7   :  { %v2862_v53 = vpop.eup %2861  ;;  %v2249_v59 = vmax.f32 %v2241_v46, 0.0  ;;  %v3720_v62 = vmul.f32 0.0025510204, %v2131_v52  ;;  %v2242_v7 = vsub.f32 %v2226_v50, %v2234_v54  ;;  %v2287_v46 = vld [vmem:[%s3908_s2 + $0x8] sm:$0xff] }
 0x1e8   :  { %v2136_v2 = vpop.xlane.xlu0 %2135  ;;  %v2278_v3 = vmul.f32 %v2862_v53, %v2254_v51 }
 0x1e9   :  { %v2265_v5 = vadd.f32 1e-05, %v2249_v59  ;;  %v2235_v13 = vmul.f32 %v3720_v62, %v3720_v62  ;;  %v2250_v17 = vmax.f32 %v2242_v7, 0.0  ;;  %v3730_v37 = vmul.f32 0.0025510204, %v2136_v2 }
 0x1ea   :  { %v2203_v19 = vpop.xlane.xlu1 %2202  ;;  %2312 = vperm.xlu0 %2859, %v2278_v3   ;;  %v2294_v32 = vmul.f32 %v2278_v3, %v2214_v47 }
 0x1eb   :  { %2867 = vrsqrt.f32 %v2265_v5  ;;  %v2227_v14 = vmul.f32 0.0025510204, %v2203_v19  ;;  %v2266_v51 = vadd.f32 1e-05, %v2250_v17  ;;  %v2236_v47 = vmul.f32 %v3730_v37, %v3730_v37  ;;  %v2256_v19 = vld [vmem:[%s3907_s1 + $0x10] sm:$0xff] }
 0x1ec   :  { %v2208_v26 = vpop.xlane.xlu0 %2207  ;;  %v2302_v5 = vsub.f32 %v2286_v30, %v2294_v32 }
 0x1ed   :  { %v2864_v16 = vpop.eup %2863  ;;  %v2243_v20 = vsub.f32 %v2227_v14, %v2235_v13  ;;  %v2228_v53 = vmul.f32 0.0025510204, %v2208_v26 }
 0x1ee   :  { %v2279_v24 = vmul.f32 %v2864_v16, %v2255_v0  ;;  %v2141_v29 = vpop.xlane.xlu1 %2140 }
 0x1ef   :  { %v2251_v41 = vmax.f32 %v2243_v20, 0.0  ;;  %v2221_v43 = vmul.f32 0.0025510204, %v2141_v29  ;;  %v2866_v7 = vpop.eup %2865  ;;  %v2244_v13 = vsub.f32 %v2228_v53, %v2236_v47 }
 0x1f0   :  { %v2295_v50 = vmul.f32 %v2279_v24, %v2215_v1  ;;  %2317 = vperm.xlu1 %2860, %v2279_v24   ;;  %v2257_v1 = vld [vmem:[%s3907_s1 + $0x18] sm:$0xff]  ;;  %v2280_v16 = vmul.f32 %v2866_v7, %v2256_v19 }
 0x1f1   :  { %v2267_v52 = vadd.f32 1e-05, %v2251_v41  ;;  %v2237_v2 = vmul.f32 %v2221_v43, %v2221_v43  ;;  %v2289_v24 = vld [vmem:[%s3908_s2 + $0x18] sm:$0xff]  ;;  %v2252_v29 = vmax.f32 %v2244_v13, 0.0 }
 0x1f2   :  { %v2213_v54 = vpop.xlane.xlu1 %2212  ;;  %v2303_v59 = vsub.f32 %v2287_v46, %v2295_v50  ;;  %v2296_v41 = vmul.f32 %v2280_v16, %v3705_v10  ;;  %v2288_v46 = vld [vmem:[%s3908_s2 + $0x10] sm:$0xff]  ;;  %v2259_v50 = vld [vmem:[%s3907_s1 + $0x28] sm:$0xff] }
 0x1f3   :  { %2869 = vrsqrt.f32 %v2267_v52  ;;  %v2229_v3 = vmul.f32 0.0025510204, %v2213_v54  ;;  %v2268_v52 = vadd.f32 1e-05, %v2252_v29  ;;  %v2291_v10 = vld [vmem:[%s3908_s2 + $0x28] sm:$0xff] }
 0x1f4   :  { %2389 = vperm.xlu0 %2859, %v2303_v59   ;;  %2384 = vperm.xlu1 %2860, %v2302_v5   ;;  %2871 = vrsqrt.f32 %v2266_v51  ;;  %v2304_v53 = vsub.f32 %v2288_v46, %v2296_v41  ;;  %v2258_v59 = vld [vmem:[%s3907_s1 + $0x20] sm:$0xff] }
 0x1f5   :  { %v2868_v0 = vpop.eup %2867  ;;  %v2245_v14 = vsub.f32 %v2229_v3, %v2237_v2  ;;  %v2261_v2 = vld [vmem:[%s3907_s1 + $0x38] sm:$0xff] }
 0x1f6   :  { %v2281_v17 = vmul.f32 %v2868_v0, %v2257_v1  ;;  %v2290_v0 = vld [vmem:[%s3908_s2 + $0x20] sm:$0xff] }
 0x1f7   :  { %v2253_v20 = vmax.f32 %v2245_v14, 0.0 }
 0x1f8   :  { %2322 = vperm.xlu1 %2860, %v2280_v16   ;;  %v2297_v26 = vmul.f32 %v2281_v17, %v3709_v23 }
 0x1f9   :  { %v2269_v30 = vadd.f32 1e-05, %v2253_v20  ;;  %v2260_v20 = vld [vmem:[%s3907_s1 + $0x30] sm:$0xff] }
 0x1fa   :  { %v2305_v32 = vsub.f32 %v2289_v24, %v2297_v26  ;;  %v2292_v26 = vld [vmem:[%s3908_s2 + $0x30] sm:$0xff] }
 0x1fb   :  { %2873 = vrsqrt.f32 %v2269_v30 }
 0x1fc   :  { %2399 = vperm.xlu0 %2859, %v2305_v32   ;;  %2327 = vperm.xlu1 %2860, %v2281_v17   ;;  %2875 = vrsqrt.f32 %v2268_v52 }
 0x1fd   :  { %v2870_v51 = vpop.eup %2869 }
 0x1fe   :  { %v2283_v23 = vmul.f32 %v2870_v51, %v2259_v50  ;;  %v2872_v54 = vpop.eup %2871 }
 0x1ff   :  { %v2282_v47 = vmul.f32 %v2872_v54, %v2258_v59 }
 0x200   :  { %2394 = vperm.xlu1 %2860, %v2304_v53   ;;  %v2299_v5 = vmul.f32 %v2283_v23, %v3720_v62  ;;  %v2293_v62 = vld [vmem:[%s3908_s2 + $0x38] sm:$0xff] }
 0x201   :  { %v2298_v19 = vmul.f32 %v2282_v47, %v3713_v34 }
 0x202   :  { %v2307_v7 = vsub.f32 %v2291_v10, %v2299_v5 }
 0x203   :  { %v2306_v14 = vsub.f32 %v2290_v0, %v2298_v19 }
 0x204   :  { %2409 = vperm.xlu0 %2859, %v2307_v7   ;;  %2332 = vperm.xlu1 %2860, %v2282_v47  }
 0x205   :  { %v2874_v3 = vpop.eup %2873 }
 0x206   :  { %v2285_v1 = vmul.f32 %v2874_v3, %v2261_v2  ;;  %v2876_v17 = vpop.eup %2875 }
 0x207   :  { %v2284_v34 = vmul.f32 %v2876_v17, %v2260_v20 }
 0x208   :  { %2337 = vperm.xlu1 %2860, %v2283_v23   ;;  %v2301_v13 = vmul.f32 %v2285_v1, %v2221_v43 }
 0x209   :  { %v2300_v24 = vmul.f32 %v2284_v34, %v3730_v37 }
 0x20a   :  { %v2309_v16 = vsub.f32 %v2293_v62, %v2301_v13 }
 0x20b   :  { %v2308_v29 = vsub.f32 %v2292_v26, %v2300_v24 }
 0x20c   :  { %2404 = vperm.xlu1 %2860, %v2306_v14   ;;  %2419 = vperm.xlu0 %2859, %v2309_v16  }
 0x210   :  { %2342 = vperm.xlu1 %2860, %v2284_v34  }
 0x214   :  { %2347 = vperm.xlu1 %2860, %v2285_v1  }
 0x218   :  { %2414 = vperm.xlu1 %2860, %v2308_v29  }
 0x269   :  { %v2313_v43 = vpop.permute.xlu0 %2312 }
 0x26a   :  { %v2350_v51 = vmul.f32 %v2313_v43, %v3545_v31  ;;  %v2351_v37 = vmul.f32 %v2313_v43, %v3549_v33  ;;  %v2352_v52 = vmul.f32 %v2313_v43, %v3565_v42  ;;  %v2353_v53 = vmul.f32 %v2313_v43, %v3571_v45 }
 0x26f   :  { %v2318_v30 = vpop.permute.xlu1 %2317 }
 0x270   :  { %v2354_v32 = vmul.f32 %v2318_v30, %v3555_v36  ;;  %v2355_v41 = vmul.f32 %v2318_v30, %v3559_v39  ;;  %v2356_v46 = vmul.f32 %v2318_v30, %v3585_v55  ;;  %v2357_v50 = vmul.f32 %v2318_v30, %v3589_v57 }
 0x273   :  { %v2390_v23 = vpop.permute.xlu0 %2389  ;;  %v2385_v54 = vpop.permute.xlu1 %2384 }
 0x274   :  { %v2426_v10 = vadd.f32 %v2390_v23, %v2354_v32  ;;  %v2427_v59 = vadd.f32 %v2390_v23, %v2355_v41  ;;  %v2428_v5 = vadd.f32 %v2390_v23, %v2356_v46  ;;  %v2429_v36 = vadd.f32 %v2390_v23, %v2357_v50 }
 0x275   :  { %v2422_v7 = vadd.f32 %v2385_v54, %v2350_v51  ;;  %v2423_v39 = vadd.f32 %v2385_v54, %v2351_v37  ;;  %v2424_v47 = vadd.f32 %v2385_v54, %v2352_v52  ;;  %v2425_v55 = vadd.f32 %v2385_v54, %v2353_v53 }
 0x276   :  { %v2458_v2 = vmax.f32 %v2426_v10, 0.0  ;;  %v2459_v57 = vmax.f32 %v2427_v59, 0.0  ;;  %v2460_v3 = vmax.f32 %v2428_v5, 0.0  ;;  %v2461_v31 = vmax.f32 %v2429_v36, 0.0 }
 0x277   :  { %v2454_v19 = vmax.f32 %v2422_v7, 0.0  ;;  %v2455_v33 = vmax.f32 %v2423_v39, 0.0  ;;  %v2456_v1 = vmax.f32 %v2424_v47, 0.0  ;;  %v2457_v42 = vmax.f32 %v2425_v55, 0.0  ;;  %v2323_v0 = vpop.permute.xlu1 %2322 }
 0x278   :  { %2490 = vst [vmem:[%s3911_s5 + $0x20] sm:$0xff] %v2458_v2  ;;  %2491 = vst [vmem:[%s3911_s5 + $0x28] sm:$0xff] %v2459_v57  ;;  %v2358_v29 = vmul.f32 %v2323_v0, %v3569_v44  ;;  %v2359_v43 = vmul.f32 %v2323_v0, %v3576_v49  ;;  %v2360_v30 = vmul.f32 %v2323_v0, %v3605_v6 }
 0x279   :  { %2492 = vst [vmem:[%s3911_s5 + $0x30] sm:$0xff] %v2460_v3  ;;  %2493 = vst [vmem:[%s3911_s5 + $0x38] sm:$0xff] %v2461_v31  ;;  %v2361_v32 = vmul.f32 %v2323_v0, %v3609_v8 }
 0x27a   :  { %2486 = vst [vmem:[%s3911_s5] sm:$0xff] %v2454_v19  ;;  %2487 = vst [vmem:[%s3911_s5 + $0x8] sm:$0xff] %v2455_v33 }
 0x27b   :  { %2488 = vst [vmem:[%s3911_s5 + $0x10] sm:$0xff] %v2456_v1  ;;  %2489 = vst [vmem:[%s3911_s5 + $0x18] sm:$0xff] %v2457_v42  ;;  %v2328_v45 = vpop.permute.xlu1 %2327  ;;  %v2400_v17 = vpop.permute.xlu0 %2399 }
 0x27c   :  { %v2362_v62 = vmul.f32 %v2328_v45, %v3591_v58  ;;  %v2363_v13 = vmul.f32 %v2328_v45, %v3596_v63  ;;  %v2364_v14 = vmul.f32 %v2328_v45, %v3625_v18  ;;  %v2365_v16 = vmul.f32 %v2328_v45, %v3629_v21 }
 0x27e   :  { %v2434_v20 = vadd.f32 %v2400_v17, %v2362_v62  ;;  %v2435_v34 = vadd.f32 %v2400_v17, %v2363_v13  ;;  %v2436_v24 = vadd.f32 %v2400_v17, %v2364_v14  ;;  %v2437_v26 = vadd.f32 %v2400_v17, %v2365_v16 }
 0x27f   :  { %v2395_v58 = vpop.permute.xlu1 %2394 }
 0x280   :  { %v2466_v41 = vmax.f32 %v2434_v20, 0.0  ;;  %v2467_v63 = vmax.f32 %v2435_v34, 0.0  ;;  %v2468_v46 = vmax.f32 %v2436_v24, 0.0  ;;  %v2469_v18 = vmax.f32 %v2437_v26, 0.0 }
 0x281   :  { %v2430_v50 = vadd.f32 %v2395_v58, %v2358_v29  ;;  %v2431_v21 = vadd.f32 %v2395_v58, %v2359_v43  ;;  %v2432_v51 = vadd.f32 %v2395_v58, %v2360_v30  ;;  %v2433_v37 = vadd.f32 %v2395_v58, %v2361_v32 }
 0x282   :  { %2498 = vst [vmem:[%s3911_s5 + $0x60] sm:$0xff] %v2466_v41  ;;  %2499 = vst [vmem:[%s3911_s5 + $0x68] sm:$0xff] %v2467_v63 }
 0x283   :  { %2500 = vst [vmem:[%s3911_s5 + $0x70] sm:$0xff] %v2468_v46  ;;  %2501 = vst [vmem:[%s3911_s5 + $0x78] sm:$0xff] %v2469_v18  ;;  %v2462_v44 = vmax.f32 %v2430_v50, 0.0  ;;  %v2463_v49 = vmax.f32 %v2431_v21, 0.0  ;;  %v2464_v6 = vmax.f32 %v2432_v51, 0.0  ;;  %v2465_v8 = vmax.f32 %v2433_v37, 0.0  ;;  %v2333_v52 = vpop.permute.xlu1 %2332  ;;  %v2410_v5 = vpop.permute.xlu0 %2409 }
 0x284   :  { %v2366_v55 = vmul.f32 %v2333_v52, %v3611_v9  ;;  %v2367_v2 = vmul.f32 %v2333_v52, %v3616_v12  ;;  %v2368_v57 = vmul.f32 %v2333_v52, %v3645_v35  ;;  %v2369_v3 = vmul.f32 %v2333_v52, %v3649_v38 }
 0x285   :  { %2494 = vst [vmem:[%s3911_s5 + $0x40] sm:$0xff] %v2462_v44  ;;  %2495 = vst [vmem:[%s3911_s5 + $0x48] sm:$0xff] %v2463_v49 }
 0x286   :  { %2496 = vst [vmem:[%s3911_s5 + $0x50] sm:$0xff] %v2464_v6  ;;  %2497 = vst [vmem:[%s3911_s5 + $0x58] sm:$0xff] %v2465_v8 }
 0x287   :  { %v2338_v53 = vpop.permute.xlu1 %2337 }
 0x288   :  { %v2370_v23 = vmul.f32 %v2338_v53, %v3631_v22  ;;  %v2371_v54 = vmul.f32 %v2338_v53, %v3636_v27  ;;  %v2372_v10 = vmul.f32 %v2338_v53, %v3665_v56  ;;  %v2373_v59 = vmul.f32 %v2338_v53, %v3669_v60 }
 0x28a   :  { %v2442_v36 = vadd.f32 %v2410_v5, %v2370_v23  ;;  %v2443_v7 = vadd.f32 %v2410_v5, %v2371_v54  ;;  %v2444_v39 = vadd.f32 %v2410_v5, %v2372_v10  ;;  %v2445_v47 = vadd.f32 %v2410_v5, %v2373_v59 }
 0x28b   :  { %v2405_v22 = vpop.permute.xlu1 %2404  ;;  %v2420_v17 = vpop.permute.xlu0 %2419 }
 0x28c   :  { %v2474_v31 = vmax.f32 %v2442_v36, 0.0  ;;  %v2475_v27 = vmax.f32 %v2443_v7, 0.0  ;;  %v2476_v19 = vmax.f32 %v2444_v39, 0.0  ;;  %v2477_v56 = vmax.f32 %v2445_v47, 0.0 }
 0x28d   :  { %v2438_v33 = vadd.f32 %v2405_v22, %v2366_v55  ;;  %v2439_v60 = vadd.f32 %v2405_v22, %v2367_v2  ;;  %v2440_v1 = vadd.f32 %v2405_v22, %v2368_v57  ;;  %v2441_v42 = vadd.f32 %v2405_v22, %v2369_v3 }
 0x28e   :  { %2506 = vst [vmem:[%s3911_s5 + $0xa0] sm:$0xff] %v2474_v31  ;;  %2507 = vst [vmem:[%s3911_s5 + $0xa8] sm:$0xff] %v2475_v27 }
 0x28f   :  { %2508 = vst [vmem:[%s3911_s5 + $0xb0] sm:$0xff] %v2476_v19  ;;  %2509 = vst [vmem:[%s3911_s5 + $0xb8] sm:$0xff] %v2477_v56  ;;  %v2470_v9 = vmax.f32 %v2438_v33, 0.0  ;;  %v2471_v12 = vmax.f32 %v2439_v60, 0.0  ;;  %v2472_v35 = vmax.f32 %v2440_v1, 0.0  ;;  %v2473_v38 = vmax.f32 %v2441_v42, 0.0  ;;  %v2343_v0 = vpop.permute.xlu1 %2342 }
 0x290   :  { %v2374_v29 = vmul.f32 %v2343_v0, %v3651_v40  ;;  %v2375_v43 = vmul.f32 %v2343_v0, %v3656_v48  ;;  %v2376_v30 = vmul.f32 %v2343_v0, %v3685_v11  ;;  %v2377_v32 = vmul.f32 %v2343_v0, %v3689_v15 }
 0x291   :  { %2502 = vst [vmem:[%s3911_s5 + $0x80] sm:$0xff] %v2470_v9  ;;  %2503 = vst [vmem:[%s3911_s5 + $0x88] sm:$0xff] %v2471_v12 }
 0x292   :  { %2504 = vst [vmem:[%s3911_s5 + $0x90] sm:$0xff] %v2472_v35  ;;  %2505 = vst [vmem:[%s3911_s5 + $0x98] sm:$0xff] %v2473_v38 }
 0x293   :  { %v2348_v45 = vpop.permute.xlu1 %2347 }
 0x294   :  { %v2378_v62 = vmul.f32 %v2348_v45, %v3671_v61  ;;  %v2379_v13 = vmul.f32 %v2348_v45, %v3676_v4  ;;  %v2380_v14 = vmul.f32 %v2348_v45, %v3695_v25  ;;  %v2381_v16 = vmul.f32 %v2348_v45, %v3699_v28 }
 0x296   :  { %v2450_v20 = vadd.f32 %v2420_v17, %v2378_v62  ;;  %v2451_v34 = vadd.f32 %v2420_v17, %v2379_v13  ;;  %v2452_v24 = vadd.f32 %v2420_v17, %v2380_v14  ;;  %v2453_v26 = vadd.f32 %v2420_v17, %v2381_v16 }
 0x297   :  { %v2415_v61 = vpop.permute.xlu1 %2414 }
 0x298   :  { %v2482_v58 = vmax.f32 %v2450_v20, 0.0  ;;  %v2483_v4 = vmax.f32 %v2451_v34, 0.0  ;;  %v2484_v41 = vmax.f32 %v2452_v24, 0.0  ;;  %v2485_v25 = vmax.f32 %v2453_v26, 0.0 }
 0x299   :  { %v2446_v63 = vadd.f32 %v2415_v61, %v2374_v29  ;;  %v2447_v28 = vadd.f32 %v2415_v61, %v2375_v43  ;;  %v2448_v46 = vadd.f32 %v2415_v61, %v2376_v30  ;;  %v2449_v18 = vadd.f32 %v2415_v61, %v2377_v32 }
 0x29a   :  { %2514 = vst [vmem:[%s3911_s5 + $0xe0] sm:$0xff] %v2482_v58  ;;  %2515 = vst [vmem:[%s3911_s5 + $0xe8] sm:$0xff] %v2483_v4 }
 0x29b   :  { %2516 = vst [vmem:[%s3911_s5 + $0xf0] sm:$0xff] %v2484_v41  ;;  %2517 = vst [vmem:[%s3911_s5 + $0xf8] sm:$0xff] %v2485_v25  ;;  %v2478_v40 = vmax.f32 %v2446_v63, 0.0  ;;  %v2479_v48 = vmax.f32 %v2447_v28, 0.0  ;;  %v2480_v11 = vmax.f32 %v2448_v46, 0.0  ;;  %v2481_v15 = vmax.f32 %v2449_v18, 0.0 }
 0x29d   :  { %2510 = vst [vmem:[%s3911_s5 + $0xc0] sm:$0xff] %v2478_v40  ;;  %2511 = vst [vmem:[%s3911_s5 + $0xc8] sm:$0xff] %v2479_v48 }
 0x29e   :  { %2512 = vst [vmem:[%s3911_s5 + $0xd0] sm:$0xff] %v2480_v11  ;;  %2513 = vst [vmem:[%s3911_s5 + $0xd8] sm:$0xff] %v2481_v15 }

// kernel: netconv_forward.14
= control target key start
LH: loop header
LB: loop body
LE: loop exit
PB: predicated region body
PF: predicated region fallthrough
CT: control target
= control target key end

     0   :  { %v20_v1 = vlaneseq  ;;  %vm889_vm1 = vcmask 523264   ;;  %s3410_s0 = inlined_call_operand.vmem [shape: f32[128,576], index: 0, kind: input, shape index: {}]   ;;  %s3411_s1 = inlined_call_operand.vmem [shape: f32[128,1], index: 1, kind: input, shape index: {}]   ;;  %s3412_s2 = inlined_call_operand.vmem [shape: f32[128,1], index: 2, kind: input, shape index: {}]   ;;  %s3413_s3 = inlined_call_operand.vmem [shape: f32[576,72], index: 3, kind: input, shape index: {}]   ;;  %s3414_s4 = inlined_call_operand.<no memory space> [shape: f32[], index: 4, kind: input, shape index: {}]   ;;  %s3415_s5 = inlined_call_operand.vmem [shape: f32[128,128], index: 5, kind: output, shape index: {}]  }
   0x1   :  { %v2341_v0 = vstv %s3414_s4  ;;  %v1888_v2 = vld [vmem:[%s3413_s3 + $0x80] sm:$0xff]  ;;  %v1889_v4 = vld [vmem:[%s3413_s3 + $0x88] sm:$0xff]  ;;  %v1890_v11 = vld [vmem:[%s3413_s3 + $0x90] sm:$0xff] }
   0x2   :  { %v2346_v3 = vand.u32 127, %v20_v1  ;;  %v1920_v5 = vld [vmem:[%s3413_s3 + $0x180] sm:$0xff]  ;;  %v1921_v6 = vld [vmem:[%s3413_s3 + $0x188] sm:$0xff]  ;;  %v1891_v16 = vld [vmem:[%s3413_s3 + $0x98] sm:$0xff] }
   0x3   :  { %v19_v7 = vld [vmem:[%s3413_s3] sm:$0xff]  ;;  %v1873_v8 = vld [vmem:[%s3413_s3 + $0x8] sm:$0xff]  ;;  %v1922_v17 = vld [vmem:[%s3413_s3 + $0x190] sm:$0xff] }
   0x4   :  { %vm23_vm0 = vcmp.lt.s32.totalorder %v2346_v3, 72  ;;  %v1904_v9 = vld [vmem:[%s3413_s3 + $0x100] sm:$0xff]  ;;  %v1905_v10 = vld [vmem:[%s3413_s3 + $0x108] sm:$0xff]  ;;  %v1923_v22 = vld [vmem:[%s3413_s3 + $0x198] sm:$0xff] }
   0x5   :  { %v183_v12 = vsel %vm23_vm0, %v1888_v2, %v2341_v0  ;;  %v193_v13 = vsel %vm23_vm0, %v1889_v4, %v2341_v0  ;;  %v503_v14 = vsel %vm23_vm0, %v1920_v5, %v2341_v0  ;;  %v513_v15 = vsel %vm23_vm0, %v1921_v6, %v2341_v0  ;;  %v1874_v23 = vld [vmem:[%s3413_s3 + $0x10] sm:$0xff]  ;;  %v1875_v24 = vld [vmem:[%s3413_s3 + $0x18] sm:$0xff]  ;;  %v1892_v34 = vld [vmem:[%s3413_s3 + $0xa0] sm:$0xff] }
   0x6   :  { %v2184_v18 = vpack.c.bf16 %v193_v13, %v183_v12  ;;  %v2216_v19 = vpack.c.bf16 %v513_v15, %v503_v14  ;;  %v24_v20 = vsel %vm23_vm0, %v19_v7, %v2341_v0  ;;  %v33_v21 = vsel %vm23_vm0, %v1873_v8, %v2341_v0  ;;  %v1906_v29 = vld [vmem:[%s3413_s3 + $0x110] sm:$0xff]  ;;  %v1907_v30 = vld [vmem:[%s3413_s3 + $0x118] sm:$0xff]  ;;  %v1893_v35 = vld [vmem:[%s3413_s3 + $0xa8] sm:$0xff] }
   0x7   :  { %v2186_v25 = vpack.c.bf16 %v33_v21, %v24_v20  ;;  %v343_v26 = vsel %vm23_vm0, %v1904_v9, %v2341_v0  ;;  %v353_v27 = vsel %vm23_vm0, %v1905_v10, %v2341_v0  ;;  %v203_v28 = vsel %vm23_vm0, %v1890_v11, %v2341_v0  ;;  %v1924_v36 = vld [vmem:[%s3413_s3 + $0x1a0] sm:$0xff]  ;;  %v1925_v41 = vld [vmem:[%s3413_s3 + $0x1a8] sm:$0xff]  ;;  %v1894_v54 = vld [vmem:[%s3413_s3 + $0xb0] sm:$0xff] }
   0x8   :  { %2185 = vmatprep.subr.bf16.mxu0 %v2184_v18  ;;  %2217 = vmatprep.subr.bf16.mxu1 %v2216_v19  ;;  %v2218_v31 = vpack.c.bf16 %v353_v27, %v343_v26  ;;  %v213_v32 = vsel %vm23_vm0, %v1891_v16, %v2341_v0  ;;  %v523_v33 = vsel %vm23_vm0, %v1922_v17, %v2341_v0  ;;  %v1876_v42 = vld [vmem:[%s3413_s3 + $0x20] sm:$0xff]  ;;  %v1877_v43 = vld [vmem:[%s3413_s3 + $0x28] sm:$0xff]  ;;  %v1895_v55 = vld [vmem:[%s3413_s3 + $0xb8] sm:$0xff] }
   0x9   :  { %2187 = vmatpush3.bf16.msra.mxu0 %v2186_v25  ;;  %v2188_v37 = vpack.c.bf16 %v213_v32, %v203_v28  ;;  %v533_v38 = vsel %vm23_vm0, %v1923_v22, %v2341_v0  ;;  %v43_v39 = vsel %vm23_vm0, %v1874_v23, %v2341_v0  ;;  %v53_v40 = vsel %vm23_vm0, %v1875_v24, %v2341_v0  ;;  %v1908_v48 = vld [vmem:[%s3413_s3 + $0x120] sm:$0xff]  ;;  %v1909_v49 = vld [vmem:[%s3413_s3 + $0x128] sm:$0xff]  ;;  %v1926_v60 = vld [vmem:[%s3413_s3 + $0x1b0] sm:$0xff] }
   0xa   :  { %2219 = vmatpush3.bf16.msra.mxu1 %v2218_v31  ;;  %v2220_v44 = vpack.c.bf16 %v533_v38, %v523_v33  ;;  %v2190_v45 = vpack.c.bf16 %v53_v40, %v43_v39  ;;  %v363_v46 = vsel %vm23_vm0, %v1906_v29, %v2341_v0  ;;  %v373_v47 = vsel %vm23_vm0, %v1907_v30, %v2341_v0  ;;  %v1927_v61 = vld [vmem:[%s3413_s3 + $0x1b8] sm:$0xff]  ;;  %v1878_v62 = vld [vmem:[%s3413_s3 + $0x30] sm:$0xff]  ;;  %v1896_v11 = vld [vmem:[%s3413_s3 + $0xc0] sm:$0xff] }
   0xb   :  { %2189 = vmatprep.subr.bf16.mxu0 %v2188_v37  ;;  %v2222_v50 = vpack.c.bf16 %v373_v47, %v363_v46  ;;  %v223_v51 = vsel %vm23_vm0, %v1892_v34, %v2341_v0  ;;  %v233_v52 = vsel %vm23_vm0, %v1893_v35, %v2341_v0  ;;  %v543_v53 = vsel %vm23_vm0, %v1924_v36, %v2341_v0  ;;  %v1879_v5 = vld [vmem:[%s3413_s3 + $0x38] sm:$0xff]  ;;  %v1910_v6 = vld [vmem:[%s3413_s3 + $0x130] sm:$0xff]  ;;  %v1897_v12 = vld [vmem:[%s3413_s3 + $0xc8] sm:$0xff] }
   0xc   :  { %2221 = vmatprep.subr.bf16.mxu1 %v2220_v44  ;;  %v2192_v56 = vpack.c.bf16 %v233_v52, %v223_v51  ;;  %v553_v57 = vsel %vm23_vm0, %v1925_v41, %v2341_v0  ;;  %v63_v58 = vsel %vm23_vm0, %v1876_v42, %v2341_v0  ;;  %v73_v59 = vsel %vm23_vm0, %v1877_v43, %v2341_v0  ;;  %v1911_v7 = vld [vmem:[%s3413_s3 + $0x138] sm:$0xff]  ;;  %v1928_v17 = vld [vmem:[%s3413_s3 + $0x1c0] sm:$0xff]  ;;  %v1929_v18 = vld [vmem:[%s3413_s3 + $0x1c8] sm:$0xff] }
   0xd   :  { %2191 = vmatpush3.bf16.msra.mxu0 %v2190_v45  ;;  %v2224_v63 = vpack.c.bf16 %v553_v57, %v543_v53  ;;  %v2194_v1 = vpack.c.bf16 %v73_v59, %v63_v58  ;;  %v383_v2 = vsel %vm23_vm0, %v1908_v48, %v2341_v0  ;;  %v393_v4 = vsel %vm23_vm0, %v1909_v49, %v2341_v0  ;;  %v1880_v23 = vld [vmem:[%s3413_s3 + $0x40] sm:$0xff]  ;;  %v1881_v24 = vld [vmem:[%s3413_s3 + $0x48] sm:$0xff]  ;;  %v1898_v31 = vld [vmem:[%s3413_s3 + $0xd0] sm:$0xff] }
   0xe   :  { %2223 = vmatpush3.bf16.msra.mxu1 %v2222_v50  ;;  %2193 = vmatprep.subr.bf16.mxu0 %v2192_v56  ;;  %v2226_v8 = vpack.c.bf16 %v393_v4, %v383_v2  ;;  %v243_v9 = vsel %vm23_vm0, %v1894_v54, %v2341_v0  ;;  %v253_v10 = vsel %vm23_vm0, %v1895_v55, %v2341_v0  ;;  %v1912_v25 = vld [vmem:[%s3413_s3 + $0x140] sm:$0xff]  ;;  %v1913_v30 = vld [vmem:[%s3413_s3 + $0x148] sm:$0xff]  ;;  %v1899_v32 = vld [vmem:[%s3413_s3 + $0xd8] sm:$0xff] }
   0xf   :  { %2225 = vmatprep.subr.bf16.mxu1 %v2224_v63  ;;  %v2196_v13 = vpack.c.bf16 %v253_v10, %v243_v9  ;;  %v563_v14 = vsel %vm23_vm0, %v1926_v60, %v2341_v0  ;;  %v573_v15 = vsel %vm23_vm0, %v1927_v61, %v2341_v0  ;;  %v83_v16 = vsel %vm23_vm0, %v1878_v62, %v2341_v0  ;;  %v1930_v36 = vld [vmem:[%s3413_s3 + $0x1d0] sm:$0xff]  ;;  %v1931_v37 = vld [vmem:[%s3413_s3 + $0x1d8] sm:$0xff]  ;;  %v1900_v49 = vld [vmem:[%s3413_s3 + $0xe0] sm:$0xff] }
  0x10   :  { %v2228_v19 = vpack.c.bf16 %v573_v15, %v563_v14  ;;  %v93_v20 = vsel %vm23_vm0, %v1879_v5, %v2341_v0  ;;  %v403_v21 = vsel %vm23_vm0, %v1910_v6, %v2341_v0  ;;  %v413_v22 = vsel %vm23_vm0, %v1911_v7, %v2341_v0  ;;  %v1882_v42 = vld [vmem:[%s3413_s3 + $0x50] sm:$0xff]  ;;  %v1883_v43 = vld [vmem:[%s3413_s3 + $0x58] sm:$0xff]  ;;  %v1901_v50 = vld [vmem:[%s3413_s3 + $0xe8] sm:$0xff] }
  0x11   :  { %2195 = vmatpush3.bf16.msra.mxu0 %v2194_v1  ;;  %v2198_v26 = vpack.c.bf16 %v93_v20, %v83_v16  ;;  %v2230_v27 = vpack.c.bf16 %v413_v22, %v403_v21  ;;  %v263_v28 = vsel %vm23_vm0, %v1896_v11, %v2341_v0  ;;  %v273_v29 = vsel %vm23_vm0, %v1897_v12, %v2341_v0  ;;  %v1914_v44 = vld [vmem:[%s3413_s3 + $0x150] sm:$0xff]  ;;  %v1915_v48 = vld [vmem:[%s3413_s3 + $0x158] sm:$0xff]  ;;  %v1932_v55 = vld [vmem:[%s3413_s3 + $0x1e0] sm:$0xff] }
  0x12   :  { %2227 = vmatpush3.bf16.msra.mxu1 %v2226_v8  ;;  %2197 = vmatprep.subr.bf16.mxu0 %v2196_v13  ;;  %v2200_v33 = vpack.c.bf16 %v273_v29, %v263_v28  ;;  %v583_v34 = vsel %vm23_vm0, %v1928_v17, %v2341_v0  ;;  %v593_v35 = vsel %vm23_vm0, %v1929_v18, %v2341_v0  ;;  %v1933_v56 = vld [vmem:[%s3413_s3 + $0x1e8] sm:$0xff]  ;;  %v1884_v61 = vld [vmem:[%s3413_s3 + $0x60] sm:$0xff]  ;;  %v1902_v10 = vld [vmem:[%s3413_s3 + $0xf0] sm:$0xff] }
  0x13   :  { %2229 = vmatprep.subr.bf16.mxu1 %v2228_v19  ;;  %v2232_v38 = vpack.c.bf16 %v593_v35, %v583_v34  ;;  %v103_v39 = vsel %vm23_vm0, %v1880_v23, %v2341_v0  ;;  %v113_v40 = vsel %vm23_vm0, %v1881_v24, %v2341_v0  ;;  %v423_v41 = vsel %vm23_vm0, %v1912_v25, %v2341_v0  ;;  %v738_v57 = vld [vmem:[%s3410_s0 + $0x8] sm:$0xff]  ;;  %v1916_v5 = vld [vmem:[%s3413_s3 + $0x160] sm:$0xff]  ;;  %v1903_v11 = vld [vmem:[%s3413_s3 + $0xf8] sm:$0xff] }
  0x14   :  { %v433_v45 = vsel %vm23_vm0, %v1913_v30, %v2341_v0  ;;  %v283_v46 = vsel %vm23_vm0, %v1898_v31, %v2341_v0  ;;  %v293_v47 = vsel %vm23_vm0, %v1899_v32, %v2341_v0  ;;  %v2202_v51 = vpack.c.bf16 %v113_v40, %v103_v39  ;;  %v1885_v4 = vld [vmem:[%s3413_s3 + $0x68] sm:$0xff]  ;;  %v1934_v12 = vld [vmem:[%s3413_s3 + $0x1f0] sm:$0xff]  ;;  %1002 = vmatprep.mubr.f32.mxu0 %v738_v57  ;;  %v1935_v17 = vld [vmem:[%s3413_s3 + $0x1f8] sm:$0xff] }
  0x15   :  { %2199 = vmatpush3.bf16.msra.mxu0 %v2198_v26  ;;  %v2234_v52 = vpack.c.bf16 %v433_v45, %v423_v41  ;;  %v603_v53 = vsel %vm23_vm0, %v1930_v36, %v2341_v0  ;;  %v613_v54 = vsel %vm23_vm0, %v1931_v37, %v2341_v0  ;;  %v2204_v58 = vpack.c.bf16 %v293_v47, %v283_v46  ;;  %v1917_v6 = vld [vmem:[%s3413_s3 + $0x168] sm:$0xff]  ;;  %v740_v18 = vld [vmem:[%s3410_s0 + $0x18] sm:$0xff]  ;;  %v1886_v26 = vld [vmem:[%s3413_s3 + $0x70] sm:$0xff] }
  0x16   :  { %2231 = vmatpush3.bf16.msra.mxu1 %v2230_v27  ;;  %2201 = vmatprep.subr.bf16.mxu0 %v2200_v33  ;;  %v123_v59 = vsel %vm23_vm0, %v1882_v42, %v2341_v0  ;;  %v133_v60 = vsel %vm23_vm0, %v1883_v43, %v2341_v0  ;;  %v2236_v62 = vpack.c.bf16 %v613_v54, %v603_v53  ;;  %v1887_v27 = vld [vmem:[%s3413_s3 + $0x78] sm:$0xff]  ;;  %v1918_v28 = vld [vmem:[%s3413_s3 + $0x170] sm:$0xff]  ;;  %v1936_v31 = vld [vmem:[%s3413_s3 + $0x200] sm:$0xff] }
  0x17   :  { %2233 = vmatprep.subr.bf16.mxu1 %v2232_v38  ;;  %v443_v63 = vsel %vm23_vm0, %v1914_v44, %v2341_v0  ;;  %v453_v1 = vsel %vm23_vm0, %v1915_v48, %v2341_v0  ;;  %v303_v2 = vsel %vm23_vm0, %v1900_v49, %v2341_v0  ;;  %v313_v7 = vsel %vm23_vm0, %v1901_v50, %v2341_v0  ;;  %v1919_v30 = vld [vmem:[%s3413_s3 + $0x178] sm:$0xff]  ;;  %v1937_v32 = vld [vmem:[%s3413_s3 + $0x208] sm:$0xff]  ;;  %v1938_v44 = vld [vmem:[%s3413_s3 + $0x210] sm:$0xff] }
  0x18   :  { %v623_v8 = vsel %vm23_vm0, %v1932_v55, %v2341_v0  ;;  %v633_v9 = vsel %vm23_vm0, %v1933_v56, %v2341_v0  ;;  %v2206_v13 = vpack.c.bf16 %v133_v60, %v123_v59  ;;  %v2238_v14 = vpack.c.bf16 %v453_v1, %v443_v63  ;;  %1147 = vmatprep.mubr.f32.mxu1 %v740_v18  ;;  %v1939_v45 = vld [vmem:[%s3413_s3 + $0x218] sm:$0xff]  ;;  %v737_v50 = vld [vmem:[%s3410_s0] sm:$0xff]  ;;  %v739_v53 = vld [vmem:[%s3410_s0 + $0x10] sm:$0xff] }
  0x19   :  { %2203 = vmatpush3.bf16.msra.mxu0 %v2202_v51  ;;  %v2208_v15 = vpack.c.bf16 %v313_v7, %v303_v2  ;;  %v143_v16 = vsel %vm23_vm0, %v1884_v61, %v2341_v0  ;;  %v153_v19 = vsel %vm23_vm0, %v1885_v4, %v2341_v0  ;;  %v463_v20 = vsel %vm23_vm0, %v1916_v5, %v2341_v0  ;;  %v1940_v51 = vld [vmem:[%s3413_s3 + $0x220] sm:$0xff]  ;;  %v743_v54 = vld [vmem:[%s3410_s0 + $0x30] sm:$0xff]  ;;  %v742_v59 = vld [vmem:[%s3410_s0 + $0x28] sm:$0xff] }
  0x1a   :  { %2235 = vmatpush3.bf16.msra.mxu1 %v2234_v52  ;;  %2205 = vmatprep.subr.bf16.mxu0 %v2204_v58  ;;  %v473_v21 = vsel %vm23_vm0, %v1917_v6, %v2341_v0  ;;  %v2240_v22 = vpack.c.bf16 %v633_v9, %v623_v8  ;;  %v323_v23 = vsel %vm23_vm0, %v1902_v10, %v2341_v0  ;;  %v1941_v52 = vld [vmem:[%s3413_s3 + $0x228] sm:$0xff]  ;;  %v745_v55 = vld [vmem:[%s3410_s0 + $0x40] sm:$0xff]  ;;  %v1942_v60 = vld [vmem:[%s3413_s3 + $0x230] sm:$0xff] }
  0x1b   :  { %2237 = vmatprep.subr.bf16.mxu1 %v2236_v62  ;;  %v333_v24 = vsel %vm23_vm0, %v1903_v11, %v2341_v0  ;;  %v643_v25 = vsel %vm23_vm0, %v1934_v12, %v2341_v0  ;;  %v653_v29 = vsel %vm23_vm0, %v1935_v17, %v2341_v0  ;;  %v2210_v33 = vpack.c.bf16 %v153_v19, %v143_v16  ;;  %v1943_v61 = vld [vmem:[%s3413_s3 + $0x238] sm:$0xff]  ;;  %v750_v1 = vld [vmem:[%s3410_s0 + $0x68] sm:$0xff]  ;;  %v747_v6 = vld [vmem:[%s3410_s0 + $0x50] sm:$0xff] }
  0x1c   :  { %v2242_v34 = vpack.c.bf16 %v473_v21, %v463_v20  ;;  %v2212_v35 = vpack.c.bf16 %v333_v24, %v323_v23  ;;  %v2244_v36 = vpack.c.bf16 %v653_v29, %v643_v25  ;;  %v163_v37 = vsel %vm23_vm0, %v1886_v26, %v2341_v0  ;;  %v744_v62 = vld [vmem:[%s3410_s0 + $0x38] sm:$0xff]  ;;  %v749_v7 = vld [vmem:[%s3410_s0 + $0x60] sm:$0xff]  ;;  %v754_v10 = vld [vmem:[%s3410_s0 + $0x88] sm:$0xff] }
  0x1d   :  { %2207 = vmatpush3.bf16.msra.mxu0 %v2206_v13  ;;  %v173_v38 = vsel %vm23_vm0, %v1887_v27, %v2341_v0  ;;  %v483_v39 = vsel %vm23_vm0, %v1918_v28, %v2341_v0  ;;  %v493_v40 = vsel %vm23_vm0, %v1919_v30, %v2341_v0  ;;  %v663_v41 = vsel %vm23_vm0, %v1936_v31, %v2341_v0  ;;  %v748_v63 = vld [vmem:[%s3410_s0 + $0x58] sm:$0xff]  ;;  %v753_v8 = vld [vmem:[%s3410_s0 + $0x80] sm:$0xff]  ;;  %v758_v11 = vld [vmem:[%s3410_s0 + $0xa8] sm:$0xff] }
  0x1e   :  { %2239 = vmatpush3.bf16.msra.mxu1 %v2238_v14  ;;  %2209 = vmatprep.subr.bf16.mxu0 %v2208_v15  ;;  %v673_v42 = vsel %vm23_vm0, %v1937_v32, %v2341_v0  ;;  %v2214_v43 = vpack.c.bf16 %v173_v38, %v163_v37  ;;  %v2246_v46 = vpack.c.bf16 %v493_v40, %v483_v39  ;;  %v752_v9 = vld [vmem:[%s3410_s0 + $0x78] sm:$0xff]  ;;  %v757_v13 = vld [vmem:[%s3410_s0 + $0xa0] sm:$0xff]  ;;  %v759_v14 = vld [vmem:[%s3410_s0 + $0xb0] sm:$0xff] }
  0x1f   :  { %2241 = vmatprep.subr.bf16.mxu1 %v2240_v22  ;;  %v2248_v47 = vpack.c.bf16 %v673_v42, %v663_v41  ;;  %v683_v48 = vsel %vm23_vm0, %v1938_v44, %v2341_v0  ;;  %v693_v49 = vsel %vm23_vm0, %v1939_v45, %v2341_v0  ;;  %v703_v57 = vsel %vm23_vm0, %v1940_v51, %v2341_v0  ;;  %v760_v12 = vld [vmem:[%s3410_s0 + $0xb8] sm:$0xff]  ;;  %v763_v15 = vld [vmem:[%s3410_s0 + $0xd0] sm:$0xff]  ;;  %v765_v16 = vld [vmem:[%s3410_s0 + $0xe0] sm:$0xff] }
  0x20   :  { %v2252_v56 = vpack.c.bf16 %v693_v49, %v683_v48  ;;  %v713_v58 = vsel %vm23_vm0, %v1941_v52, %v2341_v0  ;;  %v723_v4 = vsel %vm23_vm0, %v1942_v60, %v2341_v0  ;;  %v733_v5 = vsel %vm23_vm0, %v1943_v61, %v2341_v0  ;;  %v755_v0 = vld [vmem:[%s3410_s0 + $0x90] sm:$0xff]  ;;  %v762_v17 = vld [vmem:[%s3410_s0 + $0xc8] sm:$0xff]  ;;  %v764_v18 = vld [vmem:[%s3410_s0 + $0xd8] sm:$0xff] }
  0x21   :  { %2211 = vmatpush3.bf16.msra.mxu0 %v2210_v33  ;;  %v2256_v2 = vpack.c.bf16 %v713_v58, %v703_v57  ;;  %v2260_v3 = vpack.c.bf16 %v733_v5, %v723_v4  ;;  %v768_v19 = vld [vmem:[%s3410_s0 + $0xf8] sm:$0xff]  ;;  %v770_v20 = vld [vmem:[%s3410_s0 + $0x108] sm:$0xff]  ;;  %v767_v21 = vld [vmem:[%s3410_s0 + $0xf0] sm:$0xff] }
  0x22   :  { %2243 = vmatpush3.bf16.msra.mxu1 %v2242_v34  ;;  %2213 = vmatprep.subr.bf16.mxu0 %v2212_v35  ;;  %v769_v22 = vld [vmem:[%s3410_s0 + $0x100] sm:$0xff]  ;;  %v775_v24 = vld [vmem:[%s3410_s0 + $0x130] sm:$0xff]  ;;  %v772_v25 = vld [vmem:[%s3410_s0 + $0x118] sm:$0xff] }
  0x23   :  { %2245 = vmatprep.subr.bf16.mxu1 %v2244_v36  ;;  %v773_v23 = vld [vmem:[%s3410_s0 + $0x120] sm:$0xff]  ;;  %v774_v26 = vld [vmem:[%s3410_s0 + $0x128] sm:$0xff]  ;;  %v780_v28 = vld [vmem:[%s3410_s0 + $0x158] sm:$0xff] }
  0x24   :  { %v778_v27 = vld [vmem:[%s3410_s0 + $0x148] sm:$0xff]  ;;  %v777_v29 = vld [vmem:[%s3410_s0 + $0x140] sm:$0xff]  ;;  %v779_v30 = vld [vmem:[%s3410_s0 + $0x150] sm:$0xff] }
  0x25   :  { %2215 = vmatpush3.bf16.msra.mxu0 %v2214_v43  ;;  %v783_v31 = vld [vmem:[%s3410_s0 + $0x170] sm:$0xff]  ;;  %v785_v32 = vld [vmem:[%s3410_s0 + $0x180] sm:$0xff]  ;;  %v782_v33 = vld [vmem:[%s3410_s0 + $0x168] sm:$0xff] }
  0x26   :  { %2247 = vmatpush3.bf16.msra.mxu1 %v2246_v46  ;;  %2249 = vmatprep.subr.bf16.mxu0 %v2248_v47  ;;  %v784_v34 = vld [vmem:[%s3410_s0 + $0x178] sm:$0xff]  ;;  %v790_v36 = vld [vmem:[%s3410_s0 + $0x1a8] sm:$0xff]  ;;  %v787_v37 = vld [vmem:[%s3410_s0 + $0x190] sm:$0xff] }
  0x27   :  { %2264 = vmatprep.subr.bf16.mxu1 %v2248_v47  ;;  %v788_v35 = vld [vmem:[%s3410_s0 + $0x198] sm:$0xff]  ;;  %v789_v38 = vld [vmem:[%s3410_s0 + $0x1a0] sm:$0xff]  ;;  %v795_v40 = vld [vmem:[%s3410_s0 + $0x1d0] sm:$0xff] }
  0x28   :  { %1003 = vmatmul.mubr.f32.vlgmr.msra.gmra.mrb[0].mxu0 %v737_v50  ;;  %v793_v39 = vld [vmem:[%s3410_s0 + $0x1c0] sm:$0xff]  ;;  %v792_v41 = vld [vmem:[%s3410_s0 + $0x1b8] sm:$0xff]  ;;  %v794_v42 = vld [vmem:[%s3410_s0 + $0x1c8] sm:$0xff] }
  0x29   :  { %1148 = vmatmul.mubr.f32.vlgmr.msra.gmra.mrb[0].mxu1 %v739_v53  ;;  %1007 = vmatprep.mubr.f32.mxu0 %v743_v54  ;;  %v798_v43 = vld [vmem:[%s3410_s0 + $0x1e8] sm:$0xff]  ;;  %v800_v44 = vld [vmem:[%s3410_s0 + $0x1f8] sm:$0xff]  ;;  %v797_v45 = vld [vmem:[%s3410_s0 + $0x1e0] sm:$0xff] }
  0x2a   :  { %2268 = vmatpush3.bf16.msra.mxu1 %v2248_v47  ;;  %1152 = vmatprep.mubr.f32.mxu1 %v745_v55  ;;  %v799_v46 = vld [vmem:[%s3410_s0 + $0x1f0] sm:$0xff]  ;;  %v805_v48 = vld [vmem:[%s3410_s0 + $0x220] sm:$0xff]  ;;  %v802_v49 = vld [vmem:[%s3410_s0 + $0x208] sm:$0xff] }
  0x2b   :  { %2251 = vmatpush3.bf16.msra.mxu0 %v2248_v47  ;;  %2265 = vmatprep.subr.bf16.mxu1 %v2252_v56  ;;  %v803_v47 = vld [vmem:[%s3410_s0 + $0x210] sm:$0xff]  ;;  %v804_v50 = vld [vmem:[%s3410_s0 + $0x218] sm:$0xff]  ;;  %v810_v52 = vld [vmem:[%s3410_s0 + $0x248] sm:$0xff] }
  0x2c   :  { %1008 = vmatmul.mubr.f32.gmra.mrb[2].mxu0 %v742_v59  ;;  %2253 = vmatprep.subr.bf16.mxu0 %v2252_v56  ;;  %v808_v51 = vld [vmem:[%s3410_s0 + $0x238] sm:$0xff]  ;;  %v807_v53 = vld [vmem:[%s3410_s0 + $0x230] sm:$0xff]  ;;  %v809_v54 = vld [vmem:[%s3410_s0 + $0x240] sm:$0xff] }
  0x2d   :  { %1153 = vmatmul.mubr.f32.gmra.mrb[2].mxu1 %v744_v62  ;;  %1012 = vmatprep.mubr.f32.mxu0 %v748_v63  ;;  %v813_v55 = vld [vmem:[%s3410_s0 + $0x260] sm:$0xff]  ;;  %v812_v57 = vld [vmem:[%s3410_s0 + $0x258] sm:$0xff]  ;;  %v814_v58 = vld [vmem:[%s3410_s0 + $0x268] sm:$0xff] }
  0x2e   :  { %1157 = vmatprep.mubr.f32.mxu1 %v750_v1  ;;  %2269 = vmatpush3.bf16.msra.mxu1 %v2252_v56  ;;  %v741_v59 = vld [vmem:[%s3410_s0 + $0x20] sm:$0xff]  ;;  %v746_v61 = vld [vmem:[%s3410_s0 + $0x48] sm:$0xff]  ;;  %v751_v63 = vld [vmem:[%s3410_s0 + $0x70] sm:$0xff] }
  0x2f   :  { %2255 = vmatpush3.bf16.msra.mxu0 %v2252_v56  ;;  %2266 = vmatprep.subr.bf16.mxu1 %v2256_v2  ;;  %v815_v56 = vld [vmem:[%s3410_s0 + $0x270] sm:$0xff]  ;;  %v781_v60 = vld [vmem:[%s3410_s0 + $0x160] sm:$0xff]  ;;  %v786_v62 = vld [vmem:[%s3410_s0 + $0x188] sm:$0xff] }
  0x30   :  { %1013 = vmatmul.mubr.f32.gmra.mrb[4].mxu0 %v747_v6  ;;  %2257 = vmatprep.subr.bf16.mxu0 %v2256_v2  ;;  %v791_v1 = vld [vmem:[%s3410_s0 + $0x1b0] sm:$0xff]  ;;  %v796_v4 = vld [vmem:[%s3410_s0 + $0x1d8] sm:$0xff]  ;;  %v761_v5 = vld [vmem:[%s3410_s0 + $0xc0] sm:$0xff] }
  0x31   :  { %1158 = vmatmul.mubr.f32.gmra.mrb[4].mxu1 %v749_v7  ;;  %1017 = vmatprep.mubr.f32.mxu0 %v753_v8  ;;  %v801_v6 = vld [vmem:[%s3410_s0 + $0x200] sm:$0xff]  ;;  %v766_v7 = vld [vmem:[%s3410_s0 + $0xe8] sm:$0xff] }
  0x32   :  { %1162 = vmatprep.mubr.f32.mxu1 %v755_v0  ;;  %2270 = vmatpush3.bf16.msra.mxu1 %v2256_v2  ;;  %v806_v8 = vld [vmem:[%s3410_s0 + $0x228] sm:$0xff]  ;;  %v771_v0 = vld [vmem:[%s3410_s0 + $0x110] sm:$0xff] }
  0x33   :  { %2259 = vmatpush3.bf16.msra.mxu0 %v2256_v2  ;;  %2267 = vmatprep.subr.bf16.mxu1 %v2260_v3  ;;  %v756_v2 = vld [vmem:[%s3410_s0 + $0x98] sm:$0xff] }
  0x34   :  { %1018 = vmatmul.mubr.f32.gmra.mrb[6].mxu0 %v752_v9  ;;  %2261 = vmatprep.subr.bf16.mxu0 %v2260_v3  ;;  %v776_v9 = vld [vmem:[%s3410_s0 + $0x138] sm:$0xff] }
  0x35   :  { %1163 = vmatmul.mubr.f32.gmra.mrb[6].mxu1 %v754_v10  ;;  %1022 = vmatprep.mubr.f32.mxu0 %v758_v11  ;;  %v816_v10 = vld [vmem:[%s3410_s0 + $0x278] sm:$0xff] }
  0x36   :  { %1167 = vmatprep.mubr.f32.mxu1 %v760_v12  ;;  %2271 = vmatpush3.bf16.msra.mxu1 %v2260_v3 }
  0x37   :  { %2263 = vmatpush3.bf16.msra.mxu0 %v2260_v3  ;;  %v811_v3 = vld [vmem:[%s3410_s0 + $0x250] sm:$0xff] }
  0x38   :  { %1023 = vmatmul.mubr.f32.gmra.mrb[8].mxu0 %v757_v13 }
  0x39   :  { %1168 = vmatmul.mubr.f32.gmra.mrb[8].mxu1 %v759_v14  ;;  %1027 = vmatprep.mubr.f32.mxu0 %v763_v15 }
  0x3a   :  { %1172 = vmatprep.mubr.f32.mxu1 %v765_v16 }
  0x3c   :  { %1028 = vmatmul.mubr.f32.gmra.mrb[10].mxu0 %v762_v17 }
  0x3d   :  { %1173 = vmatmul.mubr.f32.gmra.mrb[10].mxu1 %v764_v18  ;;  %1032 = vmatprep.mubr.f32.mxu0 %v768_v19 }
  0x3e   :  { %1177 = vmatprep.mubr.f32.mxu1 %v770_v20 }
  0x40   :  { %1033 = vmatmul.mubr.f32.gmra.mrb[12].mxu0 %v767_v21 }
  0x41   :  { %1178 = vmatmul.mubr.f32.gmra.mrb[12].mxu1 %v769_v22  ;;  %1037 = vmatprep.mubr.f32.mxu0 %v773_v23 }
  0x42   :  { %1182 = vmatprep.mubr.f32.mxu1 %v775_v24 }
  0x44   :  { %1038 = vmatmul.mubr.f32.gmra.mrb[14].mxu0 %v772_v25 }
  0x45   :  { %1183 = vmatmul.mubr.f32.gmra.mrb[14].mxu1 %v774_v26  ;;  %1042 = vmatprep.mubr.f32.mxu0 %v778_v27 }
  0x46   :  { %1187 = vmatprep.mubr.f32.mxu1 %v780_v28 }
  0x48   :  { %1043 = vmatmul.mubr.f32.gmra.mrb[16].mxu0 %v777_v29 }
  0x49   :  { %1188 = vmatmul.mubr.f32.gmra.mrb[16].mxu1 %v779_v30  ;;  %1047 = vmatprep.mubr.f32.mxu0 %v783_v31 }
  0x4a   :  { %1192 = vmatprep.mubr.f32.mxu1 %v785_v32 }
  0x4c   :  { %1048 = vmatmul.mubr.f32.gmra.mrb[18].mxu0 %v782_v33 }
  0x4d   :  { %1193 = vmatmul.mubr.f32.gmra.mrb[18].mxu1 %v784_v34  ;;  %1052 = vmatprep.mubr.f32.mxu0 %v788_v35 }
  0x4e   :  { %1197 = vmatprep.mubr.f32.mxu1 %v790_v36 }
  0x50   :  { %1053 = vmatmul.mubr.f32.gmra.mrb[20].mxu0 %v787_v37 }
  0x51   :  { %1198 = vmatmul.mubr.f32.gmra.mrb[20].mxu1 %v789_v38  ;;  %1057 = vmatprep.mubr.f32.mxu0 %v793_v39 }
  0x52   :  { %1202 = vmatprep.mubr.f32.mxu1 %v795_v40 }
  0x54   :  { %1058 = vmatmul.mubr.f32.gmra.mrb[22].mxu0 %v792_v41 }
  0x55   :  { %1203 = vmatmul.mubr.f32.gmra.mrb[22].mxu1 %v794_v42  ;;  %1062 = vmatprep.mubr.f32.mxu0 %v798_v43 }
  0x56   :  { %1207 = vmatprep.mubr.f32.mxu1 %v800_v44 }
  0x58   :  { %1063 = vmatmul.mubr.f32.gmra.mrb[24].mxu0 %v797_v45 }
  0x59   :  { %1208 = vmatmul.mubr.f32.gmra.mrb[24].mxu1 %v799_v46  ;;  %1067 = vmatprep.mubr.f32.mxu0 %v803_v47 }
  0x5a   :  { %1212 = vmatprep.mubr.f32.mxu1 %v805_v48 }
  0x5c   :  { %1068 = vmatmul.mubr.f32.gmra.mrb[26].mxu0 %v802_v49 }
  0x5d   :  { %1213 = vmatmul.mubr.f32.gmra.mrb[26].mxu1 %v804_v50  ;;  %1072 = vmatprep.mubr.f32.mxu0 %v808_v51 }
  0x5e   :  { %1217 = vmatprep.mubr.f32.mxu1 %v810_v52 }
  0x60   :  { %1073 = vmatmul.mubr.f32.gmra.mrb[28].mxu0 %v807_v53 }
  0x61   :  { %1218 = vmatmul.mubr.f32.gmra.mrb[28].mxu1 %v809_v54  ;;  %1077 = vmatprep.mubr.f32.mxu0 %v813_v55 }
  0x62   :  { %1222 = vmatprep.mubr.f32.mxu1 %v815_v56 }
  0x64   :  { %1078 = vmatmul.mubr.f32.gmra.mrb[30].mxu0 %v812_v57 }
  0x65   :  { %1223 = vmatmul.mubr.f32.gmra.mrb[30].mxu1 %v814_v58  ;;  %2160 = vmatprep.mubr.msk.f32.mxu0 %vm889_vm1, %v741_v59 }
  0x66   :  { %2172 = vmatprep.mubr.msk.f32.mxu1 %vm889_vm1, %v781_v60 }
  0x68   :  { %2161 = vmatmul.mubr.msk.f32.vlgmr.msra.gmra.mrb[32].mxu0 %vm889_vm1, %v746_v61 }
  0x69   :  { %2173 = vmatmul.mubr.msk.f32.vlgmr.msra.gmra.mrb[32].mxu1 %vm889_vm1, %v786_v62  ;;  %2163 = vmatprep.mubr.msk.f32.mxu0 %vm889_vm1, %v751_v63 }
  0x6a   :  { %2175 = vmatprep.mubr.msk.f32.mxu1 %vm889_vm1, %v791_v1 }
  0x6c   :  { %2164 = vmatmul.mubr.msk.f32.gmra.mrb[34].mxu0 %vm889_vm1, %v756_v2 }
  0x6d   :  { %2176 = vmatmul.mubr.msk.f32.gmra.mrb[34].mxu1 %vm889_vm1, %v796_v4  ;;  %2166 = vmatprep.mubr.msk.f32.mxu0 %vm889_vm1, %v761_v5 }
  0x6e   :  { %2178 = vmatprep.mubr.msk.f32.mxu1 %vm889_vm1, %v801_v6 }
  0x70   :  { %2167 = vmatmul.mubr.msk.f32.gmra.mrb[36].mxu0 %vm889_vm1, %v766_v7 }
  0x71   :  { %2179 = vmatmul.mubr.msk.f32.gmra.mrb[36].mxu1 %vm889_vm1, %v806_v8  ;;  %2169 = vmatprep.mubr.msk.f32.mxu0 %vm889_vm1, %v771_v0 }
  0x72   :  { %2181 = vmatprep.mubr.msk.f32.mxu1 %vm889_vm1, %v811_v3 }
  0x74   :  { %2170 = vmatmul.mubr.msk.f32.gmra.mrb[38].mxu0 %vm889_vm1, %v776_v9 }
  0x75   :  { %2182 = vmatmul.mubr.msk.f32.gmra.mrb[38].mxu1 %vm889_vm1, %v816_v10 }
  0xfb   :  { %v1992_v11 = vpop.f32.mrb[0].mxu0 }
  0xfc   :  { %v2072_v12 = vpop.f32.mrb[0].mxu1  ;;  %v1993_v13 = vpop.f32.mrb[1].mxu0 }
  0xfd   :  { %v1994_v14 = vadd.f32 %v1993_v13, %v1992_v11  ;;  %v2073_v15 = vpop.f32.mrb[1].mxu1 }
  0xfe   :  { %v2074_v16 = vadd.f32 %v2073_v15, %v2072_v12 }
  0xff   :  { %v1995_v17 = vpop.f32.mrb[2].mxu0 }
 0x100   :  { %v2075_v18 = vpop.f32.mrb[2].mxu1  ;;  %v1996_v19 = vpop.f32.mrb[3].mxu0  ;;  %v3034_v20 = vadd.f32 %v2074_v16, %v1994_v14 }
 0x101   :  { %v1997_v21 = vadd.f32 %v1996_v19, %v1995_v17  ;;  %v2076_v22 = vpop.f32.mrb[3].mxu1 }
 0x102   :  { %v2077_v23 = vadd.f32 %v2076_v22, %v2075_v18 }
 0x103   :  { %v1998_v24 = vpop.f32.mrb[4].mxu0 }
 0x104   :  { %v2078_v25 = vpop.f32.mrb[4].mxu1  ;;  %v1999_v26 = vpop.f32.mrb[5].mxu0  ;;  %v3036_v27 = vadd.f32 %v2077_v23, %v1997_v21 }
 0x105   :  { %v2000_v28 = vadd.f32 %v1999_v26, %v1998_v24  ;;  %v2079_v29 = vpop.f32.mrb[5].mxu1 }
 0x106   :  { %v2080_v30 = vadd.f32 %v2079_v29, %v2078_v25 }
 0x107   :  { %v2001_v31 = vpop.f32.mrb[6].mxu0 }
 0x108   :  { %v2081_v32 = vpop.f32.mrb[6].mxu1  ;;  %v2002_v33 = vpop.f32.mrb[7].mxu0  ;;  %v3038_v34 = vadd.f32 %v2080_v30, %v2000_v28 }
 0x109   :  { %v2003_v35 = vadd.f32 %v2002_v33, %v2001_v31  ;;  %v2082_v36 = vpop.f32.mrb[7].mxu1 }
 0x10a   :  { %v2083_v37 = vadd.f32 %v2082_v36, %v2081_v32 }
 0x10b   :  { %v2004_v38 = vpop.f32.mrb[8].mxu0 }
 0x10c   :  { %v2084_v39 = vpop.f32.mrb[8].mxu1  ;;  %v2005_v40 = vpop.f32.mrb[9].mxu0  ;;  %v3040_v41 = vadd.f32 %v2083_v37, %v2003_v35 }
 0x10d   :  { %v2006_v42 = vadd.f32 %v2005_v40, %v2004_v38  ;;  %v2085_v43 = vpop.f32.mrb[9].mxu1 }
 0x10e   :  { %v2086_v44 = vadd.f32 %v2085_v43, %v2084_v39 }
 0x10f   :  { %v2007_v45 = vpop.f32.mrb[10].mxu0 }
 0x110   :  { %v2087_v46 = vpop.f32.mrb[10].mxu1  ;;  %v2008_v47 = vpop.f32.mrb[11].mxu0  ;;  %v3042_v48 = vadd.f32 %v2086_v44, %v2006_v42 }
 0x111   :  { %v2009_v49 = vadd.f32 %v2008_v47, %v2007_v45  ;;  %v2088_v50 = vpop.f32.mrb[11].mxu1 }
 0x112   :  { %v2089_v51 = vadd.f32 %v2088_v50, %v2087_v46 }
 0x113   :  { %v2010_v52 = vpop.f32.mrb[12].mxu0 }
 0x114   :  { %v2090_v53 = vpop.f32.mrb[12].mxu1  ;;  %v2011_v54 = vpop.f32.mrb[13].mxu0  ;;  %v3044_v55 = vadd.f32 %v2089_v51, %v2009_v49 }
 0x115   :  { %v2012_v56 = vadd.f32 %v2011_v54, %v2010_v52  ;;  %v2091_v57 = vpop.f32.mrb[13].mxu1 }
 0x116   :  { %v2092_v58 = vadd.f32 %v2091_v57, %v2090_v53 }
 0x117   :  { %v2013_v59 = vpop.f32.mrb[14].mxu0 }
 0x118   :  { %v2093_v60 = vpop.f32.mrb[14].mxu1  ;;  %v2014_v61 = vpop.f32.mrb[15].mxu0  ;;  %v3046_v62 = vadd.f32 %v2092_v58, %v2012_v56 }
 0x119   :  { %v2015_v63 = vadd.f32 %v2014_v61, %v2013_v59  ;;  %v2094_v1 = vpop.f32.mrb[15].mxu1 }
 0x11a   :  { %v2095_v2 = vadd.f32 %v2094_v1, %v2093_v60 }
 0x11b   :  { %v2016_v4 = vpop.f32.mrb[16].mxu0 }
 0x11c   :  { %v2096_v5 = vpop.f32.mrb[16].mxu1  ;;  %v2017_v6 = vpop.f32.mrb[17].mxu0  ;;  %v3048_v7 = vadd.f32 %v2095_v2, %v2015_v63 }
 0x11d   :  { %v2018_v8 = vadd.f32 %v2017_v6, %v2016_v4  ;;  %v2097_v0 = vpop.f32.mrb[17].mxu1 }
 0x11e   :  { %v2098_v3 = vadd.f32 %v2097_v0, %v2096_v5 }
 0x11f   :  { %v2019_v9 = vpop.f32.mrb[18].mxu0 }
 0x120   :  { %v2099_v10 = vpop.f32.mrb[18].mxu1  ;;  %v2020_v11 = vpop.f32.mrb[19].mxu0  ;;  %v1190_v12 = vadd.f32 %v2098_v3, %v2018_v8 }
 0x121   :  { %v2021_v13 = vadd.f32 %v2020_v11, %v2019_v9  ;;  %v2100_v14 = vpop.f32.mrb[19].mxu1 }
 0x122   :  { %v2101_v15 = vadd.f32 %v2100_v14, %v2099_v10 }
 0x123   :  { %v2022_v16 = vpop.f32.mrb[20].mxu0 }
 0x124   :  { %v2102_v17 = vpop.f32.mrb[20].mxu1  ;;  %v2023_v18 = vpop.f32.mrb[21].mxu0  ;;  %v1195_v19 = vadd.f32 %v2101_v15, %v2021_v13 }
 0x125   :  { %v2024_v21 = vadd.f32 %v2023_v18, %v2022_v16  ;;  %v2103_v22 = vpop.f32.mrb[21].mxu1 }
 0x126   :  { %v2104_v23 = vadd.f32 %v2103_v22, %v2102_v17 }
 0x127   :  { %v2025_v24 = vpop.f32.mrb[22].mxu0 }
 0x128   :  { %v2105_v25 = vpop.f32.mrb[22].mxu1  ;;  %v2026_v26 = vpop.f32.mrb[23].mxu0  ;;  %v1200_v28 = vadd.f32 %v2104_v23, %v2024_v21 }
 0x129   :  { %v2027_v29 = vadd.f32 %v2026_v26, %v2025_v24  ;;  %v2106_v30 = vpop.f32.mrb[23].mxu1 }
 0x12a   :  { %v2107_v31 = vadd.f32 %v2106_v30, %v2105_v25 }
 0x12b   :  { %v2028_v32 = vpop.f32.mrb[24].mxu0 }
 0x12c   :  { %v2108_v33 = vpop.f32.mrb[24].mxu1  ;;  %v2029_v35 = vpop.f32.mrb[25].mxu0  ;;  %v1205_v36 = vadd.f32 %v2107_v31, %v2027_v29 }
 0x12d   :  { %v2030_v37 = vadd.f32 %v2029_v35, %v2028_v32  ;;  %v2109_v38 = vpop.f32.mrb[25].mxu1 }
 0x12e   :  { %v2110_v39 = vadd.f32 %v2109_v38, %v2108_v33 }
 0x12f   :  { %v2031_v40 = vpop.f32.mrb[26].mxu0 }
 0x130   :  { %v2111_v42 = vpop.f32.mrb[26].mxu1  ;;  %v2032_v43 = vpop.f32.mrb[27].mxu0  ;;  %v1210_v44 = vadd.f32 %v2110_v39, %v2030_v37 }
 0x131   :  { %v2033_v45 = vadd.f32 %v2032_v43, %v2031_v40  ;;  %v2112_v46 = vpop.f32.mrb[27].mxu1  ;;  %v2307_v40 = vmov 0  }
 0x132   :  { %v2113_v47 = vadd.f32 %v2112_v46, %v2111_v42  ;;  %2273 = vset.pattern.permute.xlu1 %v2307_v40  ;;  %2274 = vset.pattern.permute.xlu0 %v2307_v40 }
 0x133   :  { %v2034_v49 = vpop.f32.mrb[28].mxu0 }
 0x134   :  { %v2114_v50 = vpop.f32.mrb[28].mxu1  ;;  %v2035_v51 = vpop.f32.mrb[29].mxu0  ;;  %v1215_v52 = vadd.f32 %v2113_v47, %v2033_v45 }
 0x135   :  { %v2036_v53 = vadd.f32 %v2035_v51, %v2034_v49  ;;  %v2115_v54 = vpop.f32.mrb[29].mxu1 }
 0x136   :  { %v2116_v56 = vadd.f32 %v2115_v54, %v2114_v50 }
 0x137   :  { %v2037_v57 = vpop.f32.mrb[30].mxu0 }
 0x138   :  { %v2117_v58 = vpop.f32.mrb[30].mxu1  ;;  %v2038_v59 = vpop.f32.mrb[31].mxu0  ;;  %v1220_v60 = vadd.f32 %v2116_v56, %v2036_v53 }
 0x139   :  { %v2039_v61 = vadd.f32 %v2038_v59, %v2037_v57  ;;  %v2118_v63 = vpop.f32.mrb[31].mxu1 }
 0x13a   :  { %v2119_v1 = vadd.f32 %v2118_v63, %v2117_v58 }
 0x13b   :  { %v2162_v2 = vpop.f32.mrb[32].mxu0 }
 0x13c   :  { %v3051_v4 = vadd.f32 %v2162_v2, %v3036_v27  ;;  %v2174_v5 = vpop.f32.mrb[32].mxu1  ;;  %v1294_v6 = vpop.f32.mrb[33].mxu0  ;;  %v1225_v8 = vadd.f32 %v2119_v1, %v2039_v61 }
 0x13d   :  { %v3053_v0 = vadd.f32 %v2174_v5, %v1195_v19  ;;  %v3056_v3 = vadd.f32 %v1294_v6, %v3034_v20  ;;  %v1334_v9 = vpop.f32.mrb[33].mxu1 }
 0x13e   :  { %v3058_v10 = vadd.f32 %v1334_v9, %v1190_v12  ;;  %1375 = vadd.xlane.f32.xlu0 %v3051_v4  ;;  %v1406_v12 = vmul.f32 %v3051_v4, %v3051_v4 }
 0x13f   :  { %1391 = vadd.xlane.f32.xlu1 %v3053_v0  ;;  %v2165_v11 = vpop.f32.mrb[34].mxu0  ;;  %v1414_v24 = vmul.f32 %v3053_v0, %v3053_v0  ;;  %v1405_v30 = vmul.f32 %v3056_v3, %v3056_v3 }
 0x140   :  { %v3063_v13 = vadd.f32 %v2165_v11, %v3040_v41  ;;  %v2177_v27 = vpop.f32.mrb[34].mxu1  ;;  %v1304_v14 = vpop.f32.mrb[35].mxu0 }
 0x141   :  { %v3065_v15 = vadd.f32 %v2177_v27, %v1205_v36  ;;  %v3068_v16 = vadd.f32 %v1304_v14, %v3038_v34  ;;  %v1344_v20 = vpop.f32.mrb[35].mxu1 }
 0x142   :  { %v3072_v17 = vadd.f32 %v1344_v20, %v1200_v28  ;;  %1373 = vadd.xlane.f32.xlu0 %v3056_v3  ;;  %v1408_v35 = vmul.f32 %v3063_v13, %v3063_v13 }
 0x143   :  { %1423 = vadd.xlane.f32.xlu1 %v1406_v12  ;;  %v2168_v18 = vpop.f32.mrb[36].mxu0  ;;  %v1416_v37 = vmul.f32 %v3065_v15, %v3065_v15 }
 0x144   :  { %v3076_v41 = vadd.f32 %v2168_v18, %v3044_v55  ;;  %v2180_v19 = vpop.f32.mrb[36].mxu1  ;;  %v1314_v21 = vpop.f32.mrb[37].mxu0  ;;  %v1415_v36 = vmul.f32 %v3072_v17, %v3072_v17 }
 0x145   :  { %v3078_v22 = vadd.f32 %v2180_v19, %v1215_v52  ;;  %v3081_v34 = vadd.f32 %v1314_v21, %v3042_v48  ;;  %v1354_v23 = vpop.f32.mrb[37].mxu1 }
 0x146   :  { %v3085_v25 = vadd.f32 %v1354_v23, %v1210_v44  ;;  %1389 = vadd.xlane.f32.xlu0 %v3058_v10  ;;  %v1410_v39 = vmul.f32 %v3076_v41, %v3076_v41 }
 0x147   :  { %1439 = vadd.xlane.f32.xlu1 %v1414_v24  ;;  %v2171_v26 = vpop.f32.mrb[38].mxu0  ;;  %v1409_v38 = vmul.f32 %v3081_v34, %v3081_v34  ;;  %v1418_v43 = vmul.f32 %v3078_v22, %v3078_v22 }
 0x148   :  { %v3089_v55 = vadd.f32 %v2171_v26, %v3048_v7  ;;  %v2183_v28 = vpop.f32.mrb[38].mxu1  ;;  %v1324_v29 = vpop.f32.mrb[39].mxu0  ;;  %v1413_v7 = vmul.f32 %v3058_v10, %v3058_v10  ;;  %v1417_v42 = vmul.f32 %v3085_v25, %v3085_v25 }
 0x149   :  { %v3093_v48 = vadd.f32 %v2183_v28, %v1225_v8  ;;  %v3096_v31 = vadd.f32 %v1324_v29, %v3046_v62  ;;  %v1364_v32 = vpop.f32.mrb[39].mxu1  ;;  %v1407_v62 = vmul.f32 %v3068_v16, %v3068_v16 }
 0x14a   :  { %v3098_v33 = vadd.f32 %v1364_v32, %v1220_v60  ;;  %1421 = vadd.xlane.f32.xlu0 %v1405_v30  ;;  %v1412_v45 = vmul.f32 %v3089_v55, %v3089_v55 }
 0x14b   :  { %1379 = vadd.xlane.f32.xlu1 %v3063_v13  ;;  %v1411_v44 = vmul.f32 %v3096_v31, %v3096_v31  ;;  %v1420_v47 = vmul.f32 %v3093_v48, %v3093_v48 }
 0x14c   :  { %v1419_v46 = vmul.f32 %v3098_v33, %v3098_v33 }
 0x14e   :  { %1437 = vadd.xlane.f32.xlu0 %v1413_v7 }
 0x14f   :  { %1395 = vadd.xlane.f32.xlu1 %v3065_v15 }
 0x152   :  { %1393 = vadd.xlane.f32.xlu0 %v3072_v17 }
 0x153   :  { %1377 = vadd.xlane.f32.xlu1 %v3068_v16 }
 0x156   :  { %1425 = vadd.xlane.f32.xlu0 %v1407_v62 }
 0x157   :  { %1427 = vadd.xlane.f32.xlu1 %v1408_v35 }
 0x15a   :  { %1441 = vadd.xlane.f32.xlu0 %v1415_v36  ;;  %v1534_v36 = vld [vmem:[%s3411_s1 + $0x8] sm:$0xff] }
 0x15b   :  { %1443 = vadd.xlane.f32.xlu1 %v1416_v37 }
 0x15e   :  { %1381 = vadd.xlane.f32.xlu0 %v3081_v34 }
 0x15f   :  { %1383 = vadd.xlane.f32.xlu1 %v3076_v41 }
 0x162   :  { %1397 = vadd.xlane.f32.xlu0 %v3085_v25 }
 0x163   :  { %1399 = vadd.xlane.f32.xlu1 %v3078_v22 }
 0x166   :  { %1429 = vadd.xlane.f32.xlu0 %v1409_v38 }
 0x167   :  { %1431 = vadd.xlane.f32.xlu1 %v1410_v39 }
 0x16a   :  { %1445 = vadd.xlane.f32.xlu0 %v1417_v42 }
 0x16b   :  { %1447 = vadd.xlane.f32.xlu1 %v1418_v43 }
 0x16e   :  { %1385 = vadd.xlane.f32.xlu0 %v3096_v31 }
 0x16f   :  { %1387 = vadd.xlane.f32.xlu1 %v3089_v55 }
 0x172   :  { %1401 = vadd.xlane.f32.xlu0 %v3098_v33 }
 0x173   :  { %1403 = vadd.xlane.f32.xlu1 %v3093_v48 }
 0x176   :  { %1433 = vadd.xlane.f32.xlu0 %v1411_v44 }
 0x177   :  { %1435 = vadd.xlane.f32.xlu1 %v1412_v45 }
 0x17a   :  { %1449 = vadd.xlane.f32.xlu0 %v1419_v46 }
 0x17b   :  { %1451 = vadd.xlane.f32.xlu1 %v1420_v47 }
 0x1cb   :  { %v1376_v49 = vpop.xlane.xlu0 %1375 }
 0x1cc   :  { %v1392_v50 = vpop.xlane.xlu1 %1391  ;;  %v3138_v51 = vmul.f32 0.013888889, %v1376_v49 }
 0x1cd   :  { %v3140_v54 = vmul.f32 0.013888889, %v1392_v50  ;;  %v1542_v50 = vld [vmem:[%s3411_s1 + $0x48] sm:$0xff] }
 0x1ce   :  { %v1486_v56 = vmul.f32 %v3138_v51, %v3138_v51 }
 0x1cf   :  { %v1374_v52 = vpop.xlane.xlu0 %1373  ;;  %v1494_v63 = vmul.f32 %v3140_v54, %v3140_v54 }
 0x1d0   :  { %v1424_v53 = vpop.xlane.xlu1 %1423  ;;  %v3144_v60 = vmul.f32 0.013888889, %v1374_v52 }
 0x1d1   :  { %v1470_v57 = vmul.f32 0.013888889, %v1424_v53 }
 0x1d2   :  { %v1485_v9 = vmul.f32 %v3144_v60, %v3144_v60 }
 0x1d3   :  { %v1502_v58 = vsub.f32 %v1470_v57, %v1486_v56  ;;  %v1390_v59 = vpop.xlane.xlu0 %1389 }
 0x1d4   :  { %v1440_v61 = vpop.xlane.xlu1 %1439  ;;  %v3150_v11 = vmul.f32 0.013888889, %v1390_v59 }
 0x1d5   :  { %v1518_v1 = vmax.f32 %v1502_v58, 0.0  ;;  %v1478_v2 = vmul.f32 0.013888889, %v1440_v61 }
 0x1d6   :  { %v1493_v21 = vmul.f32 %v3150_v11, %v3150_v11 }
 0x1d7   :  { %v1550_v5 = vadd.f32 1e-05, %v1518_v1  ;;  %v1510_v6 = vsub.f32 %v1478_v2, %v1494_v63  ;;  %v1422_v8 = vpop.xlane.xlu0 %1421  ;;  %v1533_v2 = vld [vmem:[%s3411_s1] sm:$0xff] }
 0x1d8   :  { %v1380_v27 = vpop.xlane.xlu1 %1379  ;;  %v1469_v14 = vmul.f32 0.013888889, %v1422_v8 }
 0x1d9   :  { %2275 = vrsqrt.f32 %v1550_v5  ;;  %v1526_v20 = vmax.f32 %v1510_v6, 0.0  ;;  %v3154_v62 = vmul.f32 0.013888889, %v1380_v27 }
 0x1da   :  { %v1501_v12 = vsub.f32 %v1469_v14, %v1485_v9 }
 0x1db   :  { %v1558_v18 = vadd.f32 1e-05, %v1526_v20  ;;  %v1438_v19 = vpop.xlane.xlu0 %1437  ;;  %v1488_v46 = vmul.f32 %v3154_v62, %v3154_v62 }
 0x1dc   :  { %v1517_v23 = vmax.f32 %v1501_v12, 0.0  ;;  %v1396_v24 = vpop.xlane.xlu1 %1395  ;;  %v1477_v26 = vmul.f32 0.013888889, %v1438_v19 }
 0x1dd   :  { %2277 = vrsqrt.f32 %v1558_v18  ;;  %v3169_v47 = vmul.f32 0.013888889, %v1396_v24  ;;  %v1541_v24 = vld [vmem:[%s3411_s1 + $0x40] sm:$0xff] }
 0x1de   :  { %v1549_v28 = vadd.f32 1e-05, %v1517_v23  ;;  %v1509_v29 = vsub.f32 %v1477_v26, %v1493_v21 }
 0x1df   :  { %v1394_v30 = vpop.xlane.xlu0 %1393  ;;  %v1496_v5 = vmul.f32 %v3169_v47, %v3169_v47 }
 0x1e0   :  { %2279 = vrsqrt.f32 %v1549_v28  ;;  %v1525_v32 = vmax.f32 %v1509_v29, 0.0  ;;  %v1378_v7 = vpop.xlane.xlu1 %1377  ;;  %v3161_v39 = vmul.f32 0.013888889, %v1394_v30 }
 0x1e1   :  { %v3156_v35 = vmul.f32 0.013888889, %v1378_v7 }
 0x1e2   :  { %v1557_v37 = vadd.f32 1e-05, %v1525_v32  ;;  %v1495_v58 = vmul.f32 %v3161_v39, %v3161_v39 }
 0x1e3   :  { %v2276_v38 = vpop.eup %2275  ;;  %v1426_v40 = vpop.xlane.xlu0 %1425  ;;  %v1487_v42 = vmul.f32 %v3156_v35, %v3156_v35 }
 0x1e4   :  { %2281 = vrsqrt.f32 %v1557_v37  ;;  %v1428_v43 = vpop.xlane.xlu1 %1427  ;;  %v1471_v44 = vmul.f32 0.013888889, %v1426_v40  ;;  %v3165_v45 = vmul.f32 %v2276_v38, %v1534_v36 }
 0x1e5   :  { %v1472_v49 = vmul.f32 0.013888889, %v1428_v43 }
 0x1e6   :  { %v1503_v52 = vsub.f32 %v1471_v44, %v1487_v42  ;;  %1652 = vperm.xlu1 %2273, %v3165_v45  }
 0x1e7   :  { %v2278_v53 = vpop.eup %2277  ;;  %v1504_v56 = vsub.f32 %v1472_v49, %v1488_v46  ;;  %v1442_v57 = vpop.xlane.xlu0 %1441  ;;  %v1536_v46 = vld [vmem:[%s3411_s1 + $0x18] sm:$0xff] }
 0x1e8   :  { %v1519_v59 = vmax.f32 %v1503_v52, 0.0  ;;  %v1444_v61 = vpop.xlane.xlu1 %1443  ;;  %v1479_v63 = vmul.f32 0.013888889, %v1442_v57  ;;  %v3177_v1 = vmul.f32 %v2278_v53, %v1542_v50 }
 0x1e9   :  { %v1520_v6 = vmax.f32 %v1504_v56, 0.0  ;;  %v1480_v8 = vmul.f32 0.013888889, %v1444_v61 }
 0x1ea   :  { %v2280_v9 = vpop.eup %2279  ;;  %v1511_v27 = vsub.f32 %v1479_v63, %v1495_v58  ;;  %1692 = vperm.xlu0 %2274, %v3177_v1   ;;  %v1551_v20 = vadd.f32 1e-05, %v1519_v59 }
 0x1eb   :  { %v1552_v14 = vadd.f32 1e-05, %v1520_v6  ;;  %v1512_v12 = vsub.f32 %v1480_v8, %v1496_v5  ;;  %v1382_v18 = vpop.xlane.xlu0 %1381  ;;  %v3185_v19 = vmul.f32 %v2280_v9, %v1533_v2 }
 0x1ec   :  { %v1527_v21 = vmax.f32 %v1511_v27, 0.0  ;;  %v1384_v23 = vpop.xlane.xlu1 %1383  ;;  %v3193_v36 = vmul.f32 0.013888889, %v1382_v18 }
 0x1ed   :  { %2283 = vrsqrt.f32 %v1552_v14  ;;  %v1528_v26 = vmax.f32 %v1512_v12, 0.0  ;;  %v3195_v38 = vmul.f32 0.013888889, %v1384_v23  ;;  %v1544_v14 = vld [vmem:[%s3411_s1 + $0x58] sm:$0xff] }
 0x1ee   :  { %v2282_v28 = vpop.eup %2281  ;;  %1647 = vperm.xlu0 %2274, %v3185_v19   ;;  %2285 = vrsqrt.f32 %v1551_v20  ;;  %v1559_v30 = vadd.f32 1e-05, %v1527_v21  ;;  %v1489_v42 = vmul.f32 %v3193_v36, %v3193_v36  ;;  %v1535_v20 = vld [vmem:[%s3411_s1 + $0x10] sm:$0xff] }
 0x1ef   :  { %v1560_v29 = vadd.f32 1e-05, %v1528_v26  ;;  %v1398_v32 = vpop.xlane.xlu0 %1397  ;;  %v3191_v7 = vmul.f32 %v2282_v28, %v1541_v24  ;;  %v1490_v49 = vmul.f32 %v3195_v38, %v3195_v38 }
 0x1f0   :  { %v1400_v37 = vpop.xlane.xlu1 %1399  ;;  %v3207_v52 = vmul.f32 0.013888889, %v1398_v32  ;;  %v1614_v32 = vmul.f32 %v3165_v45, %v3138_v51 }
 0x1f1   :  { %2287 = vrsqrt.f32 %v1560_v29  ;;  %1687 = vperm.xlu1 %2273, %v3191_v7   ;;  %v3205_v50 = vmul.f32 0.013888889, %v1400_v37 }
 0x1f2   :  { %2289 = vrsqrt.f32 %v1559_v30  ;;  %v1497_v8 = vmul.f32 %v3207_v52, %v3207_v52 }
 0x1f3   :  { %v1430_v40 = vpop.xlane.xlu0 %1429  ;;  %v1498_v6 = vmul.f32 %v3205_v50, %v3205_v50 }
 0x1f4   :  { %v1432_v43 = vpop.xlane.xlu1 %1431  ;;  %v1473_v44 = vmul.f32 0.013888889, %v1430_v40 }
 0x1f5   :  { %v1474_v53 = vmul.f32 0.013888889, %v1432_v43  ;;  %v1543_v43 = vld [vmem:[%s3411_s1 + $0x50] sm:$0xff] }
 0x1f6   :  { %v1505_v58 = vsub.f32 %v1473_v44, %v1489_v42  ;;  %v1598_v42 = vld [vmem:[%s3412_s2 + $0x8] sm:$0xff] }
 0x1f7   :  { %v2284_v56 = vpop.eup %2283  ;;  %v1506_v57 = vsub.f32 %v1474_v53, %v1490_v49  ;;  %v1446_v59 = vpop.xlane.xlu0 %1445  ;;  %v1630_v45 = vsub.f32 %v1598_v42, %v1614_v32 }
 0x1f8   :  { %v1448_v61 = vpop.xlane.xlu1 %1447  ;;  %v1481_v63 = vmul.f32 0.013888889, %v1446_v59  ;;  %v3209_v2 = vmul.f32 %v2284_v56, %v1536_v46  ;;  %v2286_v5 = vpop.eup %2285  ;;  %v1521_v21 = vmax.f32 %v1505_v58, 0.0  ;;  %v1613_v58 = vmul.f32 %v3185_v19, %v3144_v60  ;;  %v1605_v19 = vld [vmem:[%s3412_s2 + $0x40] sm:$0xff] }
 0x1f9   :  { %v1522_v9 = vmax.f32 %v1506_v57, 0.0  ;;  %v1482_v27 = vmul.f32 0.013888889, %v1448_v61  ;;  %v3224_v30 = vmul.f32 %v2286_v5, %v1535_v20  ;;  %v1622_v57 = vmul.f32 %v3177_v1, %v3140_v54  ;;  %v1606_v61 = vld [vmem:[%s3412_s2 + $0x48] sm:$0xff] }
 0x1fa   :  { %1662 = vperm.xlu1 %2273, %v3209_v2   ;;  %v1513_v24 = vsub.f32 %v1481_v63, %v1497_v8  ;;  %v1553_v44 = vadd.f32 1e-05, %v1521_v21  ;;  %v1597_v63 = vld [vmem:[%s3412_s2] sm:$0xff]  ;;  %v1621_v8 = vmul.f32 %v3191_v7, %v3150_v11 }
 0x1fb   :  { %v2288_v12 = vpop.eup %2287  ;;  %v1554_v18 = vadd.f32 1e-05, %v1522_v9  ;;  %v1514_v23 = vsub.f32 %v1482_v27, %v1498_v6  ;;  %v1386_v26 = vpop.xlane.xlu0 %1385  ;;  %v1638_v6 = vsub.f32 %v1606_v61, %v1622_v57  ;;  %v1629_v60 = vsub.f32 %v1597_v63, %v1613_v58  ;;  %v1600_v63 = vld [vmem:[%s3412_s2 + $0x18] sm:$0xff] }
 0x1fc   :  { %v1388_v28 = vpop.xlane.xlu1 %1387  ;;  %v3222_v29 = vmul.f32 %v2288_v12, %v1544_v14  ;;  %v2290_v37 = vpop.eup %2289  ;;  %v1529_v49 = vmax.f32 %v1513_v24, 0.0  ;;  %v3258_v27 = vmul.f32 0.013888889, %v1386_v26  ;;  %v1637_v24 = vsub.f32 %v1605_v19, %v1621_v8 }
 0x1fd   :  { %v1530_v40 = vmax.f32 %v1514_v23, 0.0  ;;  %2291 = vrsqrt.f32 %v1554_v18  ;;  %v3236_v56 = vmul.f32 %v2290_v37, %v1543_v43  ;;  %v3242_v59 = vmul.f32 0.013888889, %v1388_v28  ;;  %v1546_v37 = vld [vmem:[%s3411_s1 + $0x68] sm:$0xff] }
 0x1fe   :  { %1702 = vperm.xlu0 %2274, %v3222_v29   ;;  %1657 = vperm.xlu1 %2273, %v3224_v30   ;;  %v1561_v5 = vadd.f32 1e-05, %v1529_v49  ;;  %v1491_v11 = vmul.f32 %v3258_v27, %v3258_v27  ;;  %v1624_v19 = vmul.f32 %v3222_v29, %v3169_v47  ;;  %v1615_v47 = vmul.f32 %v3224_v30, %v3156_v35  ;;  %v1599_v29 = vld [vmem:[%s3412_s2 + $0x10] sm:$0xff] }
 0x1ff   :  { %v1562_v46 = vadd.f32 1e-05, %v1530_v40  ;;  %v1402_v53 = vpop.xlane.xlu0 %1401  ;;  %v1492_v9 = vmul.f32 %v3242_v59, %v3242_v59  ;;  %v1538_v40 = vld [vmem:[%s3411_s1 + $0x28] sm:$0xff]  ;;  %v1607_v35 = vld [vmem:[%s3412_s2 + $0x50] sm:$0xff] }
 0x200   :  { %v1404_v51 = vpop.xlane.xlu1 %1403  ;;  %v3266_v26 = vmul.f32 0.013888889, %v1402_v53  ;;  %v1616_v53 = vmul.f32 %v3209_v2, %v3154_v62 }
 0x201   :  { %2293 = vrsqrt.f32 %v1562_v46  ;;  %v3260_v14 = vmul.f32 0.013888889, %v1404_v51 }
 0x202   :  { %1748 = vperm.xlu0 %2274, %v1630_v45   ;;  %1697 = vperm.xlu1 %2273, %v3236_v56   ;;  %2295 = vrsqrt.f32 %v1553_v44  ;;  %v1499_v58 = vmul.f32 %v3266_v26, %v3266_v26  ;;  %v1632_v62 = vsub.f32 %v1600_v63, %v1616_v53 }
 0x203   :  { %v1434_v54 = vpop.xlane.xlu0 %1433  ;;  %2297 = vrsqrt.f32 %v1561_v5  ;;  %v1500_v7 = vmul.f32 %v3260_v14, %v3260_v14  ;;  %v1537_v5 = vld [vmem:[%s3411_s1 + $0x20] sm:$0xff] }
 0x204   :  { %v1436_v1 = vpop.xlane.xlu1 %1435  ;;  %v1475_v18 = vmul.f32 0.013888889, %v1434_v54 }
 0x205   :  { %v1476_v20 = vmul.f32 0.013888889, %v1436_v1 }
 0x206   :  { %1788 = vperm.xlu0 %2274, %v1638_v6   ;;  %1743 = vperm.xlu1 %2273, %v1629_v60   ;;  %v1507_v44 = vsub.f32 %v1475_v18, %v1491_v11  ;;  %v1623_v11 = vmul.f32 %v3236_v56, %v3161_v39  ;;  %v1602_v39 = vld [vmem:[%s3412_s2 + $0x28] sm:$0xff]  ;;  %v1540_v56 = vld [vmem:[%s3411_s1 + $0x38] sm:$0xff] }
 0x207   :  { %v1508_v12 = vsub.f32 %v1476_v20, %v1492_v9  ;;  %v1450_v23 = vpop.xlane.xlu0 %1449  ;;  %v2292_v28 = vpop.eup %2291  ;;  %v1608_v9 = vld [vmem:[%s3412_s2 + $0x58] sm:$0xff]  ;;  %v1545_v20 = vld [vmem:[%s3411_s1 + $0x60] sm:$0xff] }
 0x208   :  { %v1452_v21 = vpop.xlane.xlu1 %1451  ;;  %v1483_v49 = vmul.f32 0.013888889, %v1450_v23  ;;  %v1586_v45 = vmul.f32 %v2292_v28, %v1538_v40  ;;  %v1523_v1 = vmax.f32 %v1507_v44, 0.0  ;;  %v1631_v28 = vsub.f32 %v1599_v29, %v1615_v47 }
 0x209   :  { %v1484_v32 = vmul.f32 0.013888889, %v1452_v21  ;;  %v1524_v43 = vmax.f32 %v1508_v12, 0.0  ;;  %v1640_v21 = vsub.f32 %v1608_v9, %v1624_v19 }
 0x20a   :  { %1783 = vperm.xlu1 %2273, %v1637_v24   ;;  %v1515_v60 = vsub.f32 %v1483_v49, %v1499_v58  ;;  %v1555_v12 = vadd.f32 1e-05, %v1523_v1  ;;  %v1618_v40 = vmul.f32 %v1586_v45, %v3195_v38  ;;  %v1610_v38 = vld [vmem:[%s3412_s2 + $0x68] sm:$0xff] }
 0x20b   :  { %v2294_v42 = vpop.eup %2293  ;;  %v1516_v46 = vsub.f32 %v1484_v32, %v1500_v7  ;;  %v1556_v54 = vadd.f32 1e-05, %v1524_v43  ;;  %v1548_v7 = vld [vmem:[%s3411_s1 + $0x78] sm:$0xff] }
 0x20c   :  { %v1594_v51 = vmul.f32 %v2294_v42, %v1546_v37  ;;  %v2296_v57 = vpop.eup %2295  ;;  %v1531_v18 = vmax.f32 %v1515_v60, 0.0  ;;  %v1639_v37 = vsub.f32 %v1607_v35, %v1623_v11  ;;  %v1634_v43 = vsub.f32 %v1602_v39, %v1618_v40 }
 0x20d   :  { %v1532_v61 = vmax.f32 %v1516_v46, 0.0  ;;  %v1585_v2 = vmul.f32 %v2296_v57, %v1537_v5  ;;  %v2298_v8 = vpop.eup %2297 }
 0x20e   :  { %1712 = vperm.xlu0 %2274, %v1594_v51   ;;  %1672 = vperm.xlu1 %2273, %v1586_v45   ;;  %v1593_v23 = vmul.f32 %v2298_v8, %v1545_v20  ;;  %v1563_v24 = vadd.f32 1e-05, %v1531_v18  ;;  %v1626_v46 = vmul.f32 %v1594_v51, %v3205_v50  ;;  %v1539_v45 = vld [vmem:[%s3411_s1 + $0x30] sm:$0xff]  ;;  %v1604_v50 = vld [vmem:[%s3412_s2 + $0x38] sm:$0xff] }
 0x20f   :  { %v1564_v6 = vadd.f32 1e-05, %v1532_v61  ;;  %v1547_v51 = vld [vmem:[%s3411_s1 + $0x70] sm:$0xff]  ;;  %v1617_v1 = vmul.f32 %v1585_v2, %v3193_v36 }
 0x210   :  { %v1642_v53 = vsub.f32 %v1610_v38, %v1626_v46  ;;  %v1625_v19 = vmul.f32 %v1593_v23, %v3207_v52  ;;  %v1603_v8 = vld [vmem:[%s3412_s2 + $0x30] sm:$0xff] }
 0x211   :  { %2299 = vrsqrt.f32 %v1564_v6  ;;  %v1601_v6 = vld [vmem:[%s3412_s2 + $0x20] sm:$0xff]  ;;  %v1611_v52 = vld [vmem:[%s3412_s2 + $0x70] sm:$0xff] }
 0x212   :  { %1758 = vperm.xlu0 %2274, %v1632_v62   ;;  %1667 = vperm.xlu1 %2273, %v1585_v2   ;;  %2301 = vrsqrt.f32 %v1556_v54  ;;  %v1633_v62 = vsub.f32 %v1601_v6, %v1617_v1 }
 0x213   :  { %2303 = vrsqrt.f32 %v1555_v12 }
 0x214   :  { %2305 = vrsqrt.f32 %v1563_v24 }
 0x216   :  { %1798 = vperm.xlu0 %2274, %v1640_v21   ;;  %1707 = vperm.xlu1 %2273, %v1593_v23  }
 0x21a   :  { %1753 = vperm.xlu1 %2273, %v1631_v28  }
 0x21b   :  { %v2300_v30 = vpop.eup %2299 }
 0x21c   :  { %v1596_v32 = vmul.f32 %v2300_v30, %v1548_v7  ;;  %v2302_v42 = vpop.eup %2301 }
 0x21d   :  { %v1588_v44 = vmul.f32 %v2302_v42, %v1540_v56  ;;  %v2304_v49 = vpop.eup %2303 }
 0x21e   :  { %1722 = vperm.xlu0 %2274, %v1596_v32   ;;  %1793 = vperm.xlu1 %2273, %v1639_v37   ;;  %v1587_v57 = vmul.f32 %v2304_v49, %v1539_v45  ;;  %v2306_v61 = vpop.eup %2305  ;;  %v1628_v54 = vmul.f32 %v1596_v32, %v3260_v14  ;;  %v1609_v14 = vld [vmem:[%s3412_s2 + $0x60] sm:$0xff] }
 0x21f   :  { %v1620_v58 = vmul.f32 %v1588_v44, %v3242_v59  ;;  %v1595_v5 = vmul.f32 %v2306_v61, %v1547_v51  ;;  %v1612_v59 = vld [vmem:[%s3412_s2 + $0x78] sm:$0xff]  ;;  %v1641_v36 = vsub.f32 %v1609_v14, %v1625_v19 }
 0x220   :  { %v1644_v60 = vsub.f32 %v1612_v59, %v1628_v54  ;;  %v1619_v2 = vmul.f32 %v1587_v57, %v3258_v27 }
 0x221   :  { %v1636_v63 = vsub.f32 %v1604_v50, %v1620_v58  ;;  %v1627_v20 = vmul.f32 %v1595_v5, %v3266_v26 }
 0x222   :  { %1768 = vperm.xlu0 %2274, %v1634_v43   ;;  %1682 = vperm.xlu1 %2273, %v1588_v44   ;;  %v1635_v9 = vsub.f32 %v1603_v8, %v1619_v2 }
 0x223   :  { %v1643_v12 = vsub.f32 %v1611_v52, %v1627_v20 }
 0x226   :  { %1808 = vperm.xlu0 %2274, %v1642_v53   ;;  %1677 = vperm.xlu1 %2273, %v1587_v57  }
 0x22a   :  { %1778 = vperm.xlu0 %2274, %v1636_v63   ;;  %1717 = vperm.xlu1 %2273, %v1595_v5  }
 0x22e   :  { %1818 = vperm.xlu0 %2274, %v1644_v60   ;;  %1763 = vperm.xlu1 %2273, %v1633_v62  }
 0x232   :  { %1803 = vperm.xlu1 %2273, %v1641_v36  }
 0x236   :  { %1773 = vperm.xlu1 %2273, %v1635_v9  }
 0x23a   :  { %1813 = vperm.xlu1 %2273, %v1643_v12  }
 0x265   :  { %v1653_v18 = vpop.permute.xlu1 %1652 }
 0x266   :  { %v1726_v28 = vmul.f32 %v1653_v18, %v3051_v4 }
 0x269   :  { %v1693_v21 = vpop.permute.xlu0 %1692 }
 0x26a   :  { %v1734_v26 = vmul.f32 %v1693_v21, %v3053_v0 }
 0x26d   :  { %v1648_v47 = vpop.permute.xlu0 %1647 }
 0x26e   :  { %v1725_v30 = vmul.f32 %v1648_v47, %v3056_v3 }
 0x270   :  { %v1688_v23 = vpop.permute.xlu1 %1687 }
 0x271   :  { %v1733_v56 = vmul.f32 %v1688_v23, %v3058_v10 }
 0x279   :  { %v1663_v27 = vpop.permute.xlu1 %1662 }
 0x27a   :  { %v1728_v10 = vmul.f32 %v1663_v27, %v3063_v13 }
 0x27d   :  { %v1658_v29 = vpop.permute.xlu1 %1657  ;;  %v1703_v24 = vpop.permute.xlu0 %1702 }
 0x27e   :  { %v1736_v57 = vmul.f32 %v1703_v24, %v3065_v15  ;;  %v1727_v63 = vmul.f32 %v1658_v29, %v3068_v16 }
 0x281   :  { %v1698_v11 = vpop.permute.xlu1 %1697  ;;  %v1749_v7 = vpop.permute.xlu0 %1748 }
 0x282   :  { %v1822_v35 = vadd.f32 %v1749_v7, %v1726_v28  ;;  %v1735_v1 = vmul.f32 %v1698_v11, %v3072_v17 }
 0x284   :  { %v1838_v32 = vmax.f32 %v1822_v35, 0.0 }
 0x285   :  { %v1744_v37 = vpop.permute.xlu1 %1743  ;;  %v1789_v40 = vpop.permute.xlu0 %1788 }
 0x286   :  { %1854 = vst [vmem:[%s3415_s5 + $0x8] sm:$0xff] %v1838_v32  ;;  %v1821_v42 = vadd.f32 %v1744_v37, %v1725_v30  ;;  %v1830_v39 = vadd.f32 %v1789_v40, %v1734_v26 }
 0x288   :  { %v1837_v43 = vmax.f32 %v1821_v42, 0.0  ;;  %v1846_v4 = vmax.f32 %v1830_v39, 0.0 }
 0x289   :  { %v1784_v44 = vpop.permute.xlu1 %1783 }
 0x28a   :  { %1853 = vst [vmem:[%s3415_s5] sm:$0xff] %v1837_v43  ;;  %1862 = vst [vmem:[%s3415_s5 + $0x48] sm:$0xff] %v1846_v4  ;;  %v1829_v0 = vadd.f32 %v1784_v44, %v1733_v56 }
 0x28c   :  { %v1845_v3 = vmax.f32 %v1829_v0, 0.0 }
 0x28d   :  { %v1673_v46 = vpop.permute.xlu1 %1672  ;;  %v1713_v49 = vpop.permute.xlu0 %1712 }
 0x28e   :  { %1861 = vst [vmem:[%s3415_s5 + $0x40] sm:$0xff] %v1845_v3  ;;  %v1730_v62 = vmul.f32 %v1673_v46, %v3076_v41  ;;  %v1738_v17 = vmul.f32 %v1713_v49, %v3078_v22 }
 0x291   :  { %v1668_v38 = vpop.permute.xlu1 %1667  ;;  %v1759_v45 = vpop.permute.xlu0 %1758 }
 0x292   :  { %v1824_v53 = vadd.f32 %v1759_v45, %v1728_v10  ;;  %v1729_v22 = vmul.f32 %v1668_v38, %v3081_v34 }
 0x294   :  { %v1840_v58 = vmax.f32 %v1824_v53, 0.0 }
 0x295   :  { %v1708_v61 = vpop.permute.xlu1 %1707  ;;  %v1799_v50 = vpop.permute.xlu0 %1798 }
 0x296   :  { %1856 = vst [vmem:[%s3415_s5 + $0x18] sm:$0xff] %v1840_v58  ;;  %v1832_v51 = vadd.f32 %v1799_v50, %v1736_v57  ;;  %v1737_v28 = vmul.f32 %v1708_v61, %v3085_v25 }
 0x298   :  { %v1848_v5 = vmax.f32 %v1832_v51, 0.0 }
 0x299   :  { %v1754_v54 = vpop.permute.xlu1 %1753 }
 0x29a   :  { %1864 = vst [vmem:[%s3415_s5 + $0x58] sm:$0xff] %v1848_v5  ;;  %v1823_v13 = vadd.f32 %v1754_v54, %v1727_v63 }
 0x29c   :  { %v1839_v15 = vmax.f32 %v1823_v13, 0.0 }
 0x29d   :  { %v1794_v59 = vpop.permute.xlu1 %1793  ;;  %v1723_v6 = vpop.permute.xlu0 %1722 }
 0x29e   :  { %1855 = vst [vmem:[%s3415_s5 + $0x10] sm:$0xff] %v1839_v15  ;;  %v1831_v60 = vadd.f32 %v1794_v59, %v1735_v1  ;;  %v1740_v23 = vmul.f32 %v1723_v6, %v3093_v48 }
 0x2a0   :  { %v1847_v16 = vmax.f32 %v1831_v60, 0.0 }
 0x2a1   :  { %v1683_v19 = vpop.permute.xlu1 %1682  ;;  %v1769_v14 = vpop.permute.xlu0 %1768 }
 0x2a2   :  { %1863 = vst [vmem:[%s3415_s5 + $0x50] sm:$0xff] %v1847_v16  ;;  %v1826_v36 = vadd.f32 %v1769_v14, %v1730_v62  ;;  %v1732_v41 = vmul.f32 %v1683_v19, %v3089_v55 }
 0x2a4   :  { %v1842_v2 = vmax.f32 %v1826_v36, 0.0 }
 0x2a5   :  { %v1678_v8 = vpop.permute.xlu1 %1677  ;;  %v1809_v9 = vpop.permute.xlu0 %1808 }
 0x2a6   :  { %1858 = vst [vmem:[%s3415_s5 + $0x28] sm:$0xff] %v1842_v2  ;;  %v1834_v20 = vadd.f32 %v1809_v9, %v1738_v17  ;;  %v1731_v48 = vmul.f32 %v1678_v8, %v3096_v31 }
 0x2a8   :  { %v1850_v52 = vmax.f32 %v1834_v20, 0.0 }
 0x2a9   :  { %v1718_v12 = vpop.permute.xlu1 %1717  ;;  %v1779_v18 = vpop.permute.xlu0 %1778 }
 0x2aa   :  { %1866 = vst [vmem:[%s3415_s5 + $0x68] sm:$0xff] %v1850_v52  ;;  %v1828_v21 = vadd.f32 %v1779_v18, %v1732_v41  ;;  %v1739_v32 = vmul.f32 %v1718_v12, %v3098_v33 }
 0x2ac   :  { %v1844_v47 = vmax.f32 %v1828_v21, 0.0 }
 0x2ad   :  { %v1764_v27 = vpop.permute.xlu1 %1763  ;;  %v1819_v29 = vpop.permute.xlu0 %1818 }
 0x2ae   :  { %1860 = vst [vmem:[%s3415_s5 + $0x38] sm:$0xff] %v1844_v47  ;;  %v1825_v55 = vadd.f32 %v1764_v27, %v1729_v22  ;;  %v1836_v24 = vadd.f32 %v1819_v29, %v1740_v23 }
 0x2b0   :  { %v1841_v11 = vmax.f32 %v1825_v55, 0.0  ;;  %v1852_v7 = vmax.f32 %v1836_v24, 0.0 }
 0x2b1   :  { %v1804_v35 = vpop.permute.xlu1 %1803 }
 0x2b2   :  { %1857 = vst [vmem:[%s3415_s5 + $0x20] sm:$0xff] %v1841_v11  ;;  %1868 = vst [vmem:[%s3415_s5 + $0x78] sm:$0xff] %v1852_v7  ;;  %v1833_v34 = vadd.f32 %v1804_v35, %v1737_v28 }
 0x2b4   :  { %v1849_v26 = vmax.f32 %v1833_v34, 0.0 }
 0x2b5   :  { %v1774_v30 = vpop.permute.xlu1 %1773 }
 0x2b6   :  { %1865 = vst [vmem:[%s3415_s5 + $0x60] sm:$0xff] %v1849_v26  ;;  %v1827_v25 = vadd.f32 %v1774_v30, %v1731_v48 }
 0x2b8   :  { %v1843_v37 = vmax.f32 %v1827_v25, 0.0 }
 0x2b9   :  { %v1814_v40 = vpop.permute.xlu1 %1813 }
 0x2ba   :  { %1859 = vst [vmem:[%s3415_s5 + $0x30] sm:$0xff] %v1843_v37  ;;  %v1835_v42 = vadd.f32 %v1814_v40, %v1739_v32 }
 0x2bc   :  { %v1851_v39 = vmax.f32 %v1835_v42, 0.0 }
 0x2be   :  { %1867 = vst [vmem:[%s3415_s5 + $0x70] sm:$0xff] %v1851_v39 }

// kernel: netconv_forward.11
= control target key start
LH: loop header
LB: loop body
LE: loop exit
PB: predicated region body
PF: predicated region fallthrough
CT: control target
= control target key end

     0   :  { %v20_v1 = vlaneseq  ;;  %vm1996_vm1 = vcmask 1041408   ;;  %vm2057_vm2 = vcmask 31744   ;;  %vm2061_vm3 = vcmask 25600   ;;  %s3663_s0 = inlined_call_operand.vmem [shape: f32[10,1152], index: 0, kind: input, shape index: {}]   ;;  %s3664_s1 = inlined_call_operand.vmem [shape: f32[10,1], index: 1, kind: input, shape index: {}]   ;;  %s3665_s2 = inlined_call_operand.vmem [shape: f32[10,1], index: 2, kind: input, shape index: {}]   ;;  %s3666_s3 = inlined_call_operand.vmem [shape: f32[1152,8], index: 3, kind: input, shape index: {}]   ;;  %s3667_s4 = inlined_call_operand.<no memory space> [shape: f32[], index: 4, kind: input, shape index: {}]   ;;  %s3668_s5 = inlined_call_operand.vmem [shape: f32[10,2], index: 5, kind: output, shape index: {}]  }
   0x1   :  { %v2710_v0 = vstv %s3667_s4  ;;  %v2162_v2 = vld [vmem:[%s3666_s3 + $0x80] sm:$0xff]  ;;  %v2163_v4 = vld [vmem:[%s3666_s3 + $0x88] sm:$0xff]  ;;  %v2164_v11 = vld [vmem:[%s3666_s3 + $0x90] sm:$0xff]  ;;  %vm2095_vm4 = vcmask 1024   ;;  %vm2093_vm5 = vcmask 7168   ;;  %vm2139_vm6 = vcmask 15368  }
   0x2   :  { %v2715_v3 = vand.u32 127, %v20_v1  ;;  %v2194_v5 = vld [vmem:[%s3666_s3 + $0x180] sm:$0xff]  ;;  %v2195_v6 = vld [vmem:[%s3666_s3 + $0x188] sm:$0xff]  ;;  %v2165_v16 = vld [vmem:[%s3666_s3 + $0x98] sm:$0xff]  ;;  %vm2141_vm7 = vcmask 9224  }
   0x3   :  { %v19_v7 = vld [vmem:[%s3666_s3] sm:$0xff]  ;;  %v2147_v8 = vld [vmem:[%s3666_s3 + $0x8] sm:$0xff]  ;;  %v2196_v17 = vld [vmem:[%s3666_s3 + $0x190] sm:$0xff] }
   0x4   :  { %vm23_vm0 = vcmp.lt.s32.totalorder %v2715_v3, 8  ;;  %v2178_v9 = vld [vmem:[%s3666_s3 + $0x100] sm:$0xff]  ;;  %v2179_v10 = vld [vmem:[%s3666_s3 + $0x108] sm:$0xff]  ;;  %v2197_v22 = vld [vmem:[%s3666_s3 + $0x198] sm:$0xff] }
   0x5   :  { %v183_v12 = vsel %vm23_vm0, %v2162_v2, %v2710_v0  ;;  %v193_v13 = vsel %vm23_vm0, %v2163_v4, %v2710_v0  ;;  %v503_v14 = vsel %vm23_vm0, %v2194_v5, %v2710_v0  ;;  %v513_v15 = vsel %vm23_vm0, %v2195_v6, %v2710_v0  ;;  %v2148_v23 = vld [vmem:[%s3666_s3 + $0x10] sm:$0xff]  ;;  %v2149_v24 = vld [vmem:[%s3666_s3 + $0x18] sm:$0xff]  ;;  %v2166_v34 = vld [vmem:[%s3666_s3 + $0xa0] sm:$0xff] }
   0x6   :  { %v2495_v18 = vpack.c.bf16 %v193_v13, %v183_v12  ;;  %v2527_v19 = vpack.c.bf16 %v513_v15, %v503_v14  ;;  %v24_v20 = vsel %vm23_vm0, %v19_v7, %v2710_v0  ;;  %v33_v21 = vsel %vm23_vm0, %v2147_v8, %v2710_v0  ;;  %v2180_v29 = vld [vmem:[%s3666_s3 + $0x110] sm:$0xff]  ;;  %v2181_v30 = vld [vmem:[%s3666_s3 + $0x118] sm:$0xff]  ;;  %v2167_v35 = vld [vmem:[%s3666_s3 + $0xa8] sm:$0xff] }
   0x7   :  { %v2497_v25 = vpack.c.bf16 %v33_v21, %v24_v20  ;;  %v343_v26 = vsel %vm23_vm0, %v2178_v9, %v2710_v0  ;;  %v353_v27 = vsel %vm23_vm0, %v2179_v10, %v2710_v0  ;;  %v203_v28 = vsel %vm23_vm0, %v2164_v11, %v2710_v0  ;;  %v2198_v36 = vld [vmem:[%s3666_s3 + $0x1a0] sm:$0xff]  ;;  %v2199_v41 = vld [vmem:[%s3666_s3 + $0x1a8] sm:$0xff]  ;;  %v2168_v54 = vld [vmem:[%s3666_s3 + $0xb0] sm:$0xff] }
   0x8   :  { %2496 = vmatprep.subr.bf16.mxu0 %v2495_v18  ;;  %2528 = vmatprep.subr.bf16.mxu1 %v2527_v19  ;;  %v2529_v31 = vpack.c.bf16 %v353_v27, %v343_v26  ;;  %v213_v32 = vsel %vm23_vm0, %v2165_v16, %v2710_v0  ;;  %v523_v33 = vsel %vm23_vm0, %v2196_v17, %v2710_v0  ;;  %v2150_v42 = vld [vmem:[%s3666_s3 + $0x20] sm:$0xff]  ;;  %v2151_v43 = vld [vmem:[%s3666_s3 + $0x28] sm:$0xff]  ;;  %v2169_v55 = vld [vmem:[%s3666_s3 + $0xb8] sm:$0xff] }
   0x9   :  { %2498 = vmatpush3.bf16.msra.mxu0 %v2497_v25  ;;  %v2499_v37 = vpack.c.bf16 %v213_v32, %v203_v28  ;;  %v533_v38 = vsel %vm23_vm0, %v2197_v22, %v2710_v0  ;;  %v43_v39 = vsel %vm23_vm0, %v2148_v23, %v2710_v0  ;;  %v53_v40 = vsel %vm23_vm0, %v2149_v24, %v2710_v0  ;;  %v2182_v48 = vld [vmem:[%s3666_s3 + $0x120] sm:$0xff]  ;;  %v2183_v49 = vld [vmem:[%s3666_s3 + $0x128] sm:$0xff]  ;;  %v2200_v60 = vld [vmem:[%s3666_s3 + $0x1b0] sm:$0xff] }
   0xa   :  { %2530 = vmatpush3.bf16.msra.mxu1 %v2529_v31  ;;  %v2531_v44 = vpack.c.bf16 %v533_v38, %v523_v33  ;;  %v2501_v45 = vpack.c.bf16 %v53_v40, %v43_v39  ;;  %v363_v46 = vsel %vm23_vm0, %v2180_v29, %v2710_v0  ;;  %v373_v47 = vsel %vm23_vm0, %v2181_v30, %v2710_v0  ;;  %v2201_v61 = vld [vmem:[%s3666_s3 + $0x1b8] sm:$0xff]  ;;  %v2152_v62 = vld [vmem:[%s3666_s3 + $0x30] sm:$0xff]  ;;  %v2170_v11 = vld [vmem:[%s3666_s3 + $0xc0] sm:$0xff] }
   0xb   :  { %2500 = vmatprep.subr.bf16.mxu0 %v2499_v37  ;;  %v2533_v50 = vpack.c.bf16 %v373_v47, %v363_v46  ;;  %v223_v51 = vsel %vm23_vm0, %v2166_v34, %v2710_v0  ;;  %v233_v52 = vsel %vm23_vm0, %v2167_v35, %v2710_v0  ;;  %v543_v53 = vsel %vm23_vm0, %v2198_v36, %v2710_v0  ;;  %v2153_v5 = vld [vmem:[%s3666_s3 + $0x38] sm:$0xff]  ;;  %v2184_v6 = vld [vmem:[%s3666_s3 + $0x130] sm:$0xff]  ;;  %v2171_v12 = vld [vmem:[%s3666_s3 + $0xc8] sm:$0xff] }
   0xc   :  { %2532 = vmatprep.subr.bf16.mxu1 %v2531_v44  ;;  %v2503_v56 = vpack.c.bf16 %v233_v52, %v223_v51  ;;  %v553_v57 = vsel %vm23_vm0, %v2199_v41, %v2710_v0  ;;  %v63_v58 = vsel %vm23_vm0, %v2150_v42, %v2710_v0  ;;  %v73_v59 = vsel %vm23_vm0, %v2151_v43, %v2710_v0  ;;  %v2185_v7 = vld [vmem:[%s3666_s3 + $0x138] sm:$0xff]  ;;  %v2202_v17 = vld [vmem:[%s3666_s3 + $0x1c0] sm:$0xff]  ;;  %v2203_v18 = vld [vmem:[%s3666_s3 + $0x1c8] sm:$0xff] }
   0xd   :  { %2502 = vmatpush3.bf16.msra.mxu0 %v2501_v45  ;;  %v2535_v63 = vpack.c.bf16 %v553_v57, %v543_v53  ;;  %v2505_v1 = vpack.c.bf16 %v73_v59, %v63_v58  ;;  %v383_v2 = vsel %vm23_vm0, %v2182_v48, %v2710_v0  ;;  %v393_v4 = vsel %vm23_vm0, %v2183_v49, %v2710_v0  ;;  %v2154_v23 = vld [vmem:[%s3666_s3 + $0x40] sm:$0xff]  ;;  %v2155_v24 = vld [vmem:[%s3666_s3 + $0x48] sm:$0xff]  ;;  %v2172_v31 = vld [vmem:[%s3666_s3 + $0xd0] sm:$0xff] }
   0xe   :  { %2534 = vmatpush3.bf16.msra.mxu1 %v2533_v50  ;;  %2504 = vmatprep.subr.bf16.mxu0 %v2503_v56  ;;  %v2537_v8 = vpack.c.bf16 %v393_v4, %v383_v2  ;;  %v243_v9 = vsel %vm23_vm0, %v2168_v54, %v2710_v0  ;;  %v253_v10 = vsel %vm23_vm0, %v2169_v55, %v2710_v0  ;;  %v2186_v25 = vld [vmem:[%s3666_s3 + $0x140] sm:$0xff]  ;;  %v2187_v30 = vld [vmem:[%s3666_s3 + $0x148] sm:$0xff]  ;;  %v2173_v32 = vld [vmem:[%s3666_s3 + $0xd8] sm:$0xff] }
   0xf   :  { %2536 = vmatprep.subr.bf16.mxu1 %v2535_v63  ;;  %v2507_v13 = vpack.c.bf16 %v253_v10, %v243_v9  ;;  %v563_v14 = vsel %vm23_vm0, %v2200_v60, %v2710_v0  ;;  %v573_v15 = vsel %vm23_vm0, %v2201_v61, %v2710_v0  ;;  %v83_v16 = vsel %vm23_vm0, %v2152_v62, %v2710_v0  ;;  %v2204_v36 = vld [vmem:[%s3666_s3 + $0x1d0] sm:$0xff]  ;;  %v2205_v37 = vld [vmem:[%s3666_s3 + $0x1d8] sm:$0xff]  ;;  %v2174_v49 = vld [vmem:[%s3666_s3 + $0xe0] sm:$0xff] }
  0x10   :  { %v2539_v19 = vpack.c.bf16 %v573_v15, %v563_v14  ;;  %v93_v20 = vsel %vm23_vm0, %v2153_v5, %v2710_v0  ;;  %v403_v21 = vsel %vm23_vm0, %v2184_v6, %v2710_v0  ;;  %v413_v22 = vsel %vm23_vm0, %v2185_v7, %v2710_v0  ;;  %v2156_v42 = vld [vmem:[%s3666_s3 + $0x50] sm:$0xff]  ;;  %v2157_v43 = vld [vmem:[%s3666_s3 + $0x58] sm:$0xff]  ;;  %v2175_v50 = vld [vmem:[%s3666_s3 + $0xe8] sm:$0xff] }
  0x11   :  { %2506 = vmatpush3.bf16.msra.mxu0 %v2505_v1  ;;  %v2509_v26 = vpack.c.bf16 %v93_v20, %v83_v16  ;;  %v2541_v27 = vpack.c.bf16 %v413_v22, %v403_v21  ;;  %v263_v28 = vsel %vm23_vm0, %v2170_v11, %v2710_v0  ;;  %v273_v29 = vsel %vm23_vm0, %v2171_v12, %v2710_v0  ;;  %v2188_v44 = vld [vmem:[%s3666_s3 + $0x150] sm:$0xff]  ;;  %v2189_v48 = vld [vmem:[%s3666_s3 + $0x158] sm:$0xff]  ;;  %v2206_v55 = vld [vmem:[%s3666_s3 + $0x1e0] sm:$0xff] }
  0x12   :  { %2538 = vmatpush3.bf16.msra.mxu1 %v2537_v8  ;;  %2508 = vmatprep.subr.bf16.mxu0 %v2507_v13  ;;  %v2511_v33 = vpack.c.bf16 %v273_v29, %v263_v28  ;;  %v583_v34 = vsel %vm23_vm0, %v2202_v17, %v2710_v0  ;;  %v593_v35 = vsel %vm23_vm0, %v2203_v18, %v2710_v0  ;;  %v2207_v56 = vld [vmem:[%s3666_s3 + $0x1e8] sm:$0xff]  ;;  %v2158_v61 = vld [vmem:[%s3666_s3 + $0x60] sm:$0xff]  ;;  %v2176_v10 = vld [vmem:[%s3666_s3 + $0xf0] sm:$0xff] }
  0x13   :  { %2540 = vmatprep.subr.bf16.mxu1 %v2539_v19  ;;  %v2543_v38 = vpack.c.bf16 %v593_v35, %v583_v34  ;;  %v103_v39 = vsel %vm23_vm0, %v2154_v23, %v2710_v0  ;;  %v113_v40 = vsel %vm23_vm0, %v2155_v24, %v2710_v0  ;;  %v423_v41 = vsel %vm23_vm0, %v2186_v25, %v2710_v0  ;;  %v1458_v57 = vld [vmem:[%s3663_s0 + $0x8] sm:$0xff]  ;;  %v2190_v5 = vld [vmem:[%s3666_s3 + $0x160] sm:$0xff]  ;;  %v2177_v11 = vld [vmem:[%s3666_s3 + $0xf8] sm:$0xff] }
  0x14   :  { %v433_v45 = vsel %vm23_vm0, %v2187_v30, %v2710_v0  ;;  %v283_v46 = vsel %vm23_vm0, %v2172_v31, %v2710_v0  ;;  %v293_v47 = vsel %vm23_vm0, %v2173_v32, %v2710_v0  ;;  %v2513_v51 = vpack.c.bf16 %v113_v40, %v103_v39  ;;  %v2159_v62 = vld [vmem:[%s3666_s3 + $0x68] sm:$0xff]  ;;  %v2208_v12 = vld [vmem:[%s3666_s3 + $0x1f0] sm:$0xff]  ;;  %1683 = vmatprep.mubr.f32.mxu0 %v1458_v57  ;;  %v2209_v16 = vld [vmem:[%s3666_s3 + $0x1f8] sm:$0xff] }
  0x15   :  { %2510 = vmatpush3.bf16.msra.mxu0 %v2509_v26  ;;  %v2545_v52 = vpack.c.bf16 %v433_v45, %v423_v41  ;;  %v603_v53 = vsel %vm23_vm0, %v2204_v36, %v2710_v0  ;;  %v613_v54 = vsel %vm23_vm0, %v2205_v37, %v2710_v0  ;;  %v2515_v58 = vpack.c.bf16 %v293_v47, %v283_v46  ;;  %v2191_v6 = vld [vmem:[%s3666_s3 + $0x168] sm:$0xff]  ;;  %v2160_v17 = vld [vmem:[%s3666_s3 + $0x70] sm:$0xff]  ;;  %v1460_v18 = vld [vmem:[%s3663_s0 + $0x18] sm:$0xff] }
  0x16   :  { %2542 = vmatpush3.bf16.msra.mxu1 %v2541_v27  ;;  %2512 = vmatprep.subr.bf16.mxu0 %v2511_v33  ;;  %v123_v59 = vsel %vm23_vm0, %v2156_v42, %v2710_v0  ;;  %v133_v60 = vsel %vm23_vm0, %v2157_v43, %v2710_v0  ;;  %v2547_v63 = vpack.c.bf16 %v613_v54, %v603_v53  ;;  %v2161_v22 = vld [vmem:[%s3666_s3 + $0x78] sm:$0xff]  ;;  %v2192_v23 = vld [vmem:[%s3666_s3 + $0x170] sm:$0xff]  ;;  %v2226_v32 = vld [vmem:[%s3666_s3 + $0x280] sm:$0xff] }
  0x17   :  { %2544 = vmatprep.subr.bf16.mxu1 %v2543_v38  ;;  %v443_v1 = vsel %vm23_vm0, %v2188_v44, %v2710_v0  ;;  %v453_v2 = vsel %vm23_vm0, %v2189_v48, %v2710_v0  ;;  %v303_v4 = vsel %vm23_vm0, %v2174_v49, %v2710_v0  ;;  %v313_v7 = vsel %vm23_vm0, %v2175_v50, %v2710_v0  ;;  %v2193_v24 = vld [vmem:[%s3666_s3 + $0x178] sm:$0xff]  ;;  %v2227_v33 = vld [vmem:[%s3666_s3 + $0x288] sm:$0xff]  ;;  %v2210_v38 = vld [vmem:[%s3666_s3 + $0x200] sm:$0xff] }
  0x18   :  { %v623_v8 = vsel %vm23_vm0, %v2206_v55, %v2710_v0  ;;  %v633_v9 = vsel %vm23_vm0, %v2207_v56, %v2710_v0  ;;  %v2517_v13 = vpack.c.bf16 %v133_v60, %v123_v59  ;;  %v143_v14 = vsel %vm23_vm0, %v2158_v61, %v2710_v0  ;;  %1758 = vmatprep.mubr.f32.mxu1 %v1460_v18  ;;  %v2258_v39 = vld [vmem:[%s3666_s3 + $0x380] sm:$0xff]  ;;  %v2259_v40 = vld [vmem:[%s3666_s3 + $0x388] sm:$0xff]  ;;  %v2228_v49 = vld [vmem:[%s3666_s3 + $0x290] sm:$0xff] }
  0x19   :  { %2514 = vmatpush3.bf16.msra.mxu0 %v2513_v51  ;;  %v153_v15 = vsel %vm23_vm0, %v2159_v62, %v2710_v0  ;;  %v2549_v19 = vpack.c.bf16 %v453_v2, %v443_v1  ;;  %v2519_v20 = vpack.c.bf16 %v313_v7, %v303_v4  ;;  %v2551_v21 = vpack.c.bf16 %v633_v9, %v623_v8  ;;  %v2211_v43 = vld [vmem:[%s3666_s3 + $0x208] sm:$0xff]  ;;  %v2242_v44 = vld [vmem:[%s3666_s3 + $0x300] sm:$0xff]  ;;  %v2229_v50 = vld [vmem:[%s3666_s3 + $0x298] sm:$0xff] }
  0x1a   :  { %2546 = vmatpush3.bf16.msra.mxu1 %v2545_v52  ;;  %2516 = vmatprep.subr.bf16.mxu0 %v2515_v58  ;;  %v463_v25 = vsel %vm23_vm0, %v2190_v5, %v2710_v0  ;;  %v473_v26 = vsel %vm23_vm0, %v2191_v6, %v2710_v0  ;;  %v323_v27 = vsel %vm23_vm0, %v2176_v10, %v2710_v0  ;;  %v2243_v45 = vld [vmem:[%s3666_s3 + $0x308] sm:$0xff]  ;;  %v2260_v59 = vld [vmem:[%s3666_s3 + $0x390] sm:$0xff]  ;;  %v2261_v60 = vld [vmem:[%s3666_s3 + $0x398] sm:$0xff] }
  0x1b   :  { %2548 = vmatprep.subr.bf16.mxu1 %v2547_v63  ;;  %v333_v28 = vsel %vm23_vm0, %v2177_v11, %v2710_v0  ;;  %v2521_v29 = vpack.c.bf16 %v153_v15, %v143_v14  ;;  %v643_v30 = vsel %vm23_vm0, %v2208_v12, %v2710_v0  ;;  %v653_v31 = vsel %vm23_vm0, %v2209_v16, %v2710_v0  ;;  %v2212_v1 = vld [vmem:[%s3666_s3 + $0x210] sm:$0xff]  ;;  %v2213_v2 = vld [vmem:[%s3666_s3 + $0x218] sm:$0xff]  ;;  %v2230_v7 = vld [vmem:[%s3666_s3 + $0x2a0] sm:$0xff] }
  0x1c   :  { %v163_v34 = vsel %vm23_vm0, %v2160_v17, %v2710_v0  ;;  %v173_v35 = vsel %vm23_vm0, %v2161_v22, %v2710_v0  ;;  %v483_v36 = vsel %vm23_vm0, %v2192_v23, %v2710_v0  ;;  %v493_v37 = vsel %vm23_vm0, %v2193_v24, %v2710_v0  ;;  %v2244_v4 = vld [vmem:[%s3666_s3 + $0x310] sm:$0xff]  ;;  %v2245_v6 = vld [vmem:[%s3666_s3 + $0x318] sm:$0xff]  ;;  %v2231_v8 = vld [vmem:[%s3666_s3 + $0x2a8] sm:$0xff] }
  0x1d   :  { %2518 = vmatpush3.bf16.msra.mxu0 %v2517_v13  ;;  %v2553_v41 = vpack.c.bf16 %v473_v26, %v463_v25  ;;  %v2523_v42 = vpack.c.bf16 %v333_v28, %v323_v27  ;;  %v2555_v46 = vpack.c.bf16 %v653_v31, %v643_v30  ;;  %v823_v47 = vsel %vm23_vm0, %v2226_v32, %v2710_v0  ;;  %v1457_v13 = vld [vmem:[%s3663_s0] sm:$0xff]  ;;  %v2215_v26 = vld [vmem:[%s3666_s3 + $0x228] sm:$0xff]  ;;  %v2232_v32 = vld [vmem:[%s3666_s3 + $0x2b0] sm:$0xff] }
  0x1e   :  { %2550 = vmatpush3.bf16.msra.mxu1 %v2549_v19  ;;  %2520 = vmatprep.subr.bf16.mxu0 %v2519_v20  ;;  %v833_v48 = vsel %vm23_vm0, %v2227_v33, %v2710_v0  ;;  %v2525_v51 = vpack.c.bf16 %v173_v35, %v163_v34  ;;  %v2557_v52 = vpack.c.bf16 %v493_v37, %v483_v36  ;;  %v2262_v18 = vld [vmem:[%s3666_s3 + $0x3a0] sm:$0xff]  ;;  %v2263_v19 = vld [vmem:[%s3666_s3 + $0x3a8] sm:$0xff]  ;;  %v1459_v20 = vld [vmem:[%s3663_s0 + $0x10] sm:$0xff] }
  0x1f   :  { %2552 = vmatprep.subr.bf16.mxu1 %v2551_v21  ;;  %v1143_v53 = vsel %vm23_vm0, %v2258_v39, %v2710_v0  ;;  %v1153_v54 = vsel %vm23_vm0, %v2259_v40, %v2710_v0  ;;  %v663_v55 = vsel %vm23_vm0, %v2210_v38, %v2710_v0  ;;  %v673_v56 = vsel %vm23_vm0, %v2211_v43, %v2710_v0  ;;  %v2214_v24 = vld [vmem:[%s3666_s3 + $0x220] sm:$0xff]  ;;  %v2247_v28 = vld [vmem:[%s3666_s3 + $0x328] sm:$0xff]  ;;  %v2233_v33 = vld [vmem:[%s3666_s3 + $0x2b8] sm:$0xff] }
  0x20   :  { %v983_v57 = vsel %vm23_vm0, %v2242_v44, %v2710_v0  ;;  %v993_v58 = vsel %vm23_vm0, %v2243_v45, %v2710_v0  ;;  %v2559_v61 = vpack.c.bf16 %v833_v48, %v823_v47  ;;  %v843_v62 = vsel %vm23_vm0, %v2228_v49, %v2710_v0  ;;  %v2246_v27 = vld [vmem:[%s3666_s3 + $0x320] sm:$0xff]  ;;  %v2264_v37 = vld [vmem:[%s3666_s3 + $0x3b0] sm:$0xff]  ;;  %v2265_v38 = vld [vmem:[%s3666_s3 + $0x3b8] sm:$0xff] }
  0x21   :  { %2522 = vmatpush3.bf16.msra.mxu0 %v2521_v29  ;;  %v853_v63 = vsel %vm23_vm0, %v2229_v50, %v2710_v0  ;;  %v2591_v5 = vpack.c.bf16 %v1153_v54, %v1143_v53  ;;  %v2561_v9 = vpack.c.bf16 %v673_v56, %v663_v55  ;;  %v2593_v10 = vpack.c.bf16 %v993_v58, %v983_v57  ;;  %v1467_v39 = vld [vmem:[%s3663_s0 + $0x50] sm:$0x3]  ;;  %v2217_v44 = vld [vmem:[%s3666_s3 + $0x238] sm:$0xff]  ;;  %v2234_v50 = vld [vmem:[%s3666_s3 + $0x2c0] sm:$0xff] }
  0x22   :  { %2554 = vmatpush3.bf16.msra.mxu1 %v2553_v41  ;;  %2524 = vmatprep.subr.bf16.mxu0 %v2523_v42  ;;  %v1163_v11 = vsel %vm23_vm0, %v2260_v59, %v2710_v0  ;;  %v1173_v12 = vsel %vm23_vm0, %v2261_v60, %v2710_v0  ;;  %v2563_v14 = vpack.c.bf16 %v853_v63, %v843_v62  ;;  %v2216_v43 = vld [vmem:[%s3666_s3 + $0x230] sm:$0xff]  ;;  %v2249_v49 = vld [vmem:[%s3666_s3 + $0x338] sm:$0xff]  ;;  %v2235_v53 = vld [vmem:[%s3666_s3 + $0x2c8] sm:$0xff] }
  0x23   :  { %2556 = vmatprep.subr.bf16.mxu1 %v2555_v46  ;;  %v683_v15 = vsel %vm23_vm0, %v2212_v1, %v2710_v0  ;;  %v693_v16 = vsel %vm23_vm0, %v2213_v2, %v2710_v0  ;;  %v1003_v17 = vsel %vm23_vm0, %v2244_v4, %v2710_v0  ;;  %v1013_v21 = vsel %vm23_vm0, %v2245_v6, %v2710_v0  ;;  %v2248_v48 = vld [vmem:[%s3666_s3 + $0x330] sm:$0xff]  ;;  %v2218_v54 = vld [vmem:[%s3666_s3 + $0x240] sm:$0xff]  ;;  %v2219_v55 = vld [vmem:[%s3666_s3 + $0x248] sm:$0xff] }
  0x24   :  { %v863_v22 = vsel %vm23_vm0, %v2230_v7, %v2710_v0  ;;  %v873_v23 = vsel %vm23_vm0, %v2231_v8, %v2710_v0  ;;  %v2595_v25 = vpack.c.bf16 %v1173_v12, %v1163_v11  ;;  %v2565_v29 = vpack.c.bf16 %v693_v16, %v683_v15  ;;  %v2266_v60 = vld [vmem:[%s3666_s3 + $0x3c0] sm:$0xff]  ;;  %v2268_v15 = vld [vmem:[%s3666_s3 + $0x3d0] sm:$0xff] }
  0x25   :  { %2526 = vmatpush3.bf16.msra.mxu0 %v2525_v51  ;;  %v1183_v30 = vsel %vm23_vm0, %v2262_v18, %v2710_v0  ;;  %v1193_v31 = vsel %vm23_vm0, %v2263_v19, %v2710_v0  ;;  %v2597_v34 = vpack.c.bf16 %v1013_v21, %v1003_v17  ;;  %v2567_v35 = vpack.c.bf16 %v873_v23, %v863_v22  ;;  %v1469_v62 = vld [vmem:[%s3663_s0 + $0x60] sm:$0x3]  ;;  %v1466_v21 = vld [vmem:[%s3663_s0 + $0x48] sm:$0x3]  ;;  %v1468_v22 = vld [vmem:[%s3663_s0 + $0x58] sm:$0x3] }
  0x26   :  { %2558 = vmatpush3.bf16.msra.mxu1 %v2557_v52  ;;  %2560 = vmatprep.subr.bf16.mxu0 %v2559_v61  ;;  %v703_v36 = vsel %vm23_vm0, %v2214_v24, %v2710_v0  ;;  %v713_v40 = vsel %vm23_vm0, %v2215_v26, %v2710_v0  ;;  %v1023_v41 = vsel %vm23_vm0, %v2246_v27, %v2710_v0  ;;  %v2267_v61 = vld [vmem:[%s3666_s3 + $0x3c8] sm:$0xff]  ;;  %v2250_v4 = vld [vmem:[%s3666_s3 + $0x340] sm:$0xff]  ;;  %v2220_v26 = vld [vmem:[%s3666_s3 + $0x250] sm:$0xff] }
  0x27   :  { %2592 = vmatprep.subr.bf16.mxu1 %v2591_v5  ;;  %v1033_v42 = vsel %vm23_vm0, %v2247_v28, %v2710_v0  ;;  %v2599_v45 = vpack.c.bf16 %v1193_v31, %v1183_v30  ;;  %v883_v46 = vsel %vm23_vm0, %v2232_v32, %v2710_v0  ;;  %v893_v47 = vsel %vm23_vm0, %v2233_v33, %v2710_v0  ;;  %v2251_v5 = vld [vmem:[%s3666_s3 + $0x348] sm:$0xff]  ;;  %v2221_v27 = vld [vmem:[%s3666_s3 + $0x258] sm:$0xff]  ;;  %v2252_v28 = vld [vmem:[%s3666_s3 + $0x350] sm:$0xff] }
  0x28   :  { %1684 = vmatmul.mubr.f32.vlgmr.msra.gmra.mrb[0].mxu0 %v1457_v13  ;;  %v1203_v51 = vsel %vm23_vm0, %v2264_v37, %v2710_v0  ;;  %v1213_v52 = vsel %vm23_vm0, %v2265_v38, %v2710_v0  ;;  %v2569_v56 = vpack.c.bf16 %v713_v40, %v703_v36  ;;  %v2601_v57 = vpack.c.bf16 %v1033_v42, %v1023_v41  ;;  %v2253_v31 = vld [vmem:[%s3666_s3 + $0x358] sm:$0xff]  ;;  %v2238_v32 = vld [vmem:[%s3666_s3 + $0x2e0] sm:$0xff]  ;;  %v2239_v33 = vld [vmem:[%s3666_s3 + $0x2e8] sm:$0xff] }
  0x29   :  { %1759 = vmatmul.mubr.f32.vlgmr.msra.gmra.mrb[0].mxu1 %v1459_v20  ;;  %2562 = vmatpush3.bf16.msra.mxu0 %v2561_v9  ;;  %v723_v58 = vsel %vm23_vm0, %v2216_v43, %v2710_v0  ;;  %v733_v59 = vsel %vm23_vm0, %v2217_v44, %v2710_v0  ;;  %v2571_v63 = vpack.c.bf16 %v893_v47, %v883_v46  ;;  %v2236_v9 = vld [vmem:[%s3666_s3 + $0x2d0] sm:$0xff]  ;;  %v2269_v20 = vld [vmem:[%s3666_s3 + $0x3d8] sm:$0xff]  ;;  %v1462_v37 = vld [vmem:[%s3663_s0 + $0x28] sm:$0xff] }
  0x2a   :  { %2594 = vmatpush3.bf16.msra.mxu1 %v2593_v10  ;;  %2564 = vmatprep.subr.bf16.mxu0 %v2563_v14  ;;  %v1043_v1 = vsel %vm23_vm0, %v2248_v48, %v2710_v0  ;;  %v1053_v2 = vsel %vm23_vm0, %v2249_v49, %v2710_v0  ;;  %v2603_v6 = vpack.c.bf16 %v1213_v52, %v1203_v51  ;;  %v2237_v10 = vld [vmem:[%s3666_s3 + $0x2d8] sm:$0xff]  ;;  %v2270_v42 = vld [vmem:[%s3666_s3 + $0x3e0] sm:$0xff]  ;;  %v2271_v43 = vld [vmem:[%s3666_s3 + $0x3e8] sm:$0xff] }
  0x2b   :  { %2596 = vmatprep.subr.bf16.mxu1 %v2595_v25  ;;  %1688 = vmatprep.mubr.f32.mxu0 %v1467_v39  ;;  %v903_v7 = vsel %vm23_vm0, %v2234_v50, %v2710_v0  ;;  %v913_v8 = vsel %vm23_vm0, %v2235_v53, %v2710_v0  ;;  %v743_v11 = vsel %vm23_vm0, %v2218_v54, %v2710_v0  ;;  %v1464_v44 = vld [vmem:[%s3663_s0 + $0x38] sm:$0xff]  ;;  %v2222_v48 = vld [vmem:[%s3666_s3 + $0x260] sm:$0xff]  ;;  %v2223_v50 = vld [vmem:[%s3666_s3 + $0x268] sm:$0xff] }
  0x2c   :  { %v753_v12 = vsel %vm23_vm0, %v2219_v55, %v2710_v0  ;;  %v1223_v13 = vsel %vm23_vm0, %v2266_v60, %v2710_v0  ;;  %v1233_v14 = vsel %vm23_vm0, %v2267_v61, %v2710_v0  ;;  %1763 = vmatprep.mubr.f32.mxu1 %v1469_v62  ;;  %v2573_v16 = vpack.c.bf16 %v733_v59, %v723_v58  ;;  %v2254_v51 = vld [vmem:[%s3666_s3 + $0x360] sm:$0xff]  ;;  %v2255_v52 = vld [vmem:[%s3666_s3 + $0x368] sm:$0xff]  ;;  %v2240_v55 = vld [vmem:[%s3666_s3 + $0x2f0] sm:$0xff] }
  0x2d   :  { %2566 = vmatpush3.bf16.msra.mxu0 %v2565_v29  ;;  %v2605_v17 = vpack.c.bf16 %v1053_v2, %v1043_v1  ;;  %v1063_v18 = vsel %vm23_vm0, %v2250_v4, %v2710_v0  ;;  %v1073_v19 = vsel %vm23_vm0, %v2251_v5, %v2710_v0  ;;  %v2575_v23 = vpack.c.bf16 %v913_v8, %v903_v7  ;;  %v2272_v61 = vld [vmem:[%s3666_s3 + $0x3f0] sm:$0xff]  ;;  %v2273_v62 = vld [vmem:[%s3666_s3 + $0x3f8] sm:$0xff] }
  0x2e   :  { %2598 = vmatpush3.bf16.msra.mxu1 %v2597_v34  ;;  %2568 = vmatprep.subr.bf16.mxu0 %v2567_v35  ;;  %v923_v24 = vsel %vm23_vm0, %v2236_v9, %v2710_v0  ;;  %v933_v25 = vsel %vm23_vm0, %v2237_v10, %v2710_v0  ;;  %v2577_v29 = vpack.c.bf16 %v753_v12, %v743_v11  ;;  %v2224_v4 = vld [vmem:[%s3666_s3 + $0x270] sm:$0xff]  ;;  %v2225_v8 = vld [vmem:[%s3666_s3 + $0x278] sm:$0xff] }
  0x2f   :  { %2600 = vmatprep.subr.bf16.mxu1 %v2599_v45  ;;  %v2607_v30 = vpack.c.bf16 %v1233_v14, %v1223_v13  ;;  %v2609_v34 = vpack.c.bf16 %v1073_v19, %v1063_v18  ;;  %v1243_v35 = vsel %vm23_vm0, %v2268_v15, %v2710_v0  ;;  %v1253_v36 = vsel %vm23_vm0, %v2269_v20, %v2710_v0  ;;  %v2256_v9 = vld [vmem:[%s3666_s3 + $0x370] sm:$0xff]  ;;  %v2257_v12 = vld [vmem:[%s3666_s3 + $0x378] sm:$0xff]  ;;  %v2274_v13 = vld [vmem:[%s3666_s3 + $0x400] sm:$0xff] }
  0x30   :  { %1689 = vmatmul.mubr.f32.gmra.mrb[2].mxu0 %v1466_v21  ;;  %1764 = vmatmul.mubr.f32.gmra.mrb[2].mxu1 %v1468_v22  ;;  %v2579_v38 = vpack.c.bf16 %v933_v25, %v923_v24  ;;  %v763_v39 = vsel %vm23_vm0, %v2220_v26, %v2710_v0  ;;  %v773_v40 = vsel %vm23_vm0, %v2221_v27, %v2710_v0  ;;  %v2275_v14 = vld [vmem:[%s3666_s3 + $0x408] sm:$0xff]  ;;  %v2276_v25 = vld [vmem:[%s3666_s3 + $0x410] sm:$0xff]  ;;  %v2277_v26 = vld [vmem:[%s3666_s3 + $0x418] sm:$0xff] }
  0x31   :  { %2570 = vmatpush3.bf16.msra.mxu0 %v2569_v56  ;;  %v1083_v41 = vsel %vm23_vm0, %v2252_v28, %v2710_v0  ;;  %v1093_v45 = vsel %vm23_vm0, %v2253_v31, %v2710_v0  ;;  %v943_v46 = vsel %vm23_vm0, %v2238_v32, %v2710_v0  ;;  %v953_v47 = vsel %vm23_vm0, %v2239_v33, %v2710_v0  ;;  %v2241_v56 = vld [vmem:[%s3666_s3 + $0x2f8] sm:$0xff]  ;;  %v2278_v32 = vld [vmem:[%s3666_s3 + $0x420] sm:$0xff]  ;;  %v2279_v33 = vld [vmem:[%s3666_s3 + $0x428] sm:$0xff] }
  0x32   :  { %2602 = vmatpush3.bf16.msra.mxu1 %v2601_v57  ;;  %2572 = vmatprep.subr.bf16.mxu0 %v2571_v63  ;;  %v2611_v49 = vpack.c.bf16 %v1253_v36, %v1243_v35  ;;  %v1263_v53 = vsel %vm23_vm0, %v2270_v42, %v2710_v0  ;;  %v1273_v54 = vsel %vm23_vm0, %v2271_v43, %v2710_v0  ;;  %v1463_v35 = vld [vmem:[%s3663_s0 + $0x30] sm:$0xff]  ;;  %v2281_v42 = vld [vmem:[%s3666_s3 + $0x438] sm:$0xff]  ;;  %v1470_v43 = vld [vmem:[%s3663_s0 + $0x68] sm:$0x3] }
  0x33   :  { %2604 = vmatprep.subr.bf16.mxu1 %v2603_v6  ;;  %1833 = vmatprep.mubr.f32.mxu0 %v1462_v37  ;;  %v2581_v57 = vpack.c.bf16 %v773_v40, %v763_v39  ;;  %v2613_v58 = vpack.c.bf16 %v1093_v45, %v1083_v41  ;;  %v2583_v59 = vpack.c.bf16 %v953_v47, %v943_v46  ;;  %v1471_v37 = vld [vmem:[%s3663_s0 + $0x70] sm:$0x3]  ;;  %v1473_v40 = vld [vmem:[%s3663_s0 + $0x80] sm:$0x3] }
  0x34   :  { %1908 = vmatprep.mubr.f32.mxu1 %v1464_v44  ;;  %v783_v60 = vsel %vm23_vm0, %v2222_v48, %v2710_v0  ;;  %v793_v63 = vsel %vm23_vm0, %v2223_v50, %v2710_v0  ;;  %v1103_v1 = vsel %vm23_vm0, %v2254_v51, %v2710_v0  ;;  %v1113_v2 = vsel %vm23_vm0, %v2255_v52, %v2710_v0  ;;  %v2280_v41 = vld [vmem:[%s3666_s3 + $0x430] sm:$0xff]  ;;  %v1472_v44 = vld [vmem:[%s3663_s0 + $0x78] sm:$0x3]  ;;  %v1465_v48 = vld [vmem:[%s3663_s0 + $0x40] sm:$0xff] }
  0x35   :  { %2574 = vmatpush3.bf16.msra.mxu0 %v2573_v16  ;;  %v2615_v5 = vpack.c.bf16 %v1273_v54, %v1263_v53  ;;  %v963_v6 = vsel %vm23_vm0, %v2240_v55, %v2710_v0  ;;  %v973_v7 = vsel %vm23_vm0, %v2241_v56, %v2710_v0  ;;  %v1283_v10 = vsel %vm23_vm0, %v2272_v61, %v2710_v0  ;;  %v2283_v50 = vld [vmem:[%s3666_s3 + $0x448] sm:$0xff]  ;;  %v2284_v54 = vld [vmem:[%s3666_s3 + $0x450] sm:$0xff]  ;;  %v2285_v55 = vld [vmem:[%s3666_s3 + $0x458] sm:$0xff] }
  0x36   :  { %2606 = vmatpush3.bf16.msra.mxu1 %v2605_v17  ;;  %2576 = vmatprep.subr.bf16.mxu0 %v2575_v23  ;;  %v1293_v11 = vsel %vm23_vm0, %v2273_v62, %v2710_v0  ;;  %v2585_v15 = vpack.c.bf16 %v793_v63, %v783_v60  ;;  %v2617_v16 = vpack.c.bf16 %v1113_v2, %v1103_v1  ;;  %v2287_v60 = vld [vmem:[%s3666_s3 + $0x468] sm:$0xff]  ;;  %v2288_v1 = vld [vmem:[%s3666_s3 + $0x470] sm:$0xff]  ;;  %v2289_v2 = vld [vmem:[%s3666_s3 + $0x478] sm:$0xff] }
  0x37   :  { %2608 = vmatprep.subr.bf16.mxu1 %v2607_v30  ;;  %v803_v17 = vsel %vm23_vm0, %v2224_v4, %v2710_v0  ;;  %v2587_v18 = vpack.c.bf16 %v973_v7, %v963_v6  ;;  %v813_v19 = vsel %vm23_vm0, %v2225_v8, %v2710_v0  ;;  %v1123_v20 = vsel %vm23_vm0, %v2256_v9, %v2710_v0  ;;  %v1474_v8 = vld [vmem:[%s3663_s0 + $0x88] sm:$0x3] }
  0x38   :  { %v2619_v21 = vpack.c.bf16 %v1293_v11, %v1283_v10  ;;  %v1133_v22 = vsel %vm23_vm0, %v2257_v12, %v2710_v0  ;;  %v1303_v23 = vsel %vm23_vm0, %v2274_v13, %v2710_v0  ;;  %v1313_v24 = vsel %vm23_vm0, %v2275_v14, %v2710_v0 }
  0x39   :  { %2578 = vmatpush3.bf16.msra.mxu0 %v2577_v29  ;;  %v2589_v27 = vpack.c.bf16 %v813_v19, %v803_v17  ;;  %v2621_v28 = vpack.c.bf16 %v1133_v22, %v1123_v20  ;;  %v2623_v29 = vpack.c.bf16 %v1313_v24, %v1303_v23  ;;  %v1323_v30 = vsel %vm23_vm0, %v2276_v25, %v2710_v0 }
  0x3a   :  { %2610 = vmatpush3.bf16.msra.mxu1 %v2609_v34  ;;  %2580 = vmatprep.subr.bf16.mxu0 %v2579_v38  ;;  %v1333_v31 = vsel %vm23_vm0, %v2277_v26, %v2710_v0  ;;  %v1461_v34 = vld [vmem:[%s3663_s0 + $0x20] sm:$0xff]  ;;  %v1343_v38 = vsel %vm23_vm0, %v2278_v32, %v2710_v0  ;;  %v1353_v39 = vsel %vm23_vm0, %v2279_v33, %v2710_v0 }
  0x3b   :  { %2612 = vmatprep.subr.bf16.mxu1 %v2611_v49  ;;  %v2627_v36 = vpack.c.bf16 %v1333_v31, %v1323_v30  ;;  %v2631_v45 = vpack.c.bf16 %v1353_v39, %v1343_v38  ;;  %v1363_v46 = vsel %vm23_vm0, %v2280_v41, %v2710_v0  ;;  %v1373_v47 = vsel %vm23_vm0, %v2281_v42, %v2710_v0  ;;  %v2282_v49 = vld [vmem:[%s3666_s3 + $0x440] sm:$0xff] }
  0x3c   :  { %v2635_v51 = vpack.c.bf16 %v1373_v47, %v1363_v46  ;;  %v1383_v52 = vsel %vm23_vm0, %v2282_v49, %v2710_v0  ;;  %v1393_v53 = vsel %vm23_vm0, %v2283_v50, %v2710_v0  ;;  %v1433_v63 = vsel %vm23_vm0, %v2287_v60, %v2710_v0 }
  0x3d   :  { %2582 = vmatpush3.bf16.msra.mxu0 %v2581_v57  ;;  %v2639_v56 = vpack.c.bf16 %v1393_v53, %v1383_v52  ;;  %v1403_v57 = vsel %vm23_vm0, %v2284_v54, %v2710_v0  ;;  %v1453_v6 = vsel %vm23_vm0, %v2289_v2, %v2710_v0  ;;  %v2017_v2 = vld [vmem:[%s3664_s1] sm:$0xff] }
  0x3e   :  { %2614 = vmatpush3.bf16.msra.mxu1 %v2613_v58  ;;  %2584 = vmatprep.subr.bf16.mxu0 %v2583_v59  ;;  %v1413_v58 = vsel %vm23_vm0, %v2285_v55, %v2710_v0  ;;  %v2286_v59 = vld [vmem:[%s3666_s3 + $0x460] sm:$0xff] }
  0x3f   :  { %2616 = vmatprep.subr.bf16.mxu1 %v2615_v5  ;;  %v2643_v61 = vpack.c.bf16 %v1413_v58, %v1403_v57  ;;  %v1423_v62 = vsel %vm23_vm0, %v2286_v59, %v2710_v0  ;;  %v1443_v5 = vsel %vm23_vm0, %v2288_v1, %v2710_v0 }
  0x40   :  { %v2647_v4 = vpack.c.bf16 %v1433_v63, %v1423_v62  ;;  %v2651_v7 = vpack.c.bf16 %v1453_v6, %v1443_v5  ;;  %v2018_v62 = vld [vmem:[%s3664_s1 + $0x8] sm:$0x3]  ;;  %s2676_s1 = smov 124  }
  0x41   :  { %2586 = vmatpush3.bf16.msra.mxu0 %v2585_v15 }
  0x42   :  { %2618 = vmatpush3.bf16.msra.mxu1 %v2617_v16  ;;  %2588 = vmatprep.subr.bf16.mxu0 %v2587_v18 }
  0x43   :  { %2620 = vmatprep.subr.bf16.mxu1 %v2619_v21 }
  0x45   :  { %2590 = vmatpush3.bf16.msra.mxu0 %v2589_v27 }
  0x46   :  { %2622 = vmatpush3.bf16.msra.mxu1 %v2621_v28  ;;  %2624 = vmatprep.subr.bf16.mxu0 %v2623_v29 }
  0x48   :  { %1834 = vmatmul.mubr.f32.vlgmr.msra.gmra.mrb[4].mxu0 %v1461_v34 }
  0x49   :  { %2626 = vmatpush3.bf16.msra.mxu0 %v2623_v29  ;;  %1909 = vmatmul.mubr.f32.vlgmr.msra.gmra.mrb[4].mxu1 %v1463_v35 }
  0x4a   :  { %1838 = vmatprep.mubr.f32.mxu0 %v1471_v37  ;;  %2628 = vmatprep.subr.bf16.mxu0 %v2627_v36 }
  0x4b   :  { %1913 = vmatprep.mubr.f32.mxu1 %v1473_v40 }
  0x4c   :  { %1839 = vmatmul.mubr.f32.gmra.mrb[6].mxu0 %v1470_v43 }
  0x4d   :  { %2630 = vmatpush3.bf16.msra.mxu0 %v2627_v36  ;;  %1914 = vmatmul.mubr.f32.gmra.mrb[6].mxu1 %v1472_v44 }
  0x4e   :  { %2632 = vmatprep.subr.bf16.mxu0 %v2631_v45  ;;  %2492 = vmatprep.mubr.f32.mxu0 %v1465_v48 }
  0x51   :  { %2634 = vmatpush3.bf16.msra.mxu0 %v2631_v45  ;;  %v2675_v45 = vmov 0  }
  0x52   :  { %2636 = vmatprep.subr.bf16.mxu0 %v2635_v51  ;;  %2657 = vset.pattern.permute.xlu0 %v2675_v45 }
  0x53   :  { %2658 = vset.pattern.permute.xlu1 %v2675_v45 }
  0x55   :  { %2638 = vmatpush3.bf16.msra.mxu0 %v2635_v51 }
  0x56   :  { %2640 = vmatprep.subr.bf16.mxu0 %v2639_v56 }
  0x59   :  { %2642 = vmatpush3.bf16.msra.mxu0 %v2639_v56 }
  0x5a   :  { %2644 = vmatprep.subr.bf16.mxu0 %v2643_v61 }
  0x5d   :  { %2646 = vmatpush3.bf16.msra.mxu0 %v2643_v61 }
  0x5e   :  { %2648 = vmatprep.subr.bf16.mxu0 %v2647_v4 }
  0x61   :  { %2650 = vmatpush3.bf16.msra.mxu0 %v2647_v4 }
  0x62   :  { %2652 = vmatprep.subr.bf16.mxu0 %v2651_v7 }
  0x65   :  { %2654 = vmatpush3.bf16.msra.mxu0 %v2651_v7  ;;  %v2026_v7 = vld [vmem:[%s3665_s2 + $0x8] sm:$0x3] }
  0x68   :  { %2493 = vmatmul.mubr.f32.vlgmr.msra.gmra.mrb[8].mxu0 %v1474_v8 }
  0xfb   :  { %v2322_v9 = vpop.f32.mrb[0].mxu0 }
  0xfc   :  { %v2360_v10 = vpop.f32.mrb[0].mxu1  ;;  %v2323_v11 = vpop.f32.mrb[1].mxu0 }
  0xfd   :  { %v2324_v12 = vadd.f32 %v2323_v11, %v2322_v9  ;;  %v2361_v13 = vpop.f32.mrb[1].mxu1 }
  0xfe   :  { %v2362_v14 = vadd.f32 %v2361_v13, %v2360_v10  ;;  %v2025_v10 = vld [vmem:[%s3665_s2] sm:$0xff] }
 0x100   :  { %v1761_v15 = vadd.f32 %v2362_v14, %v2324_v12 }
 0x103   :  { %v2325_v3 = vpop.f32.mrb[2].mxu0  ;;  %v2363_v0 = vpop.f32.mrb[2].mxu1 }
 0x104   :  { %v2326_v16 = vpop.f32.mrb[3].mxu0  ;;  %v2364_v17 = vpop.f32.mrb[3].mxu1 }
 0x105   :  { %v2327_v18 = vadd.f32 %v2326_v16, %v2325_v3  ;;  %v2365_v19 = vadd.f32 %v2364_v17, %v2363_v0 }
 0x107   :  { %v1766_v20 = vadd.f32 %v2365_v19, %v2327_v18 }
 0x11b   :  { %v2398_v21 = vpop.f32.mrb[4].mxu0 }
 0x11c   :  { %v2399_v22 = vpop.f32.mrb[5].mxu0  ;;  %v2436_v23 = vpop.f32.mrb[4].mxu1 }
 0x11d   :  { %v2400_v24 = vadd.f32 %v2399_v22, %v2398_v21  ;;  %v2437_v25 = vpop.f32.mrb[5].mxu1 }
 0x11e   :  { %v2438_v26 = vadd.f32 %v2437_v25, %v2436_v23 }
 0x11f   :  { %v1836_v27 = vadd.f32 %v2400_v24, %v1761_v15  ;;  %v2401_v28 = vpop.f32.mrb[6].mxu0 }
 0x120   :  { %v2402_v29 = vpop.f32.mrb[7].mxu0  ;;  %v2439_v30 = vpop.f32.mrb[6].mxu1 }
 0x121   :  { %v2403_v31 = vadd.f32 %v2402_v29, %v2401_v28  ;;  %v2440_v32 = vpop.f32.mrb[7].mxu1  ;;  %v1911_v33 = vadd.f32 %v2438_v26, %v1836_v27 }
 0x122   :  { %v2441_v34 = vadd.f32 %v2440_v32, %v2439_v30 }
 0x123   :  { %v1841_v35 = vadd.f32 %v2403_v31, %v1766_v20 }
 0x125   :  { %v1916_v36 = vadd.f32 %v2441_v34, %v1841_v35 }
 0x13b   :  { %v2494_v37 = vpop.f32.mrb[8].mxu0 }
 0x13c   :  { %v1991_v38 = vadd.f32 %v2494_v37, %v1916_v36  ;;  %v1985_v39 = vpop.f32.mrb[9].mxu0 }
 0x13d   :  { %v1986_v40 = vadd.f32 %v1985_v39, %v1911_v33 }
 0x13e   :  { %v1997_v41 = vsel %vm1996_vm1, %v1991_v38, 0.0  ;;  %v2001_v42 = vmul.f32 %v1991_v38, %v1991_v38 }
 0x13f   :  { %1998 = vadd.xlane.f32.xlu0 %v1997_v41  ;;  %v2000_v44 = vmul.f32 %v1986_v40, %v1986_v40 }
 0x140   :  { %v2004_v43 = vsel %vm1996_vm1, %v2001_v42, 0.0 }
 0x141   :  { %2005 = vadd.xlane.f32.xlu1 %v2004_v43 }
 0x143   :  { %1994 = vadd.xlane.f32.xlu0 %v1986_v40 }
 0x145   :  { %2002 = vadd.xlane.f32.xlu1 %v2000_v44 }
 0x1cc   :  { %v1999_v46 = vpop.xlane.xlu0 %1998 }
 0x1cd   :  { %v2008_v47 = vmul.f32 0.125, %v1999_v46 }
 0x1ce   :  { %v2006_v48 = vpop.xlane.xlu1 %2005 }
 0x1cf   :  { %v2012_v49 = vmul.f32 %v2008_v47, %v2008_v47  ;;  %v2010_v50 = vmul.f32 0.125, %v2006_v48 }
 0x1d0   :  { %v1995_v51 = vpop.xlane.xlu0 %1994 }
 0x1d1   :  { %v2014_v52 = vsub.f32 %v2010_v50, %v2012_v49  ;;  %v2007_v53 = vmul.f32 0.125, %v1995_v51 }
 0x1d2   :  { %v2003_v54 = vpop.xlane.xlu1 %2002 }
 0x1d3   :  { %v2016_v55 = vmax.f32 %v2014_v52, 0.0  ;;  %v2011_v56 = vmul.f32 %v2007_v53, %v2007_v53  ;;  %v2009_v57 = vmul.f32 0.125, %v2003_v54 }
 0x1d5   :  { %v2020_v58 = vadd.f32 1e-05, %v2016_v55  ;;  %v2013_v59 = vsub.f32 %v2009_v57, %v2011_v56 }
 0x1d7   :  { %2659 = vrsqrt.f32 %v2020_v58  ;;  %v2015_v60 = vmax.f32 %v2013_v59, 0.0 }
 0x1d9   :  { %v2019_v61 = vadd.f32 1e-05, %v2015_v60 }
 0x1db   :  { %2661 = vrsqrt.f32 %v2019_v61 }
 0x1e1   :  { %v2660_v63 = vpop.eup %2659 }
 0x1e2   :  { %v2024_v1 = vmul.f32 %v2660_v63, %v2018_v62 }
 0x1e4   :  { %2038 = vperm.xlu0 %2657, %v2024_v1   ;;  %v2028_v6 = vmul.f32 %v2024_v1, %v2008_v47 }
 0x1e5   :  { %v2662_v4 = vpop.eup %2661 }
 0x1e6   :  { %v2023_v5 = vmul.f32 %v2662_v4, %v2017_v2  ;;  %v2030_v8 = vsub.f32 %v2026_v7, %v2028_v6 }
 0x1e8   :  { %2033 = vperm.xlu1 %2658, %v2023_v5   ;;  %v2027_v9 = vmul.f32 %v2023_v5, %v2007_v53 }
 0x1ea   :  { %v2029_v11 = vsub.f32 %v2025_v10, %v2027_v9 }
 0x1ec   :  { %2050 = vperm.xlu1 %2658, %v2030_v8  }
 0x1f0   :  { %2045 = vperm.xlu1 %2658, %v2029_v11  }
 0x263   :  { %v2039_v12 = vpop.permute.xlu0 %2038 }
 0x264   :  { %v2042_v14 = vmul.f32 %v2039_v12, %v1991_v38 }
 0x267   :  { %v2034_v13 = vpop.permute.xlu1 %2033 }
 0x268   :  { %v2041_v0 = vmul.f32 %v2034_v13, %v1986_v40 }
 0x26b   :  { %v2051_v15 = vpop.permute.xlu1 %2050 }
 0x26c   :  { %v2054_v3 = vadd.f32 %v2051_v15, %v2042_v14 }
 0x26e   :  { %v2056_v16 = vmax.f32 %v2054_v3, 0.0 }
 0x26f   :  { %v2046_v17 = vpop.permute.xlu1 %2045 }
 0x270   :  { %v2053_v18 = vadd.f32 %v2046_v17, %v2041_v0  ;;  %2101 = vrot.lane.b32.xlu1 %v2056_v16, %s2676_s1  ;;  %v2062_v21 = vsel %vm2061_vm3, %v2056_v16, 0.0 }
 0x272   :  { %v2055_v19 = vmax.f32 %v2053_v18, 0.0 }
 0x274   :  { %2099 = vrot.lane.b32.xlu1 %v2055_v19, %s2676_s1  ;;  %v2058_v20 = vsel %vm2057_vm2, %v2055_v19, 0.0 }
 0x275   :  { %2059 = vadd.xlane.f32.xlu0 %v2058_v20 }
 0x298   :  { %2063 = vadd.xlane.f32.xlu1 %v2062_v21 }
 0x2e2   :  { %v2102_v22 = vpop.permute.xlu1 %2101 }
 0x2e3   :  { %v2108_v23 = vsel %vm2061_vm3, %v2102_v22, 0.0 }
 0x2e4   :  { %2109 = vadd.xlane.f32.xlu1 %v2108_v23 }
 0x2e6   :  { %v2100_v24 = vpop.permute.xlu1 %2099 }
 0x2e7   :  { %v2105_v25 = vsel %vm2057_vm2, %v2100_v24, 0.0 }
 0x2e8   :  { %2106 = vadd.xlane.f32.xlu1 %v2105_v25 }
 0x302   :  { %v2060_v26 = vpop.xlane.xlu0 %2059 }
 0x303   :  { %v2065_v29 = vmul.f32 0.25, %v2060_v26 }
 0x325   :  { %v2064_v27 = vpop.xlane.xlu1 %2063 }
 0x326   :  { %v2066_v28 = vmul.f32 0.25, %v2064_v27 }
 0x328   :  { %v2067_v30 = vsel %vm1996_vm1, %v2066_v28, -inf }
 0x329   :  { %v2068_v31 = vmax.f32 %v2065_v29, %v2067_v30 }
 0x32b   :  { %v2069_v32 = vrot.slane %v2068_v31, 4 }
 0x32d   :  { %v2070_v33 = vmax.f32 %v2068_v31, %v2069_v32 }
 0x32f   :  { %v2071_v34 = vrot.slane %v2070_v33, 2 }
 0x331   :  { %v2072_v35 = vmax.f32 %v2070_v33, %v2071_v34 }
 0x333   :  { %v2073_v36 = vrot.slane %v2072_v35, 1 }
 0x335   :  { %v2074_v37 = vmax.f32 %v2072_v35, %v2073_v36 }
 0x337   :  { %v2075_v38 = vsub.f32 %v2065_v29, %v2074_v37  ;;  %v2076_v39 = vsub.f32 %v2066_v28, %v2074_v37 }
 0x339   :  { %v2077_v40 = vmul.f32 1.442695, %v2075_v38  ;;  %v2079_v41 = vmul.f32 1.442695, %v2076_v39 }
 0x33b   :  { %2663 = vpow2.f32 %v2077_v40 }
 0x33c   :  { %2665 = vpow2.f32 %v2079_v41 }
 0x345   :  { %v2664_v42 = vpop.eup %2663 }
 0x346   :  { %v2666_v43 = vpop.eup %2665 }
 0x347   :  { %v2081_v44 = vsel %vm1996_vm1, %v2666_v43, 0.0 }
 0x348   :  { %v2082_v45 = vadd.f32 %v2664_v42, %v2081_v44 }
 0x34a   :  { %v2083_v46 = vrot.slane %v2082_v45, 4 }
 0x34c   :  { %v2084_v47 = vadd.f32 %v2083_v46, %v2082_v45 }
 0x34e   :  { %v2085_v48 = vrot.slane %v2084_v47, 2 }
 0x350   :  { %v2086_v49 = vadd.f32 %v2085_v48, %v2084_v47 }
 0x352   :  { %v2087_v50 = vrot.slane %v2086_v49, 1 }
 0x354   :  { %v2088_v51 = vadd.f32 %v2087_v50, %v2086_v49 }
 0x356   :  { %2667 = vlog2.f32 %v2088_v51 }
 0x360   :  { %v2668_v52 = vpop.eup %2667 }
 0x361   :  { %v2090_v53 = vmul.f32 0.6931472, %v2668_v52 }
 0x363   :  { %v2091_v54 = vsub.f32 %v2075_v38, %v2090_v53  ;;  %v2092_v55 = vsub.f32 %v2076_v39, %v2090_v53 }
 0x365   :  { %2096 = vst.msk [vmem:[%s3668_s5 + $0x8] sm:$0x3] %vm2095_vm4, %v2092_v55 }
 0x366   :  { %2094 = vst.msk [vmem:[%s3668_s5] sm:$0xff] %vm2093_vm5, %v2091_v54 }
 0x371   :  { %v2110_v56 = vpop.xlane.xlu1 %2109 }
 0x372   :  { %v2112_v57 = vmul.f32 0.25, %v2110_v56 }
 0x374   :  { %v2113_v60 = vsel %vm1996_vm1, %v2112_v57, -inf }
 0x375   :  { %v2107_v58 = vpop.xlane.xlu1 %2106 }
 0x376   :  { %v2111_v59 = vmul.f32 0.25, %v2107_v58 }
 0x378   :  { %v2114_v61 = vmax.f32 %v2111_v59, %v2113_v60 }
 0x37a   :  { %v2115_v62 = vrot.slane %v2114_v61, 4 }
 0x37c   :  { %v2116_v63 = vmax.f32 %v2114_v61, %v2115_v62 }
 0x37e   :  { %v2117_v1 = vrot.slane %v2116_v63, 2 }
 0x380   :  { %v2118_v2 = vmax.f32 %v2116_v63, %v2117_v1 }
 0x382   :  { %v2119_v4 = vrot.slane %v2118_v2, 1 }
 0x384   :  { %v2120_v5 = vmax.f32 %v2118_v2, %v2119_v4 }
 0x386   :  { %v2121_v6 = vsub.f32 %v2111_v59, %v2120_v5  ;;  %v2122_v7 = vsub.f32 %v2112_v57, %v2120_v5 }
 0x388   :  { %v2123_v8 = vmul.f32 1.442695, %v2121_v6  ;;  %v2125_v9 = vmul.f32 1.442695, %v2122_v7 }
 0x38a   :  { %2669 = vpow2.f32 %v2123_v8 }
 0x38b   :  { %2671 = vpow2.f32 %v2125_v9 }
 0x394   :  { %v2670_v10 = vpop.eup %2669 }
 0x395   :  { %v2672_v11 = vpop.eup %2671 }
 0x396   :  { %v2127_v12 = vsel %vm1996_vm1, %v2672_v11, 0.0 }
 0x397   :  { %v2128_v13 = vadd.f32 %v2670_v10, %v2127_v12 }
 0x399   :  { %v2129_v14 = vrot.slane %v2128_v13, 4 }
 0x39b   :  { %v2130_v15 = vadd.f32 %v2129_v14, %v2128_v13 }
 0x39d   :  { %v2131_v3 = vrot.slane %v2130_v15, 2 }
 0x39f   :  { %v2132_v0 = vadd.f32 %v2131_v3, %v2130_v15 }
 0x3a1   :  { %v2133_v16 = vrot.slane %v2132_v0, 1 }
 0x3a3   :  { %v2134_v17 = vadd.f32 %v2133_v16, %v2132_v0 }
 0x3a5   :  { %2673 = vlog2.f32 %v2134_v17 }
 0x3af   :  { %v2674_v18 = vpop.eup %2673 }
 0x3b0   :  { %v2136_v19 = vmul.f32 0.6931472, %v2674_v18 }
 0x3b2   :  { %v2137_v20 = vsub.f32 %v2121_v6, %v2136_v19  ;;  %v2138_v21 = vsub.f32 %v2122_v7, %v2136_v19 }
 0x3b4   :  { %2140 = vst.msk [vmem:[%s3668_s5] sm:$0xff] %vm2139_vm6, %v2137_v20 }
 0x3b5   :  { %2142 = vst.msk [vmem:[%s3668_s5 + $0x8] sm:$0x3] %vm2141_vm7, %v2138_v21 }

</bundles_post_ra>
